<compile_context>
chip_gen: v6e
topology: v6e:2x2x1
jax: 0.10.0
libtpu: 0.0.40
codegen_flags: <defaults>
</compile_context>

<pallas_src>
import jax
import jax.numpy as jnp
from jax.experimental import pallas as pl
from jax.experimental.pallas import tpu as pltpu

EPS = 1e-5            # nn.InstanceNorm2d default eps
LRELU_SLOPE = 0.2
LANES = 128
VMEM_LIMIT = 32 * 1024 * 1024   # explicit scoped-VMEM budget (safe on v5e/v6e/v7x)


def _round_up(x, m):
    return (x + m - 1) // m * m


# ---------------------------------------------------------------------------
# Pallas kernels
# ---------------------------------------------------------------------------
def _in_stats_kernel(x_ref, mean_ref, rstd_ref):
    """Per-(n, c) InstanceNorm statistics over one image.  Block (1, H*W, C)."""
    x = x_ref[0].astype(jnp.float32)                        # (HW, C)
    m = jnp.mean(x, axis=0, keepdims=True)                  # (1, C)
    v = jnp.mean(jnp.square(x - m), axis=0, keepdims=True)  # biased variance
    mean_ref[0] = m
    rstd_ref[0] = jax.lax.rsqrt(v + EPS)


def _make_conv_kernel(shifts, needs_mask, pad_off, add_shortcut):
    """Fused IN-apply + conv (shifted flat taps) + bias + LeakyReLU (+ residual).

    shifts[t]     : constant row shift of tap t inside the flat padded scratch
    needs_mask[t] : tap crosses a row boundary -> apply precomputed column mask
    pad_off       : sublane-aligned row offset of the real data in the scratch
    """

    def kernel(x_ref, mean_ref, rstd_ref, w_ref, b_ref, m_ref, *rest):
        if add_shortcut:
            s_ref, o_ref, pad_ref = rest
        else:
            o_ref, pad_ref = rest
        n_rows = x_ref.shape[1]

        # InstanceNorm apply (stats come from _in_stats_kernel) -- VPU filler.
        xn = (x_ref[0].astype(jnp.float32) - mean_ref[0]) * rstd_ref[0]

        # Write once into the zero-padded flat scratch (vertical padding = the
        # zero rows around the data; horizontal padding handled by the masks).
        pad_ref[...] = jnp.zeros_like(pad_ref)
        pad_ref[pad_off:pad_off + n_rows, :] = xn

        # Accumulate the taps on the MXU: bf16 x bf16 -> f32.
        acc = jnp.zeros(o_ref.shape[1:], jnp.float32)
        for t, d in enumerate(shifts):
            a = pad_ref[pad_off + d:pad_off + d + n_rows, :]
            if needs_mask[t]:
                a = a * m_ref[t]                              # zero invalid rows
            acc = acc + jnp.dot(a.astype(jnp.bfloat16), w_ref[t],
                                preferred_element_type=jnp.float32)

        # Epilogue: bias + LeakyReLU (+ fused residual add), lane-dense store.
        y = acc + b_ref[...].astype(jnp.float32)
        y = jnp.where(y >= 0.0, y, LRELU_SLOPE * y)
        if add_shortcut:
            y = y + s_ref[0].astype(jnp.float32)
        o_ref[0] = y.astype(o_ref.dtype)

    return kernel


# ---------------------------------------------------------------------------
# pallas_call wrappers
# ---------------------------------------------------------------------------
def _instance_norm_stats(xf):
    """xf: (N, H*W, C) -> (mean, rstd), each (N, 1, C) float32."""
    n, n_rows, c = xf.shape
    return pl.pallas_call(
        _in_stats_kernel,
        out_shape=(jax.ShapeDtypeStruct((n, 1, c), jnp.float32),
                   jax.ShapeDtypeStruct((n, 1, c), jnp.float32)),
        grid=(n,),
        in_specs=[pl.BlockSpec((1, n_rows, c), lambda i: (i, 0, 0))],
        out_specs=(pl.BlockSpec((1, 1, c), lambda i: (i, 0, 0)),
                   pl.BlockSpec((1, 1, c), lambda i: (i, 0, 0))),
        compiler_params=pltpu.CompilerParams(
            dimension_semantics=("parallel",),
            vmem_limit_bytes=VMEM_LIMIT),
    )(xf)


def _fused_conv(xf, mean, rstd, w_taps, bias_p, col_masks, *, width, shifts,
                dks, shortcut=None):
    """One fused conv over flattened (channels-last) images.

    xf        : (N, n_rows, Cin_k) raw activations (pre-normalization)
    mean/rstd : (N, 1, Cin_k) InstanceNorm statistics
    w_taps    : (T, Cin_k, Cout_p) bf16 per-tap weights (Cout_p % 128 == 0)
    bias_p    : (1, Cout_p) f32 (zero in the padded lanes)
    col_masks : (T, n_rows, 1) f32 row-boundary masks
    shortcut  : optional (N, n_rows, Cout_p) tensor added in the epilogue
    """
    n, n_rows, cin_k = xf.shape
    n_taps, _, cout_p = w_taps.shape
    pad_off = _round_up(width + 1, 8)                     # aligned data offset
    pad_rows = _round_up(pad_off + n_rows + max(max(shifts), 0), 8)
    needs_mask = tuple(dk != 0 for dk in dks)

    kernel = _make_conv_kernel(tuple(shifts), needs_mask, pad_off,
                               shortcut is not None)

    in_specs = [
        pl.BlockSpec((1, n_rows, cin_k), lambda i: (i, 0, 0)),     # activations
        pl.BlockSpec((1, 1, cin_k), lambda i: (i, 0, 0)),          # mean
        pl.BlockSpec((1, 1, cin_k), lambda i: (i, 0, 0)),          # rstd
        pl.BlockSpec((n_taps, cin_k, cout_p), lambda i: (0, 0, 0)),  # weights
        pl.BlockSpec((1, cout_p), lambda i: (0, 0)),               # bias
        pl.BlockSpec((n_taps, n_rows, 1), lambda i: (0, 0, 0)),    # col masks
    ]
    args = [xf, mean, rstd, w_taps, bias_p, col_masks]
    if shortcut is not None:
        in_specs.append(pl.BlockSpec((1, n_rows, cout_p), lambda i: (i, 0, 0)))
        args.append(shortcut)

    # TODO(synk): for very large Cin/Cout (>512) add a Cout/K grid axis instead
    #             of keeping the full weight resident.
    return pl.pallas_call(
        kernel,
        out_shape=jax.ShapeDtypeStruct((n, n_rows, cout_p), jnp.float32),
        grid=(n,),
        in_specs=in_specs,
        out_specs=pl.BlockSpec((1, n_rows, cout_p), lambda i: (i, 0, 0)),
        scratch_shapes=[pltpu.VMEM((pad_rows, cin_k), jnp.float32)],
        compiler_params=pltpu.CompilerParams(
            dimension_semantics=("parallel",),   # v7x 2-TC sharding; free elsewhere
            vmem_limit_bytes=VMEM_LIMIT),
    )(*args)


# ---------------------------------------------------------------------------
# Plain-JAX glue (layout only, no heavy compute)
# ---------------------------------------------------------------------------
def _taps_3x3(width):
    shifts = [(kh - 1) * width + (kw - 1) for kh in range(3) for kw in range(3)]
    dks = [kw - 1 for _ in range(3) for kw in range(3)]
    return shifts, dks


def _taps_2x2(width):
    shifts = [(di - 1) * width + (dj - 1) for di in range(2) for dj in range(2)]
    dks = [dj - 1 for _ in range(2) for dj in range(2)]
    return shifts, dks


def _col_masks(n_rows, width, dks):
    ow = jnp.arange(n_rows, dtype=jnp.int32) % width
    cols = []
    for dk in dks:
        valid = jnp.logical_and(ow + dk >= 0, ow + dk < width)
        cols.append(valid.astype(jnp.float32))
    return jnp.stack(cols, axis=0)[:, :, None]            # (T, n_rows, 1)


def _nchw_to_flat(x):
    n, c, h, w = x.shape
    return jnp.transpose(x, (0, 2, 3, 1)).reshape(n, h * w, c)


def _flat_to_nchw(xf, h, w, c):
    n = xf.shape[0]
    return jnp.transpose(xf[:, :, :c].reshape(n, h, w, c), (0, 3, 1, 2))


def _space_to_depth_flat(xf, h, w):
    """(N, H*W, C) -> (N, (H/2)*(W/2), 4*C), channel order (p, q, c)."""
    n, _, c = xf.shape
    x4 = xf.reshape(n, h // 2, 2, w // 2, 2, c)
    x4 = jnp.transpose(x4, (0, 1, 3, 2, 4, 5))
    return x4.reshape(n, (h // 2) * (w // 2), 4 * c)


def _avg_pool2_flat(xf, h, w):
    n, _, c = xf.shape
    y = xf.reshape(n, h // 2, 2, w // 2, 2, c).mean(axis=(2, 4))
    return y.reshape(n, (h // 2) * (w // 2), c)


# ---------------------------------------------------------------------------
# Weight preparation (hoisted out of the hot path)
# ---------------------------------------------------------------------------
def _prep_w_3x3(w, cin_p, cout_p):
    """OIHW 3x3 weight -> (9, cin_p, cout_p) bf16, tap order t = kh*3 + kw."""
    cout, cin, _, _ = w.shape
    wt = jnp.transpose(w, (2, 3, 1, 0)).reshape(9, cin, cout)
    wt = jnp.pad(wt, ((0, 0), (0, cin_p - cin), (0, cout_p - cout)))
    return wt.astype(jnp.bfloat16)


def _prep_w_3x3_s2(w, cin_p, cout_p):
    """Stride-2 3x3 OIHW weight rewritten as a 2x2 stride-1 kernel over a
    space-to-depth input: (4, 4*cin_p, cout_p) bf16, tap t = di*2 + dj,
    K index = (p*2 + q)*cin_p + c, with kh = 2*di + p - 1, kw = 2*dj + q - 1."""
    cout, cin, _, _ = w.shape
    w2 = jnp.zeros((2, 2, 2, 2, cin_p, cout_p), jnp.float32)
    for di in range(2):
        for dj in range(2):
            for p in range(2):
                for q in range(2):
                    kh, kw = 2 * di + p - 1, 2 * dj + q - 1
                    if 0 <= kh <= 2 and 0 <= kw <= 2:
                        w2 = w2.at[di, dj, p, q, :cin, :cout].set(w[:, :, kh, kw].T)
    return w2.reshape(4, 4 * cin_p, cout_p).astype(jnp.bfloat16)


def _prep_bias(b, cout_p):
    return jnp.pad(b, (0, cout_p - b.shape[0])).reshape(1, cout_p).astype(jnp.float32)


# ---------------------------------------------------------------------------
# Resblock
# ---------------------------------------------------------------------------
class Resblock:
    def __init__(self, in_channels, out_channels, learned_shortcut=True,
                 fused=True, key=None):
        if key is None:
            key = jax.random.PRNGKey(0)
        mid = min(in_channels, out_channels)
        self.in_channels = in_channels
        self.mid_channels = mid
        self.out_channels = out_channels
        self.learned_shortcut = learned_shortcut
        self.fused = fused
        self.cmid_p = _round_up(mid, LANES)
        self.cout_p = _round_up(out_channels, LANES)

        ks = jax.random.split(key, 6)

        def init_conv(kw_, kb_, cin, cout):
            w = jax.random.normal(kw_, (cout, cin, 3, 3), jnp.float32) * 0.1
            b = jax.random.normal(kb_, (cout,), jnp.float32) * 0.1
            return w, b

        # raw f32 parameters (kept for the pure-JAX reference check)
        self.w0, self.b0 = init_conv(ks[0], ks[1], in_channels, mid)
        self.w1, self.b1 = init_conv(ks[2], ks[3], mid, out_channels)
        if learned_shortcut:
            self.ws, self.bs = init_conv(ks[4], ks[5], in_channels, out_channels)

        # pre-laid-out bf16 kernel weights, Cout padded to 128 lanes
        self.w0_taps = _prep_w_3x3(self.w0, in_channels, self.cmid_p)
        self.b0_p = _prep_bias(self.b0, self.cmid_p)
        if fused:
            self.w1_taps = _prep_w_3x3_s2(self.w1, self.cmid_p, self.cout_p)
            if learned_shortcut:
                self.ws_taps = _prep_w_3x3_s2(self.ws, in_channels, self.cout_p)
        else:
            self.w1_taps = _prep_w_3x3(self.w1, self.cmid_p, self.cout_p)
            if learned_shortcut:
                self.ws_taps = _prep_w_3x3(self.ws, in_channels, self.cout_p)
        self.b1_p = _prep_bias(self.b1, self.cout_p)
        if learned_shortcut:
            self.bs_p = _prep_bias(self.bs, self.cout_p)

    def __call__(self, x):
        n, c, h, w = x.shape
        assert c == self.in_channels
        assert h % 2 == 0 and w % 2 == 0, "downsample path needs even H, W"
        hd, wd = h // 2, w // 2

        xf = _nchw_to_flat(x)                               # (N, H*W, Cin)
        mean_x, rstd_x = _instance_norm_stats(xf)           # norm_0 / norm_s stats

        shifts1, dks1 = _taps_3x3(w)
        masks1 = _col_masks(h * w, w, dks1)

        # conv0: 3x3, stride 1, fused IN-apply + bias + LeakyReLU
        hmid = _fused_conv(xf, mean_x, rstd_x, self.w0_taps, self.b0_p, masks1,
                           width=w, shifts=shifts1, dks=dks1)   # (N, H*W, Cmid_p)

        mean_h, rstd_h = _instance_norm_stats(hmid)          # norm_1 stats

        if self.fused:
            # stride-2 convs as 2x2 stride-1 convs over space-to-depth inputs
            shifts2, dks2 = _taps_2x2(wd)
            masks2 = _col_masks(hd * wd, wd, dks2)
            tile4 = lambda s: jnp.tile(s, (1, 1, 4))

            x_s = None
            if self.learned_shortcut:
                xs2 = _space_to_depth_flat(xf, h, w)
                x_s = _fused_conv(xs2, tile4(mean_x), tile4(rstd_x),
                                  self.ws_taps, self.bs_p, masks2,
                                  width=wd, shifts=shifts2, dks=dks2)

            h2 = _space_to_depth_flat(hmid, h, w)
            # conv1 with the residual add fused into its epilogue
            out_f = _fused_conv(h2, tile4(mean_h), tile4(rstd_h),
                                self.w1_taps, self.b1_p, masks2,
                                width=wd, shifts=shifts2, dks=dks2,
                                shortcut=x_s)
        else:
            # TODO(synk): ConvBlock source not given; non-fused downsample is
            # assumed to be stride-1 conv + LeakyReLU + 2x2 average pool.
            x_s = None
            if self.learned_shortcut:
                xs_full = _fused_conv(xf, mean_x, rstd_x, self.ws_taps,
                                      self.bs_p, masks1,
                                      width=w, shifts=shifts1, dks=dks1)
                x_s = _avg_pool2_flat(xs_full, h, w)
            y_full = _fused_conv(hmid, mean_h, rstd_h, self.w1_taps, self.b1_p,
                                 masks1, width=w, shifts=shifts1, dks=dks1)
            out_f = _avg_pool2_flat(y_full, h, w)
            if x_s is not None:
                out_f = out_f + x_s

        out = _flat_to_nchw(out_f, hd, wd, self.out_channels)
        if not self.learned_shortcut:
            # identity shortcut, mirroring the PyTorch module (only valid when
            # the block does not change shape).
            out = out + x
        return out


# ---------------------------------------------------------------------------
# Pure-JAX reference (precision-matched: bf16 operands, f32 accumulation)
# ---------------------------------------------------------------------------
def _ref_inorm(x):
    mean = x.mean(axis=(2, 3), keepdims=True)
    var = ((x - mean) ** 2).mean(axis=(2, 3), keepdims=True)
    return (x - mean) * jax.lax.rsqrt(var + EPS)


def _ref_conv(x, w, b, stride):
    xq = x.astype(jnp.bfloat16).astype(jnp.float32)
    wq = w.astype(jnp.bfloat16).astype(jnp.float32)
    y = jax.lax.conv_general_dilated(
        xq, wq, (stride, stride), ((1, 1), (1, 1)),
        dimension_numbers=("NCHW", "OIHW", "NCHW"),
        precision=jax.lax.Precision.HIGHEST)
    y = y + b.reshape(1, -1, 1, 1)
    return jnp.where(y >= 0, y, LRELU_SLOPE * y)


def ref_resblock(block, x):
    xs = _ref_conv(_ref_inorm(x), block.ws, block.bs, 2)
    h = _ref_conv(_ref_inorm(x), block.w0, block.b0, 1)
    h = _ref_conv(_ref_inorm(h), block.w1, block.b1, 2)
    return xs + h


if __name__ == "__main__":
    key = jax.random.PRNGKey(0)
    kx, kp = jax.random.split(key)
    x = jax.random.normal(kx, (2, 4, 16, 16), jnp.float32)   # NCHW
    block = Resblock(4, 8, learned_shortcut=True, fused=True, key=kp)

    fwd = jax.jit(lambda inp: block(inp))
    out = jax.block_until_ready(fwd(x))
    assert out.shape == (2, 8, 8, 8), out.shape

    ref = jax.block_until_ready(ref_resblock(block, x))
    max_err = float(jnp.max(jnp.abs(out - ref)))
    assert max_err < 2e-2, f"max abs err vs reference: {max_err}"

    print("KERNEL_OK")
</pallas_src>

<mosaic_0001>
module attributes {stable_mosaic.version = 11 : i64} {
  func.func @_in_stats_kernel(%arg0: i32, %arg1: memref<1x256x4xf32, #tpu.memory_space<vmem>>, %arg2: memref<1x1x4xf32, #tpu.memory_space<vmem>>, %arg3: memref<1x1x4xf32, #tpu.memory_space<vmem>>) attributes {dimension_semantics = [#tpu.dimension_semantics<parallel>], iteration_bounds = array<i64: 2>, scalar_prefetch = 0 : i64, scratch_operands = 0 : i64, tpu.core_type = #tpu.core_type<tc>, window_params = [{transform_indices = @transform_0, window_bounds = array<i64: 1, 256, 4>}, {transform_indices = @transform_1, window_bounds = array<i64: 1, 1, 4>}, {transform_indices = @transform_2, window_bounds = array<i64: 1, 1, 4>}]} {
    %c0 = arith.constant 0 : index
    %c0_0 = arith.constant 0 : index
    %c0_1 = arith.constant 0 : index
    %0 = vector.load %arg1[%c0, %c0_0, %c0_1] : memref<1x256x4xf32, #tpu.memory_space<vmem>>, vector<1x256x4xf32>
    %1 = vector.shape_cast %0 : vector<1x256x4xf32> to vector<256x4xf32>
    %cst = arith.constant dense<0.000000e+00> : vector<4xf32>
    %2 = vector.multi_reduction <add>, %1, %cst [0] : vector<256x4xf32> to vector<4xf32>
    %3 = vector.shape_cast %2 : vector<4xf32> to vector<1x4xf32>
    %cst_2 = arith.constant 2.560000e+02 : f32
    %4 = vector.broadcast %cst_2 : f32 to vector<1x4xf32>
    %5 = arith.divf %3, %4 : vector<1x4xf32>
    %6 = vector.broadcast %5 : vector<1x4xf32> to vector<256x4xf32>
    %7 = arith.subf %1, %6 : vector<256x4xf32>
    %8 = arith.mulf %7, %7 : vector<256x4xf32>
    %cst_3 = arith.constant dense<0.000000e+00> : vector<4xf32>
    %9 = vector.multi_reduction <add>, %8, %cst_3 [0] : vector<256x4xf32> to vector<4xf32>
    %10 = vector.shape_cast %9 : vector<4xf32> to vector<1x4xf32>
    %cst_4 = arith.constant 2.560000e+02 : f32
    %11 = vector.broadcast %cst_4 : f32 to vector<1x4xf32>
    %12 = arith.divf %10, %11 : vector<1x4xf32>
    %c0_5 = arith.constant 0 : index
    %c0_6 = arith.constant 0 : index
    %c0_7 = arith.constant 0 : index
    %13 = vector.load %arg2[%c0_5, %c0_6, %c0_7] : memref<1x1x4xf32, #tpu.memory_space<vmem>>, vector<1x1x4xf32>
    %14 = vector.shape_cast %13 : vector<1x1x4xf32> to vector<1x4xf32>
    %15 = vector.shape_cast %5 : vector<1x4xf32> to vector<1x1x4xf32>
    tpu.vector_store %arg2[%c0_5, %c0_6, %c0_7], %15 {strides = array<i32>} : memref<1x1x4xf32, #tpu.memory_space<vmem>>, vector<1x1x4xf32>,
    %cst_8 = arith.constant 9.99999974E-6 : f32
    %16 = vector.broadcast %cst_8 : f32 to vector<1x4xf32>
    %17 = arith.addf %12, %16 : vector<1x4xf32>
    %18 = math.rsqrt %17 : vector<1x4xf32>
    %c0_9 = arith.constant 0 : index
    %c0_10 = arith.constant 0 : index
    %c0_11 = arith.constant 0 : index
    %19 = vector.load %arg3[%c0_9, %c0_10, %c0_11] : memref<1x1x4xf32, #tpu.memory_space<vmem>>, vector<1x1x4xf32>
    %20 = vector.shape_cast %19 : vector<1x1x4xf32> to vector<1x4xf32>
    %21 = vector.shape_cast %18 : vector<1x4xf32> to vector<1x1x4xf32>
    tpu.vector_store %arg3[%c0_9, %c0_10, %c0_11], %21 {strides = array<i32>} : memref<1x1x4xf32, #tpu.memory_space<vmem>>, vector<1x1x4xf32>,
    return
  }
  func.func @transform_0(%arg0: i32) -> (i32, i32, i32) {
    %c0_i32 = arith.constant 0 : i32
    %c0_i32_0 = arith.constant 0 : i32
    %c0_i32_1 = arith.constant 0 : i32
    return %arg0, %c0_i32, %c0_i32_0 : i32, i32, i32
  }
  func.func @transform_1(%arg0: i32) -> (i32, i32, i32) {
    %c0_i32 = arith.constant 0 : i32
    %c0_i32_0 = arith.constant 0 : i32
    %c0_i32_1 = arith.constant 0 : i32
    return %arg0, %c0_i32, %c0_i32_0 : i32, i32, i32
  }
  func.func @transform_2(%arg0: i32) -> (i32, i32, i32) {
    %c0_i32 = arith.constant 0 : i32
    %c0_i32_0 = arith.constant 0 : i32
    %c0_i32_1 = arith.constant 0 : i32
    return %arg0, %c0_i32, %c0_i32_0 : i32, i32, i32
  }
}

module attributes {stable_mosaic.version = 11 : i64} {
  func.func @kernel(%arg0: i32, %arg1: memref<1x256x4xf32, #tpu.memory_space<vmem>>, %arg2: memref<1x1x4xf32, #tpu.memory_space<vmem>>, %arg3: memref<1x1x4xf32, #tpu.memory_space<vmem>>, %arg4: memref<9x4x128xbf16, #tpu.memory_space<vmem>>, %arg5: memref<1x128xf32, #tpu.memory_space<vmem>>, %arg6: memref<9x256x1xf32, #tpu.memory_space<vmem>>, %arg7: memref<1x256x128xf32, #tpu.memory_space<vmem>>, %arg8: memref<304x4xf32, #tpu.memory_space<vmem>>) attributes {dimension_semantics = [#tpu.dimension_semantics<parallel>], iteration_bounds = array<i64: 2>, scalar_prefetch = 0 : i64, scratch_operands = 1 : i64, tpu.core_type = #tpu.core_type<tc>, window_params = [{transform_indices = @transform_0, window_bounds = array<i64: 1, 256, 4>}, {transform_indices = @transform_1, window_bounds = array<i64: 1, 1, 4>}, {transform_indices = @transform_2, window_bounds = array<i64: 1, 1, 4>}, {pipeline_mode = #tpu.pipeline_mode<synchronous>, transform_indices = @transform_3, window_bounds = array<i64: 9, 4, 128>}, {pipeline_mode = #tpu.pipeline_mode<synchronous>, transform_indices = @transform_4, window_bounds = array<i64: 1, 128>}, {pipeline_mode = #tpu.pipeline_mode<synchronous>, transform_indices = @transform_5, window_bounds = array<i64: 9, 256, 1>}, {transform_indices = @transform_6, window_bounds = array<i64: 1, 256, 128>}]} {
    %c0 = arith.constant 0 : index
    %c0_0 = arith.constant 0 : index
    %c0_1 = arith.constant 0 : index
    %0 = vector.load %arg1[%c0, %c0_0, %c0_1] : memref<1x256x4xf32, #tpu.memory_space<vmem>>, vector<1x256x4xf32>
    %1 = vector.shape_cast %0 : vector<1x256x4xf32> to vector<256x4xf32>
    %c0_2 = arith.constant 0 : index
    %c0_3 = arith.constant 0 : index
    %c0_4 = arith.constant 0 : index
    %2 = vector.load %arg2[%c0_2, %c0_3, %c0_4] : memref<1x1x4xf32, #tpu.memory_space<vmem>>, vector<1x1x4xf32>
    %3 = vector.shape_cast %2 : vector<1x1x4xf32> to vector<1x4xf32>
    %4 = vector.broadcast %3 : vector<1x4xf32> to vector<256x4xf32>
    %5 = arith.subf %1, %4 : vector<256x4xf32>
    %c0_5 = arith.constant 0 : index
    %c0_6 = arith.constant 0 : index
    %c0_7 = arith.constant 0 : index
    %6 = vector.load %arg3[%c0_5, %c0_6, %c0_7] : memref<1x1x4xf32, #tpu.memory_space<vmem>>, vector<1x1x4xf32>
    %7 = vector.shape_cast %6 : vector<1x1x4xf32> to vector<1x4xf32>
    %8 = vector.broadcast %7 : vector<1x4xf32> to vector<256x4xf32>
    %9 = arith.mulf %5, %8 : vector<256x4xf32>
    %cst = arith.constant 0.000000e+00 : f32
    %10 = vector.broadcast %cst : f32 to vector<304x4xf32>
    %c0_8 = arith.constant 0 : index
    %c0_9 = arith.constant 0 : index
    %11 = vector.load %arg8[%c0_8, %c0_9] : memref<304x4xf32, #tpu.memory_space<vmem>>, vector<304x4xf32>
    tpu.vector_store %arg8[%c0_8, %c0_9], %10 {strides = array<i32>} : memref<304x4xf32, #tpu.memory_space<vmem>>, vector<304x4xf32>,
    %c24 = arith.constant 24 : index
    %c0_10 = arith.constant 0 : index
    %12 = vector.load %arg8[%c24, %c0_10] : memref<304x4xf32, #tpu.memory_space<vmem>>, vector<256x4xf32>
    tpu.vector_store %arg8[%c24, %c0_10], %9 {strides = array<i32>} : memref<304x4xf32, #tpu.memory_space<vmem>>, vector<256x4xf32>,
    %cst_11 = arith.constant 0.000000e+00 : f32
    %13 = vector.broadcast %cst_11 : f32 to vector<256x128xf32>
    %c7 = arith.constant 7 : index
    %c0_12 = arith.constant 0 : index
    %14 = vector.load %arg8[%c7, %c0_12] : memref<304x4xf32, #tpu.memory_space<vmem>>, vector<256x4xf32>
    %c0_13 = arith.constant 0 : index
    %c0_14 = arith.constant 0 : index
    %c0_15 = arith.constant 0 : index
    %15 = vector.load %arg6[%c0_13, %c0_14, %c0_15] : memref<9x256x1xf32, #tpu.memory_space<vmem>>, vector<1x256x1xf32>
    %16 = vector.shape_cast %15 : vector<1x256x1xf32> to vector<256x1xf32>
    %17 = vector.broadcast %16 : vector<256x1xf32> to vector<256x4xf32>
    %18 = arith.mulf %14, %17 : vector<256x4xf32>
    %19 = arith.truncf %18 : vector<256x4xf32> to vector<256x4xbf16>
    %c0_16 = arith.constant 0 : index
    %c0_17 = arith.constant 0 : index
    %c0_18 = arith.constant 0 : index
    %20 = vector.load %arg4[%c0_16, %c0_17, %c0_18] : memref<9x4x128xbf16, #tpu.memory_space<vmem>>, vector<1x4x128xbf16>
    %21 = vector.shape_cast %20 : vector<1x4x128xbf16> to vector<4x128xbf16>
    %cst_19 = arith.constant dense<0.000000e+00> : vector<256x128xf32>
    %22 = tpu.matmul %19, %21, %cst_19 {dimension_numbers = #tpu.dot_dimension_numbers<[1], [0], [0], [1], [0, 0, 1, 1], [], []>} : vector<256x4xbf16>, vector<4x128xbf16>, vector<256x128xf32> -> vector<256x128xf32>
    %23 = arith.addf %13, %22 : vector<256x128xf32>
    %c8 = arith.constant 8 : index
    %c0_20 = arith.constant 0 : index
    %24 = vector.load %arg8[%c8, %c0_20] : memref<304x4xf32, #tpu.memory_space<vmem>>, vector<256x4xf32>
    %25 = arith.truncf %24 : vector<256x4xf32> to vector<256x4xbf16>
    %c1 = arith.constant 1 : index
    %c0_21 = arith.constant 0 : index
    %c0_22 = arith.constant 0 : index
    %26 = vector.load %arg4[%c1, %c0_21, %c0_22] : memref<9x4x128xbf16, #tpu.memory_space<vmem>>, vector<1x4x128xbf16>
    %27 = vector.shape_cast %26 : vector<1x4x128xbf16> to vector<4x128xbf16>
    %cst_23 = arith.constant dense<0.000000e+00> : vector<256x128xf32>
    %28 = tpu.matmul %25, %27, %cst_23 {dimension_numbers = #tpu.dot_dimension_numbers<[1], [0], [0], [1], [0, 0, 1, 1], [], []>} : vector<256x4xbf16>, vector<4x128xbf16>, vector<256x128xf32> -> vector<256x128xf32>
    %29 = arith.addf %23, %28 : vector<256x128xf32>
    %c9 = arith.constant 9 : index
    %c0_24 = arith.constant 0 : index
    %30 = vector.load %arg8[%c9, %c0_24] : memref<304x4xf32, #tpu.memory_space<vmem>>, vector<256x4xf32>
    %c2 = arith.constant 2 : index
    %c0_25 = arith.constant 0 : index
    %c0_26 = arith.constant 0 : index
    %31 = vector.load %arg6[%c2, %c0_25, %c0_26] : memref<9x256x1xf32, #tpu.memory_space<vmem>>, vector<1x256x1xf32>
    %32 = vector.shape_cast %31 : vector<1x256x1xf32> to vector<256x1xf32>
    %33 = vector.broadcast %32 : vector<256x1xf32> to vector<256x4xf32>
    %34 = arith.mulf %30, %33 : vector<256x4xf32>
    %35 = arith.truncf %34 : vector<256x4xf32> to vector<256x4xbf16>
    %c2_27 = arith.constant 2 : index
    %c0_28 = arith.constant 0 : index
    %c0_29 = arith.constant 0 : index
    %36 = vector.load %arg4[%c2_27, %c0_28, %c0_29] : memref<9x4x128xbf16, #tpu.memory_space<vmem>>, vector<1x4x128xbf16>
    %37 = vector.shape_cast %36 : vector<1x4x128xbf16> to vector<4x128xbf16>
    %cst_30 = arith.constant dense<0.000000e+00> : vector<256x128xf32>
    %38 = tpu.matmul %35, %37, %cst_30 {dimension_numbers = #tpu.dot_dimension_numbers<[1], [0], [0], [1], [0, 0, 1, 1], [], []>} : vector<256x4xbf16>, vector<4x128xbf16>, vector<256x128xf32> -> vector<256x128xf32>
    %39 = arith.addf %29, %38 : vector<256x128xf32>
    %c23 = arith.constant 23 : index
    %c0_31 = arith.constant 0 : index
    %40 = vector.load %arg8[%c23, %c0_31] : memref<304x4xf32, #tpu.memory_space<vmem>>, vector<256x4xf32>
    %c3 = arith.constant 3 : index
    %c0_32 = arith.constant 0 : index
    %c0_33 = arith.constant 0 : index
    %41 = vector.load %arg6[%c3, %c0_32, %c0_33] : memref<9x256x1xf32, #tpu.memory_space<vmem>>, vector<1x256x1xf32>
    %42 = vector.shape_cast %41 : vector<1x256x1xf32> to vector<256x1xf32>
    %43 = vector.broadcast %42 : vector<256x1xf32> to vector<256x4xf32>
    %44 = arith.mulf %40, %43 : vector<256x4xf32>
    %45 = arith.truncf %44 : vector<256x4xf32> to vector<256x4xbf16>
    %c3_34 = arith.constant 3 : index
    %c0_35 = arith.constant 0 : index
    %c0_36 = arith.constant 0 : index
    %46 = vector.load %arg4[%c3_34, %c0_35, %c0_36] : memref<9x4x128xbf16, #tpu.memory_space<vmem>>, vector<1x4x128xbf16>
    %47 = vector.shape_cast %46 : vector<1x4x128xbf16> to vector<4x128xbf16>
    %cst_37 = arith.constant dense<0.000000e+00> : vector<256x128xf32>
    %48 = tpu.matmul %45, %47, %cst_37 {dimension_numbers = #tpu.dot_dimension_numbers<[1], [0], [0], [1], [0, 0, 1, 1], [], []>} : vector<256x4xbf16>, vector<4x128xbf16>, vector<256x128xf32> -> vector<256x128xf32>
    %49 = arith.addf %39, %48 : vector<256x128xf32>
    %c24_38 = arith.constant 24 : index
    %c0_39 = arith.constant 0 : index
    %50 = vector.load %arg8[%c24_38, %c0_39] : memref<304x4xf32, #tpu.memory_space<vmem>>, vector<256x4xf32>
    %51 = arith.truncf %50 : vector<256x4xf32> to vector<256x4xbf16>
    %c4 = arith.constant 4 : index
    %c0_40 = arith.constant 0 : index
    %c0_41 = arith.constant 0 : index
    %52 = vector.load %arg4[%c4, %c0_40, %c0_41] : memref<9x4x128xbf16, #tpu.memory_space<vmem>>, vector<1x4x128xbf16>
    %53 = vector.shape_cast %52 : vector<1x4x128xbf16> to vector<4x128xbf16>
    %cst_42 = arith.constant dense<0.000000e+00> : vector<256x128xf32>
    %54 = tpu.matmul %51, %53, %cst_42 {dimension_numbers = #tpu.dot_dimension_numbers<[1], [0], [0], [1], [0, 0, 1, 1], [], []>} : vector<256x4xbf16>, vector<4x128xbf16>, vector<256x128xf32> -> vector<256x128xf32>
    %55 = arith.addf %49, %54 : vector<256x128xf32>
    %c25 = arith.constant 25 : index
    %c0_43 = arith.constant 0 : index
    %56 = vector.load %arg8[%c25, %c0_43] : memref<304x4xf32, #tpu.memory_space<vmem>>, vector<256x4xf32>
    %c5 = arith.constant 5 : index
    %c0_44 = arith.constant 0 : index
    %c0_45 = arith.constant 0 : index
    %57 = vector.load %arg6[%c5, %c0_44, %c0_45] : memref<9x256x1xf32, #tpu.memory_space<vmem>>, vector<1x256x1xf32>
    %58 = vector.shape_cast %57 : vector<1x256x1xf32> to vector<256x1xf32>
    %59 = vector.broadcast %58 : vector<256x1xf32> to vector<256x4xf32>
    %60 = arith.mulf %56, %59 : vector<256x4xf32>
    %61 = arith.truncf %60 : vector<256x4xf32> to vector<256x4xbf16>
    %c5_46 = arith.constant 5 : index
    %c0_47 = arith.constant 0 : index
    %c0_48 = arith.constant 0 : index
    %62 = vector.load %arg4[%c5_46, %c0_47, %c0_48] : memref<9x4x128xbf16, #tpu.memory_space<vmem>>, vector<1x4x128xbf16>
    %63 = vector.shape_cast %62 : vector<1x4x128xbf16> to vector<4x128xbf16>
    %cst_49 = arith.constant dense<0.000000e+00> : vector<256x128xf32>
    %64 = tpu.matmul %61, %63, %cst_49 {dimension_numbers = #tpu.dot_dimension_numbers<[1], [0], [0], [1], [0, 0, 1, 1], [], []>} : vector<256x4xbf16>, vector<4x128xbf16>, vector<256x128xf32> -> vector<256x128xf32>
    %65 = arith.addf %55, %64 : vector<256x128xf32>
    %c39 = arith.constant 39 : index
    %c0_50 = arith.constant 0 : index
    %66 = vector.load %arg8[%c39, %c0_50] : memref<304x4xf32, #tpu.memory_space<vmem>>, vector<256x4xf32>
    %c6 = arith.constant 6 : index
    %c0_51 = arith.constant 0 : index
    %c0_52 = arith.constant 0 : index
    %67 = vector.load %arg6[%c6, %c0_51, %c0_52] : memref<9x256x1xf32, #tpu.memory_space<vmem>>, vector<1x256x1xf32>
    %68 = vector.shape_cast %67 : vector<1x256x1xf32> to vector<256x1xf32>
    %69 = vector.broadcast %68 : vector<256x1xf32> to vector<256x4xf32>
    %70 = arith.mulf %66, %69 : vector<256x4xf32>
    %71 = arith.truncf %70 : vector<256x4xf32> to vector<256x4xbf16>
    %c6_53 = arith.constant 6 : index
    %c0_54 = arith.constant 0 : index
    %c0_55 = arith.constant 0 : index
    %72 = vector.load %arg4[%c6_53, %c0_54, %c0_55] : memref<9x4x128xbf16, #tpu.memory_space<vmem>>, vector<1x4x128xbf16>
    %73 = vector.shape_cast %72 : vector<1x4x128xbf16> to vector<4x128xbf16>
    %cst_56 = arith.constant dense<0.000000e+00> : vector<256x128xf32>
    %74 = tpu.matmul %71, %73, %cst_56 {dimension_numbers = #tpu.dot_dimension_numbers<[1], [0], [0], [1], [0, 0, 1, 1], [], []>} : vector<256x4xbf16>, vector<4x128xbf16>, vector<256x128xf32> -> vector<256x128xf32>
    %75 = arith.addf %65, %74 : vector<256x128xf32>
    %c40 = arith.constant 40 : index
    %c0_57 = arith.constant 0 : index
    %76 = vector.load %arg8[%c40, %c0_57] : memref<304x4xf32, #tpu.memory_space<vmem>>, vector<256x4xf32>
    %77 = arith.truncf %76 : vector<256x4xf32> to vector<256x4xbf16>
    %c7_58 = arith.constant 7 : index
    %c0_59 = arith.constant 0 : index
    %c0_60 = arith.constant 0 : index
    %78 = vector.load %arg4[%c7_58, %c0_59, %c0_60] : memref<9x4x128xbf16, #tpu.memory_space<vmem>>, vector<1x4x128xbf16>
    %79 = vector.shape_cast %78 : vector<1x4x128xbf16> to vector<4x128xbf16>
    %cst_61 = arith.constant dense<0.000000e+00> : vector<256x128xf32>
    %80 = tpu.matmul %77, %79, %cst_61 {dimension_numbers = #tpu.dot_dimension_numbers<[1], [0], [0], [1], [0, 0, 1, 1], [], []>} : vector<256x4xbf16>, vector<4x128xbf16>, vector<256x128xf32> -> vector<256x128xf32>
    %81 = arith.addf %75, %80 : vector<256x128xf32>
    %c41 = arith.constant 41 : index
    %c0_62 = arith.constant 0 : index
    %82 = vector.load %arg8[%c41, %c0_62] : memref<304x4xf32, #tpu.memory_space<vmem>>, vector<256x4xf32>
    %c8_63 = arith.constant 8 : index
    %c0_64 = arith.constant 0 : index
    %c0_65 = arith.constant 0 : index
    %83 = vector.load %arg6[%c8_63, %c0_64, %c0_65] : memref<9x256x1xf32, #tpu.memory_space<vmem>>, vector<1x256x1xf32>
    %84 = vector.shape_cast %83 : vector<1x256x1xf32> to vector<256x1xf32>
    %85 = vector.broadcast %84 : vector<256x1xf32> to vector<256x4xf32>
    %86 = arith.mulf %82, %85 : vector<256x4xf32>
    %87 = arith.truncf %86 : vector<256x4xf32> to vector<256x4xbf16>
    %c8_66 = arith.constant 8 : index
    %c0_67 = arith.constant 0 : index
    %c0_68 = arith.constant 0 : index
    %88 = vector.load %arg4[%c8_66, %c0_67, %c0_68] : memref<9x4x128xbf16, #tpu.memory_space<vmem>>, vector<1x4x128xbf16>
    %89 = vector.shape_cast %88 : vector<1x4x128xbf16> to vector<4x128xbf16>
    %cst_69 = arith.constant dense<0.000000e+00> : vector<256x128xf32>
    %90 = tpu.matmul %87, %89, %cst_69 {dimension_numbers = #tpu.dot_dimension_numbers<[1], [0], [0], [1], [0, 0, 1, 1], [], []>} : vector<256x4xbf16>, vector<4x128xbf16>, vector<256x128xf32> -> vector<256x128xf32>
    %91 = arith.addf %81, %90 : vector<256x128xf32>
    %c0_70 = arith.constant 0 : index
    %c0_71 = arith.constant 0 : index
    %92 = vector.load %arg5[%c0_70, %c0_71] : memref<1x128xf32, #tpu.memory_space<vmem>>, vector<1x128xf32>
    %93 = vector.broadcast %92 : vector<1x128xf32> to vector<256x128xf32>
    %94 = arith.addf %91, %93 : vector<256x128xf32>
    %cst_72 = arith.constant 0.000000e+00 : f32
    %95 = vector.broadcast %cst_72 : f32 to vector<256x128xf32>
    %96 = arith.cmpf oge, %94, %95 : vector<256x128xf32>
    %cst_73 = arith.constant 2.000000e-01 : f32
    %97 = vector.broadcast %cst_73 : f32 to vector<256x128xf32>
    %98 = arith.mulf %97, %94 : vector<256x128xf32>
    %99 = arith.select %96, %94, %98 : vector<256x128xi1>, vector<256x128xf32>
    %c0_74 = arith.constant 0 : index
    %c0_75 = arith.constant 0 : index
    %c0_76 = arith.constant 0 : index
    %100 = vector.load %arg7[%c0_74, %c0_75, %c0_76] : memref<1x256x128xf32, #tpu.memory_space<vmem>>, vector<1x256x128xf32>
    %101 = vector.shape_cast %100 : vector<1x256x128xf32> to vector<256x128xf32>
    %102 = vector.shape_cast %99 : vector<256x128xf32> to vector<1x256x128xf32>
    tpu.vector_store %arg7[%c0_74, %c0_75, %c0_76], %102 {strides = array<i32>} : memref<1x256x128xf32, #tpu.memory_space<vmem>>, vector<1x256x128xf32>,
    return
  }
  func.func @transform_0(%arg0: i32) -> (i32, i32, i32) {
    %c0_i32 = arith.constant 0 : i32
    %c0_i32_0 = arith.constant 0 : i32
    %c0_i32_1 = arith.constant 0 : i32
    return %arg0, %c0_i32, %c0_i32_0 : i32, i32, i32
  }
  func.func @transform_1(%arg0: i32) -> (i32, i32, i32) {
    %c0_i32 = arith.constant 0 : i32
    %c0_i32_0 = arith.constant 0 : i32
    %c0_i32_1 = arith.constant 0 : i32
    return %arg0, %c0_i32, %c0_i32_0 : i32, i32, i32
  }
  func.func @transform_2(%arg0: i32) -> (i32, i32, i32) {
    %c0_i32 = arith.constant 0 : i32
    %c0_i32_0 = arith.constant 0 : i32
    %c0_i32_1 = arith.constant 0 : i32
    return %arg0, %c0_i32, %c0_i32_0 : i32, i32, i32
  }
  func.func @transform_3(%arg0: i32) -> (i32, i32, i32) {
    %c0_i32 = arith.constant 0 : i32
    %c0_i32_0 = arith.constant 0 : i32
    %c0_i32_1 = arith.constant 0 : i32
    %c0_i32_2 = arith.constant 0 : i32
    return %c0_i32, %c0_i32_0, %c0_i32_1 : i32, i32, i32
  }
  func.func @transform_4(%arg0: i32) -> (i32, i32) {
    %c0_i32 = arith.constant 0 : i32
    %c0_i32_0 = arith.constant 0 : i32
    %c0_i32_1 = arith.constant 0 : i32
    return %c0_i32, %c0_i32_0 : i32, i32
  }
  func.func @transform_5(%arg0: i32) -> (i32, i32, i32) {
    %c0_i32 = arith.constant 0 : i32
    %c0_i32_0 = arith.constant 0 : i32
    %c0_i32_1 = arith.constant 0 : i32
    %c0_i32_2 = arith.constant 0 : i32
    return %c0_i32, %c0_i32_0, %c0_i32_1 : i32, i32, i32
  }
  func.func @transform_6(%arg0: i32) -> (i32, i32, i32) {
    %c0_i32 = arith.constant 0 : i32
    %c0_i32_0 = arith.constant 0 : i32
    %c0_i32_1 = arith.constant 0 : i32
    return %arg0, %c0_i32, %c0_i32_0 : i32, i32, i32
  }
}

module attributes {stable_mosaic.version = 11 : i64} {
  func.func @_in_stats_kernel(%arg0: i32, %arg1: memref<1x256x128xf32, #tpu.memory_space<vmem>>, %arg2: memref<1x1x128xf32, #tpu.memory_space<vmem>>, %arg3: memref<1x1x128xf32, #tpu.memory_space<vmem>>) attributes {dimension_semantics = [#tpu.dimension_semantics<parallel>], iteration_bounds = array<i64: 2>, scalar_prefetch = 0 : i64, scratch_operands = 0 : i64, tpu.core_type = #tpu.core_type<tc>, window_params = [{transform_indices = @transform_0, window_bounds = array<i64: 1, 256, 128>}, {transform_indices = @transform_1, window_bounds = array<i64: 1, 1, 128>}, {transform_indices = @transform_2, window_bounds = array<i64: 1, 1, 128>}]} {
    %c0 = arith.constant 0 : index
    %c0_0 = arith.constant 0 : index
    %c0_1 = arith.constant 0 : index
    %0 = vector.load %arg1[%c0, %c0_0, %c0_1] : memref<1x256x128xf32, #tpu.memory_space<vmem>>, vector<1x256x128xf32>
    %1 = vector.shape_cast %0 : vector<1x256x128xf32> to vector<256x128xf32>
    %cst = arith.constant dense<0.000000e+00> : vector<128xf32>
    %2 = vector.multi_reduction <add>, %1, %cst [0] : vector<256x128xf32> to vector<128xf32>
    %3 = vector.shape_cast %2 : vector<128xf32> to vector<1x128xf32>
    %cst_2 = arith.constant 2.560000e+02 : f32
    %4 = vector.broadcast %cst_2 : f32 to vector<1x128xf32>
    %5 = arith.divf %3, %4 : vector<1x128xf32>
    %6 = vector.broadcast %5 : vector<1x128xf32> to vector<256x128xf32>
    %7 = arith.subf %1, %6 : vector<256x128xf32>
    %8 = arith.mulf %7, %7 : vector<256x128xf32>
    %cst_3 = arith.constant dense<0.000000e+00> : vector<128xf32>
    %9 = vector.multi_reduction <add>, %8, %cst_3 [0] : vector<256x128xf32> to vector<128xf32>
    %10 = vector.shape_cast %9 : vector<128xf32> to vector<1x128xf32>
    %cst_4 = arith.constant 2.560000e+02 : f32
    %11 = vector.broadcast %cst_4 : f32 to vector<1x128xf32>
    %12 = arith.divf %10, %11 : vector<1x128xf32>
    %c0_5 = arith.constant 0 : index
    %c0_6 = arith.constant 0 : index
    %c0_7 = arith.constant 0 : index
    %13 = vector.load %arg2[%c0_5, %c0_6, %c0_7] : memref<1x1x128xf32, #tpu.memory_space<vmem>>, vector<1x1x128xf32>
    %14 = vector.shape_cast %13 : vector<1x1x128xf32> to vector<1x128xf32>
    %15 = vector.shape_cast %5 : vector<1x128xf32> to vector<1x1x128xf32>
    tpu.vector_store %arg2[%c0_5, %c0_6, %c0_7], %15 {strides = array<i32>} : memref<1x1x128xf32, #tpu.memory_space<vmem>>, vector<1x1x128xf32>,
    %cst_8 = arith.constant 9.99999974E-6 : f32
    %16 = vector.broadcast %cst_8 : f32 to vector<1x128xf32>
    %17 = arith.addf %12, %16 : vector<1x128xf32>
    %18 = math.rsqrt %17 : vector<1x128xf32>
    %c0_9 = arith.constant 0 : index
    %c0_10 = arith.constant 0 : index
    %c0_11 = arith.constant 0 : index
    %19 = vector.load %arg3[%c0_9, %c0_10, %c0_11] : memref<1x1x128xf32, #tpu.memory_space<vmem>>, vector<1x1x128xf32>
    %20 = vector.shape_cast %19 : vector<1x1x128xf32> to vector<1x128xf32>
    %21 = vector.shape_cast %18 : vector<1x128xf32> to vector<1x1x128xf32>
    tpu.vector_store %arg3[%c0_9, %c0_10, %c0_11], %21 {strides = array<i32>} : memref<1x1x128xf32, #tpu.memory_space<vmem>>, vector<1x1x128xf32>,
    return
  }
  func.func @transform_0(%arg0: i32) -> (i32, i32, i32) {
    %c0_i32 = arith.constant 0 : i32
    %c0_i32_0 = arith.constant 0 : i32
    %c0_i32_1 = arith.constant 0 : i32
    return %arg0, %c0_i32, %c0_i32_0 : i32, i32, i32
  }
  func.func @transform_1(%arg0: i32) -> (i32, i32, i32) {
    %c0_i32 = arith.constant 0 : i32
    %c0_i32_0 = arith.constant 0 : i32
    %c0_i32_1 = arith.constant 0 : i32
    return %arg0, %c0_i32, %c0_i32_0 : i32, i32, i32
  }
  func.func @transform_2(%arg0: i32) -> (i32, i32, i32) {
    %c0_i32 = arith.constant 0 : i32
    %c0_i32_0 = arith.constant 0 : i32
    %c0_i32_1 = arith.constant 0 : i32
    return %arg0, %c0_i32, %c0_i32_0 : i32, i32, i32
  }
}

module attributes {stable_mosaic.version = 11 : i64} {
  func.func @kernel(%arg0: i32, %arg1: memref<1x64x16xf32, #tpu.memory_space<vmem>>, %arg2: memref<1x1x16xf32, #tpu.memory_space<vmem>>, %arg3: memref<1x1x16xf32, #tpu.memory_space<vmem>>, %arg4: memref<4x16x128xbf16, #tpu.memory_space<vmem>>, %arg5: memref<1x128xf32, #tpu.memory_space<vmem>>, %arg6: memref<4x64x1xf32, #tpu.memory_space<vmem>>, %arg7: memref<1x64x128xf32, #tpu.memory_space<vmem>>, %arg8: memref<80x16xf32, #tpu.memory_space<vmem>>) attributes {dimension_semantics = [#tpu.dimension_semantics<parallel>], iteration_bounds = array<i64: 2>, scalar_prefetch = 0 : i64, scratch_operands = 1 : i64, tpu.core_type = #tpu.core_type<tc>, window_params = [{transform_indices = @transform_0, window_bounds = array<i64: 1, 64, 16>}, {transform_indices = @transform_1, window_bounds = array<i64: 1, 1, 16>}, {transform_indices = @transform_2, window_bounds = array<i64: 1, 1, 16>}, {pipeline_mode = #tpu.pipeline_mode<synchronous>, transform_indices = @transform_3, window_bounds = array<i64: 4, 16, 128>}, {pipeline_mode = #tpu.pipeline_mode<synchronous>, transform_indices = @transform_4, window_bounds = array<i64: 1, 128>}, {pipeline_mode = #tpu.pipeline_mode<synchronous>, transform_indices = @transform_5, window_bounds = array<i64: 4, 64, 1>}, {transform_indices = @transform_6, window_bounds = array<i64: 1, 64, 128>}]} {
    %c0 = arith.constant 0 : index
    %c0_0 = arith.constant 0 : index
    %c0_1 = arith.constant 0 : index
    %0 = vector.load %arg1[%c0, %c0_0, %c0_1] : memref<1x64x16xf32, #tpu.memory_space<vmem>>, vector<1x64x16xf32>
    %1 = vector.shape_cast %0 : vector<1x64x16xf32> to vector<64x16xf32>
    %c0_2 = arith.constant 0 : index
    %c0_3 = arith.constant 0 : index
    %c0_4 = arith.constant 0 : index
    %2 = vector.load %arg2[%c0_2, %c0_3, %c0_4] : memref<1x1x16xf32, #tpu.memory_space<vmem>>, vector<1x1x16xf32>
    %3 = vector.shape_cast %2 : vector<1x1x16xf32> to vector<1x16xf32>
    %4 = vector.broadcast %3 : vector<1x16xf32> to vector<64x16xf32>
    %5 = arith.subf %1, %4 : vector<64x16xf32>
    %c0_5 = arith.constant 0 : index
    %c0_6 = arith.constant 0 : index
    %c0_7 = arith.constant 0 : index
    %6 = vector.load %arg3[%c0_5, %c0_6, %c0_7] : memref<1x1x16xf32, #tpu.memory_space<vmem>>, vector<1x1x16xf32>
    %7 = vector.shape_cast %6 : vector<1x1x16xf32> to vector<1x16xf32>
    %8 = vector.broadcast %7 : vector<1x16xf32> to vector<64x16xf32>
    %9 = arith.mulf %5, %8 : vector<64x16xf32>
    %cst = arith.constant 0.000000e+00 : f32
    %10 = vector.broadcast %cst : f32 to vector<80x16xf32>
    %c0_8 = arith.constant 0 : index
    %c0_9 = arith.constant 0 : index
    %11 = vector.load %arg8[%c0_8, %c0_9] : memref<80x16xf32, #tpu.memory_space<vmem>>, vector<80x16xf32>
    tpu.vector_store %arg8[%c0_8, %c0_9], %10 {strides = array<i32>} : memref<80x16xf32, #tpu.memory_space<vmem>>, vector<80x16xf32>,
    %c16 = arith.constant 16 : index
    %c0_10 = arith.constant 0 : index
    %12 = vector.load %arg8[%c16, %c0_10] : memref<80x16xf32, #tpu.memory_space<vmem>>, vector<64x16xf32>
    tpu.vector_store %arg8[%c16, %c0_10], %9 {strides = array<i32>} : memref<80x16xf32, #tpu.memory_space<vmem>>, vector<64x16xf32>,
    %cst_11 = arith.constant 0.000000e+00 : f32
    %13 = vector.broadcast %cst_11 : f32 to vector<64x128xf32>
    %c7 = arith.constant 7 : index
    %c0_12 = arith.constant 0 : index
    %14 = vector.load %arg8[%c7, %c0_12] : memref<80x16xf32, #tpu.memory_space<vmem>>, vector<64x16xf32>
    %c0_13 = arith.constant 0 : index
    %c0_14 = arith.constant 0 : index
    %c0_15 = arith.constant 0 : index
    %15 = vector.load %arg6[%c0_13, %c0_14, %c0_15] : memref<4x64x1xf32, #tpu.memory_space<vmem>>, vector<1x64x1xf32>
    %16 = vector.shape_cast %15 : vector<1x64x1xf32> to vector<64x1xf32>
    %17 = vector.broadcast %16 : vector<64x1xf32> to vector<64x16xf32>
    %18 = arith.mulf %14, %17 : vector<64x16xf32>
    %19 = arith.truncf %18 : vector<64x16xf32> to vector<64x16xbf16>
    %c0_16 = arith.constant 0 : index
    %c0_17 = arith.constant 0 : index
    %c0_18 = arith.constant 0 : index
    %20 = vector.load %arg4[%c0_16, %c0_17, %c0_18] : memref<4x16x128xbf16, #tpu.memory_space<vmem>>, vector<1x16x128xbf16>
    %21 = vector.shape_cast %20 : vector<1x16x128xbf16> to vector<16x128xbf16>
    %cst_19 = arith.constant dense<0.000000e+00> : vector<64x128xf32>
    %22 = tpu.matmul %19, %21, %cst_19 {dimension_numbers = #tpu.dot_dimension_numbers<[1], [0], [0], [1], [0, 0, 1, 1], [], []>} : vector<64x16xbf16>, vector<16x128xbf16>, vector<64x128xf32> -> vector<64x128xf32>
    %23 = arith.addf %13, %22 : vector<64x128xf32>
    %c8 = arith.constant 8 : index
    %c0_20 = arith.constant 0 : index
    %24 = vector.load %arg8[%c8, %c0_20] : memref<80x16xf32, #tpu.memory_space<vmem>>, vector<64x16xf32>
    %25 = arith.truncf %24 : vector<64x16xf32> to vector<64x16xbf16>
    %c1 = arith.constant 1 : index
    %c0_21 = arith.constant 0 : index
    %c0_22 = arith.constant 0 : index
    %26 = vector.load %arg4[%c1, %c0_21, %c0_22] : memref<4x16x128xbf16, #tpu.memory_space<vmem>>, vector<1x16x128xbf16>
    %27 = vector.shape_cast %26 : vector<1x16x128xbf16> to vector<16x128xbf16>
    %cst_23 = arith.constant dense<0.000000e+00> : vector<64x128xf32>
    %28 = tpu.matmul %25, %27, %cst_23 {dimension_numbers = #tpu.dot_dimension_numbers<[1], [0], [0], [1], [0, 0, 1, 1], [], []>} : vector<64x16xbf16>, vector<16x128xbf16>, vector<64x128xf32> -> vector<64x128xf32>
    %29 = arith.addf %23, %28 : vector<64x128xf32>
    %c15 = arith.constant 15 : index
    %c0_24 = arith.constant 0 : index
    %30 = vector.load %arg8[%c15, %c0_24] : memref<80x16xf32, #tpu.memory_space<vmem>>, vector<64x16xf32>
    %c2 = arith.constant 2 : index
    %c0_25 = arith.constant 0 : index
    %c0_26 = arith.constant 0 : index
    %31 = vector.load %arg6[%c2, %c0_25, %c0_26] : memref<4x64x1xf32, #tpu.memory_space<vmem>>, vector<1x64x1xf32>
    %32 = vector.shape_cast %31 : vector<1x64x1xf32> to vector<64x1xf32>
    %33 = vector.broadcast %32 : vector<64x1xf32> to vector<64x16xf32>
    %34 = arith.mulf %30, %33 : vector<64x16xf32>
    %35 = arith.truncf %34 : vector<64x16xf32> to vector<64x16xbf16>
    %c2_27 = arith.constant 2 : index
    %c0_28 = arith.constant 0 : index
    %c0_29 = arith.constant 0 : index
    %36 = vector.load %arg4[%c2_27, %c0_28, %c0_29] : memref<4x16x128xbf16, #tpu.memory_space<vmem>>, vector<1x16x128xbf16>
    %37 = vector.shape_cast %36 : vector<1x16x128xbf16> to vector<16x128xbf16>
    %cst_30 = arith.constant dense<0.000000e+00> : vector<64x128xf32>
    %38 = tpu.matmul %35, %37, %cst_30 {dimension_numbers = #tpu.dot_dimension_numbers<[1], [0], [0], [1], [0, 0, 1, 1], [], []>} : vector<64x16xbf16>, vector<16x128xbf16>, vector<64x128xf32> -> vector<64x128xf32>
    %39 = arith.addf %29, %38 : vector<64x128xf32>
    %c16_31 = arith.constant 16 : index
    %c0_32 = arith.constant 0 : index
    %40 = vector.load %arg8[%c16_31, %c0_32] : memref<80x16xf32, #tpu.memory_space<vmem>>, vector<64x16xf32>
    %41 = arith.truncf %40 : vector<64x16xf32> to vector<64x16xbf16>
    %c3 = arith.constant 3 : index
    %c0_33 = arith.constant 0 : index
    %c0_34 = arith.constant 0 : index
    %42 = vector.load %arg4[%c3, %c0_33, %c0_34] : memref<4x16x128xbf16, #tpu.memory_space<vmem>>, vector<1x16x128xbf16>
    %43 = vector.shape_cast %42 : vector<1x16x128xbf16> to vector<16x128xbf16>
    %cst_35 = arith.constant dense<0.000000e+00> : vector<64x128xf32>
    %44 = tpu.matmul %41, %43, %cst_35 {dimension_numbers = #tpu.dot_dimension_numbers<[1], [0], [0], [1], [0, 0, 1, 1], [], []>} : vector<64x16xbf16>, vector<16x128xbf16>, vector<64x128xf32> -> vector<64x128xf32>
    %45 = arith.addf %39, %44 : vector<64x128xf32>
    %c0_36 = arith.constant 0 : index
    %c0_37 = arith.constant 0 : index
    %46 = vector.load %arg5[%c0_36, %c0_37] : memref<1x128xf32, #tpu.memory_space<vmem>>, vector<1x128xf32>
    %47 = vector.broadcast %46 : vector<1x128xf32> to vector<64x128xf32>
    %48 = arith.addf %45, %47 : vector<64x128xf32>
    %cst_38 = arith.constant 0.000000e+00 : f32
    %49 = vector.broadcast %cst_38 : f32 to vector<64x128xf32>
    %50 = arith.cmpf oge, %48, %49 : vector<64x128xf32>
    %cst_39 = arith.constant 2.000000e-01 : f32
    %51 = vector.broadcast %cst_39 : f32 to vector<64x128xf32>
    %52 = arith.mulf %51, %48 : vector<64x128xf32>
    %53 = arith.select %50, %48, %52 : vector<64x128xi1>, vector<64x128xf32>
    %c0_40 = arith.constant 0 : index
    %c0_41 = arith.constant 0 : index
    %c0_42 = arith.constant 0 : index
    %54 = vector.load %arg7[%c0_40, %c0_41, %c0_42] : memref<1x64x128xf32, #tpu.memory_space<vmem>>, vector<1x64x128xf32>
    %55 = vector.shape_cast %54 : vector<1x64x128xf32> to vector<64x128xf32>
    %56 = vector.shape_cast %53 : vector<64x128xf32> to vector<1x64x128xf32>
    tpu.vector_store %arg7[%c0_40, %c0_41, %c0_42], %56 {strides = array<i32>} : memref<1x64x128xf32, #tpu.memory_space<vmem>>, vector<1x64x128xf32>,
    return
  }
  func.func @transform_0(%arg0: i32) -> (i32, i32, i32) {
    %c0_i32 = arith.constant 0 : i32
    %c0_i32_0 = arith.constant 0 : i32
    %c0_i32_1 = arith.constant 0 : i32
    return %arg0, %c0_i32, %c0_i32_0 : i32, i32, i32
  }
  func.func @transform_1(%arg0: i32) -> (i32, i32, i32) {
    %c0_i32 = arith.constant 0 : i32
    %c0_i32_0 = arith.constant 0 : i32
    %c0_i32_1 = arith.constant 0 : i32
    return %arg0, %c0_i32, %c0_i32_0 : i32, i32, i32
  }
  func.func @transform_2(%arg0: i32) -> (i32, i32, i32) {
    %c0_i32 = arith.constant 0 : i32
    %c0_i32_0 = arith.constant 0 : i32
    %c0_i32_1 = arith.constant 0 : i32
    return %arg0, %c0_i32, %c0_i32_0 : i32, i32, i32
  }
  func.func @transform_3(%arg0: i32) -> (i32, i32, i32) {
    %c0_i32 = arith.constant 0 : i32
    %c0_i32_0 = arith.constant 0 : i32
    %c0_i32_1 = arith.constant 0 : i32
    %c0_i32_2 = arith.constant 0 : i32
    return %c0_i32, %c0_i32_0, %c0_i32_1 : i32, i32, i32
  }
  func.func @transform_4(%arg0: i32) -> (i32, i32) {
    %c0_i32 = arith.constant 0 : i32
    %c0_i32_0 = arith.constant 0 : i32
    %c0_i32_1 = arith.constant 0 : i32
    return %c0_i32, %c0_i32_0 : i32, i32
  }
  func.func @transform_5(%arg0: i32) -> (i32, i32, i32) {
    %c0_i32 = arith.constant 0 : i32
    %c0_i32_0 = arith.constant 0 : i32
    %c0_i32_1 = arith.constant 0 : i32
    %c0_i32_2 = arith.constant 0 : i32
    return %c0_i32, %c0_i32_0, %c0_i32_1 : i32, i32, i32
  }
  func.func @transform_6(%arg0: i32) -> (i32, i32, i32) {
    %c0_i32 = arith.constant 0 : i32
    %c0_i32_0 = arith.constant 0 : i32
    %c0_i32_1 = arith.constant 0 : i32
    return %arg0, %c0_i32, %c0_i32_0 : i32, i32, i32
  }
}

module attributes {stable_mosaic.version = 11 : i64} {
  func.func @kernel(%arg0: i32, %arg1: memref<1x64x512xf32, #tpu.memory_space<vmem>>, %arg2: memref<1x1x512xf32, #tpu.memory_space<vmem>>, %arg3: memref<1x1x512xf32, #tpu.memory_space<vmem>>, %arg4: memref<4x512x128xbf16, #tpu.memory_space<vmem>>, %arg5: memref<1x128xf32, #tpu.memory_space<vmem>>, %arg6: memref<4x64x1xf32, #tpu.memory_space<vmem>>, %arg7: memref<1x64x128xf32, #tpu.memory_space<vmem>>, %arg8: memref<1x64x128xf32, #tpu.memory_space<vmem>>, %arg9: memref<80x512xf32, #tpu.memory_space<vmem>>) attributes {dimension_semantics = [#tpu.dimension_semantics<parallel>], iteration_bounds = array<i64: 2>, scalar_prefetch = 0 : i64, scratch_operands = 1 : i64, tpu.core_type = #tpu.core_type<tc>, window_params = [{transform_indices = @transform_0, window_bounds = array<i64: 1, 64, 512>}, {transform_indices = @transform_1, window_bounds = array<i64: 1, 1, 512>}, {transform_indices = @transform_2, window_bounds = array<i64: 1, 1, 512>}, {pipeline_mode = #tpu.pipeline_mode<synchronous>, transform_indices = @transform_3, window_bounds = array<i64: 4, 512, 128>}, {pipeline_mode = #tpu.pipeline_mode<synchronous>, transform_indices = @transform_4, window_bounds = array<i64: 1, 128>}, {pipeline_mode = #tpu.pipeline_mode<synchronous>, transform_indices = @transform_5, window_bounds = array<i64: 4, 64, 1>}, {transform_indices = @transform_6, window_bounds = array<i64: 1, 64, 128>}, {transform_indices = @transform_7, window_bounds = array<i64: 1, 64, 128>}]} {
    %c0 = arith.constant 0 : index
    %c0_0 = arith.constant 0 : index
    %c0_1 = arith.constant 0 : index
    %0 = vector.load %arg1[%c0, %c0_0, %c0_1] : memref<1x64x512xf32, #tpu.memory_space<vmem>>, vector<1x64x512xf32>
    %1 = vector.shape_cast %0 : vector<1x64x512xf32> to vector<64x512xf32>
    %c0_2 = arith.constant 0 : index
    %c0_3 = arith.constant 0 : index
    %c0_4 = arith.constant 0 : index
    %2 = vector.load %arg2[%c0_2, %c0_3, %c0_4] : memref<1x1x512xf32, #tpu.memory_space<vmem>>, vector<1x1x512xf32>
    %3 = vector.shape_cast %2 : vector<1x1x512xf32> to vector<1x512xf32>
    %4 = vector.broadcast %3 : vector<1x512xf32> to vector<64x512xf32>
    %5 = arith.subf %1, %4 : vector<64x512xf32>
    %c0_5 = arith.constant 0 : index
    %c0_6 = arith.constant 0 : index
    %c0_7 = arith.constant 0 : index
    %6 = vector.load %arg3[%c0_5, %c0_6, %c0_7] : memref<1x1x512xf32, #tpu.memory_space<vmem>>, vector<1x1x512xf32>
    %7 = vector.shape_cast %6 : vector<1x1x512xf32> to vector<1x512xf32>
    %8 = vector.broadcast %7 : vector<1x512xf32> to vector<64x512xf32>
    %9 = arith.mulf %5, %8 : vector<64x512xf32>
    %cst = arith.constant 0.000000e+00 : f32
    %10 = vector.broadcast %cst : f32 to vector<80x512xf32>
    %c0_8 = arith.constant 0 : index
    %c0_9 = arith.constant 0 : index
    %11 = vector.load %arg9[%c0_8, %c0_9] : memref<80x512xf32, #tpu.memory_space<vmem>>, vector<80x512xf32>
    tpu.vector_store %arg9[%c0_8, %c0_9], %10 {strides = array<i32>} : memref<80x512xf32, #tpu.memory_space<vmem>>, vector<80x512xf32>,
    %c16 = arith.constant 16 : index
    %c0_10 = arith.constant 0 : index
    %12 = vector.load %arg9[%c16, %c0_10] : memref<80x512xf32, #tpu.memory_space<vmem>>, vector<64x512xf32>
    tpu.vector_store %arg9[%c16, %c0_10], %9 {strides = array<i32>} : memref<80x512xf32, #tpu.memory_space<vmem>>, vector<64x512xf32>,
    %cst_11 = arith.constant 0.000000e+00 : f32
    %13 = vector.broadcast %cst_11 : f32 to vector<64x128xf32>
    %c7 = arith.constant 7 : index
    %c0_12 = arith.constant 0 : index
    %14 = vector.load %arg9[%c7, %c0_12] : memref<80x512xf32, #tpu.memory_space<vmem>>, vector<64x512xf32>
    %c0_13 = arith.constant 0 : index
    %c0_14 = arith.constant 0 : index
    %c0_15 = arith.constant 0 : index
    %15 = vector.load %arg6[%c0_13, %c0_14, %c0_15] : memref<4x64x1xf32, #tpu.memory_space<vmem>>, vector<1x64x1xf32>
    %16 = vector.shape_cast %15 : vector<1x64x1xf32> to vector<64x1xf32>
    %17 = vector.broadcast %16 : vector<64x1xf32> to vector<64x512xf32>
    %18 = arith.mulf %14, %17 : vector<64x512xf32>
    %19 = arith.truncf %18 : vector<64x512xf32> to vector<64x512xbf16>
    %c0_16 = arith.constant 0 : index
    %c0_17 = arith.constant 0 : index
    %c0_18 = arith.constant 0 : index
    %20 = vector.load %arg4[%c0_16, %c0_17, %c0_18] : memref<4x512x128xbf16, #tpu.memory_space<vmem>>, vector<1x512x128xbf16>
    %21 = vector.shape_cast %20 : vector<1x512x128xbf16> to vector<512x128xbf16>
    %cst_19 = arith.constant dense<0.000000e+00> : vector<64x128xf32>
    %22 = tpu.matmul %19, %21, %cst_19 {dimension_numbers = #tpu.dot_dimension_numbers<[1], [0], [0], [1], [0, 0, 1, 1], [], []>} : vector<64x512xbf16>, vector<512x128xbf16>, vector<64x128xf32> -> vector<64x128xf32>
    %23 = arith.addf %13, %22 : vector<64x128xf32>
    %c8 = arith.constant 8 : index
    %c0_20 = arith.constant 0 : index
    %24 = vector.load %arg9[%c8, %c0_20] : memref<80x512xf32, #tpu.memory_space<vmem>>, vector<64x512xf32>
    %25 = arith.truncf %24 : vector<64x512xf32> to vector<64x512xbf16>
    %c1 = arith.constant 1 : index
    %c0_21 = arith.constant 0 : index
    %c0_22 = arith.constant 0 : index
    %26 = vector.load %arg4[%c1, %c0_21, %c0_22] : memref<4x512x128xbf16, #tpu.memory_space<vmem>>, vector<1x512x128xbf16>
    %27 = vector.shape_cast %26 : vector<1x512x128xbf16> to vector<512x128xbf16>
    %cst_23 = arith.constant dense<0.000000e+00> : vector<64x128xf32>
    %28 = tpu.matmul %25, %27, %cst_23 {dimension_numbers = #tpu.dot_dimension_numbers<[1], [0], [0], [1], [0, 0, 1, 1], [], []>} : vector<64x512xbf16>, vector<512x128xbf16>, vector<64x128xf32> -> vector<64x128xf32>
    %29 = arith.addf %23, %28 : vector<64x128xf32>
    %c15 = arith.constant 15 : index
    %c0_24 = arith.constant 0 : index
    %30 = vector.load %arg9[%c15, %c0_24] : memref<80x512xf32, #tpu.memory_space<vmem>>, vector<64x512xf32>
    %c2 = arith.constant 2 : index
    %c0_25 = arith.constant 0 : index
    %c0_26 = arith.constant 0 : index
    %31 = vector.load %arg6[%c2, %c0_25, %c0_26] : memref<4x64x1xf32, #tpu.memory_space<vmem>>, vector<1x64x1xf32>
    %32 = vector.shape_cast %31 : vector<1x64x1xf32> to vector<64x1xf32>
    %33 = vector.broadcast %32 : vector<64x1xf32> to vector<64x512xf32>
    %34 = arith.mulf %30, %33 : vector<64x512xf32>
    %35 = arith.truncf %34 : vector<64x512xf32> to vector<64x512xbf16>
    %c2_27 = arith.constant 2 : index
    %c0_28 = arith.constant 0 : index
    %c0_29 = arith.constant 0 : index
    %36 = vector.load %arg4[%c2_27, %c0_28, %c0_29] : memref<4x512x128xbf16, #tpu.memory_space<vmem>>, vector<1x512x128xbf16>
    %37 = vector.shape_cast %36 : vector<1x512x128xbf16> to vector<512x128xbf16>
    %cst_30 = arith.constant dense<0.000000e+00> : vector<64x128xf32>
    %38 = tpu.matmul %35, %37, %cst_30 {dimension_numbers = #tpu.dot_dimension_numbers<[1], [0], [0], [1], [0, 0, 1, 1], [], []>} : vector<64x512xbf16>, vector<512x128xbf16>, vector<64x128xf32> -> vector<64x128xf32>
    %39 = arith.addf %29, %38 : vector<64x128xf32>
    %c16_31 = arith.constant 16 : index
    %c0_32 = arith.constant 0 : index
    %40 = vector.load %arg9[%c16_31, %c0_32] : memref<80x512xf32, #tpu.memory_space<vmem>>, vector<64x512xf32>
    %41 = arith.truncf %40 : vector<64x512xf32> to vector<64x512xbf16>
    %c3 = arith.constant 3 : index
    %c0_33 = arith.constant 0 : index
    %c0_34 = arith.constant 0 : index
    %42 = vector.load %arg4[%c3, %c0_33, %c0_34] : memref<4x512x128xbf16, #tpu.memory_space<vmem>>, vector<1x512x128xbf16>
    %43 = vector.shape_cast %42 : vector<1x512x128xbf16> to vector<512x128xbf16>
    %cst_35 = arith.constant dense<0.000000e+00> : vector<64x128xf32>
    %44 = tpu.matmul %41, %43, %cst_35 {dimension_numbers = #tpu.dot_dimension_numbers<[1], [0], [0], [1], [0, 0, 1, 1], [], []>} : vector<64x512xbf16>, vector<512x128xbf16>, vector<64x128xf32> -> vector<64x128xf32>
    %45 = arith.addf %39, %44 : vector<64x128xf32>
    %c0_36 = arith.constant 0 : index
    %c0_37 = arith.constant 0 : index
    %46 = vector.load %arg5[%c0_36, %c0_37] : memref<1x128xf32, #tpu.memory_space<vmem>>, vector<1x128xf32>
    %47 = vector.broadcast %46 : vector<1x128xf32> to vector<64x128xf32>
    %48 = arith.addf %45, %47 : vector<64x128xf32>
    %cst_38 = arith.constant 0.000000e+00 : f32
    %49 = vector.broadcast %cst_38 : f32 to vector<64x128xf32>
    %50 = arith.cmpf oge, %48, %49 : vector<64x128xf32>
    %cst_39 = arith.constant 2.000000e-01 : f32
    %51 = vector.broadcast %cst_39 : f32 to vector<64x128xf32>
    %52 = arith.mulf %51, %48 : vector<64x128xf32>
    %53 = arith.select %50, %48, %52 : vector<64x128xi1>, vector<64x128xf32>
    %c0_40 = arith.constant 0 : index
    %c0_41 = arith.constant 0 : index
    %c0_42 = arith.constant 0 : index
    %54 = vector.load %arg7[%c0_40, %c0_41, %c0_42] : memref<1x64x128xf32, #tpu.memory_space<vmem>>, vector<1x64x128xf32>
    %55 = vector.shape_cast %54 : vector<1x64x128xf32> to vector<64x128xf32>
    %56 = arith.addf %53, %55 : vector<64x128xf32>
    %c0_43 = arith.constant 0 : index
    %c0_44 = arith.constant 0 : index
    %c0_45 = arith.constant 0 : index
    %57 = vector.load %arg8[%c0_43, %c0_44, %c0_45] : memref<1x64x128xf32, #tpu.memory_space<vmem>>, vector<1x64x128xf32>
    %58 = vector.shape_cast %57 : vector<1x64x128xf32> to vector<64x128xf32>
    %59 = vector.shape_cast %56 : vector<64x128xf32> to vector<1x64x128xf32>
    tpu.vector_store %arg8[%c0_43, %c0_44, %c0_45], %59 {strides = array<i32>} : memref<1x64x128xf32, #tpu.memory_space<vmem>>, vector<1x64x128xf32>,
    return
  }
  func.func @transform_0(%arg0: i32) -> (i32, i32, i32) {
    %c0_i32 = arith.constant 0 : i32
    %c0_i32_0 = arith.constant 0 : i32
    %c0_i32_1 = arith.constant 0 : i32
    return %arg0, %c0_i32, %c0_i32_0 : i32, i32, i32
  }
  func.func @transform_1(%arg0: i32) -> (i32, i32, i32) {
    %c0_i32 = arith.constant 0 : i32
    %c0_i32_0 = arith.constant 0 : i32
    %c0_i32_1 = arith.constant 0 : i32
    return %arg0, %c0_i32, %c0_i32_0 : i32, i32, i32
  }
  func.func @transform_2(%arg0: i32) -> (i32, i32, i32) {
    %c0_i32 = arith.constant 0 : i32
    %c0_i32_0 = arith.constant 0 : i32
    %c0_i32_1 = arith.constant 0 : i32
    return %arg0, %c0_i32, %c0_i32_0 : i32, i32, i32
  }
  func.func @transform_3(%arg0: i32) -> (i32, i32, i32) {
    %c0_i32 = arith.constant 0 : i32
    %c0_i32_0 = arith.constant 0 : i32
    %c0_i32_1 = arith.constant 0 : i32
    %c0_i32_2 = arith.constant 0 : i32
    return %c0_i32, %c0_i32_0, %c0_i32_1 : i32, i32, i32
  }
  func.func @transform_4(%arg0: i32) -> (i32, i32) {
    %c0_i32 = arith.constant 0 : i32
    %c0_i32_0 = arith.constant 0 : i32
    %c0_i32_1 = arith.constant 0 : i32
    return %c0_i32, %c0_i32_0 : i32, i32
  }
  func.func @transform_5(%arg0: i32) -> (i32, i32, i32) {
    %c0_i32 = arith.constant 0 : i32
    %c0_i32_0 = arith.constant 0 : i32
    %c0_i32_1 = arith.constant 0 : i32
    %c0_i32_2 = arith.constant 0 : i32
    return %c0_i32, %c0_i32_0, %c0_i32_1 : i32, i32, i32
  }
  func.func @transform_6(%arg0: i32) -> (i32, i32, i32) {
    %c0_i32 = arith.constant 0 : i32
    %c0_i32_0 = arith.constant 0 : i32
    %c0_i32_1 = arith.constant 0 : i32
    return %arg0, %c0_i32, %c0_i32_0 : i32, i32, i32
  }
  func.func @transform_7(%arg0: i32) -> (i32, i32, i32) {
    %c0_i32 = arith.constant 0 : i32
    %c0_i32_0 = arith.constant 0 : i32
    %c0_i32_1 = arith.constant 0 : i32
    return %arg0, %c0_i32, %c0_i32_0 : i32, i32, i32
  }
}

</mosaic_0001>

<bundles_post_ra>
// kernel: _lambda_.5
= control target key start
LH: loop header
LB: loop body
LE: loop exit
PB: predicated region body
PF: predicated region fallthrough
CT: control target
= control target key end

     0   :  { %s507_s9 = smov 0   ;;  %s795_s0 = inlined_call_operand.vmem [shape: f32[2,256,4], index: 0, kind: input, shape index: {}]   ;;  %s796_s1 = inlined_call_operand.vmem [shape: f32[2,1,4], index: 1, kind: output, shape index: {0}]   ;;  %s797_s2 = inlined_call_operand.vmem [shape: f32[2,1,4], index: 2, kind: output, shape index: {1}]  }
   0x1 LB: > { %s464_s10 = sadd.s32 4294967295, %s490_s9   ;;  %p468_p0 = scmp.ge.s32.totalorder %s490_s9, 1  ;;  %s490_s9 = sphi %s507_s9, %s13_s9  }
   0x2   : > { %p115_p1 = scmp.lt.s32.totalorder %s490_s9, 3 }
   0x4   : > { %p116_p2 = pnand %p468_p0, %p115_p1 }
   0x5   : > { %p138_p3 = scmp.lt.s32.totalorder (!%p116_p2), %s464_s10, 1 }
   0x6   : > { %119 = sbr.rel (%p116_p2) target bundleno = 190 (0xbe), region = 24 }
   0xb   : > { %s799_s10 = smov (!%p138_p3, %s464_s10), 1  ;;  %vm181_vm0 = vcmask 31744   ;;  %vm387_vm1 = vcmask 24576  }
   0xc   : > { %s473_s11 = sshll.u32 %s799_s10, 8  ;;  %s145_s17 = scalar_lea.vmem %s796_s1, %s799_s10 }
   0xd   : > { %s521_s14 = scalar_lea.vmem %s795_s0, %s473_s11  ;;  %s148_s20 = scalar_lea.vmem %s797_s2, %s799_s10 }
   0xe   : > { %v524_v0 = vld [vmem:[%s521_s14] sm:$0xff]  ;;  %v527_v1 = vld [vmem:[%s521_s14 + $0x8] sm:$0xff]  ;;  %v530_v2 = vld [vmem:[%s521_s14 + $0x10] sm:$0xff] }
   0xf   : > { %v533_v3 = vld [vmem:[%s521_s14 + $0x18] sm:$0xff]  ;;  %v182_v4 = vsel %vm181_vm0, %v524_v0, 0.0  ;;  %v183_v5 = vsel %vm181_vm0, %v527_v1, 0.0  ;;  %v185_v6 = vsel %vm181_vm0, %v530_v2, 0.0  ;;  %v542_v7 = vld [vmem:[%s521_s14 + $0x20] sm:$0xff]  ;;  %v547_v10 = vld [vmem:[%s521_s14 + $0x28] sm:$0xff] }
  0x10   : > { %v184_v8 = vadd.f32 %v183_v5, %v182_v4  ;;  %v187_v9 = vsel %vm181_vm0, %v533_v3, 0.0  ;;  %v189_v12 = vsel %vm181_vm0, %v542_v7, 0.0  ;;  %v552_v13 = vld [vmem:[%s521_s14 + $0x30] sm:$0xff]  ;;  %v191_v15 = vsel %vm181_vm0, %v547_v10, 0.0  ;;  %v557_v16 = vld [vmem:[%s521_s14 + $0x38] sm:$0xff]  ;;  %v562_v19 = vld [vmem:[%s521_s14 + $0x40] sm:$0xff] }
  0x11   : > { %v193_v18 = vsel %vm181_vm0, %v552_v13, 0.0  ;;  %v195_v21 = vsel %vm181_vm0, %v557_v16, 0.0  ;;  %v567_v22 = vld [vmem:[%s521_s14 + $0x48] sm:$0xff]  ;;  %v197_v24 = vsel %vm181_vm0, %v562_v19, 0.0  ;;  %v572_v25 = vld [vmem:[%s521_s14 + $0x50] sm:$0xff]  ;;  %v577_v28 = vld [vmem:[%s521_s14 + $0x58] sm:$0xff] }
  0x12   : > { %v186_v11 = vadd.f32 %v185_v6, %v184_v8  ;;  %v199_v27 = vsel %vm181_vm0, %v567_v22, 0.0  ;;  %v201_v30 = vsel %vm181_vm0, %v572_v25, 0.0  ;;  %v582_v31 = vld [vmem:[%s521_s14 + $0x60] sm:$0xff]  ;;  %v203_v33 = vsel %vm181_vm0, %v577_v28, 0.0  ;;  %v587_v34 = vld [vmem:[%s521_s14 + $0x68] sm:$0xff]  ;;  %v592_v37 = vld [vmem:[%s521_s14 + $0x70] sm:$0xff] }
  0x13   : > { %v205_v36 = vsel %vm181_vm0, %v582_v31, 0.0  ;;  %v207_v39 = vsel %vm181_vm0, %v587_v34, 0.0  ;;  %v597_v40 = vld [vmem:[%s521_s14 + $0x78] sm:$0xff]  ;;  %v209_v42 = vsel %vm181_vm0, %v592_v37, 0.0  ;;  %v602_v43 = vld [vmem:[%s521_s14 + $0x80] sm:$0xff]  ;;  %v607_v46 = vld [vmem:[%s521_s14 + $0x88] sm:$0xff] }
  0x14   : > { %v188_v14 = vadd.f32 %v187_v9, %v186_v11  ;;  %v211_v45 = vsel %vm181_vm0, %v597_v40, 0.0  ;;  %v213_v48 = vsel %vm181_vm0, %v602_v43, 0.0  ;;  %v612_v49 = vld [vmem:[%s521_s14 + $0x90] sm:$0xff]  ;;  %v215_v51 = vsel %vm181_vm0, %v607_v46, 0.0  ;;  %v617_v52 = vld [vmem:[%s521_s14 + $0x98] sm:$0xff]  ;;  %v622_v55 = vld [vmem:[%s521_s14 + $0xa0] sm:$0xff] }
  0x15   : > { %v217_v54 = vsel %vm181_vm0, %v612_v49, 0.0  ;;  %v219_v57 = vsel %vm181_vm0, %v617_v52, 0.0  ;;  %v627_v58 = vld [vmem:[%s521_s14 + $0xa8] sm:$0xff]  ;;  %v221_v60 = vsel %vm181_vm0, %v622_v55, 0.0  ;;  %v632_v61 = vld [vmem:[%s521_s14 + $0xb0] sm:$0xff]  ;;  %v637_v4 = vld [vmem:[%s521_s14 + $0xb8] sm:$0xff] }
  0x16   : > { %v190_v17 = vadd.f32 %v189_v12, %v188_v14  ;;  %v223_v63 = vsel %vm181_vm0, %v627_v58, 0.0  ;;  %v225_v6 = vsel %vm181_vm0, %v632_v61, 0.0  ;;  %v642_v8 = vld [vmem:[%s521_s14 + $0xc0] sm:$0xff]  ;;  %v227_v11 = vsel %vm181_vm0, %v637_v4, 0.0  ;;  %v647_v12 = vld [vmem:[%s521_s14 + $0xc8] sm:$0xff] }
  0x18   : > { %v192_v20 = vadd.f32 %v191_v15, %v190_v17  ;;  %v229_v15 = vsel %vm181_vm0, %v642_v8, 0.0  ;;  %v652_v17 = vld [vmem:[%s521_s14 + $0xd0] sm:$0xff] }
  0x1a   : > { %v194_v23 = vadd.f32 %v193_v18, %v192_v20  ;;  %v231_v20 = vsel %vm181_vm0, %v647_v12, 0.0 }
  0x1c   : > { %v196_v26 = vadd.f32 %v195_v21, %v194_v23  ;;  %v657_v21 = vld [vmem:[%s521_s14 + $0xd8] sm:$0xff] }
  0x1e   : > { %v198_v29 = vadd.f32 %v197_v24, %v196_v26  ;;  %v233_v24 = vsel %vm181_vm0, %v652_v17, 0.0  ;;  %v662_v26 = vld [vmem:[%s521_s14 + $0xe0] sm:$0xff] }
  0x20   : > { %v200_v32 = vadd.f32 %v199_v27, %v198_v29  ;;  %v235_v29 = vsel %vm181_vm0, %v657_v21, 0.0 }
  0x22   : > { %v202_v35 = vadd.f32 %v201_v30, %v200_v32  ;;  %v667_v30 = vld [vmem:[%s521_s14 + $0xe8] sm:$0xff] }
  0x24   : > { %v204_v38 = vadd.f32 %v203_v33, %v202_v35  ;;  %v237_v33 = vsel %vm181_vm0, %v662_v26, 0.0  ;;  %v672_v35 = vld [vmem:[%s521_s14 + $0xf0] sm:$0xff] }
  0x26   : > { %v206_v41 = vadd.f32 %v205_v36, %v204_v38  ;;  %v239_v38 = vsel %vm181_vm0, %v667_v30, 0.0 }
  0x28   : > { %v208_v44 = vadd.f32 %v207_v39, %v206_v41  ;;  %v677_v39 = vld [vmem:[%s521_s14 + $0xf8] sm:$0xff] }
  0x2a   : > { %v210_v47 = vadd.f32 %v209_v42, %v208_v44  ;;  %v241_v42 = vsel %vm181_vm0, %v672_v35, 0.0 }
  0x2c   : > { %v212_v50 = vadd.f32 %v211_v45, %v210_v47  ;;  %v243_v45 = vsel %vm181_vm0, %v677_v39, 0.0 }
  0x2e   : > { %v214_v53 = vadd.f32 %v213_v48, %v212_v50 }
  0x30   : > { %v216_v56 = vadd.f32 %v215_v51, %v214_v53 }
  0x32   : > { %v218_v59 = vadd.f32 %v217_v54, %v216_v56 }
  0x34   : > { %v220_v62 = vadd.f32 %v219_v57, %v218_v59 }
  0x36   : > { %v222_v5 = vadd.f32 %v221_v60, %v220_v62 }
  0x38   : > { %v224_v9 = vadd.f32 %v223_v63, %v222_v5 }
  0x3a   : > { %v226_v14 = vadd.f32 %v225_v6, %v224_v9 }
  0x3c   : > { %v228_v18 = vadd.f32 %v227_v11, %v226_v14 }
  0x3e   : > { %v230_v23 = vadd.f32 %v229_v15, %v228_v18 }
  0x40   : > { %v232_v27 = vadd.f32 %v231_v20, %v230_v23 }
  0x42   : > { %v234_v32 = vadd.f32 %v233_v24, %v232_v27 }
  0x44   : > { %v236_v36 = vadd.f32 %v235_v29, %v234_v32 }
  0x46   : > { %v238_v41 = vadd.f32 %v237_v33, %v236_v36 }
  0x48   : > { %v240_v44 = vadd.f32 %v239_v38, %v238_v41 }
  0x4a   : > { %v242_v47 = vadd.f32 %v241_v42, %v240_v44 }
  0x4c   : > { %v244_v48 = vadd.f32 %v243_v45, %v242_v47 }
  0x4e   : > { %v245_v50 = vrot.slane %v244_v48, 4 }
  0x50   : > { %v246_v51 = vadd.f32 %v245_v50, %v244_v48 }
  0x52   : > { %v247_v53 = vrot.slane %v246_v51, 2 }
  0x54   : > { %v248_v54 = vadd.f32 %v247_v53, %v246_v51 }
  0x56   : > { %v249_v56 = vrot.slane %v248_v54, 1 }
  0x58   : > { %v250_v57 = vadd.f32 %v249_v56, %v248_v54 }
  0x5a   : > { %v687_v59 = vmul.f32 0.00390625, %v250_v57 }
  0x5c   : > { %388 = vst.msk [vmem:[%s145_s17] sm:$0x1] %vm387_vm1, %v687_v59  ;;  %v253_v60 = vsub.f32 %v524_v0, %v687_v59  ;;  %v254_v62 = vsub.f32 %v527_v1, %v687_v59  ;;  %v255_v63 = vsub.f32 %v530_v2, %v687_v59  ;;  %v256_v5 = vsub.f32 %v533_v3, %v687_v59 }
  0x5d   : > { %v257_v6 = vsub.f32 %v542_v7, %v687_v59  ;;  %v258_v15 = vsub.f32 %v547_v10, %v687_v59  ;;  %v259_v0 = vsub.f32 %v552_v13, %v687_v59  ;;  %v260_v7 = vsub.f32 %v557_v16, %v687_v59 }
  0x5e   : > { %v285_v9 = vmul.f32 %v253_v60, %v253_v60  ;;  %v286_v11 = vmul.f32 %v254_v62, %v254_v62  ;;  %v287_v14 = vmul.f32 %v255_v63, %v255_v63  ;;  %v288_v18 = vmul.f32 %v256_v5, %v256_v5 }
  0x5f   : > { %v289_v1 = vmul.f32 %v257_v6, %v257_v6  ;;  %v290_v24 = vmul.f32 %v258_v15, %v258_v15  ;;  %v261_v10 = vsub.f32 %v562_v19, %v687_v59  ;;  %v291_v32 = vmul.f32 %v259_v0, %v259_v0 }
  0x60   : > { %v317_v20 = vsel %vm181_vm0, %v285_v9, 0.0  ;;  %v318_v2 = vsel %vm181_vm0, %v286_v11, 0.0  ;;  %v320_v3 = vsel %vm181_vm0, %v287_v14, 0.0  ;;  %v322_v27 = vsel %vm181_vm0, %v288_v18, 0.0 }
  0x61   : > { %v319_v23 = vadd.f32 %v318_v2, %v317_v20  ;;  %v324_v13 = vsel %vm181_vm0, %v289_v1, 0.0  ;;  %v262_v36 = vsub.f32 %v567_v22, %v687_v59  ;;  %v292_v38 = vmul.f32 %v260_v7, %v260_v7 }
  0x62   : > { %v326_v41 = vsel %vm181_vm0, %v290_v24, 0.0  ;;  %v263_v16 = vsub.f32 %v572_v25, %v687_v59  ;;  %v293_v44 = vmul.f32 %v261_v10, %v261_v10  ;;  %v328_v45 = vsel %vm181_vm0, %v291_v32, 0.0 }
  0x63   : > { %v321_v29 = vadd.f32 %v320_v3, %v319_v23  ;;  %v264_v19 = vsub.f32 %v577_v28, %v687_v59  ;;  %v294_v48 = vmul.f32 %v262_v36, %v262_v36  ;;  %v330_v50 = vsel %vm181_vm0, %v292_v38, 0.0 }
  0x64   : > { %v265_v22 = vsub.f32 %v582_v31, %v687_v59  ;;  %v295_v53 = vmul.f32 %v263_v16, %v263_v16  ;;  %v332_v54 = vsel %vm181_vm0, %v293_v44, 0.0  ;;  %v266_v25 = vsub.f32 %v587_v34, %v687_v59 }
  0x65   : > { %v323_v33 = vadd.f32 %v322_v27, %v321_v29  ;;  %v296_v57 = vmul.f32 %v264_v19, %v264_v19  ;;  %v334_v60 = vsel %vm181_vm0, %v294_v48, 0.0  ;;  %v267_v28 = vsub.f32 %v592_v37, %v687_v59 }
  0x66   : > { %v297_v63 = vmul.f32 %v265_v22, %v265_v22  ;;  %v336_v5 = vsel %vm181_vm0, %v295_v53, 0.0  ;;  %v268_v31 = vsub.f32 %v597_v40, %v687_v59  ;;  %v298_v9 = vmul.f32 %v266_v25, %v266_v25 }
  0x67   : > { %v325_v42 = vadd.f32 %v324_v13, %v323_v33  ;;  %v338_v11 = vsel %vm181_vm0, %v296_v57, 0.0  ;;  %v269_v34 = vsub.f32 %v602_v43, %v687_v59  ;;  %v299_v15 = vmul.f32 %v267_v28, %v267_v28 }
  0x68   : > { %v340_v18 = vsel %vm181_vm0, %v297_v63, 0.0  ;;  %v270_v37 = vsub.f32 %v607_v46, %v687_v59  ;;  %v300_v1 = vmul.f32 %v268_v31, %v268_v31  ;;  %v342_v20 = vsel %vm181_vm0, %v298_v9, 0.0 }
  0x69   : > { %v327_v47 = vadd.f32 %v326_v41, %v325_v42  ;;  %v271_v40 = vsub.f32 %v612_v49, %v687_v59  ;;  %v301_v3 = vmul.f32 %v269_v34, %v269_v34  ;;  %v344_v23 = vsel %vm181_vm0, %v299_v15, 0.0 }
  0x6a   : > { %v272_v43 = vsub.f32 %v617_v52, %v687_v59  ;;  %v302_v24 = vmul.f32 %v270_v37, %v270_v37  ;;  %v346_v27 = vsel %vm181_vm0, %v300_v1, 0.0  ;;  %v273_v46 = vsub.f32 %v622_v55, %v687_v59 }
  0x6b   : > { %v329_v51 = vadd.f32 %v328_v45, %v327_v47  ;;  %v303_v10 = vmul.f32 %v271_v40, %v271_v40  ;;  %v348_v32 = vsel %vm181_vm0, %v301_v3, 0.0  ;;  %v274_v49 = vsub.f32 %v627_v58, %v687_v59 }
  0x6c   : > { %v304_v33 = vmul.f32 %v272_v43, %v272_v43  ;;  %v350_v36 = vsel %vm181_vm0, %v302_v24, 0.0  ;;  %v275_v52 = vsub.f32 %v632_v61, %v687_v59  ;;  %v305_v41 = vmul.f32 %v273_v46, %v273_v46 }
  0x6d   : > { %v331_v56 = vadd.f32 %v330_v50, %v329_v51  ;;  %v352_v42 = vsel %vm181_vm0, %v303_v10, 0.0  ;;  %v276_v55 = vsub.f32 %v637_v4, %v687_v59  ;;  %v306_v44 = vmul.f32 %v274_v49, %v274_v49 }
  0x6e   : > { %v354_v45 = vsel %vm181_vm0, %v304_v33, 0.0  ;;  %v277_v58 = vsub.f32 %v642_v8, %v687_v59  ;;  %v307_v19 = vmul.f32 %v275_v52, %v275_v52  ;;  %v356_v48 = vsel %vm181_vm0, %v305_v41, 0.0 }
  0x6f   : > { %v333_v62 = vadd.f32 %v332_v54, %v331_v56  ;;  %v278_v61 = vsub.f32 %v647_v12, %v687_v59  ;;  %v308_v51 = vmul.f32 %v276_v55, %v276_v55  ;;  %v358_v22 = vsel %vm181_vm0, %v306_v44, 0.0 }
  0x70   : > { %v279_v4 = vsub.f32 %v652_v17, %v687_v59  ;;  %v309_v54 = vmul.f32 %v277_v58, %v277_v58  ;;  %v360_v56 = vsel %vm181_vm0, %v307_v19, 0.0  ;;  %v280_v8 = vsub.f32 %v657_v21, %v687_v59 }
  0x71   : > { %v335_v6 = vadd.f32 %v334_v60, %v333_v62  ;;  %v310_v57 = vmul.f32 %v278_v61, %v278_v61  ;;  %v362_v60 = vsel %vm181_vm0, %v308_v51, 0.0  ;;  %v281_v12 = vsub.f32 %v662_v26, %v687_v59 }
  0x72   : > { %v311_v28 = vmul.f32 %v279_v4, %v279_v4  ;;  %v364_v63 = vsel %vm181_vm0, %v309_v54, 0.0  ;;  %v282_v17 = vsub.f32 %v667_v30, %v687_v59  ;;  %v283_v21 = vsub.f32 %v672_v35, %v687_v59 }
  0x73   : > { %v337_v14 = vadd.f32 %v336_v5, %v335_v6  ;;  %v312_v6 = vmul.f32 %v280_v8, %v280_v8  ;;  %v366_v31 = vsel %vm181_vm0, %v310_v57, 0.0  ;;  %v284_v26 = vsub.f32 %v677_v39, %v687_v59 }
  0x74   : > { %v314_v15 = vmul.f32 %v282_v17, %v282_v17  ;;  %v315_v37 = vmul.f32 %v283_v21, %v283_v21 }
  0x75   : > { %v339_v0 = vadd.f32 %v338_v11, %v337_v14  ;;  %v313_v11 = vmul.f32 %v281_v12, %v281_v12  ;;  %v368_v14 = vsel %vm181_vm0, %v311_v28, 0.0 }
  0x76   : > { %v376_v40 = vsel %vm181_vm0, %v315_v37, 0.0 }
  0x77   : > { %v341_v2 = vadd.f32 %v340_v18, %v339_v0  ;;  %v370_v18 = vsel %vm181_vm0, %v312_v6, 0.0  ;;  %v372_v30 = vsel %vm181_vm0, %v313_v11, 0.0 }
  0x79   : > { %v343_v7 = vadd.f32 %v342_v20, %v341_v2  ;;  %v316_v20 = vmul.f32 %v284_v26, %v284_v26  ;;  %v374_v2 = vsel %vm181_vm0, %v314_v15, 0.0 }
  0x7b   : > { %v345_v29 = vadd.f32 %v344_v23, %v343_v7  ;;  %v378_v23 = vsel %vm181_vm0, %v316_v20, 0.0 }
  0x7d   : > { %v347_v13 = vadd.f32 %v346_v27, %v345_v29 }
  0x7f   : > { %v349_v38 = vadd.f32 %v348_v32, %v347_v13 }
  0x81   : > { %v351_v16 = vadd.f32 %v350_v36, %v349_v38 }
  0x83   : > { %v353_v47 = vadd.f32 %v352_v42, %v351_v16 }
  0x85   : > { %v355_v50 = vadd.f32 %v354_v45, %v353_v47 }
  0x87   : > { %v357_v53 = vadd.f32 %v356_v48, %v355_v50 }
  0x89   : > { %v359_v25 = vadd.f32 %v358_v22, %v357_v53 }
  0x8b   : > { %v361_v62 = vadd.f32 %v360_v56, %v359_v25 }
  0x8d   : > { %v363_v5 = vadd.f32 %v362_v60, %v361_v62 }
  0x8f   : > { %v365_v9 = vadd.f32 %v364_v63, %v363_v5 }
  0x91   : > { %v367_v34 = vadd.f32 %v366_v31, %v365_v9 }
  0x93   : > { %v369_v0 = vadd.f32 %v368_v14, %v367_v34 }
  0x95   : > { %v371_v1 = vadd.f32 %v370_v18, %v369_v0 }
  0x97   : > { %v373_v35 = vadd.f32 %v372_v30, %v371_v1 }
  0x99   : > { %v375_v3 = vadd.f32 %v374_v2, %v373_v35 }
  0x9b   : > { %v377_v7 = vadd.f32 %v376_v40, %v375_v3 }
  0x9d   : > { %v379_v39 = vadd.f32 %v378_v23, %v377_v7 }
  0x9f   : > { %v380_v59 = vrot.slane %v379_v39, 4 }
  0xa1   : > { %v381_v43 = vadd.f32 %v380_v59, %v379_v39 }
  0xa3   : > { %v382_v24 = vrot.slane %v381_v43, 2 }
  0xa5   : > { %v383_v27 = vadd.f32 %v382_v24, %v381_v43 }
  0xa7   : > { %v384_v29 = vrot.slane %v383_v27, 1 }
  0xa9   : > { %v385_v46 = vadd.f32 %v384_v29, %v383_v27 }
  0xab   : > { %v386_v10 = vmul.f32 0.00390625, %v385_v46 }
  0xad   : > { %v389_v32 = vadd.f32 1e-05, %v386_v10 }
  0xaf   : > { %482 = vrsqrt.f32 %v389_v32 }
  0xbc   : > { %v483_v13 = vpop.eup %482 }
  0xbd   : > { %391 = vst.msk [vmem:[%s148_s20] sm:$0x1] %vm387_vm1, %v483_v13 }
  0xbe PF: > { %s13_s9 = sadd.s32 1, %s490_s9  }
  0xbf   : > { %p10_p4 = scmp.ge.s32.totalorder %s13_s9, 4  }
  0xc1   :  { %12 = sbr.rel (!%p10_p4) target bundleno = 1 (0x1), region = 66 }

// kernel: _lambda_.7
= control target key start
LH: loop header
LB: loop body
LE: loop exit
PB: predicated region body
PF: predicated region fallthrough
CT: control target
= control target key end

     0   :  { %s441_s9 = smov 0   ;;  %s663_s0 = inlined_call_operand.vmem [shape: f32[2,256,128], index: 0, kind: input, shape index: {}]   ;;  %s664_s1 = inlined_call_operand.vmem [shape: f32[2,1,128], index: 1, kind: output, shape index: {0}]   ;;  %s665_s2 = inlined_call_operand.vmem [shape: f32[2,1,128], index: 2, kind: output, shape index: {1}]  }
   0x1 LB: > { %s398_s10 = sadd.s32 4294967295, %s424_s9   ;;  %p402_p0 = scmp.ge.s32.totalorder %s424_s9, 1  ;;  %s424_s9 = sphi %s441_s9, %s13_s9  }
   0x2   : > { %p115_p1 = scmp.lt.s32.totalorder %s424_s9, 3 }
   0x4   : > { %p116_p2 = pnand %p402_p0, %p115_p1 }
   0x5   : > { %p138_p3 = scmp.lt.s32.totalorder (!%p116_p2), %s398_s10, 1 }
   0x6   : > { %119 = sbr.rel (%p116_p2) target bundleno = 189 (0xbd), region = 24 }
   0xb   : > { %s667_s10 = smov (!%p138_p3, %s398_s10), 1 }
   0xc   : > { %s407_s11 = sshll.u32 %s667_s10, 8  ;;  %s145_s17 = scalar_lea.vmem %s664_s1, %s667_s10 }
   0xd   : > { %s455_s14 = scalar_lea.vmem %s663_s0, %s407_s11  ;;  %s148_s20 = scalar_lea.vmem %s665_s2, %s667_s10 }
   0xe   : > { %v458_v0 = vld [vmem:[%s455_s14] sm:$0xff]  ;;  %v461_v1 = vld [vmem:[%s455_s14 + $0x8] sm:$0xff]  ;;  %v464_v2 = vld [vmem:[%s455_s14 + $0x10] sm:$0xff] }
   0xf   : > { %v181_v3 = vadd.f32 %v461_v1, %v458_v0  ;;  %v469_v4 = vld [vmem:[%s455_s14 + $0x18] sm:$0xff]  ;;  %v473_v6 = vld [vmem:[%s455_s14 + $0x20] sm:$0xff]  ;;  %v477_v8 = vld [vmem:[%s455_s14 + $0x28] sm:$0xff] }
  0x10   : > { %v481_v10 = vld [vmem:[%s455_s14 + $0x30] sm:$0xff]  ;;  %v485_v12 = vld [vmem:[%s455_s14 + $0x38] sm:$0xff]  ;;  %v489_v14 = vld [vmem:[%s455_s14 + $0x40] sm:$0xff] }
  0x11   : > { %v182_v5 = vadd.f32 %v181_v3, %v464_v2  ;;  %v493_v16 = vld [vmem:[%s455_s14 + $0x48] sm:$0xff]  ;;  %v497_v18 = vld [vmem:[%s455_s14 + $0x50] sm:$0xff]  ;;  %v501_v20 = vld [vmem:[%s455_s14 + $0x58] sm:$0xff] }
  0x12   : > { %v505_v22 = vld [vmem:[%s455_s14 + $0x60] sm:$0xff]  ;;  %v509_v24 = vld [vmem:[%s455_s14 + $0x68] sm:$0xff]  ;;  %v513_v26 = vld [vmem:[%s455_s14 + $0x70] sm:$0xff] }
  0x13   : > { %v183_v7 = vadd.f32 %v182_v5, %v469_v4  ;;  %v517_v28 = vld [vmem:[%s455_s14 + $0x78] sm:$0xff]  ;;  %v521_v30 = vld [vmem:[%s455_s14 + $0x80] sm:$0xff]  ;;  %v525_v32 = vld [vmem:[%s455_s14 + $0x88] sm:$0xff] }
  0x14   : > { %v529_v34 = vld [vmem:[%s455_s14 + $0x90] sm:$0xff]  ;;  %v533_v36 = vld [vmem:[%s455_s14 + $0x98] sm:$0xff]  ;;  %v537_v38 = vld [vmem:[%s455_s14 + $0xa0] sm:$0xff] }
  0x15   : > { %v184_v9 = vadd.f32 %v183_v7, %v473_v6  ;;  %v541_v40 = vld [vmem:[%s455_s14 + $0xa8] sm:$0xff]  ;;  %v545_v42 = vld [vmem:[%s455_s14 + $0xb0] sm:$0xff]  ;;  %v549_v44 = vld [vmem:[%s455_s14 + $0xb8] sm:$0xff] }
  0x16   : > { %v553_v46 = vld [vmem:[%s455_s14 + $0xc0] sm:$0xff]  ;;  %v557_v48 = vld [vmem:[%s455_s14 + $0xc8] sm:$0xff]  ;;  %v561_v50 = vld [vmem:[%s455_s14 + $0xd0] sm:$0xff] }
  0x17   : > { %v185_v11 = vadd.f32 %v184_v9, %v477_v8  ;;  %v176_v52 = vld [vmem:[%s455_s14 + $0xd8] sm:$0xff]  ;;  %v177_v54 = vld [vmem:[%s455_s14 + $0xe0] sm:$0xff]  ;;  %v178_v56 = vld [vmem:[%s455_s14 + $0xe8] sm:$0xff] }
  0x18   : > { %v179_v58 = vld [vmem:[%s455_s14 + $0xf0] sm:$0xff]  ;;  %v180_v60 = vld [vmem:[%s455_s14 + $0xf8] sm:$0xff] }
  0x19   : > { %v186_v13 = vadd.f32 %v185_v11, %v481_v10 }
  0x1b   : > { %v187_v15 = vadd.f32 %v186_v13, %v485_v12 }
  0x1d   : > { %v188_v17 = vadd.f32 %v187_v15, %v489_v14 }
  0x1f   : > { %v189_v19 = vadd.f32 %v188_v17, %v493_v16 }
  0x21   : > { %v190_v21 = vadd.f32 %v189_v19, %v497_v18 }
  0x23   : > { %v191_v23 = vadd.f32 %v190_v21, %v501_v20 }
  0x25   : > { %v192_v25 = vadd.f32 %v191_v23, %v505_v22 }
  0x27   : > { %v193_v27 = vadd.f32 %v192_v25, %v509_v24 }
  0x29   : > { %v194_v29 = vadd.f32 %v193_v27, %v513_v26 }
  0x2b   : > { %v195_v31 = vadd.f32 %v194_v29, %v517_v28 }
  0x2d   : > { %v196_v33 = vadd.f32 %v195_v31, %v521_v30 }
  0x2f   : > { %v197_v35 = vadd.f32 %v196_v33, %v525_v32 }
  0x31   : > { %v198_v37 = vadd.f32 %v197_v35, %v529_v34 }
  0x33   : > { %v199_v39 = vadd.f32 %v198_v37, %v533_v36 }
  0x35   : > { %v200_v41 = vadd.f32 %v199_v39, %v537_v38 }
  0x37   : > { %v201_v43 = vadd.f32 %v200_v41, %v541_v40 }
  0x39   : > { %v202_v45 = vadd.f32 %v201_v43, %v545_v42 }
  0x3b   : > { %v203_v47 = vadd.f32 %v202_v45, %v549_v44 }
  0x3d   : > { %v204_v49 = vadd.f32 %v203_v47, %v553_v46 }
  0x3f   : > { %v205_v51 = vadd.f32 %v204_v49, %v557_v48 }
  0x41   : > { %v206_v53 = vadd.f32 %v205_v51, %v561_v50 }
  0x43   : > { %v207_v55 = vadd.f32 %v206_v53, %v176_v52 }
  0x45   : > { %v208_v57 = vadd.f32 %v207_v55, %v177_v54 }
  0x47   : > { %v209_v59 = vadd.f32 %v208_v57, %v178_v56 }
  0x49   : > { %v210_v61 = vadd.f32 %v209_v59, %v179_v58 }
  0x4b   : > { %v211_v62 = vadd.f32 %v210_v61, %v180_v60 }
  0x4d   : > { %v212_v63 = vrot.slane %v211_v62, 4 }
  0x4f   : > { %v213_v3 = vadd.f32 %v212_v63, %v211_v62 }
  0x51   : > { %v214_v5 = vrot.slane %v213_v3, 2 }
  0x53   : > { %v215_v7 = vadd.f32 %v214_v5, %v213_v3 }
  0x55   : > { %v216_v9 = vrot.slane %v215_v7, 1 }
  0x57   : > { %v217_v11 = vadd.f32 %v216_v9, %v215_v7 }
  0x59   : > { %v574_v13 = vmul.f32 0.00390625, %v217_v11 }
  0x5b   : > { %322 = vst [vmem:[%s145_s17] sm:$0x1] %v574_v13  ;;  %v578_v15 = vsub.f32 %v176_v52, %v574_v13  ;;  %v581_v17 = vsub.f32 %v177_v54, %v574_v13  ;;  %v584_v19 = vsub.f32 %v178_v56, %v574_v13  ;;  %v587_v21 = vsub.f32 %v179_v58, %v574_v13 }
  0x5c   : > { %v590_v23 = vsub.f32 %v180_v60, %v574_v13  ;;  %v220_v25 = vsub.f32 %v458_v0, %v574_v13  ;;  %v221_v27 = vsub.f32 %v461_v1, %v574_v13  ;;  %v222_v29 = vsub.f32 %v464_v2, %v574_v13 }
  0x5d   : > { %v223_v31 = vsub.f32 %v469_v4, %v574_v13  ;;  %v224_v37 = vsub.f32 %v473_v6, %v574_v13  ;;  %v225_v41 = vsub.f32 %v477_v8, %v574_v13  ;;  %v226_v1 = vsub.f32 %v481_v10, %v574_v13 }
  0x5e   : > { %v252_v33 = vmul.f32 %v220_v25, %v220_v25  ;;  %v253_v35 = vmul.f32 %v221_v27, %v221_v27  ;;  %v254_v39 = vmul.f32 %v222_v29, %v222_v29  ;;  %v227_v2 = vsub.f32 %v485_v12, %v574_v13 }
  0x5f   : > { %v255_v43 = vmul.f32 %v223_v31, %v223_v31  ;;  %v256_v45 = vmul.f32 %v224_v37, %v224_v37  ;;  %v257_v4 = vmul.f32 %v225_v41, %v225_v41  ;;  %v228_v51 = vsub.f32 %v489_v14, %v574_v13 }
  0x60   : > { %v284_v0 = vadd.f32 %v253_v35, %v252_v33  ;;  %v258_v6 = vmul.f32 %v226_v1, %v226_v1  ;;  %v229_v8 = vsub.f32 %v493_v16, %v574_v13  ;;  %v259_v53 = vmul.f32 %v227_v2, %v227_v2 }
  0x61   : > { %v230_v10 = vsub.f32 %v497_v18, %v574_v13  ;;  %v260_v55 = vmul.f32 %v228_v51, %v228_v51  ;;  %v231_v12 = vsub.f32 %v501_v20, %v574_v13  ;;  %v232_v14 = vsub.f32 %v505_v22, %v574_v13 }
  0x62   : > { %v285_v47 = vadd.f32 %v284_v0, %v254_v39  ;;  %v261_v57 = vmul.f32 %v229_v8, %v229_v8  ;;  %v233_v16 = vsub.f32 %v509_v24, %v574_v13  ;;  %v234_v18 = vsub.f32 %v513_v26, %v574_v13 }
  0x63   : > { %v262_v59 = vmul.f32 %v230_v10, %v230_v10  ;;  %v263_v61 = vmul.f32 %v231_v12, %v231_v12  ;;  %v264_v63 = vmul.f32 %v232_v14, %v232_v14  ;;  %v235_v20 = vsub.f32 %v517_v28, %v574_v13 }
  0x64   : > { %v286_v49 = vadd.f32 %v285_v47, %v255_v43  ;;  %v265_v5 = vmul.f32 %v233_v16, %v233_v16  ;;  %v236_v22 = vsub.f32 %v521_v30, %v574_v13  ;;  %v266_v9 = vmul.f32 %v234_v18, %v234_v18 }
  0x65   : > { %v237_v24 = vsub.f32 %v525_v32, %v574_v13  ;;  %v267_v25 = vmul.f32 %v235_v20, %v235_v20  ;;  %v238_v26 = vsub.f32 %v529_v34, %v574_v13  ;;  %v239_v28 = vsub.f32 %v533_v36, %v574_v13 }
  0x66   : > { %v287_v52 = vadd.f32 %v286_v49, %v256_v45  ;;  %v268_v29 = vmul.f32 %v236_v22, %v236_v22  ;;  %v240_v30 = vsub.f32 %v537_v38, %v574_v13  ;;  %v241_v32 = vsub.f32 %v541_v40, %v574_v13 }
  0x67   : > { %v269_v33 = vmul.f32 %v237_v24, %v237_v24  ;;  %v270_v37 = vmul.f32 %v238_v26, %v238_v26  ;;  %v271_v41 = vmul.f32 %v239_v28, %v239_v28  ;;  %v242_v34 = vsub.f32 %v545_v42, %v574_v13 }
  0x68   : > { %v288_v54 = vadd.f32 %v287_v52, %v257_v4  ;;  %v272_v0 = vmul.f32 %v240_v30, %v240_v30  ;;  %v243_v36 = vsub.f32 %v549_v44, %v574_v13  ;;  %v273_v45 = vmul.f32 %v241_v32, %v241_v32 }
  0x69   : > { %v244_v38 = vsub.f32 %v553_v46, %v574_v13  ;;  %v274_v2 = vmul.f32 %v242_v34, %v242_v34  ;;  %v245_v40 = vsub.f32 %v557_v48, %v574_v13  ;;  %v246_v42 = vsub.f32 %v561_v50, %v574_v13 }
  0x6a   : > { %v289_v56 = vadd.f32 %v288_v54, %v258_v6  ;;  %v275_v49 = vmul.f32 %v243_v36, %v243_v36  ;;  %v279_v10 = vmul.f32 %v578_v15, %v578_v15  ;;  %v281_v48 = vmul.f32 %v584_v19, %v584_v19 }
  0x6b   : > { %v276_v6 = vmul.f32 %v244_v38, %v244_v38  ;;  %v277_v8 = vmul.f32 %v245_v40, %v245_v40  ;;  %v278_v44 = vmul.f32 %v246_v42, %v246_v42  ;;  %v282_v50 = vmul.f32 %v587_v21, %v587_v21 }
  0x6c   : > { %v290_v58 = vadd.f32 %v289_v56, %v259_v53 }
  0x6e   : > { %v291_v60 = vadd.f32 %v290_v58, %v260_v55  ;;  %v280_v55 = vmul.f32 %v581_v17, %v581_v17 }
  0x70   : > { %v292_v62 = vadd.f32 %v291_v60, %v261_v57  ;;  %v283_v57 = vmul.f32 %v590_v23, %v590_v23 }
  0x72   : > { %v293_v3 = vadd.f32 %v292_v62, %v262_v59 }
  0x74   : > { %v294_v7 = vadd.f32 %v293_v3, %v263_v61 }
  0x76   : > { %v295_v11 = vadd.f32 %v294_v7, %v264_v63 }
  0x78   : > { %v296_v27 = vadd.f32 %v295_v11, %v265_v5 }
  0x7a   : > { %v297_v31 = vadd.f32 %v296_v27, %v266_v9 }
  0x7c   : > { %v298_v35 = vadd.f32 %v297_v31, %v267_v25 }
  0x7e   : > { %v299_v39 = vadd.f32 %v298_v35, %v268_v29 }
  0x80   : > { %v300_v43 = vadd.f32 %v299_v39, %v269_v33 }
  0x82   : > { %v301_v1 = vadd.f32 %v300_v43, %v270_v37 }
  0x84   : > { %v302_v47 = vadd.f32 %v301_v1, %v271_v41 }
  0x86   : > { %v303_v4 = vadd.f32 %v302_v47, %v272_v0 }
  0x88   : > { %v304_v51 = vadd.f32 %v303_v4, %v273_v45 }
  0x8a   : > { %v305_v52 = vadd.f32 %v304_v51, %v274_v2 }
  0x8c   : > { %v306_v53 = vadd.f32 %v305_v52, %v275_v49 }
  0x8e   : > { %v307_v54 = vadd.f32 %v306_v53, %v276_v6 }
  0x90   : > { %v308_v46 = vadd.f32 %v307_v54, %v277_v8 }
  0x92   : > { %v309_v56 = vadd.f32 %v308_v46, %v278_v44 }
  0x94   : > { %v310_v12 = vadd.f32 %v309_v56, %v279_v10 }
  0x96   : > { %v311_v13 = vadd.f32 %v310_v12, %v280_v55 }
  0x98   : > { %v312_v58 = vadd.f32 %v311_v13, %v281_v48 }
  0x9a   : > { %v313_v14 = vadd.f32 %v312_v58, %v282_v50 }
  0x9c   : > { %v314_v15 = vadd.f32 %v313_v14, %v283_v57 }
  0x9e   : > { %v315_v59 = vrot.slane %v314_v15, 4 }
  0xa0   : > { %v316_v60 = vadd.f32 %v315_v59, %v314_v15 }
  0xa2   : > { %v317_v16 = vrot.slane %v316_v60, 2 }
  0xa4   : > { %v318_v17 = vadd.f32 %v317_v16, %v316_v60 }
  0xa6   : > { %v319_v61 = vrot.slane %v318_v17, 1 }
  0xa8   : > { %v320_v62 = vadd.f32 %v319_v61, %v318_v17 }
  0xaa   : > { %v321_v18 = vmul.f32 0.00390625, %v320_v62 }
  0xac   : > { %v323_v19 = vadd.f32 1e-05, %v321_v18 }
  0xae   : > { %416 = vrsqrt.f32 %v323_v19 }
  0xbb   : > { %v417_v21 = vpop.eup %416 }
  0xbc   : > { %325 = vst [vmem:[%s148_s20] sm:$0x1] %v417_v21 }
  0xbd PF: > { %s13_s9 = sadd.s32 1, %s424_s9  }
  0xbe   : > { %p10_p4 = scmp.ge.s32.totalorder %s13_s9, 4  }
  0xc0   :  { %12 = sbr.rel (!%p10_p4) target bundleno = 1 (0x1), region = 66 }

// kernel: _lambda_.8
= control target key start
LH: loop header
LB: loop body
LE: loop exit
PB: predicated region body
PF: predicated region fallthrough
CT: control target
= control target key end

     0   :  { %s1149_s21 = smov 0   ;;  %s1346_s0 = inlined_call_operand.vmem [shape: f32[2,64,16], index: 0, kind: input, shape index: {}]   ;;  %s1347_s1 = inlined_call_operand.vmem [shape: f32[2,1,16], index: 1, kind: input, shape index: {}]   ;;  %s1348_s2 = inlined_call_operand.vmem [shape: f32[2,1,16], index: 2, kind: input, shape index: {}]   ;;  %s1349_s3 = inlined_call_operand.vmem [shape: bf16[4,16,128], index: 3, kind: input, shape index: {}]   ;;  %s1350_s4 = inlined_call_operand.vmem [shape: f32[1,128], index: 4, kind: input, shape index: {}]   ;;  %s1351_s5 = inlined_call_operand.vmem [shape: f32[4,64,1], index: 5, kind: input, shape index: {}]   ;;  %s1352_s6 = inlined_call_operand.vmem [shape: f32[2,64,128], index: 6, kind: output, shape index: {}]  }
   0x1 LB: > { %s978_s22 = sadd.s32 4294967295, %s1110_s21   ;;  %p982_p0 = scmp.ge.s32.totalorder %s1110_s21, 1  ;;  %s1110_s21 = sphi %s1149_s21, %s16_s21  }
   0x2   : > { %p228_p1 = scmp.lt.s32.totalorder %s1110_s21, 3 }
   0x4   : > { %p229_p2 = pnand %p982_p0, %p228_p1 }
   0x5   : > { %p264_p3 = scmp.lt.s32.totalorder (!%p229_p2), %s978_s22, 1 }
   0x6   : > { %232 = sbr.rel (%p229_p2) target bundleno = 378 (0x17a), region = 44 }
   0xb   : > { %v348_v0 = vld [vmem:[%s1351_s5 + $0x10] sm:$0xff]  ;;  %v346_v1 = vld [vmem:[%s1351_s5] sm:$0xff]  ;;  %vm319_vm0 = vcmask 130048   ;;  %v1112_v2 = vmov 0   ;;  %s1354_s22 = smov (!%p264_p3, %s978_s22), 1  ;;  %v1113_v3 = vmov 0.0  }
   0xc   : > { %1099 = vset.pattern.permute.xlu1 %v1112_v2  ;;  %1098 = vset.pattern.permute.xlu0 %v1112_v2  ;;  %322 = vst.msk [vmem:[#allocation2 + $0x10] sm:$0xff] %vm319_vm0, %v1113_v3  ;;  %323 = vst.msk [vmem:[#allocation2 + $0x18] sm:$0xff] %vm319_vm0, %v1113_v3  ;;  %v349_v4 = vld [vmem:[%s1351_s5 + $0x18] sm:$0xff]  ;;  %v347_v5 = vld [vmem:[%s1351_s5 + $0x8] sm:$0xff]  ;;  %s1026_s7 = sshll.u32 %s1354_s22, 6  ;;  %s271_s10 = scalar_lea.vmem %s1347_s1, %s1354_s22 }
   0xd   : > { %366 = vperm.xlu1 %1099, %v348_v0   ;;  %356 = vperm.xlu0 %1098, %v346_v1   ;;  %320 = vst.msk [vmem:[#allocation2] sm:$0xff] %vm319_vm0, %v1113_v3  ;;  %321 = vst.msk [vmem:[#allocation2 + $0x8] sm:$0xff] %vm319_vm0, %v1113_v3  ;;  %v351_v6 = vld [vmem:[%s1351_s5 + $0x28] sm:$0xff]  ;;  %v350_v7 = vld [vmem:[%s1351_s5 + $0x20] sm:$0xff]  ;;  %s1197_s17 = scalar_lea.vmem %s1346_s0, %s1026_s7  ;;  %s274_s20 = scalar_lea.vmem %s1348_s2, %s1354_s22 }
   0xe   : > { %324 = vst.msk [vmem:[#allocation2 + $0x20] sm:$0xff] %vm319_vm0, %v1113_v3  ;;  %325 = vst.msk [vmem:[#allocation2 + $0x28] sm:$0xff] %vm319_vm0, %v1113_v3  ;;  %v1100_v8 = vld [vmem:[%s1349_s3 + $0x8] sm:$0xff]   ;;  %v281_v9 = vld [vmem:[%s1197_s17] sm:$0xff]  ;;  %s1326_s11 = scalar_lea.vmem %s1352_s6, %s1026_s7 }
   0xf   : > { %326 = vst.msk [vmem:[#allocation2 + $0x30] sm:$0xff] %vm319_vm0, %v1113_v3  ;;  %327 = vst.msk [vmem:[#allocation2 + $0x38] sm:$0xff] %vm319_vm0, %v1113_v3  ;;  %v282_v10 = vld [vmem:[%s1197_s17 + $0x8] sm:$0xff]  ;;  %v987_v11 = vld [vmem:[%s271_s10] ss:$0 sm:$0xff]  ;;  %1048 = vmatprep.subr.bf16.mxu0 %v1100_v8 }
  0x10   : > { %328 = vst.msk [vmem:[#allocation2 + $0x40] sm:$0xff] %vm319_vm0, %v1113_v3  ;;  %329 = vst.msk [vmem:[#allocation2 + $0x48] sm:$0xff] %vm319_vm0, %v1113_v3  ;;  %v988_v12 = vld [vmem:[%s274_s20] ss:$0 sm:$0xff]  ;;  %v283_v13 = vld [vmem:[%s1197_s17 + $0x10] sm:$0xff]  ;;  %v296_v14 = vsub.f32 %v281_v9, %v987_v11  ;;  %v297_v15 = vsub.f32 %v282_v10, %v987_v11  ;;  %1049 = vmatpush3.bf16.msra.mxu0 %v1100_v8 }
  0x11   : > { %371 = vperm.xlu1 %1099, %v349_v4   ;;  %361 = vperm.xlu0 %1098, %v347_v5   ;;  %v298_v16 = vsub.f32 %v283_v13, %v987_v11  ;;  %v1101_v17 = vld [vmem:[%s1349_s3] sm:$0xff]   ;;  %v353_v18 = vld [vmem:[%s1351_s5 + $0x38] sm:$0xff]  ;;  %v352_v19 = vld [vmem:[%s1351_s5 + $0x30] sm:$0xff] }
  0x12   : > { %v311_v20 = vmul.f32 %v988_v12, %v296_v14  ;;  %v312_v21 = vmul.f32 %v988_v12, %v297_v15  ;;  %v1102_v23 = vld [vmem:[%s1349_s3 + $0x10] sm:$0xff]   ;;  %v284_v24 = vld [vmem:[%s1197_s17 + $0x18] sm:$0xff]  ;;  %1058 = vmatprep.subr.bf16.mxu1 %v1101_v17  ;;  %v285_v25 = vld [vmem:[%s1197_s17 + $0x20] sm:$0xff] }
  0x13   : > { %v313_v22 = vmul.f32 %v988_v12, %v298_v16  ;;  %v299_v26 = vsub.f32 %v284_v24, %v987_v11  ;;  %1059 = vmatpush3.bf16.msra.mxu1 %v1101_v17  ;;  %1068 = vmatprep.subr.bf16.mxu0 %v1102_v23  ;;  %v300_v27 = vsub.f32 %v285_v25, %v987_v11  ;;  %v1229_v28 = vld [vmem:[%s1349_s3 + $0x18] sm:$0xff]   ;;  %v286_v29 = vld [vmem:[%s1197_s17 + $0x28] sm:$0xff]  ;;  %v287_v30 = vld [vmem:[%s1197_s17 + $0x30] sm:$0xff] }
  0x14   : > { %330 = vst.msk [vmem:[#allocation2 + $0x10] sm:$0xff] %vm319_vm0, %v311_v20  ;;  %331 = vst.msk [vmem:[#allocation2 + $0x18] sm:$0xff] %vm319_vm0, %v312_v21  ;;  %v301_v32 = vsub.f32 %v286_v29, %v987_v11  ;;  %v302_v33 = vsub.f32 %v287_v30, %v987_v11  ;;  %v288_v34 = vld [vmem:[%s1197_s17 + $0x38] sm:$0xff]  ;;  %v1002_v37 = vld [vmem:[%s1351_s5 + $0x88] sm:$0xff]  ;;  %1078 = vmatprep.subr.bf16.mxu1 %v1229_v28 }
  0x15   : > { %381 = vperm.xlu1 %1099, %v351_v6   ;;  %376 = vperm.xlu0 %1098, %v350_v7   ;;  %332 = vst.msk [vmem:[#allocation2 + $0x20] sm:$0xff] %vm319_vm0, %v313_v22  ;;  %v314_v31 = vmul.f32 %v988_v12, %v299_v26  ;;  %v315_v35 = vmul.f32 %v988_v12, %v300_v27  ;;  %v1001_v38 = vld [vmem:[%s1351_s5 + $0x80] sm:$0xff]  ;;  %v408_v42 = vld [vmem:[#allocation2 + $0x8] sm:$0xff]  ;;  %v1004_v43 = vld [vmem:[%s1351_s5 + $0x98] sm:$0xff] }
  0x16   : > { %v303_v36 = vsub.f32 %v288_v34, %v987_v11  ;;  %v316_v39 = vmul.f32 %v988_v12, %v301_v32  ;;  %v317_v40 = vmul.f32 %v988_v12, %v302_v33  ;;  %v1003_v44 = vld [vmem:[%s1351_s5 + $0x90] sm:$0xff]  ;;  %v1006_v52 = vld [vmem:[%s1351_s5 + $0xa8] sm:$0xff]  ;;  %v1005_v53 = vld [vmem:[%s1351_s5 + $0xa0] sm:$0xff] }
  0x17   : > { %333 = vst.msk [vmem:[#allocation2 + $0x28] sm:$0xff] %vm319_vm0, %v314_v31  ;;  %334 = vst.msk [vmem:[#allocation2 + $0x30] sm:$0xff] %vm319_vm0, %v315_v35  ;;  %v1008_v59 = vld [vmem:[%s1351_s5 + $0xb8] sm:$0xff]  ;;  %v1007_v60 = vld [vmem:[%s1351_s5 + $0xb0] sm:$0xff] }
  0x18   : > { %v318_v41 = vmul.f32 %v988_v12, %v303_v36  ;;  %335 = vst.msk [vmem:[#allocation2 + $0x38] sm:$0xff] %vm319_vm0, %v316_v39  ;;  %336 = vst.msk [vmem:[#allocation2 + $0x40] sm:$0xff] %vm319_vm0, %v317_v40  ;;  %v338_v1 = vld [vmem:[#allocation2 + $0x7] sm:$0xff] }
  0x19   : > { %391 = vperm.xlu1 %1099, %v353_v18   ;;  %386 = vperm.xlu0 %1098, %v352_v19  }
  0x1a   : > { %337 = vst.msk [vmem:[#allocation2 + $0x48] sm:$0xff] %vm319_vm0, %v318_v41 }
  0x1b   : > { %v1252_v45 = vld [vmem:[#allocation2 + $0x10] sm:$0xff]  ;;  %v1254_v46 = vld [vmem:[#allocation2 + $0x18] sm:$0xff] }
  0x1c   : > { %v416_v47 = vpack.c.bf16 %v1252_v45, %v408_v42  ;;  %v1257_v48 = vld [vmem:[#allocation2 + $0x20] sm:$0xff]  ;;  %v760_v49 = vpack.c.bf16 %v1254_v46, %v1252_v45  ;;  %v340_v2 = vld [vmem:[#allocation2 + $0x17] sm:$0xff]  ;;  %v339_v4 = vld [vmem:[#allocation2 + $0xf] sm:$0xff] }
  0x1d   : > { %613 = vperm.xlu1 %1099, %v1002_v37   ;;  %608 = vperm.xlu0 %1098, %v1001_v38   ;;  %v417_v50 = vpack.c.bf16 %v1257_v48, %v1254_v46  ;;  %v341_v3 = vld [vmem:[#allocation2 + $0x1f] sm:$0xff] }
  0x1e   : > { %v1263_v51 = vld [vmem:[#allocation2 + $0x28] sm:$0xff]  ;;  %1050 = vmatprep.mubr.msk.bf16.mxu0 %vm319_vm0, %v416_v47  ;;  %v1272_v54 = vld [vmem:[#allocation2 + $0x30] sm:$0xff] }
  0x1f   : > { %v761_v55 = vpack.c.bf16 %v1263_v51, %v1257_v48  ;;  %1051 = vmatmul.mubr.msk.bf16.vlgmr.msra.gmra.mxu0 %vm319_vm0, %v417_v50  ;;  %v418_v56 = vpack.c.bf16 %v1272_v54, %v1263_v51  ;;  %v1279_v57 = vld [vmem:[#allocation2 + $0x38] sm:$0xff]  ;;  %v1281_v58 = vld [vmem:[#allocation2 + $0x40] sm:$0xff]  ;;  %v343_v11 = vld [vmem:[#allocation2 + $0x2f] sm:$0xff] }
  0x20   : > { %1069 = vmatpush3.bf16.msra.mxu0 %v1102_v23  ;;  %v419_v61 = vpack.c.bf16 %v1281_v58, %v1279_v57  ;;  %v762_v62 = vpack.c.bf16 %v1279_v57, %v1272_v54  ;;  %v342_v12 = vld [vmem:[#allocation2 + $0x27] sm:$0xff]  ;;  %v345_v19 = vld [vmem:[#allocation2 + $0x3f] sm:$0xff]  ;;  %v344_v20 = vld [vmem:[#allocation2 + $0x37] sm:$0xff] }
  0x21   : > { %623 = vperm.xlu1 %1099, %v1004_v43   ;;  %618 = vperm.xlu0 %1098, %v1003_v44   ;;  %v596_v41 = vld [vmem:[#allocation2 + $0x47] sm:$0xff] }
  0x22   : > { %1054 = vmatprep.mubr.msk.bf16.mxu0 %vm319_vm0, %v418_v56  ;;  %v759_v43 = vld [vmem:[#allocation2 + $0x48] sm:$0xff] }
  0x25   : > { %633 = vperm.xlu1 %1099, %v1006_v52   ;;  %628 = vperm.xlu0 %1098, %v1005_v53  }
  0x27   : > { %1055 = vmatmul.mubr.msk.bf16.gmra.mxu0 %vm319_vm0, %v419_v61 }
  0x29   : > { %643 = vperm.xlu1 %1099, %v1008_v59   ;;  %638 = vperm.xlu0 %1098, %v1007_v60  }
  0x88   : > { %v367_v63 = vpop.permute.xlu1 %366  ;;  %v357_v0 = vpop.permute.xlu0 %356 }
  0x89   : > { %v396_v7 = vmul.f32 %v367_v63, %v340_v2  ;;  %v394_v8 = vmul.f32 %v357_v0, %v338_v1 }
  0x8c   : > { %v372_v5 = vpop.permute.xlu1 %371  ;;  %v362_v6 = vpop.permute.xlu0 %361 }
  0x8d   : > { %v397_v9 = vmul.f32 %v372_v5, %v341_v3  ;;  %v395_v10 = vmul.f32 %v362_v6, %v339_v4 }
  0x8f   : > { %v403_v13 = vpack.c.bf16 %v397_v9, %v396_v7  ;;  %v402_v14 = vpack.c.bf16 %v395_v10, %v394_v8  ;;  %v1318_v7 = vld [vmem:[%s1350_s4] ss:$0 sm:$0xff] }
  0x90   : > { %v382_v15 = vpop.permute.xlu1 %381  ;;  %v377_v16 = vpop.permute.xlu0 %376 }
  0x91   : > { %v399_v17 = vmul.f32 %v382_v15, %v343_v11  ;;  %v398_v18 = vmul.f32 %v377_v16, %v342_v12  ;;  %1060 = vmatprep.mubr.msk.bf16.mxu1 %vm319_vm0, %v402_v14 }
  0x92   : > { %1061 = vmatmul.mubr.msk.bf16.vlgmr.msra.gmra.mxu1 %vm319_vm0, %v403_v13 }
  0x93   : > { %v404_v21 = vpack.c.bf16 %v399_v17, %v398_v18  ;;  %1079 = vmatpush3.bf16.msra.mxu1 %v1229_v28 }
  0x94   : > { %v392_v22 = vpop.permute.xlu1 %391  ;;  %v387_v23 = vpop.permute.xlu0 %386 }
  0x95   : > { %v401_v24 = vmul.f32 %v392_v22, %v345_v19  ;;  %v400_v25 = vmul.f32 %v387_v23, %v344_v20  ;;  %1064 = vmatprep.mubr.msk.bf16.mxu1 %vm319_vm0, %v404_v21 }
  0x97   : > { %v405_v26 = vpack.c.bf16 %v401_v24, %v400_v25 }
  0x98   : > { %v614_v27 = vpop.permute.xlu1 %613  ;;  %v609_v29 = vpop.permute.xlu0 %608 }
  0x99   : > { %v647_v30 = vmul.f32 %v614_v27, %v340_v2  ;;  %v646_v31 = vmul.f32 %v609_v29, %v339_v4 }
  0x9a   : > { %1065 = vmatmul.mubr.msk.bf16.gmra.mxu1 %vm319_vm0, %v405_v26 }
  0x9b   : > { %v654_v32 = vpack.c.bf16 %v647_v30, %v646_v31  ;;  %1080 = vmatprep.mubr.msk.bf16.mxu1 %vm319_vm0, %v760_v49  ;;  %v763_v49 = vpack.c.bf16 %v759_v43, %v1281_v58 }
  0x9c   : > { %v624_v28 = vpop.permute.xlu1 %623  ;;  %v619_v33 = vpop.permute.xlu0 %618 }
  0x9d   : > { %v649_v34 = vmul.f32 %v624_v28, %v342_v12  ;;  %v648_v35 = vmul.f32 %v619_v33, %v341_v3  ;;  %1070 = vmatprep.mubr.msk.bf16.mxu0 %vm319_vm0, %v654_v32 }
  0x9f   : > { %v655_v36 = vpack.c.bf16 %v649_v34, %v648_v35 }
  0xa0   : > { %v634_v37 = vpop.permute.xlu1 %633  ;;  %v629_v38 = vpop.permute.xlu0 %628 }
  0xa1   : > { %v651_v39 = vmul.f32 %v634_v37, %v344_v20  ;;  %v650_v40 = vmul.f32 %v629_v38, %v343_v11  ;;  %1071 = vmatmul.mubr.msk.bf16.vlgmr.msra.gmra.mxu0 %vm319_vm0, %v655_v36 }
  0xa2   : > { %1081 = vmatmul.mubr.msk.bf16.vlgmr.msra.gmra.mxu1 %vm319_vm0, %v761_v55 }
  0xa3   : > { %v656_v42 = vpack.c.bf16 %v651_v39, %v650_v40  ;;  %1084 = vmatprep.mubr.msk.bf16.mxu1 %vm319_vm0, %v762_v62 }
  0xa4   : > { %v644_v44 = vpop.permute.xlu1 %643  ;;  %v639_v45 = vpop.permute.xlu0 %638 }
  0xa5   : > { %v653_v46 = vmul.f32 %v644_v44, %v596_v41  ;;  %v652_v47 = vmul.f32 %v639_v45, %v345_v19  ;;  %1074 = vmatprep.mubr.msk.bf16.mxu0 %vm319_vm0, %v656_v42 }
  0xa7   : > { %v657_v50 = vpack.c.bf16 %v653_v46, %v652_v47 }
  0xa9   : > { %1075 = vmatmul.mubr.msk.bf16.gmra.mxu0 %vm319_vm0, %v657_v50 }
  0xaa   : > { %1085 = vmatmul.mubr.msk.bf16.gmra.mxu1 %vm319_vm0, %v763_v49 }
  0xdf   : > { %v1052_v48 = vpop.f32.mrf.mxu0 }
  0xe1   : > { %v475_v51 = vpop.f32.mrf.mxu0 }
  0xe3   : > { %v1053_v52 = vpop.f32.mrf.mxu0 }
  0xe5   : > { %v478_v53 = vpop.f32.mrf.mxu0 }
  0xe7   : > { %v1056_v55 = vpop.f32.mrf.mxu0 }
  0xe9   : > { %v491_v59 = vpop.f32.mrf.mxu0 }
  0xeb   : > { %v1057_v62 = vpop.f32.mrf.mxu0 }
  0xed   : > { %v494_v58 = vpop.f32.mrf.mxu0 }
 0x152   : > { %v1062_v54 = vpop.f32.mrf.mxu1 }
 0x153   : > { %v567_v1 = vadd.f32 %v1062_v54, %v1052_v48 }
 0x154   : > { %v558_v56 = vpop.f32.mrf.mxu1 }
 0x155   : > { %v559_v4 = vadd.f32 %v558_v56, %v475_v51 }
 0x156   : > { %v1063_v57 = vpop.f32.mrf.mxu1 }
 0x157   : > { %v570_v9 = vadd.f32 %v1063_v57, %v1053_v52 }
 0x158   : > { %v561_v60 = vpop.f32.mrf.mxu1 }
 0x159   : > { %v562_v18 = vadd.f32 %v561_v60, %v478_v53 }
 0x15a   : > { %v1066_v61 = vpop.f32.mrf.mxu1 }
 0x15b   : > { %v583_v24 = vadd.f32 %v1066_v61, %v1056_v55 }
 0x15c   : > { %v574_v63 = vpop.f32.mrf.mxu1 }
 0x15d   : > { %v575_v25 = vadd.f32 %v574_v63, %v491_v59 }
 0x15e   : > { %v1067_v0 = vpop.f32.mrf.mxu1 }
 0x15f   : > { %v586_v28 = vadd.f32 %v1067_v0, %v1057_v62 }
 0x160   : > { %v577_v2 = vpop.f32.mrf.mxu1 }
 0x161   : > { %v1072_v3 = vpop.f32.mrf.mxu0  ;;  %v578_v43 = vadd.f32 %v577_v2, %v494_v58 }
 0x162   : > { %v746_v5 = vadd.f32 %v1072_v3, %v567_v1  ;;  %v1082_v6 = vpop.f32.mrf.mxu1 }
 0x163   : > { %v713_v8 = vpop.f32.mrf.mxu0 }
 0x164   : > { %v852_v10 = vadd.f32 %v1082_v6, %v746_v5  ;;  %v744_v11 = vadd.f32 %v713_v8, %v559_v4  ;;  %v819_v12 = vpop.f32.mrf.mxu1 }
 0x165   : > { %v1073_v13 = vpop.f32.mrf.mxu0 }
 0x166   : > { %v867_v14 = vadd.f32 %v1318_v7, %v852_v10  ;;  %v850_v15 = vadd.f32 %v819_v12, %v744_v11  ;;  %v747_v16 = vadd.f32 %v1073_v13, %v570_v9  ;;  %v1083_v17 = vpop.f32.mrf.mxu1 }
 0x167   : > { %v716_v19 = vpop.f32.mrf.mxu0 }
 0x168   : > { %vm875_vm1 = vcmp.ge.f32.partialorder %v867_v14, 0.0  ;;  %v883_v20 = vmul.f32 0.2, %v867_v14  ;;  %v865_v21 = vadd.f32 %v1318_v7, %v850_v15  ;;  %v853_v22 = vadd.f32 %v1083_v17, %v747_v16  ;;  %v822_v23 = vpop.f32.mrf.mxu1 }
 0x169   : > { %v745_v26 = vadd.f32 %v716_v19, %v562_v18  ;;  %v1076_v27 = vpop.f32.mrf.mxu0 }
 0x16a   : > { %v891_v29 = vsel %vm875_vm1, %v867_v14, %v883_v20  ;;  %vm873_vm2 = vcmp.ge.f32.partialorder %v865_v21, 0.0  ;;  %v881_v30 = vmul.f32 0.2, %v865_v21  ;;  %v868_v31 = vadd.f32 %v1318_v7, %v853_v22  ;;  %v1086_v32 = vpop.f32.mrf.mxu1 }
 0x16b   : > { %899 = vst [vmem:[%s1326_s11 + $0x10] sm:$0xff] %v891_v29  ;;  %v851_v33 = vadd.f32 %v822_v23, %v745_v26  ;;  %v750_v34 = vadd.f32 %v1076_v27, %v583_v24  ;;  %v729_v35 = vpop.f32.mrf.mxu0 }
 0x16c   : > { %v889_v36 = vsel %vm873_vm2, %v865_v21, %v881_v30  ;;  %vm876_vm3 = vcmp.ge.f32.partialorder %v868_v31, 0.0  ;;  %v884_v37 = vmul.f32 0.2, %v868_v31  ;;  %v748_v38 = vadd.f32 %v729_v35, %v575_v25  ;;  %v835_v39 = vpop.f32.mrf.mxu1 }
 0x16d   : > { %897 = vst [vmem:[%s1326_s11] sm:$0xff] %v889_v36  ;;  %v866_v40 = vadd.f32 %v1318_v7, %v851_v33  ;;  %v856_v41 = vadd.f32 %v1086_v32, %v750_v34  ;;  %v1077_v42 = vpop.f32.mrf.mxu0 }
 0x16e   : > { %v892_v44 = vsel %vm876_vm3, %v868_v31, %v884_v37  ;;  %v854_v45 = vadd.f32 %v835_v39, %v748_v38  ;;  %v751_v46 = vadd.f32 %v1077_v42, %v586_v28  ;;  %v1087_v47 = vpop.f32.mrf.mxu1 }
 0x16f   : > { %900 = vst [vmem:[%s1326_s11 + $0x18] sm:$0xff] %v892_v44  ;;  %vm874_vm4 = vcmp.ge.f32.partialorder %v866_v40, 0.0  ;;  %v882_v49 = vmul.f32 0.2, %v866_v40  ;;  %v871_v50 = vadd.f32 %v1318_v7, %v856_v41  ;;  %v732_v48 = vpop.f32.mrf.mxu0 }
 0x170   : > { %v869_v51 = vadd.f32 %v1318_v7, %v854_v45  ;;  %v857_v52 = vadd.f32 %v1087_v47, %v751_v46  ;;  %v749_v53 = vadd.f32 %v732_v48, %v578_v43  ;;  %v838_v54 = vpop.f32.mrf.mxu1 }
 0x171   : > { %v890_v55 = vsel %vm874_vm4, %v866_v40, %v882_v49  ;;  %vm879_vm5 = vcmp.ge.f32.partialorder %v871_v50, 0.0  ;;  %v887_v56 = vmul.f32 0.2, %v871_v50 }
 0x172   : > { %898 = vst [vmem:[%s1326_s11 + $0x8] sm:$0xff] %v890_v55  ;;  %vm877_vm6 = vcmp.ge.f32.partialorder %v869_v51, 0.0  ;;  %v885_v57 = vmul.f32 0.2, %v869_v51  ;;  %v872_v59 = vadd.f32 %v1318_v7, %v857_v52  ;;  %v855_v60 = vadd.f32 %v838_v54, %v749_v53 }
 0x173   : > { %v895_v61 = vsel %vm879_vm5, %v871_v50, %v887_v56 }
 0x174   : > { %903 = vst [vmem:[%s1326_s11 + $0x30] sm:$0xff] %v895_v61  ;;  %v893_v62 = vsel %vm877_vm6, %v869_v51, %v885_v57  ;;  %vm880_vm7 = vcmp.ge.f32.partialorder %v872_v59, 0.0  ;;  %v888_v63 = vmul.f32 0.2, %v872_v59  ;;  %v870_v0 = vadd.f32 %v1318_v7, %v855_v60 }
 0x175   : > { %901 = vst [vmem:[%s1326_s11 + $0x20] sm:$0xff] %v893_v62 }
 0x176   : > { %v896_v58 = vsel %vm880_vm7, %v872_v59, %v888_v63  ;;  %vm878_vm8 = vcmp.ge.f32.partialorder %v870_v0, 0.0  ;;  %v886_v1 = vmul.f32 0.2, %v870_v0 }
 0x177   : > { %904 = vst [vmem:[%s1326_s11 + $0x38] sm:$0xff] %v896_v58 }
 0x178   : > { %v894_v2 = vsel %vm878_vm8, %v870_v0, %v886_v1 }
 0x179   : > { %902 = vst [vmem:[%s1326_s11 + $0x28] sm:$0xff] %v894_v2 }
 0x17a PF: > { %s16_s21 = sadd.s32 1, %s1110_s21  }
 0x17b   : > { %p13_p4 = scmp.ge.s32.totalorder %s16_s21, 4  }
 0x17d   :  { %15 = sbr.rel (!%p13_p4) target bundleno = 1 (0x1), region = 84 }

// kernel: _lambda_.6
= control target key start
LH: loop header
LB: loop body
LE: loop exit
PB: predicated region body
PF: predicated region fallthrough
CT: control target
= control target key end

     0   :  { %s5489_s21 = smov 0   ;;  %s7393_s0 = inlined_call_operand.vmem [shape: f32[2,256,4], index: 0, kind: input, shape index: {}]   ;;  %s7394_s1 = inlined_call_operand.vmem [shape: f32[2,1,4], index: 1, kind: input, shape index: {}]   ;;  %s7395_s2 = inlined_call_operand.vmem [shape: f32[2,1,4], index: 2, kind: input, shape index: {}]   ;;  %s7396_s3 = inlined_call_operand.vmem [shape: bf16[9,4,128], index: 3, kind: input, shape index: {}]   ;;  %s7397_s4 = inlined_call_operand.vmem [shape: f32[1,128], index: 4, kind: input, shape index: {}]   ;;  %s7398_s5 = inlined_call_operand.vmem [shape: f32[9,256,1], index: 5, kind: input, shape index: {}]   ;;  %s7399_s6 = inlined_call_operand.vmem [shape: f32[2,256,128], index: 6, kind: output, shape index: {}]  }
   0x1 LB: > { %s4633_s22 = sadd.s32 4294967295, %s5450_s21   ;;  %p4637_p0 = scmp.ge.s32.totalorder %s5450_s21, 1  ;;  %s5450_s21 = sphi %s5489_s21, %s16_s21  }
   0x2   : > { %p228_p1 = scmp.lt.s32.totalorder %s5450_s21, 3 }
   0x4   : > { %p229_p2 = pnand %p4637_p0, %p228_p1 }
   0x6   : > { %232 = sbr.rel (%p229_p2) target bundleno = 730 (0x2da), region = 44 }
   0xb   : > { %v496_v0 = vld [vmem:[%s7398_s5 + $0x10] sm:$0xff]  ;;  %v494_v1 = vld [vmem:[%s7398_s5] sm:$0xff]  ;;  %v5452_v2 = vmov 0   ;;  %vm391_vm0 = vcmask 31744   ;;  %v5453_v3 = vmov 0.0   ;;  %v497_v4 = vld [vmem:[%s7398_s5 + $0x18] sm:$0xff] }
   0xc   : > { %5443 = vset.pattern.permute.xlu1 %v5452_v2  ;;  %5442 = vset.pattern.permute.xlu0 %v5452_v2  ;;  %409 = vst.msk [vmem:[#allocation2 + $0x88] sm:$0xff] %vm391_vm0, %v5453_v3  ;;  %410 = vst.msk [vmem:[#allocation2 + $0x90] sm:$0xff] %vm391_vm0, %v5453_v3  ;;  %v495_v5 = vld [vmem:[%s7398_s5 + $0x8] sm:$0xff]  ;;  %p264_p3 = scmp.lt.s32.totalorder %s4633_s22, 1  ;;  %v498_v7 = vld [vmem:[%s7398_s5 + $0x20] sm:$0xff]  ;;  %vm833_vm1 = vcmask 1041408  }
   0xd   : > { %538 = vperm.xlu1 %5443, %v496_v0   ;;  %528 = vperm.xlu0 %5442, %v494_v1   ;;  %392 = vst.msk [vmem:[#allocation2] sm:$0xff] %vm391_vm0, %v5453_v3  ;;  %393 = vst.msk [vmem:[#allocation2 + $0x8] sm:$0xff] %vm391_vm0, %v5453_v3  ;;  %v499_v6 = vld [vmem:[%s7398_s5 + $0x28] sm:$0xff]  ;;  %v501_v8 = vld [vmem:[%s7398_s5 + $0x38] sm:$0xff] }
   0xe   : > { %394 = vst.msk [vmem:[#allocation2 + $0x10] sm:$0xff] %vm391_vm0, %v5453_v3  ;;  %395 = vst.msk [vmem:[#allocation2 + $0x18] sm:$0xff] %vm391_vm0, %v5453_v3  ;;  %s7572_s22 = smov (!%p264_p3, %s4633_s22), 1  ;;  %v500_v9 = vld [vmem:[%s7398_s5 + $0x30] sm:$0xff]  ;;  %v503_v10 = vld [vmem:[%s7398_s5 + $0x48] sm:$0xff] }
   0xf   : > { %396 = vst.msk [vmem:[#allocation2 + $0x20] sm:$0xff] %vm391_vm0, %v5453_v3  ;;  %397 = vst.msk [vmem:[#allocation2 + $0x28] sm:$0xff] %vm391_vm0, %v5453_v3  ;;  %s4959_s15 = sshll.u32 %s7572_s22, 8  ;;  %v502_v11 = vld [vmem:[%s7398_s5 + $0x40] sm:$0xff]  ;;  %s271_s27 = scalar_lea.vmem %s7394_s1, %s7572_s22  ;;  %v505_v13 = vld [vmem:[%s7398_s5 + $0x58] sm:$0xff] }
  0x10   : > { %398 = vst.msk [vmem:[#allocation2 + $0x30] sm:$0xff] %vm391_vm0, %v5453_v3  ;;  %399 = vst.msk [vmem:[#allocation2 + $0x38] sm:$0xff] %vm391_vm0, %v5453_v3  ;;  %s5571_s18 = scalar_lea.vmem %s7393_s0, %s4959_s15  ;;  %s274_s30 = scalar_lea.vmem %s7395_s2, %s7572_s22  ;;  %v4644_v12 = vld [vmem:[%s7396_s3 + $0x2] sm:$0x3]  ;;  %v5598_v17 = vld [vmem:[%s271_s27] ss:$0 sm:$0xff] }
  0x11   : > { %400 = vst.msk [vmem:[#allocation2 + $0x40] sm:$0xff] %vm391_vm0, %v5453_v3  ;;  %401 = vst.msk [vmem:[#allocation2 + $0x48] sm:$0xff] %vm391_vm0, %v5453_v3  ;;  %543 = vperm.xlu1 %5443, %v497_v4   ;;  %533 = vperm.xlu0 %5442, %v495_v5   ;;  %v835_v14 = vsel %vm833_vm1, %v4644_v12, 0  ;;  %v295_v15 = vld [vmem:[%s5571_s18 + $0x70] sm:$0xff]  ;;  %v296_v16 = vld [vmem:[%s5571_s18 + $0x78] sm:$0xff]  ;;  %s7248_s26 = scalar_lea.vmem %s7399_s6, %s4959_s15 }
  0x12   : > { %402 = vst.msk [vmem:[#allocation2 + $0x50] sm:$0xff] %vm391_vm0, %v5453_v3  ;;  %403 = vst.msk [vmem:[#allocation2 + $0x58] sm:$0xff] %vm391_vm0, %v5453_v3  ;;  %5423 = vmatprep.subr.msk.bf16.mxu1 %vm833_vm1, %v4644_v12  ;;  %5422 = vmatprep.subr.msk.bf16.mxu0 %vm833_vm1, %v4644_v12  ;;  %v5600_v18 = vld [vmem:[%s274_s30] ss:$0 sm:$0xff]  ;;  %v504_v19 = vld [vmem:[%s7398_s5 + $0x50] sm:$0xff]  ;;  %v334_v20 = vsub.f32 %v295_v15, %v5598_v17  ;;  %v335_v21 = vsub.f32 %v296_v16, %v5598_v17 }
  0x13   : > { %404 = vst.msk [vmem:[#allocation2 + $0x60] sm:$0xff] %vm391_vm0, %v5453_v3  ;;  %405 = vst.msk [vmem:[#allocation2 + $0x68] sm:$0xff] %vm391_vm0, %v5453_v3  ;;  %5421 = vmatpush3.bf16.msra.mxu1 %v835_v14  ;;  %v297_v22 = vld [vmem:[%s5571_s18 + $0x80] sm:$0xff]  ;;  %v298_v23 = vld [vmem:[%s5571_s18 + $0x88] sm:$0xff]  ;;  %5115 = vmatpush3.bf16.msra.mxu0 %v835_v14 }
  0x14   : > { %406 = vst.msk [vmem:[#allocation2 + $0x70] sm:$0xff] %vm391_vm0, %v5453_v3  ;;  %407 = vst.msk [vmem:[#allocation2 + $0x78] sm:$0xff] %vm391_vm0, %v5453_v3  ;;  %v336_v24 = vsub.f32 %v297_v22, %v5598_v17  ;;  %v337_v25 = vsub.f32 %v298_v23, %v5598_v17  ;;  %v373_v26 = vmul.f32 %v5600_v18, %v334_v20  ;;  %v299_v28 = vld [vmem:[%s5571_s18 + $0x90] sm:$0xff]  ;;  %v300_v29 = vld [vmem:[%s5571_s18 + $0x98] sm:$0xff] }
  0x15   : > { %408 = vst.msk [vmem:[#allocation2 + $0x80] sm:$0xff] %vm391_vm0, %v5453_v3  ;;  %411 = vst.msk [vmem:[#allocation2 + $0x98] sm:$0xff] %vm391_vm0, %v5453_v3  ;;  %553 = vperm.xlu1 %5443, %v499_v6   ;;  %548 = vperm.xlu0 %5442, %v498_v7   ;;  %v374_v27 = vmul.f32 %v5600_v18, %v335_v21  ;;  %v301_v30 = vld [vmem:[%s5571_s18 + $0xa0] sm:$0xff]  ;;  %v338_v33 = vsub.f32 %v299_v28, %v5598_v17  ;;  %v302_v34 = vld [vmem:[%s5571_s18 + $0xa8] sm:$0xff] }
  0x16   : > { %412 = vst.msk [vmem:[#allocation2 + $0xa0] sm:$0xff] %vm391_vm0, %v5453_v3  ;;  %413 = vst.msk [vmem:[#allocation2 + $0xa8] sm:$0xff] %vm391_vm0, %v5453_v3  ;;  %v375_v31 = vmul.f32 %v5600_v18, %v336_v24  ;;  %v376_v32 = vmul.f32 %v5600_v18, %v337_v25  ;;  %v507_v35 = vld [vmem:[%s7398_s5 + $0x68] sm:$0xff]  ;;  %v506_v36 = vld [vmem:[%s7398_s5 + $0x60] sm:$0xff]  ;;  %v339_v37 = vsub.f32 %v300_v29, %v5598_v17 }
  0x17   : > { %414 = vst.msk [vmem:[#allocation2 + $0xb0] sm:$0xff] %vm391_vm0, %v5453_v3  ;;  %415 = vst.msk [vmem:[#allocation2 + $0xb8] sm:$0xff] %vm391_vm0, %v5453_v3  ;;  %v340_v38 = vsub.f32 %v301_v30, %v5598_v17  ;;  %v341_v39 = vsub.f32 %v302_v34, %v5598_v17  ;;  %v303_v40 = vld [vmem:[%s5571_s18 + $0xb0] sm:$0xff]  ;;  %v377_v41 = vmul.f32 %v5600_v18, %v338_v33  ;;  %v304_v42 = vld [vmem:[%s5571_s18 + $0xb8] sm:$0xff] }
  0x18   : > { %416 = vst.msk [vmem:[#allocation2 + $0xc0] sm:$0xff] %vm391_vm0, %v5453_v3  ;;  %417 = vst.msk [vmem:[#allocation2 + $0xc8] sm:$0xff] %vm391_vm0, %v5453_v3  ;;  %v342_v43 = vsub.f32 %v303_v40, %v5598_v17  ;;  %v305_v44 = vld [vmem:[%s5571_s18 + $0xc0] sm:$0xff]  ;;  %v306_v45 = vld [vmem:[%s5571_s18 + $0xc8] sm:$0xff]  ;;  %v378_v46 = vmul.f32 %v5600_v18, %v339_v37  ;;  %v343_v49 = vsub.f32 %v304_v42, %v5598_v17 }
  0x19   : > { %418 = vst.msk [vmem:[#allocation2 + $0xd0] sm:$0xff] %vm391_vm0, %v5453_v3  ;;  %419 = vst.msk [vmem:[#allocation2 + $0xd8] sm:$0xff] %vm391_vm0, %v5453_v3  ;;  %563 = vperm.xlu1 %5443, %v501_v8   ;;  %558 = vperm.xlu0 %5442, %v500_v9   ;;  %v379_v47 = vmul.f32 %v5600_v18, %v340_v38  ;;  %v380_v48 = vmul.f32 %v5600_v18, %v341_v39  ;;  %v281_v50 = vld [vmem:[%s5571_s18] sm:$0xff]  ;;  %v509_v51 = vld [vmem:[%s7398_s5 + $0x78] sm:$0xff] }
  0x1a   : > { %420 = vst.msk [vmem:[#allocation2 + $0xe0] sm:$0xff] %vm391_vm0, %v5453_v3  ;;  %421 = vst.msk [vmem:[#allocation2 + $0xe8] sm:$0xff] %vm391_vm0, %v5453_v3  ;;  %v508_v52 = vld [vmem:[%s7398_s5 + $0x70] sm:$0xff]  ;;  %v381_v53 = vmul.f32 %v5600_v18, %v342_v43  ;;  %v344_v54 = vsub.f32 %v305_v44, %v5598_v17  ;;  %v345_v55 = vsub.f32 %v306_v45, %v5598_v17  ;;  %v308_v59 = vld [vmem:[%s5571_s18 + $0xd8] sm:$0xff] }
  0x1b   : > { %422 = vst.msk [vmem:[#allocation2 + $0xf0] sm:$0xff] %vm391_vm0, %v5453_v3  ;;  %423 = vst.msk [vmem:[#allocation2 + $0xf8] sm:$0xff] %vm391_vm0, %v5453_v3  ;;  %v382_v56 = vmul.f32 %v5600_v18, %v343_v49  ;;  %v320_v57 = vsub.f32 %v281_v50, %v5598_v17  ;;  %v307_v58 = vld [vmem:[%s5571_s18 + $0xd0] sm:$0xff]  ;;  %v309_v60 = vld [vmem:[%s5571_s18 + $0xe0] sm:$0xff]  ;;  %v347_v0 = vsub.f32 %v308_v59, %v5598_v17 }
  0x1c   : > { %424 = vst.msk [vmem:[#allocation2 + $0x100] sm:$0xff] %vm391_vm0, %v5453_v3  ;;  %425 = vst.msk [vmem:[#allocation2 + $0x108] sm:$0xff] %vm391_vm0, %v5453_v3  ;;  %v383_v61 = vmul.f32 %v5600_v18, %v344_v54  ;;  %v384_v62 = vmul.f32 %v5600_v18, %v345_v55  ;;  %v346_v63 = vsub.f32 %v307_v58, %v5598_v17  ;;  %v310_v1 = vld [vmem:[%s5571_s18 + $0xe8] sm:$0xff]  ;;  %v510_v4 = vld [vmem:[%s7398_s5 + $0x80] sm:$0xff] }
  0x1d   : > { %426 = vst.msk [vmem:[#allocation2 + $0x110] sm:$0xff] %vm391_vm0, %v5453_v3  ;;  %427 = vst.msk [vmem:[#allocation2 + $0x118] sm:$0xff] %vm391_vm0, %v5453_v3  ;;  %573 = vperm.xlu1 %5443, %v503_v10   ;;  %568 = vperm.xlu0 %5442, %v502_v11   ;;  %v282_v2 = vld [vmem:[%s5571_s18 + $0x8] sm:$0xff]  ;;  %v359_v5 = vmul.f32 %v5600_v18, %v320_v57  ;;  %v348_v6 = vsub.f32 %v309_v60, %v5598_v17  ;;  %v734_v9 = vld [vmem:[%s7396_s3] sm:$0x3] }
  0x1e   : > { %428 = vst.msk [vmem:[#allocation2 + $0x120] sm:$0xff] %vm391_vm0, %v5453_v3  ;;  %429 = vst.msk [vmem:[#allocation2 + $0x128] sm:$0xff] %vm391_vm0, %v5453_v3  ;;  %v511_v3 = vld [vmem:[%s7398_s5 + $0x88] sm:$0xff]  ;;  %v349_v7 = vsub.f32 %v310_v1, %v5598_v17  ;;  %v321_v8 = vsub.f32 %v282_v2, %v5598_v17  ;;  %v385_v12 = vmul.f32 %v5600_v18, %v346_v63  ;;  %v283_v14 = vld [vmem:[%s5571_s18 + $0x10] sm:$0xff]  ;;  %5424 = vmatprep.subr.msk.bf16.mxu1 %vm833_vm1, %v734_v9 }
  0x1f   : > { %444 = vst.msk [vmem:[#allocation2 + $0x88] sm:$0xff] %vm391_vm0, %v373_v26  ;;  %445 = vst.msk [vmem:[#allocation2 + $0x90] sm:$0xff] %vm391_vm0, %v374_v27  ;;  %v387_v20 = vmul.f32 %v5600_v18, %v348_v6  ;;  %v284_v23 = vld [vmem:[%s5571_s18 + $0x18] sm:$0xff]  ;;  %v322_v25 = vsub.f32 %v283_v14, %v5598_v17  ;;  %v735_v27 = vld [vmem:[#allocation2 + $0x8] sm:$0xff]  ;;  %v1047_v29 = vsel %vm833_vm1, %v734_v9, 0 }
  0x20   : > { %446 = vst.msk [vmem:[#allocation2 + $0x98] sm:$0xff] %vm391_vm0, %v375_v31  ;;  %447 = vst.msk [vmem:[#allocation2 + $0xa0] sm:$0xff] %vm391_vm0, %v376_v32  ;;  %v388_v21 = vmul.f32 %v5600_v18, %v349_v7  ;;  %v360_v22 = vmul.f32 %v5600_v18, %v321_v8  ;;  %v323_v26 = vsub.f32 %v284_v23, %v5598_v17  ;;  %v736_v30 = vld [vmem:[#allocation2 + $0x10] sm:$0xff]  ;;  %v285_v31 = vld [vmem:[%s5571_s18 + $0x20] sm:$0xff] }
  0x21   : > { %583 = vperm.xlu1 %5443, %v505_v13   ;;  %578 = vperm.xlu0 %5442, %v504_v19   ;;  %448 = vst.msk [vmem:[#allocation2 + $0xa8] sm:$0xff] %vm391_vm0, %v377_v41  ;;  %449 = vst.msk [vmem:[#allocation2 + $0xb0] sm:$0xff] %vm391_vm0, %v378_v46  ;;  %v386_v13 = vmul.f32 %v5600_v18, %v347_v0  ;;  %v361_v33 = vmul.f32 %v5600_v18, %v322_v25  ;;  %v512_v37 = vld [vmem:[%s7398_s5 + $0x90] sm:$0xff]  ;;  %v286_v39 = vld [vmem:[%s5571_s18 + $0x28] sm:$0xff] }
  0x22   : > { %450 = vst.msk [vmem:[#allocation2 + $0xb8] sm:$0xff] %vm391_vm0, %v379_v47  ;;  %451 = vst.msk [vmem:[#allocation2 + $0xc0] sm:$0xff] %vm391_vm0, %v380_v48  ;;  %v362_v34 = vmul.f32 %v5600_v18, %v323_v26  ;;  %v324_v40 = vsub.f32 %v285_v31, %v5598_v17  ;;  %v325_v43 = vsub.f32 %v286_v39, %v5598_v17  ;;  %v287_v44 = vld [vmem:[%s5571_s18 + $0x30] sm:$0xff]  ;;  %v288_v48 = vld [vmem:[%s5571_s18 + $0x38] sm:$0xff] }
  0x23   : > { %452 = vst.msk [vmem:[#allocation2 + $0xc8] sm:$0xff] %vm391_vm0, %v381_v53  ;;  %453 = vst.msk [vmem:[#allocation2 + $0xd0] sm:$0xff] %vm391_vm0, %v382_v56  ;;  %v326_v49 = vsub.f32 %v287_v44, %v5598_v17  ;;  %v514_v53 = vld [vmem:[%s7398_s5 + $0xa0] sm:$0xff]  ;;  %v516_v63 = vld [vmem:[%s7398_s5 + $0xb0] sm:$0xff] }
  0x24   : > { %454 = vst.msk [vmem:[#allocation2 + $0xd8] sm:$0xff] %vm391_vm0, %v383_v61  ;;  %455 = vst.msk [vmem:[#allocation2 + $0xe0] sm:$0xff] %vm391_vm0, %v384_v62  ;;  %v363_v47 = vmul.f32 %v5600_v18, %v324_v40  ;;  %v364_v50 = vmul.f32 %v5600_v18, %v325_v43  ;;  %v289_v60 = vld [vmem:[%s5571_s18 + $0x40] sm:$0xff]  ;;  %v290_v61 = vld [vmem:[%s5571_s18 + $0x48] sm:$0xff] }
  0x25   : > { %593 = vperm.xlu1 %5443, %v507_v35   ;;  %588 = vperm.xlu0 %5442, %v506_v36   ;;  %430 = vst.msk [vmem:[#allocation2 + $0x18] sm:$0xff] %vm391_vm0, %v359_v5  ;;  %456 = vst.msk [vmem:[#allocation2 + $0xe8] sm:$0xff] %vm391_vm0, %v385_v12  ;;  %v767_v35 = vpack.c.bf16 %v736_v30, %v735_v27  ;;  %v513_v36 = vld [vmem:[%s7398_s5 + $0x98] sm:$0xff]  ;;  %v365_v56 = vmul.f32 %v5600_v18, %v326_v49  ;;  %v518_v25 = vld [vmem:[%s7398_s5 + $0xc0] sm:$0xff] }
  0x26   : > { %v751_v10 = vld [vmem:[#allocation2 + $0x88] sm:$0xff]  ;;  %v752_v11 = vld [vmem:[#allocation2 + $0x90] sm:$0xff]  ;;  %457 = vst.msk [vmem:[#allocation2 + $0xf0] sm:$0xff] %vm391_vm0, %v386_v13  ;;  %458 = vst.msk [vmem:[#allocation2 + $0xf8] sm:$0xff] %vm391_vm0, %v387_v20  ;;  %v328_v1 = vsub.f32 %v289_v60, %v5598_v17  ;;  %v329_v2 = vsub.f32 %v290_v61, %v5598_v17 }
  0x27   : > { %v775_v15 = vpack.c.bf16 %v752_v11, %v751_v10  ;;  %v753_v16 = vld [vmem:[#allocation2 + $0x98] sm:$0xff]  ;;  %v754_v19 = vld [vmem:[#allocation2 + $0xa0] sm:$0xff]  ;;  %459 = vst.msk [vmem:[#allocation2 + $0x100] sm:$0xff] %vm391_vm0, %v388_v21  ;;  %431 = vst.msk [vmem:[#allocation2 + $0x20] sm:$0xff] %vm391_vm0, %v360_v22  ;;  %5116 = vmatprep.mubr.msk.bf16.mxu0 %vm391_vm0, %v767_v35 }
  0x28   : > { %v776_v24 = vpack.c.bf16 %v754_v19, %v753_v16  ;;  %v755_v28 = vld [vmem:[#allocation2 + $0xa8] sm:$0xff]  ;;  %v756_v32 = vld [vmem:[#allocation2 + $0xb0] sm:$0xff]  ;;  %432 = vst.msk [vmem:[#allocation2 + $0x28] sm:$0xff] %vm391_vm0, %v361_v33  ;;  %433 = vst.msk [vmem:[#allocation2 + $0x30] sm:$0xff] %vm391_vm0, %v362_v34  ;;  %v367_v10 = vmul.f32 %v5600_v18, %v328_v1  ;;  %v368_v11 = vmul.f32 %v5600_v18, %v329_v2 }
  0x29   : > { %603 = vperm.xlu1 %5443, %v509_v51   ;;  %598 = vperm.xlu0 %5442, %v508_v52   ;;  %v777_v38 = vpack.c.bf16 %v756_v32, %v755_v28  ;;  %v757_v41 = vld [vmem:[#allocation2 + $0xb8] sm:$0xff]  ;;  %v758_v42 = vld [vmem:[#allocation2 + $0xc0] sm:$0xff]  ;;  %v327_v51 = vsub.f32 %v288_v48, %v5598_v17  ;;  %v515_v52 = vld [vmem:[%s7398_s5 + $0xa8] sm:$0xff]  ;;  %434 = vst.msk [vmem:[#allocation2 + $0x38] sm:$0xff] %vm391_vm0, %v363_v47 }
  0x2a   : > { %5132 = vmatprep.mubr.msk.bf16.mxu1 %vm391_vm0, %v775_v15  ;;  %v759_v45 = vld [vmem:[#allocation2 + $0xc8] sm:$0xff]  ;;  %v760_v46 = vld [vmem:[#allocation2 + $0xd0] sm:$0xff]  ;;  %v778_v54 = vpack.c.bf16 %v758_v42, %v757_v41  ;;  %435 = vst.msk [vmem:[#allocation2 + $0x40] sm:$0xff] %vm391_vm0, %v364_v50  ;;  %436 = vst.msk [vmem:[#allocation2 + $0x48] sm:$0xff] %vm391_vm0, %v365_v56 }
  0x2b   : > { %5133 = vmatmul.mubr.msk.bf16.vlgmr.msra.gmra.mxu1 %vm391_vm0, %v776_v24  ;;  %v779_v57 = vpack.c.bf16 %v760_v46, %v759_v45  ;;  %v366_v58 = vmul.f32 %v5600_v18, %v327_v51  ;;  %v517_v62 = vld [vmem:[%s7398_s5 + $0xb8] sm:$0xff]  ;;  %v762_v5 = vld [vmem:[#allocation2 + $0xe0] sm:$0xff]  ;;  %v294_v20 = vld [vmem:[%s5571_s18 + $0x68] sm:$0xff]  ;;  %438 = vst.msk [vmem:[#allocation2 + $0x58] sm:$0xff] %vm391_vm0, %v367_v10 }
  0x2c   : > { %5149 = vmatpush3.bf16.msra.mxu1 %v1047_v29  ;;  %5136 = vmatprep.mubr.msk.bf16.mxu1 %vm391_vm0, %v777_v38  ;;  %v737_v55 = vld [vmem:[#allocation2 + $0x18] sm:$0xff]  ;;  %v763_v8 = vld [vmem:[#allocation2 + $0xe8] sm:$0xff]  ;;  %v293_v19 = vld [vmem:[%s5571_s18 + $0x60] sm:$0xff]  ;;  %439 = vst.msk [vmem:[#allocation2 + $0x60] sm:$0xff] %vm391_vm0, %v368_v11  ;;  %v333_v23 = vsub.f32 %v294_v20, %v5598_v17 }
  0x2d   : > { %613 = vperm.xlu1 %5443, %v511_v3   ;;  %608 = vperm.xlu0 %5442, %v510_v4   ;;  %437 = vst.msk [vmem:[#allocation2 + $0x50] sm:$0xff] %vm391_vm0, %v366_v58  ;;  %v291_v3 = vld [vmem:[%s5571_s18 + $0x50] sm:$0xff]  ;;  %v761_v4 = vld [vmem:[#allocation2 + $0xd8] sm:$0xff]  ;;  %v332_v22 = vsub.f32 %v293_v19, %v5598_v17  ;;  %v519_v24 = vld [vmem:[%s7398_s5 + $0xc8] sm:$0xff] }
  0x2e   : > { %v738_v59 = vld [vmem:[#allocation2 + $0x20] sm:$0xff]  ;;  %v330_v7 = vsub.f32 %v291_v3, %v5598_v17  ;;  %v292_v12 = vld [vmem:[%s5571_s18 + $0x58] sm:$0xff]  ;;  %v764_v13 = vld [vmem:[#allocation2 + $0xf0] sm:$0xff]  ;;  %v780_v26 = vpack.c.bf16 %v762_v5, %v761_v4  ;;  %v372_v33 = vmul.f32 %v5600_v18, %v333_v23 }
  0x2f   : > { %v5745_v0 = vpack.c.bf16 %v738_v59, %v737_v55  ;;  %v739_v6 = vld [vmem:[#allocation2 + $0x28] sm:$0xff]  ;;  %v740_v9 = vld [vmem:[#allocation2 + $0x30] sm:$0xff]  ;;  %v331_v15 = vsub.f32 %v292_v12, %v5598_v17  ;;  %v781_v29 = vpack.c.bf16 %v764_v13, %v763_v8  ;;  %v371_v32 = vmul.f32 %v5600_v18, %v332_v22  ;;  %v765_v38 = vld [vmem:[#allocation2 + $0xf8] sm:$0xff] }
  0x30   : > { %v5759_v14 = vpack.c.bf16 %v740_v9, %v739_v6  ;;  %v369_v16 = vmul.f32 %v5600_v18, %v330_v7  ;;  %v741_v21 = vld [vmem:[#allocation2 + $0x38] sm:$0xff]  ;;  %443 = vst.msk [vmem:[#allocation2 + $0x80] sm:$0xff] %vm391_vm0, %v372_v33  ;;  %v766_v39 = vld [vmem:[#allocation2 + $0x100] sm:$0xff]  ;;  %v523_v43 = vld [vmem:[%s7398_s5 + $0xe8] sm:$0xff] }
  0x31   : > { %623 = vperm.xlu1 %5443, %v513_v36   ;;  %618 = vperm.xlu0 %5442, %v512_v37   ;;  %v742_v27 = vld [vmem:[#allocation2 + $0x40] sm:$0xff]  ;;  %v370_v28 = vmul.f32 %v5600_v18, %v331_v15  ;;  %v743_v31 = vld [vmem:[#allocation2 + $0x48] sm:$0xff]  ;;  %442 = vst.msk [vmem:[#allocation2 + $0x78] sm:$0xff] %vm391_vm0, %v371_v32  ;;  %v521_v36 = vld [vmem:[%s7398_s5 + $0xd8] sm:$0xff]  ;;  %v782_v45 = vpack.c.bf16 %v766_v39, %v765_v38 }
  0x32   : > { %5117 = vmatmul.mubr.msk.bf16.vlgmr.msra.gmra.mxu0 %vm391_vm0, %v5745_v0  ;;  %440 = vst.msk [vmem:[#allocation2 + $0x68] sm:$0xff] %vm391_vm0, %v369_v16  ;;  %v5779_v30 = vpack.c.bf16 %v742_v27, %v741_v21  ;;  %v520_v37 = vld [vmem:[%s7398_s5 + $0xd0] sm:$0xff]  ;;  %v745_v40 = vld [vmem:[#allocation2 + $0x58] sm:$0xff]  ;;  %v522_v44 = vld [vmem:[%s7398_s5 + $0xe0] sm:$0xff] }
  0x33   : > { %5137 = vmatmul.mubr.msk.bf16.gmra.mxu1 %vm391_vm0, %v778_v54  ;;  %5120 = vmatprep.mubr.msk.bf16.mxu0 %vm391_vm0, %v5759_v14  ;;  %441 = vst.msk [vmem:[#allocation2 + $0x70] sm:$0xff] %vm391_vm0, %v370_v28  ;;  %v746_v41 = vld [vmem:[#allocation2 + $0x60] sm:$0xff]  ;;  %v525_v49 = vld [vmem:[%s7398_s5 + $0xf8] sm:$0xff]  ;;  %v524_v50 = vld [vmem:[%s7398_s5 + $0xf0] sm:$0xff] }
  0x34   : > { %5140 = vmatprep.mubr.msk.bf16.mxu1 %vm391_vm0, %v779_v57  ;;  %v744_v34 = vld [vmem:[#allocation2 + $0x50] sm:$0xff]  ;;  %v5806_v46 = vpack.c.bf16 %v746_v41, %v745_v40  ;;  %v4677_v54 = vld [vmem:[%s7398_s5 + $0x200] sm:$0xff]  ;;  %v4680_v57 = vld [vmem:[%s7398_s5 + $0x218] sm:$0xff] }
  0x35   : > { %633 = vperm.xlu1 %5443, %v515_v52   ;;  %628 = vperm.xlu0 %5442, %v514_v53   ;;  %v5784_v35 = vpack.c.bf16 %v744_v34, %v743_v31  ;;  %v4678_v53 = vld [vmem:[%s7398_s5 + $0x208] sm:$0xff]  ;;  %v4709_v56 = vld [vmem:[%s7396_s3 + $0x4] sm:$0x3]  ;;  %v4679_v58 = vld [vmem:[%s7398_s5 + $0x210] sm:$0xff] }
  0x36   : > { %5425 = vmatprep.subr.msk.bf16.mxu0 %vm833_vm1, %v4709_v56  ;;  %v1534_v59 = vsel %vm833_vm1, %v4709_v56, 0  ;;  %v4682_v60 = vld [vmem:[%s7398_s5 + $0x228] sm:$0xff]  ;;  %v4681_v61 = vld [vmem:[%s7398_s5 + $0x220] sm:$0xff]  ;;  %v4688_v3 = vld [vmem:[%s7398_s5 + $0x258] sm:$0xff] }
  0x37   : > { %v750_v52 = vld [vmem:[#allocation2 + $0x80] sm:$0xff]  ;;  %5183 = vmatpush3.bf16.msra.mxu0 %v1534_v59  ;;  %v4686_v1 = vld [vmem:[%s7398_s5 + $0x248] sm:$0xff]  ;;  %v4687_v4 = vld [vmem:[%s7398_s5 + $0x250] sm:$0xff] }
  0x38   : > { %v749_v51 = vld [vmem:[#allocation2 + $0x78] sm:$0xff]  ;;  %v4685_v2 = vld [vmem:[%s7398_s5 + $0x240] sm:$0xff]  ;;  %v4690_v5 = vld [vmem:[%s7398_s5 + $0x268] sm:$0xff] }
  0x39   : > { %643 = vperm.xlu1 %5443, %v517_v62   ;;  %638 = vperm.xlu0 %5442, %v516_v63   ;;  %v747_v42 = vld [vmem:[#allocation2 + $0x68] sm:$0xff]  ;;  %v5827_v55 = vpack.c.bf16 %v750_v52, %v749_v51  ;;  %v4684_v62 = vld [vmem:[%s7398_s5 + $0x238] sm:$0xff]  ;;  %v4683_v63 = vld [vmem:[%s7398_s5 + $0x230] sm:$0xff] }
  0x3a   : > { %5121 = vmatmul.mubr.msk.bf16.gmra.mxu0 %vm391_vm0, %v5779_v30  ;;  %v748_v47 = vld [vmem:[#allocation2 + $0x70] sm:$0xff]  ;;  %v4689_v6 = vld [vmem:[%s7398_s5 + $0x260] sm:$0xff]  ;;  %v4692_v7 = vld [vmem:[%s7398_s5 + $0x278] sm:$0xff] }
  0x3b   : > { %5141 = vmatmul.mubr.msk.bf16.gmra.mxu1 %vm391_vm0, %v780_v26  ;;  %5124 = vmatprep.mubr.msk.bf16.mxu0 %vm391_vm0, %v5784_v35  ;;  %v5808_v48 = vpack.c.bf16 %v748_v47, %v747_v42  ;;  %v4691_v8 = vld [vmem:[%s7398_s5 + $0x270] sm:$0xff]  ;;  %v4694_v9 = vld [vmem:[%s7398_s5 + $0x288] sm:$0xff]  ;;  %v4693_v10 = vld [vmem:[%s7398_s5 + $0x280] sm:$0xff] }
  0x3c   : > { %5144 = vmatprep.mubr.msk.bf16.mxu1 %vm391_vm0, %v781_v29  ;;  %v4696_v11 = vld [vmem:[%s7398_s5 + $0x298] sm:$0xff]  ;;  %v4695_v12 = vld [vmem:[%s7398_s5 + $0x290] sm:$0xff]  ;;  %v4698_v13 = vld [vmem:[%s7398_s5 + $0x2a8] sm:$0xff] }
  0x3d   : > { %653 = vperm.xlu1 %5443, %v519_v24   ;;  %648 = vperm.xlu0 %5442, %v518_v25   ;;  %v4697_v15 = vld [vmem:[%s7398_s5 + $0x2a0] sm:$0xff]  ;;  %v4700_v16 = vld [vmem:[%s7398_s5 + $0x2b8] sm:$0xff]  ;;  %v4699_v19 = vld [vmem:[%s7398_s5 + $0x2b0] sm:$0xff] }
  0x3e   : > { %v4702_v20 = vld [vmem:[%s7398_s5 + $0x2c8] sm:$0xff]  ;;  %v4701_v21 = vld [vmem:[%s7398_s5 + $0x2c0] sm:$0xff]  ;;  %v311_v22 = vld [vmem:[%s5571_s18 + $0xf0] sm:$0xff] }
  0x3f   : > { %v350_v23 = vsub.f32 %v311_v22, %v5598_v17  ;;  %v4704_v25 = vld [vmem:[%s7398_s5 + $0x2d8] sm:$0xff]  ;;  %v4703_v26 = vld [vmem:[%s7398_s5 + $0x2d0] sm:$0xff]  ;;  %v4706_v27 = vld [vmem:[%s7398_s5 + $0x2e8] sm:$0xff] }
  0x40   : > { %v4705_v28 = vld [vmem:[%s7398_s5 + $0x2e0] sm:$0xff]  ;;  %v4708_v29 = vld [vmem:[%s7398_s5 + $0x2f8] sm:$0xff]  ;;  %v4707_v31 = vld [vmem:[%s7398_s5 + $0x2f0] sm:$0xff] }
  0x41   : > { %663 = vperm.xlu1 %5443, %v521_v36   ;;  %658 = vperm.xlu0 %5442, %v520_v37   ;;  %v389_v24 = vmul.f32 %v5600_v18, %v350_v23  ;;  %v5930_v34 = vld [vmem:[#allocation2 + $0x17] sm:$0xff]  ;;  %v462_v36 = vld [vmem:[#allocation2 + $0x7] sm:$0xff]  ;;  %v463_v37 = vld [vmem:[#allocation2 + $0xf] sm:$0xff] }
  0x42   : > { %5125 = vmatmul.mubr.msk.bf16.gmra.mxu0 %vm391_vm0, %v5806_v46  ;;  %v5932_v38 = vld [vmem:[#allocation2 + $0x1f] sm:$0xff]  ;;  %v4727_v39 = vld [vmem:[%s7398_s5 + $0x308] sm:$0xff]  ;;  %v5998_v23 = vld [vmem:[#allocation2 + $0x57] sm:$0xff] }
  0x43   : > { %5145 = vmatmul.mubr.msk.bf16.gmra.mxu1 %vm391_vm0, %v782_v45  ;;  %5128 = vmatprep.mubr.msk.bf16.mxu0 %vm391_vm0, %v5808_v48  ;;  %460 = vst.msk [vmem:[#allocation2 + $0x108] sm:$0xff] %vm391_vm0, %v389_v24  ;;  %v4726_v40 = vld [vmem:[%s7398_s5 + $0x300] sm:$0xff]  ;;  %v5948_v51 = vld [vmem:[#allocation2 + $0x2f] sm:$0xff] }
  0x44   : > { %v5950_v52 = vld [vmem:[#allocation2 + $0x27] sm:$0xff]  ;;  %v5996_v22 = vld [vmem:[#allocation2 + $0x5f] sm:$0xff] }
  0x45   : > { %673 = vperm.xlu1 %5443, %v523_v43   ;;  %668 = vperm.xlu0 %5442, %v522_v44   ;;  %v4734_v24 = vld [vmem:[%s7398_s5 + $0x340] sm:$0xff] }
  0x49   : > { %683 = vperm.xlu1 %5443, %v525_v49   ;;  %678 = vperm.xlu0 %5442, %v524_v50   ;;  %v4729_v49 = vld [vmem:[%s7398_s5 + $0x318] sm:$0xff]  ;;  %v4758_v50 = vld [vmem:[%s7396_s3 + $0x6] sm:$0x3] }
  0x4a   : > { %5129 = vmatmul.mubr.msk.bf16.gmra.mxu0 %vm391_vm0, %v5827_v55  ;;  %5426 = vmatprep.subr.msk.bf16.mxu1 %vm833_vm1, %v4758_v50 }
  0x4d   : > { %1282 = vperm.xlu1 %5443, %v4678_v53   ;;  %1277 = vperm.xlu0 %5442, %v4677_v54   ;;  %v4728_v53 = vld [vmem:[%s7398_s5 + $0x310] sm:$0xff] }
  0x51   : > { %1292 = vperm.xlu1 %5443, %v4680_v57   ;;  %1287 = vperm.xlu0 %5442, %v4679_v58   ;;  %v5959_v57 = vld [vmem:[%s7396_s3 + $0x8] sm:$0x3] }
  0x52   : > { %5427 = vmatprep.subr.msk.bf16.mxu0 %vm833_vm1, %v5959_v57 }
  0x55   : > { %1302 = vperm.xlu1 %5443, %v4682_v60   ;;  %1297 = vperm.xlu0 %5442, %v4681_v61  }
  0x59   : > { %1312 = vperm.xlu1 %5443, %v4684_v62   ;;  %1307 = vperm.xlu0 %5442, %v4683_v63   ;;  %v4731_v62 = vld [vmem:[%s7398_s5 + $0x328] sm:$0xff]  ;;  %v2053_v63 = vsel %vm833_vm1, %v4758_v50, 0 }
  0x5d   : > { %1322 = vperm.xlu1 %5443, %v4686_v1   ;;  %1317 = vperm.xlu0 %5442, %v4685_v2   ;;  %v5970_v1 = vld [vmem:[#allocation2 + $0x3f] sm:$0xff]  ;;  %v5972_v2 = vld [vmem:[#allocation2 + $0x37] sm:$0xff] }
  0x61   : > { %1332 = vperm.xlu1 %5443, %v4688_v3   ;;  %1327 = vperm.xlu0 %5442, %v4687_v4   ;;  %v4730_v3 = vld [vmem:[%s7398_s5 + $0x320] sm:$0xff] }
  0x65   : > { %1342 = vperm.xlu1 %5443, %v4690_v5   ;;  %1337 = vperm.xlu0 %5442, %v4689_v6  }
  0x69   : > { %1352 = vperm.xlu1 %5443, %v4692_v7   ;;  %1347 = vperm.xlu0 %5442, %v4691_v8  }
  0x6d   : > { %1362 = vperm.xlu1 %5443, %v4694_v9   ;;  %1357 = vperm.xlu0 %5442, %v4693_v10   ;;  %v4733_v9 = vld [vmem:[%s7398_s5 + $0x338] sm:$0xff]  ;;  %v5984_v10 = vld [vmem:[#allocation2 + $0x4f] sm:$0xff] }
  0x71   : > { %1372 = vperm.xlu1 %5443, %v4696_v11   ;;  %1367 = vperm.xlu0 %5442, %v4695_v12   ;;  %v5986_v11 = vld [vmem:[#allocation2 + $0x47] sm:$0xff]  ;;  %v4732_v12 = vld [vmem:[%s7398_s5 + $0x330] sm:$0xff] }
  0x75   : > { %1382 = vperm.xlu1 %5443, %v4698_v13   ;;  %1377 = vperm.xlu0 %5442, %v4697_v15  }
  0x79   : > { %1392 = vperm.xlu1 %5443, %v4700_v16   ;;  %1387 = vperm.xlu0 %5442, %v4699_v19  }
  0x7d   : > { %1402 = vperm.xlu1 %5443, %v4702_v20   ;;  %1397 = vperm.xlu0 %5442, %v4701_v21   ;;  %v4735_v21 = vld [vmem:[%s7398_s5 + $0x348] sm:$0xff] }
  0x81   : > { %1412 = vperm.xlu1 %5443, %v4704_v25   ;;  %1407 = vperm.xlu0 %5442, %v4703_v26  }
  0x85   : > { %1422 = vperm.xlu1 %5443, %v4706_v27   ;;  %1417 = vperm.xlu0 %5442, %v4705_v28  }
  0x88   : > { %v539_v32 = vpop.permute.xlu1 %538  ;;  %v529_v33 = vpop.permute.xlu0 %528 }
  0x89   : > { %1432 = vperm.xlu1 %5443, %v4708_v29   ;;  %1427 = vperm.xlu0 %5442, %v4707_v31   ;;  %v688_v41 = vmul.f32 %v539_v32, %v5930_v34  ;;  %v686_v44 = vmul.f32 %v529_v33, %v462_v36  ;;  %v4737_v31 = vld [vmem:[%s7398_s5 + $0x358] sm:$0xff]  ;;  %v6010_v32 = vld [vmem:[#allocation2 + $0x6f] sm:$0xff]  ;;  %v6012_v33 = vld [vmem:[#allocation2 + $0x67] sm:$0xff] }
  0x8a   : > { %v4736_v36 = vld [vmem:[%s7398_s5 + $0x350] sm:$0xff] }
  0x8c   : > { %v544_v42 = vpop.permute.xlu1 %543  ;;  %v534_v43 = vpop.permute.xlu0 %533 }
  0x8d   : > { %v689_v45 = vmul.f32 %v544_v42, %v5932_v38  ;;  %v687_v47 = vmul.f32 %v534_v43, %v463_v37  ;;  %1801 = vperm.xlu1 %5443, %v4727_v39   ;;  %1796 = vperm.xlu0 %5442, %v4726_v40   ;;  %v4739_v43 = vld [vmem:[%s7398_s5 + $0x368] sm:$0xff] }
  0x8f   : > { %v719_v54 = vpack.c.bf16 %v689_v45, %v688_v41  ;;  %v718_v56 = vpack.c.bf16 %v687_v47, %v686_v44  ;;  %v6022_v44 = vld [vmem:[#allocation2 + $0x7f] sm:$0xff]  ;;  %v6024_v45 = vld [vmem:[#allocation2 + $0x77] sm:$0xff] }
  0x90   : > { %v554_v58 = vpop.permute.xlu1 %553  ;;  %v549_v59 = vpop.permute.xlu0 %548  ;;  %v4738_v47 = vld [vmem:[%s7398_s5 + $0x360] sm:$0xff] }
  0x91   : > { %v691_v60 = vmul.f32 %v554_v58, %v5948_v51  ;;  %v690_v61 = vmul.f32 %v549_v59, %v5950_v52  ;;  %1811 = vperm.xlu1 %5443, %v4729_v49   ;;  %1806 = vperm.xlu0 %5442, %v4728_v53   ;;  %v6032_v58 = vld [vmem:[#allocation2 + $0x8f] sm:$0xff]  ;;  %v6035_v59 = vld [vmem:[#allocation2 + $0x87] sm:$0xff] }
  0x92   : > { %5150 = vmatprep.mubr.msk.bf16.mxu1 %vm391_vm0, %v718_v56 }
  0x93   : > { %v720_v4 = vpack.c.bf16 %v691_v60, %v690_v61  ;;  %5151 = vmatmul.mubr.msk.bf16.vlgmr.msra.gmra.mxu1 %vm391_vm0, %v719_v54  ;;  %v4741_v60 = vld [vmem:[%s7398_s5 + $0x378] sm:$0xff]  ;;  %v4740_v61 = vld [vmem:[%s7398_s5 + $0x370] sm:$0xff] }
  0x94   : > { %v564_v5 = vpop.permute.xlu1 %563  ;;  %v559_v6 = vpop.permute.xlu0 %558  ;;  %5217 = vmatpush3.bf16.msra.mxu1 %v2053_v63 }
  0x95   : > { %v693_v7 = vmul.f32 %v564_v5, %v5970_v1  ;;  %v692_v8 = vmul.f32 %v559_v6, %v5972_v2  ;;  %1821 = vperm.xlu1 %5443, %v4731_v62   ;;  %1816 = vperm.xlu0 %5442, %v4730_v3   ;;  %v6045_v6 = vld [vmem:[#allocation2 + $0x9f] sm:$0xff] }
  0x96   : > { %5154 = vmatprep.mubr.msk.bf16.mxu1 %vm391_vm0, %v720_v4 }
  0x97   : > { %v721_v13 = vpack.c.bf16 %v693_v7, %v692_v8  ;;  %v6047_v7 = vld [vmem:[#allocation2 + $0x97] sm:$0xff]  ;;  %v4743_v8 = vld [vmem:[%s7398_s5 + $0x388] sm:$0xff] }
  0x98   : > { %v574_v15 = vpop.permute.xlu1 %573  ;;  %v569_v16 = vpop.permute.xlu0 %568 }
  0x99   : > { %v695_v19 = vmul.f32 %v574_v15, %v5984_v10  ;;  %v694_v20 = vmul.f32 %v569_v16, %v5986_v11  ;;  %1831 = vperm.xlu1 %5443, %v4733_v9   ;;  %1826 = vperm.xlu0 %5442, %v4732_v12   ;;  %v4742_v9 = vld [vmem:[%s7398_s5 + $0x380] sm:$0xff] }
  0x9b   : > { %v722_v25 = vpack.c.bf16 %v695_v19, %v694_v20  ;;  %5155 = vmatmul.mubr.msk.bf16.gmra.mxu1 %vm391_vm0, %v721_v13  ;;  %v6058_v20 = vld [vmem:[#allocation2 + $0xaf] sm:$0xff] }
  0x9c   : > { %v584_v26 = vpop.permute.xlu1 %583  ;;  %v579_v27 = vpop.permute.xlu0 %578 }
  0x9d   : > { %v697_v28 = vmul.f32 %v584_v26, %v5996_v22  ;;  %v696_v29 = vmul.f32 %v579_v27, %v5998_v23  ;;  %1841 = vperm.xlu1 %5443, %v4735_v21   ;;  %1836 = vperm.xlu0 %5442, %v4734_v24   ;;  %v6061_v21 = vld [vmem:[#allocation2 + $0xa7] sm:$0xff]  ;;  %v4745_v24 = vld [vmem:[%s7398_s5 + $0x398] sm:$0xff] }
  0x9e   : > { %5158 = vmatprep.mubr.msk.bf16.mxu1 %vm391_vm0, %v722_v25  ;;  %v4744_v25 = vld [vmem:[%s7398_s5 + $0x390] sm:$0xff] }
  0x9f   : > { %v723_v37 = vpack.c.bf16 %v697_v28, %v696_v29 }
  0xa0   : > { %v594_v39 = vpop.permute.xlu1 %593  ;;  %v589_v40 = vpop.permute.xlu0 %588 }
  0xa1   : > { %v699_v41 = vmul.f32 %v594_v39, %v6010_v32  ;;  %v698_v42 = vmul.f32 %v589_v40, %v6012_v33  ;;  %1851 = vperm.xlu1 %5443, %v4737_v31   ;;  %1846 = vperm.xlu0 %5442, %v4736_v36   ;;  %v6071_v36 = vld [vmem:[#allocation2 + $0xbf] sm:$0xff]  ;;  %v4747_v39 = vld [vmem:[%s7398_s5 + $0x3a8] sm:$0xff] }
  0xa2   : > { %v4746_v40 = vld [vmem:[%s7398_s5 + $0x3a0] sm:$0xff] }
  0xa3   : > { %v724_v49 = vpack.c.bf16 %v699_v41, %v698_v42  ;;  %5159 = vmatmul.mubr.msk.bf16.gmra.mxu1 %vm391_vm0, %v723_v37  ;;  %v6073_v37 = vld [vmem:[#allocation2 + $0xb7] sm:$0xff] }
  0xa4   : > { %v604_v50 = vpop.permute.xlu1 %603  ;;  %v599_v53 = vpop.permute.xlu0 %598 }
  0xa5   : > { %v701_v54 = vmul.f32 %v604_v50, %v6022_v44  ;;  %v700_v56 = vmul.f32 %v599_v53, %v6024_v45  ;;  %1861 = vperm.xlu1 %5443, %v4739_v43   ;;  %1856 = vperm.xlu0 %5442, %v4738_v47   ;;  %v6084_v50 = vld [vmem:[#allocation2 + $0xcf] sm:$0xff]  ;;  %v6087_v53 = vld [vmem:[#allocation2 + $0xc7] sm:$0xff] }
  0xa6   : > { %5162 = vmatprep.mubr.msk.bf16.mxu1 %vm391_vm0, %v724_v49 }
  0xa7   : > { %v725_v62 = vpack.c.bf16 %v701_v54, %v700_v56  ;;  %v4749_v54 = vld [vmem:[%s7398_s5 + $0x3b8] sm:$0xff]  ;;  %v4748_v56 = vld [vmem:[%s7398_s5 + $0x3b0] sm:$0xff] }
  0xa8   : > { %v614_v63 = vpop.permute.xlu1 %613  ;;  %v609_v3 = vpop.permute.xlu0 %608 }
  0xa9   : > { %v703_v4 = vmul.f32 %v614_v63, %v6032_v58  ;;  %v702_v5 = vmul.f32 %v609_v3, %v6035_v59  ;;  %1871 = vperm.xlu1 %5443, %v4741_v60   ;;  %1866 = vperm.xlu0 %5442, %v4740_v61  }
  0xab   : > { %v726_v12 = vpack.c.bf16 %v703_v4, %v702_v5  ;;  %5163 = vmatmul.mubr.msk.bf16.gmra.mxu1 %vm391_vm0, %v725_v62  ;;  %v6097_v4 = vld [vmem:[#allocation2 + $0xdf] sm:$0xff]  ;;  %v6099_v5 = vld [vmem:[#allocation2 + $0xd7] sm:$0xff] }
  0xac   : > { %v624_v13 = vpop.permute.xlu1 %623  ;;  %v619_v15 = vpop.permute.xlu0 %618 }
  0xad   : > { %v705_v16 = vmul.f32 %v624_v13, %v6045_v6  ;;  %v704_v19 = vmul.f32 %v619_v15, %v6047_v7  ;;  %1881 = vperm.xlu1 %5443, %v4743_v8   ;;  %1876 = vperm.xlu0 %5442, %v4742_v9   ;;  %v4751_v8 = vld [vmem:[%s7398_s5 + $0x3c8] sm:$0xff]  ;;  %v4750_v9 = vld [vmem:[%s7398_s5 + $0x3c0] sm:$0xff] }
  0xae   : > { %5166 = vmatprep.mubr.msk.bf16.mxu1 %vm391_vm0, %v726_v12  ;;  %v312_v12 = vld [vmem:[%s5571_s18 + $0xf8] sm:$0xff] }
  0xaf   : > { %v727_v26 = vpack.c.bf16 %v705_v16, %v704_v19  ;;  %v351_v15 = vsub.f32 %v312_v12, %v5598_v17  ;;  %v4753_v17 = vld [vmem:[%s7398_s5 + $0x3d8] sm:$0xff] }
  0xb0   : > { %v634_v27 = vpop.permute.xlu1 %633  ;;  %v629_v28 = vpop.permute.xlu0 %628 }
  0xb1   : > { %v707_v29 = vmul.f32 %v634_v27, %v6058_v20  ;;  %v706_v31 = vmul.f32 %v629_v28, %v6061_v21  ;;  %1891 = vperm.xlu1 %5443, %v4745_v24   ;;  %1886 = vperm.xlu0 %5442, %v4744_v25   ;;  %v390_v27 = vmul.f32 %v5600_v18, %v351_v15  ;;  %v6116_v28 = vld [vmem:[#allocation2 + $0xe7] sm:$0xff] }
  0xb3   : > { %v728_v41 = vpack.c.bf16 %v707_v29, %v706_v31  ;;  %5167 = vmatmul.mubr.msk.bf16.gmra.mxu1 %vm391_vm0, %v727_v26  ;;  %v6112_v26 = vld [vmem:[#allocation2 + $0xef] sm:$0xff]  ;;  %461 = vst.msk [vmem:[#allocation2 + $0x110] sm:$0xff] %vm391_vm0, %v390_v27 }
  0xb4   : > { %v644_v42 = vpop.permute.xlu1 %643  ;;  %v639_v43 = vpop.permute.xlu0 %638  ;;  %v4752_v29 = vld [vmem:[%s7398_s5 + $0x3d0] sm:$0xff]  ;;  %v4793_v27 = vld [vmem:[%s7398_s5 + $0x508] sm:$0xff] }
  0xb5   : > { %v709_v47 = vmul.f32 %v644_v42, %v6071_v36  ;;  %v708_v49 = vmul.f32 %v639_v43, %v6073_v37  ;;  %1901 = vperm.xlu1 %5443, %v4747_v39   ;;  %1896 = vperm.xlu0 %5442, %v4746_v40   ;;  %v6127_v42 = vld [vmem:[#allocation2 + $0xff] sm:$0xff]  ;;  %v6129_v43 = vld [vmem:[#allocation2 + $0xf7] sm:$0xff] }
  0xb6   : > { %5170 = vmatprep.mubr.msk.bf16.mxu1 %vm391_vm0, %v728_v41 }
  0xb7   : > { %v729_v60 = vpack.c.bf16 %v709_v47, %v708_v49  ;;  %v4755_v47 = vld [vmem:[%s7398_s5 + $0x3e8] sm:$0xff]  ;;  %v4754_v49 = vld [vmem:[%s7398_s5 + $0x3e0] sm:$0xff] }
  0xb8   : > { %v654_v61 = vpop.permute.xlu1 %653  ;;  %v649_v62 = vpop.permute.xlu0 %648 }
  0xb9   : > { %v711_v63 = vmul.f32 %v654_v61, %v6084_v50  ;;  %v710_v3 = vmul.f32 %v649_v62, %v6087_v53  ;;  %1911 = vperm.xlu1 %5443, %v4749_v54   ;;  %1906 = vperm.xlu0 %5442, %v4748_v56  }
  0xbb   : > { %v730_v13 = vpack.c.bf16 %v711_v63, %v710_v3  ;;  %5171 = vmatmul.mubr.msk.bf16.gmra.mxu1 %vm391_vm0, %v729_v60  ;;  %v1211_v63 = vld [vmem:[#allocation2 + $0x11] sm:$0xff]  ;;  %v1210_v3 = vld [vmem:[#allocation2 + $0x9] sm:$0xff] }
  0xbc   : > { %v664_v16 = vpop.permute.xlu1 %663  ;;  %v659_v19 = vpop.permute.xlu0 %658 }
  0xbd   : > { %v713_v24 = vmul.f32 %v664_v16, %v6097_v4  ;;  %v712_v25 = vmul.f32 %v659_v19, %v6099_v5  ;;  %1921 = vperm.xlu1 %5443, %v4751_v8   ;;  %1916 = vperm.xlu0 %5442, %v4750_v9   ;;  %v4757_v8 = vld [vmem:[%s7398_s5 + $0x3f8] sm:$0xff]  ;;  %v4756_v9 = vld [vmem:[%s7398_s5 + $0x3f0] sm:$0xff] }
  0xbe   : > { %5174 = vmatprep.mubr.msk.bf16.mxu1 %vm391_vm0, %v730_v13 }
  0xbf   : > { %v731_v31 = vpack.c.bf16 %v713_v24, %v712_v25  ;;  %v6147_v24 = vld [vmem:[#allocation2 + $0x21] sm:$0xff]  ;;  %v6149_v25 = vld [vmem:[#allocation2 + $0x19] sm:$0xff] }
  0xc0   : > { %v674_v39 = vpop.permute.xlu1 %673  ;;  %v669_v40 = vpop.permute.xlu0 %668 }
  0xc1   : > { %v715_v41 = vmul.f32 %v674_v39, %v6112_v26  ;;  %v714_v18 = vmul.f32 %v669_v40, %v6116_v28  ;;  %1931 = vperm.xlu1 %5443, %v4753_v17   ;;  %1926 = vperm.xlu0 %5442, %v4752_v29   ;;  %v4792_v17 = vld [vmem:[%s7398_s5 + $0x500] sm:$0xff] }
  0xc3   : > { %v732_v54 = vpack.c.bf16 %v715_v41, %v714_v18  ;;  %5175 = vmatmul.mubr.msk.bf16.gmra.mxu1 %vm391_vm0, %v731_v31  ;;  %v6160_v18 = vld [vmem:[#allocation2 + $0x31] sm:$0xff] }
  0xc4   : > { %v684_v56 = vpop.permute.xlu1 %683  ;;  %v679_v60 = vpop.permute.xlu0 %678 }
  0xc5   : > { %v717_v61 = vmul.f32 %v684_v56, %v6127_v42  ;;  %v716_v62 = vmul.f32 %v679_v60, %v6129_v43  ;;  %1941 = vperm.xlu1 %5443, %v4755_v47   ;;  %1936 = vperm.xlu0 %5442, %v4754_v49   ;;  %v6165_v47 = vld [vmem:[%s7396_s3 + $0xa] sm:$0x3]  ;;  %v4794_v56 = vld [vmem:[%s7398_s5 + $0x510] sm:$0xff] }
  0xc6   : > { %5178 = vmatprep.mubr.msk.bf16.mxu1 %vm391_vm0, %v732_v54  ;;  %v6168_v49 = vld [vmem:[#allocation2 + $0x29] sm:$0xff]  ;;  %v4795_v54 = vld [vmem:[%s7398_s5 + $0x518] sm:$0xff]  ;;  %5428 = vmatprep.subr.msk.bf16.mxu1 %vm833_vm1, %v6165_v47 }
  0xc7   : > { %v733_v12 = vpack.c.bf16 %v717_v61, %v716_v62 }
  0xc8   : > { %v1283_v13 = vpop.permute.xlu1 %1282  ;;  %v1278_v15 = vpop.permute.xlu0 %1277 }
  0xc9   : > { %v1436_v16 = vmul.f32 %v1283_v13, %v1211_v63  ;;  %v1435_v19 = vmul.f32 %v1278_v15, %v1210_v3  ;;  %1951 = vperm.xlu1 %5443, %v4757_v8   ;;  %1946 = vperm.xlu0 %5442, %v4756_v9   ;;  %v2347_v63 = vsel %vm833_vm1, %v5959_v57, 0  ;;  %v6182_v9 = vld [vmem:[#allocation2 + $0x41] sm:$0xff] }
  0xca   : > { %v4842_v13 = vld [vmem:[%s7398_s5 + $0x608] sm:$0xff]  ;;  %v4841_v57 = vld [vmem:[%s7398_s5 + $0x600] sm:$0xff] }
  0xcb   : > { %v1467_v29 = vpack.c.bf16 %v1436_v16, %v1435_v19  ;;  %5179 = vmatmul.mubr.msk.bf16.gmra.mxu1 %vm391_vm0, %v733_v12  ;;  %v6185_v12 = vld [vmem:[#allocation2 + $0x39] sm:$0xff]  ;;  %v6196_v16 = vld [vmem:[%s7396_s3 + $0xc] sm:$0x3] }
  0xcc   : > { %v1293_v31 = vpop.permute.xlu1 %1292  ;;  %v1288_v39 = vpop.permute.xlu0 %1287 }
  0xcd   : > { %v1438_v40 = vmul.f32 %v1293_v31, %v6147_v24  ;;  %v1437_v41 = vmul.f32 %v1288_v39, %v6149_v25  ;;  %2614 = vperm.xlu1 %5443, %v4793_v27   ;;  %2609 = vperm.xlu0 %5442, %v4792_v17   ;;  %v1219_v31 = vld [vmem:[#allocation2 + $0x51] sm:$0xff]  ;;  %v1218_v39 = vld [vmem:[#allocation2 + $0x49] sm:$0xff] }
  0xce   : > { %5184 = vmatprep.mubr.msk.bf16.mxu0 %vm391_vm0, %v1467_v29 }
  0xcf   : > { %v1468_v60 = vpack.c.bf16 %v1438_v40, %v1437_v41  ;;  %v4844_v40 = vld [vmem:[%s7398_s5 + $0x618] sm:$0xff]  ;;  %v4843_v41 = vld [vmem:[%s7398_s5 + $0x610] sm:$0xff] }
  0xd0   : > { %v1303_v61 = vpop.permute.xlu1 %1302  ;;  %v1298_v62 = vpop.permute.xlu0 %1297 }
  0xd1   : > { %v1440_v3 = vmul.f32 %v1303_v61, %v6160_v18  ;;  %v1439_v8 = vmul.f32 %v1298_v62, %v6168_v49  ;;  %2624 = vperm.xlu1 %5443, %v4795_v54   ;;  %2619 = vperm.xlu0 %5442, %v4794_v56  }
  0xd2   : > { %5185 = vmatmul.mubr.msk.bf16.vlgmr.msra.gmra.mxu0 %vm391_vm0, %v1468_v60 }
  0xd3   : > { %v1469_v15 = vpack.c.bf16 %v1440_v3, %v1439_v8  ;;  %5251 = vmatpush3.bf16.msra.mxu0 %v2347_v63  ;;  %v1221_v63 = vld [vmem:[#allocation2 + $0x61] sm:$0xff]  ;;  %v1220_v3 = vld [vmem:[#allocation2 + $0x59] sm:$0xff] }
  0xd4   : > { %v1313_v19 = vpop.permute.xlu1 %1312  ;;  %v1308_v27 = vpop.permute.xlu0 %1307  ;;  %5429 = vmatprep.subr.msk.bf16.mxu0 %vm833_vm1, %v6196_v16  ;;  %v4797_v8 = vld [vmem:[%s7398_s5 + $0x528] sm:$0xff] }
  0xd5   : > { %v1442_v17 = vmul.f32 %v1313_v19, %v6182_v9  ;;  %v1441_v29 = vmul.f32 %v1308_v27, %v6185_v12  ;;  %3133 = vperm.xlu1 %5443, %v4842_v13   ;;  %3128 = vperm.xlu0 %5442, %v4841_v57   ;;  %v4796_v13 = vld [vmem:[%s7398_s5 + $0x520] sm:$0xff] }
  0xd6   : > { %5188 = vmatprep.mubr.msk.bf16.mxu0 %vm391_vm0, %v1469_v15 }
  0xd7   : > { %v1470_v54 = vpack.c.bf16 %v1442_v17, %v1441_v29  ;;  %v1223_v29 = vld [vmem:[#allocation2 + $0x71] sm:$0xff] }
  0xd8   : > { %v1323_v56 = vpop.permute.xlu1 %1322  ;;  %v1318_v60 = vpop.permute.xlu0 %1317 }
  0xd9   : > { %v1444_v61 = vmul.f32 %v1323_v56, %v1219_v31  ;;  %v1443_v62 = vmul.f32 %v1318_v60, %v1218_v39  ;;  %3143 = vperm.xlu1 %5443, %v4844_v40   ;;  %3138 = vperm.xlu0 %5442, %v4843_v41   ;;  %v1222_v31 = vld [vmem:[#allocation2 + $0x69] sm:$0xff]  ;;  %v4799_v39 = vld [vmem:[%s7398_s5 + $0x538] sm:$0xff] }
  0xda   : > { %5189 = vmatmul.mubr.msk.bf16.gmra.mxu0 %vm391_vm0, %v1470_v54  ;;  %v4798_v40 = vld [vmem:[%s7398_s5 + $0x530] sm:$0xff] }
  0xdb   : > { %v1471_v57 = vpack.c.bf16 %v1444_v61, %v1443_v62  ;;  %v1225_v62 = vld [vmem:[#allocation2 + $0x81] sm:$0xff] }
  0xdc   : > { %v1333_v15 = vpop.permute.xlu1 %1332  ;;  %v1328_v19 = vpop.permute.xlu0 %1327 }
  0xdd   : > { %v1446_v27 = vmul.f32 %v1333_v15, %v1221_v63  ;;  %v1445_v17 = vmul.f32 %v1328_v19, %v1220_v3  ;;  %2634 = vperm.xlu1 %5443, %v4797_v8   ;;  %2629 = vperm.xlu0 %5442, %v4796_v13   ;;  %v1224_v63 = vld [vmem:[#allocation2 + $0x79] sm:$0xff]  ;;  %v4846_v3 = vld [vmem:[%s7398_s5 + $0x628] sm:$0xff] }
  0xde   : > { %5192 = vmatprep.mubr.msk.bf16.mxu0 %vm391_vm0, %v1471_v57  ;;  %v4845_v8 = vld [vmem:[%s7398_s5 + $0x620] sm:$0xff] }
  0xdf   : > { %v1472_v41 = vpack.c.bf16 %v1446_v27, %v1445_v17  ;;  %v1227_v17 = vld [vmem:[#allocation2 + $0x91] sm:$0xff] }
  0xe0   : > { %v1343_v54 = vpop.permute.xlu1 %1342  ;;  %v1338_v56 = vpop.permute.xlu0 %1337 }
  0xe1   : > { %v1448_v60 = vmul.f32 %v1343_v54, %v1223_v29  ;;  %v1447_v61 = vmul.f32 %v1338_v56, %v1222_v31  ;;  %2644 = vperm.xlu1 %5443, %v4799_v39   ;;  %2639 = vperm.xlu0 %5442, %v4798_v40   ;;  %v1226_v29 = vld [vmem:[#allocation2 + $0x89] sm:$0xff]  ;;  %v4848_v31 = vld [vmem:[%s7398_s5 + $0x638] sm:$0xff] }
  0xe2   : > { %5193 = vmatmul.mubr.msk.bf16.gmra.mxu0 %vm391_vm0, %v1472_v41  ;;  %v4847_v39 = vld [vmem:[%s7398_s5 + $0x630] sm:$0xff] }
  0xe3   : > { %v1473_v13 = vpack.c.bf16 %v1448_v60, %v1447_v61  ;;  %v1229_v61 = vld [vmem:[#allocation2 + $0xa1] sm:$0xff] }
  0xe4   : > { %v1353_v57 = vpop.permute.xlu1 %1352  ;;  %v1348_v15 = vpop.permute.xlu0 %1347 }
  0xe5   : > { %v1450_v19 = vmul.f32 %v1353_v57, %v1225_v62  ;;  %v1449_v27 = vmul.f32 %v1348_v15, %v1224_v63  ;;  %3153 = vperm.xlu1 %5443, %v4846_v3   ;;  %3148 = vperm.xlu0 %5442, %v4845_v8   ;;  %v1228_v62 = vld [vmem:[#allocation2 + $0x99] sm:$0xff]  ;;  %v4801_v63 = vld [vmem:[%s7398_s5 + $0x548] sm:$0xff] }
  0xe6   : > { %5196 = vmatprep.mubr.msk.bf16.mxu0 %vm391_vm0, %v1473_v13  ;;  %v4800_v3 = vld [vmem:[%s7398_s5 + $0x540] sm:$0xff] }
  0xe7   : > { %v1474_v40 = vpack.c.bf16 %v1450_v19, %v1449_v27  ;;  %v1231_v27 = vld [vmem:[#allocation2 + $0xb1] sm:$0xff] }
  0xe8   : > { %v1363_v41 = vpop.permute.xlu1 %1362  ;;  %v1358_v54 = vpop.permute.xlu0 %1357 }
  0xe9   : > { %v1452_v56 = vmul.f32 %v1363_v41, %v1227_v17  ;;  %v1451_v60 = vmul.f32 %v1358_v54, %v1226_v29  ;;  %3163 = vperm.xlu1 %5443, %v4848_v31   ;;  %3158 = vperm.xlu0 %5442, %v4847_v39   ;;  %v1230_v17 = vld [vmem:[#allocation2 + $0xa9] sm:$0xff]  ;;  %v4803_v29 = vld [vmem:[%s7398_s5 + $0x558] sm:$0xff] }
  0xea   : > { %5197 = vmatmul.mubr.msk.bf16.gmra.mxu0 %vm391_vm0, %v1474_v40  ;;  %v4802_v31 = vld [vmem:[%s7398_s5 + $0x550] sm:$0xff] }
  0xeb   : > { %v1475_v8 = vpack.c.bf16 %v1452_v56, %v1451_v60  ;;  %v1233_v60 = vld [vmem:[#allocation2 + $0xc1] sm:$0xff] }
  0xec   : > { %v1373_v13 = vpop.permute.xlu1 %1372  ;;  %v1368_v57 = vpop.permute.xlu0 %1367 }
  0xed   : > { %v1454_v15 = vmul.f32 %v1373_v13, %v1229_v61  ;;  %v1453_v19 = vmul.f32 %v1368_v57, %v1228_v62  ;;  %2654 = vperm.xlu1 %5443, %v4801_v63   ;;  %2649 = vperm.xlu0 %5442, %v4800_v3   ;;  %v1232_v61 = vld [vmem:[#allocation2 + $0xb9] sm:$0xff]  ;;  %v4850_v62 = vld [vmem:[%s7398_s5 + $0x648] sm:$0xff] }
  0xee   : > { %5200 = vmatprep.mubr.msk.bf16.mxu0 %vm391_vm0, %v1475_v8  ;;  %v4849_v63 = vld [vmem:[%s7398_s5 + $0x640] sm:$0xff] }
  0xef   : > { %v1476_v39 = vpack.c.bf16 %v1454_v15, %v1453_v19  ;;  %v1235_v19 = vld [vmem:[#allocation2 + $0xd1] sm:$0xff] }
  0xf0   : > { %v1383_v40 = vpop.permute.xlu1 %1382  ;;  %v1378_v41 = vpop.permute.xlu0 %1377 }
  0xf1   : > { %v1456_v54 = vmul.f32 %v1383_v40, %v1231_v27  ;;  %v1455_v56 = vmul.f32 %v1378_v41, %v1230_v17  ;;  %2664 = vperm.xlu1 %5443, %v4803_v29   ;;  %2659 = vperm.xlu0 %5442, %v4802_v31   ;;  %v1234_v27 = vld [vmem:[#allocation2 + $0xc9] sm:$0xff]  ;;  %v4852_v17 = vld [vmem:[%s7398_s5 + $0x658] sm:$0xff] }
  0xf2   : > { %5201 = vmatmul.mubr.msk.bf16.gmra.mxu0 %vm391_vm0, %v1476_v39  ;;  %v4851_v29 = vld [vmem:[%s7398_s5 + $0x650] sm:$0xff] }
  0xf3   : > { %v1477_v3 = vpack.c.bf16 %v1456_v54, %v1455_v56  ;;  %v1237_v56 = vld [vmem:[#allocation2 + $0xe1] sm:$0xff] }
  0xf4   : > { %v1393_v8 = vpop.permute.xlu1 %1392  ;;  %v1388_v13 = vpop.permute.xlu0 %1387 }
  0xf5   : > { %v1458_v57 = vmul.f32 %v1393_v8, %v1233_v60  ;;  %v1457_v15 = vmul.f32 %v1388_v13, %v1232_v61  ;;  %3173 = vperm.xlu1 %5443, %v4850_v62   ;;  %3168 = vperm.xlu0 %5442, %v4849_v63   ;;  %v1236_v60 = vld [vmem:[#allocation2 + $0xd9] sm:$0xff]  ;;  %v4805_v61 = vld [vmem:[%s7398_s5 + $0x568] sm:$0xff] }
  0xf6   : > { %5204 = vmatprep.mubr.msk.bf16.mxu0 %vm391_vm0, %v1477_v3  ;;  %v4804_v62 = vld [vmem:[%s7398_s5 + $0x560] sm:$0xff] }
  0xf7   : > { %v1478_v31 = vpack.c.bf16 %v1458_v57, %v1457_v15  ;;  %v1239_v15 = vld [vmem:[#allocation2 + $0xf1] sm:$0xff] }
  0xf8   : > { %v1403_v39 = vpop.permute.xlu1 %1402  ;;  %v1398_v40 = vpop.permute.xlu0 %1397 }
  0xf9   : > { %v1460_v41 = vmul.f32 %v1403_v39, %v1235_v19  ;;  %v1459_v54 = vmul.f32 %v1398_v40, %v1234_v27  ;;  %3183 = vperm.xlu1 %5443, %v4852_v17   ;;  %3178 = vperm.xlu0 %5442, %v4851_v29   ;;  %v1238_v19 = vld [vmem:[#allocation2 + $0xe9] sm:$0xff]  ;;  %v4807_v27 = vld [vmem:[%s7398_s5 + $0x578] sm:$0xff] }
  0xfa   : > { %5205 = vmatmul.mubr.msk.bf16.gmra.mxu0 %vm391_vm0, %v1478_v31  ;;  %v4806_v17 = vld [vmem:[%s7398_s5 + $0x570] sm:$0xff] }
  0xfb   : > { %v1479_v63 = vpack.c.bf16 %v1460_v41, %v1459_v54  ;;  %v1240_v54 = vld [vmem:[#allocation2 + $0xf9] sm:$0xff] }
  0xfc   : > { %v1413_v3 = vpop.permute.xlu1 %1412  ;;  %v1408_v8 = vpop.permute.xlu0 %1407 }
  0xfd   : > { %v1462_v13 = vmul.f32 %v1413_v3, %v1237_v56  ;;  %v1461_v57 = vmul.f32 %v1408_v8, %v1236_v60  ;;  %2674 = vperm.xlu1 %5443, %v4805_v61   ;;  %2669 = vperm.xlu0 %5442, %v4804_v62   ;;  %v1241_v56 = vld [vmem:[#allocation2 + $0x101] sm:$0xff] }
  0xfe   : > { %5208 = vmatprep.mubr.msk.bf16.mxu0 %vm391_vm0, %v1479_v63  ;;  %v4854_v60 = vld [vmem:[%s7398_s5 + $0x668] sm:$0xff]  ;;  %v4853_v61 = vld [vmem:[%s7398_s5 + $0x660] sm:$0xff] }
  0xff   : > { %v1480_v29 = vpack.c.bf16 %v1462_v13, %v1461_v57  ;;  %v4856_v57 = vld [vmem:[%s7398_s5 + $0x678] sm:$0xff] }
 0x100   : > { %v1423_v31 = vpop.permute.xlu1 %1422  ;;  %v1418_v39 = vpop.permute.xlu0 %1417 }
 0x101   : > { %v1464_v40 = vmul.f32 %v1423_v31, %v1239_v15  ;;  %v1463_v41 = vmul.f32 %v1418_v39, %v1238_v19  ;;  %2684 = vperm.xlu1 %5443, %v4807_v27   ;;  %2679 = vperm.xlu0 %5442, %v4806_v17   ;;  %v4855_v15 = vld [vmem:[%s7398_s5 + $0x670] sm:$0xff]  ;;  %v4809_v39 = vld [vmem:[%s7398_s5 + $0x588] sm:$0xff] }
 0x102   : > { %5209 = vmatmul.mubr.msk.bf16.gmra.mxu0 %vm391_vm0, %v1480_v29 }
 0x103   : > { %v1481_v62 = vpack.c.bf16 %v1464_v40, %v1463_v41  ;;  %v4808_v40 = vld [vmem:[%s7398_s5 + $0x580] sm:$0xff] }
 0x104   : > { %v1433_v63 = vpop.permute.xlu1 %1432  ;;  %v1428_v3 = vpop.permute.xlu0 %1427 }
 0x105   : > { %v1466_v8 = vmul.f32 %v1433_v63, %v1241_v56  ;;  %v1465_v13 = vmul.f32 %v1428_v3, %v1240_v54  ;;  %3193 = vperm.xlu1 %5443, %v4854_v60   ;;  %3188 = vperm.xlu0 %5442, %v4853_v61   ;;  %v4811_v60 = vld [vmem:[%s7398_s5 + $0x598] sm:$0xff]  ;;  %v4810_v61 = vld [vmem:[%s7398_s5 + $0x590] sm:$0xff] }
 0x106   : > { %5212 = vmatprep.mubr.msk.bf16.mxu0 %vm391_vm0, %v1481_v62 }
 0x107   : > { %v1482_v19 = vpack.c.bf16 %v1466_v8, %v1465_v13  ;;  %v3385_v8 = vsel %vm833_vm1, %v6196_v16, 0  ;;  %v6322_v13 = vld [vmem:[%s7396_s3 + $0xe] sm:$0x3]  ;;  %v6335_v16 = vpop.f32.mrf.mxu1 }
 0x108   : > { %v1802_v27 = vpop.permute.xlu1 %1801  ;;  %v1797_v17 = vpop.permute.xlu0 %1796 }
 0x109   : > { %v1955_v29 = vmul.f32 %v1802_v27, %v5932_v38  ;;  %v1954_v31 = vmul.f32 %v1797_v17, %v5930_v34  ;;  %3203 = vperm.xlu1 %5443, %v4856_v57   ;;  %3198 = vperm.xlu0 %5442, %v4855_v15   ;;  %v6340_v57 = vld [vmem:[%s7396_s3 + $0x10] sm:$0x3] }
 0x10a   : > { %5213 = vmatmul.mubr.msk.bf16.gmra.mxu0 %vm391_vm0, %v1482_v19  ;;  %v4859_v17 = vld [vmem:[%s7398_s5 + $0x690] sm:$0xff] }
 0x10b   : > { %v1986_v41 = vpack.c.bf16 %v1955_v29, %v1954_v31  ;;  %5252 = vmatprep.mubr.msk.bf16.mxu0 %vm391_vm0, %v5745_v0  ;;  %v6355_v31 = vpop.f32.mrf.mxu1 }
 0x10c   : > { %v1812_v54 = vpop.permute.xlu1 %1811  ;;  %v1807_v38 = vpop.permute.xlu0 %1806 }
 0x10d   : > { %v1957_v34 = vmul.f32 %v1812_v54, %v5948_v51  ;;  %v1956_v56 = vmul.f32 %v1807_v38, %v5950_v52  ;;  %2694 = vperm.xlu1 %5443, %v4809_v39   ;;  %2689 = vperm.xlu0 %5442, %v4808_v40   ;;  %v2866_v51 = vsel %vm833_vm1, %v6165_v47, 0  ;;  %v4812_v54 = vld [vmem:[%s7398_s5 + $0x5a0] sm:$0xff] }
 0x10e   : > { %5218 = vmatprep.mubr.msk.bf16.mxu1 %vm391_vm0, %v1986_v41  ;;  %v4813_v41 = vld [vmem:[%s7398_s5 + $0x5a8] sm:$0xff] }
 0x10f   : > { %v1987_v62 = vpack.c.bf16 %v1957_v34, %v1956_v56 }
 0x110   : > { %v1822_v0 = vpop.permute.xlu1 %1821  ;;  %v1817_v63 = vpop.permute.xlu0 %1816 }
 0x111   : > { %v1959_v52 = vmul.f32 %v1822_v0, %v5970_v1  ;;  %v1958_v3 = vmul.f32 %v1817_v63, %v5972_v2  ;;  %2704 = vperm.xlu1 %5443, %v4811_v60   ;;  %2699 = vperm.xlu0 %5442, %v4810_v61   ;;  %v4858_v1 = vld [vmem:[%s7398_s5 + $0x688] sm:$0xff]  ;;  %v4857_v2 = vld [vmem:[%s7398_s5 + $0x680] sm:$0xff]  ;;  %v4815_v60 = vld [vmem:[%s7398_s5 + $0x5b8] sm:$0xff] }
 0x112   : > { %5219 = vmatmul.mubr.msk.bf16.vlgmr.msra.gmra.mxu1 %vm391_vm0, %v1987_v62  ;;  %5253 = vmatmul.mubr.msk.bf16.vlgmr.msra.gmra.mxu0 %vm391_vm0, %v5759_v14 }
 0x113   : > { %v1988_v47 = vpack.c.bf16 %v1959_v52, %v1958_v3  ;;  %5256 = vmatprep.mubr.msk.bf16.mxu0 %vm391_vm0, %v5779_v30  ;;  %5285 = vmatpush3.bf16.msra.mxu1 %v2866_v51  ;;  %v4860_v30 = vld [vmem:[%s7398_s5 + $0x698] sm:$0xff]  ;;  %v4862_v51 = vld [vmem:[%s7398_s5 + $0x6a8] sm:$0xff]  ;;  %v4861_v52 = vld [vmem:[%s7398_s5 + $0x6a0] sm:$0xff] }
 0x114   : > { %v1832_v14 = vpop.permute.xlu1 %1831  ;;  %v1827_v15 = vpop.permute.xlu0 %1826  ;;  %5319 = vmatpush3.bf16.msra.mxu0 %v3385_v8  ;;  %5430 = vmatprep.subr.msk.bf16.mxu1 %vm833_vm1, %v6322_v13 }
 0x115   : > { %v1961_v19 = vmul.f32 %v1832_v14, %v5984_v10  ;;  %v1960_v27 = vmul.f32 %v1827_v15, %v5986_v11  ;;  %3213 = vperm.xlu1 %5443, %v4858_v1   ;;  %3208 = vperm.xlu0 %5442, %v4857_v2  }
 0x116   : > { %5222 = vmatprep.mubr.msk.bf16.mxu1 %vm391_vm0, %v1988_v47  ;;  %5431 = vmatprep.subr.msk.bf16.mxu0 %vm833_vm1, %v6340_v57  ;;  %v2264_v47 = vld [vmem:[#allocation2 + $0x98] sm:$0xff] }
 0x117   : > { %v1989_v29 = vpack.c.bf16 %v1961_v19, %v1960_v27  ;;  %v4863_v19 = vld [vmem:[%s7398_s5 + $0x6b0] sm:$0xff] }
 0x118   : > { %v1842_v10 = vpop.permute.xlu1 %1841  ;;  %v1837_v11 = vpop.permute.xlu0 %1836 }
 0x119   : > { %v1963_v39 = vmul.f32 %v1842_v10, %v5996_v22  ;;  %v1962_v40 = vmul.f32 %v1837_v11, %v5998_v23  ;;  %3223 = vperm.xlu1 %5443, %v4860_v30   ;;  %3218 = vperm.xlu0 %5442, %v4859_v17   ;;  %v6370_v22 = vpop.f32.mrf.mxu1 }
 0x11a   : > { %5223 = vmatmul.mubr.msk.bf16.gmra.mxu1 %vm391_vm0, %v1989_v29  ;;  %5257 = vmatmul.mubr.msk.bf16.gmra.mxu0 %vm391_vm0, %v5784_v35 }
 0x11b   : > { %v1990_v38 = vpack.c.bf16 %v1963_v39, %v1962_v40  ;;  %5260 = vmatprep.mubr.msk.bf16.mxu0 %vm391_vm0, %v5806_v46  ;;  %v4814_v46 = vld [vmem:[%s7398_s5 + $0x5b0] sm:$0xff]  ;;  %v6381_v62 = vpop.f32.mrf.mxu1  ;;  %v4817_v39 = vld [vmem:[%s7398_s5 + $0x5c8] sm:$0xff]  ;;  %v4816_v40 = vld [vmem:[%s7398_s5 + $0x5c0] sm:$0xff] }
 0x11c   : > { %v1852_v23 = vpop.permute.xlu1 %1851  ;;  %v1847_v34 = vpop.permute.xlu0 %1846 }
 0x11d   : > { %v1965_v56 = vmul.f32 %v1852_v23, %v6010_v32  ;;  %v1964_v35 = vmul.f32 %v1847_v34, %v6012_v33  ;;  %2714 = vperm.xlu1 %5443, %v4813_v41   ;;  %2709 = vperm.xlu0 %5442, %v4812_v54   ;;  %v6396_v8 = vpop.f32.mrf.mxu1  ;;  %v2267_v54 = vld [vmem:[#allocation2 + $0xb0] sm:$0xff]  ;;  %v2268_v34 = vld [vmem:[#allocation2 + $0xb8] sm:$0xff] }
 0x11e   : > { %5226 = vmatprep.mubr.msk.bf16.mxu1 %vm391_vm0, %v1990_v38 }
 0x11f   : > { %v1991_v61 = vpack.c.bf16 %v1965_v56, %v1964_v35  ;;  %v6407_v29 = vpop.f32.mrf.mxu1  ;;  %v2269_v56 = vld [vmem:[#allocation2 + $0xc0] sm:$0xff] }
 0x120   : > { %v1862_v0 = vpop.permute.xlu1 %1861  ;;  %v1857_v63 = vpop.permute.xlu0 %1856 }
 0x121   : > { %v1967_v32 = vmul.f32 %v1862_v0, %v6022_v44  ;;  %v1966_v33 = vmul.f32 %v1857_v63, %v6024_v45  ;;  %2724 = vperm.xlu1 %5443, %v4815_v60   ;;  %2719 = vperm.xlu0 %5442, %v4814_v46   ;;  %v2262_v44 = vld [vmem:[#allocation2 + $0x88] sm:$0xff]  ;;  %v2263_v45 = vld [vmem:[#allocation2 + $0x90] sm:$0xff]  ;;  %v4819_v46 = vld [vmem:[%s7398_s5 + $0x5d8] sm:$0xff] }
 0x122   : > { %5227 = vmatmul.mubr.msk.bf16.gmra.mxu1 %vm391_vm0, %v1991_v61  ;;  %5261 = vmatmul.mubr.msk.bf16.gmra.mxu0 %vm391_vm0, %v5808_v48  ;;  %v2265_v48 = vld [vmem:[#allocation2 + $0xa0] sm:$0xff]  ;;  %v2287_v27 = vpack.c.bf16 %v2263_v45, %v2262_v44  ;;  %v4818_v61 = vld [vmem:[%s7398_s5 + $0x5d0] sm:$0xff] }
 0x123   : > { %v1992_v3 = vpack.c.bf16 %v1967_v32, %v1966_v33  ;;  %5264 = vmatprep.mubr.msk.bf16.mxu0 %vm391_vm0, %v5827_v55  ;;  %v4864_v55 = vld [vmem:[%s7398_s5 + $0x6b8] sm:$0xff]  ;;  %v2288_v17 = vpack.c.bf16 %v2265_v48, %v2264_v47  ;;  %v2290_v32 = vpack.c.bf16 %v2269_v56, %v2268_v34  ;;  %v4865_v44 = vld [vmem:[%s7398_s5 + $0x6c0] sm:$0xff] }
 0x124   : > { %v1872_v1 = vpop.permute.xlu1 %1871  ;;  %v1867_v2 = vpop.permute.xlu0 %1866  ;;  %v2272_v48 = vld [vmem:[#allocation2 + $0xd8] sm:$0xff]  ;;  %v2277_v34 = vld [vmem:[#allocation2 + $0x100] sm:$0xff] }
 0x125   : > { %v1969_v14 = vmul.f32 %v1872_v1, %v6032_v58  ;;  %v1968_v15 = vmul.f32 %v1867_v2, %v6035_v59  ;;  %3233 = vperm.xlu1 %5443, %v4862_v51   ;;  %3228 = vperm.xlu0 %5442, %v4861_v52   ;;  %v2271_v1 = vld [vmem:[#allocation2 + $0xd0] sm:$0xff] }
 0x126   : > { %5230 = vmatprep.mubr.msk.bf16.mxu1 %vm391_vm0, %v1992_v3  ;;  %v4866_v3 = vld [vmem:[%s7398_s5 + $0x6c8] sm:$0xff] }
 0x127   : > { %v1993_v30 = vpack.c.bf16 %v1969_v14, %v1968_v15  ;;  %v2273_v14 = vld [vmem:[#allocation2 + $0xe0] sm:$0xff] }
 0x128   : > { %v1882_v58 = vpop.permute.xlu1 %1881  ;;  %v1877_v10 = vpop.permute.xlu0 %1876 }
 0x129   : > { %v1971_v59 = vmul.f32 %v1882_v58, %v6045_v6  ;;  %v1970_v11 = vmul.f32 %v1877_v10, %v6047_v7  ;;  %3243 = vperm.xlu1 %5443, %v4864_v55   ;;  %3238 = vperm.xlu0 %5442, %v4863_v19   ;;  %v2266_v6 = vld [vmem:[#allocation2 + $0xa8] sm:$0xff]  ;;  %v6420_v7 = vpop.f32.mrf.mxu1  ;;  %v4868_v19 = vld [vmem:[%s7398_s5 + $0x6d8] sm:$0xff]  ;;  %v2292_v58 = vpack.c.bf16 %v2273_v14, %v2272_v48 }
 0x12a   : > { %5231 = vmatmul.mubr.msk.bf16.gmra.mxu1 %vm391_vm0, %v1993_v30  ;;  %5265 = vmatmul.mubr.msk.bf16.gmra.mxu0 %vm391_vm0, %v2287_v27  ;;  %v2289_v0 = vpack.c.bf16 %v2267_v54, %v2266_v6  ;;  %v4867_v27 = vld [vmem:[%s7398_s5 + $0x6d0] sm:$0xff]  ;;  %v4872_v14 = vld [vmem:[%s7398_s5 + $0x6f8] sm:$0xff] }
 0x12b   : > { %v1994_v41 = vpack.c.bf16 %v1971_v59, %v1970_v11  ;;  %5268 = vmatprep.mubr.msk.bf16.mxu0 %vm391_vm0, %v2288_v17  ;;  %v6431_v33 = vpop.f32.mrf.mxu1  ;;  %v2275_v6 = vld [vmem:[#allocation2 + $0xf0] sm:$0xff] }
 0x12c   : > { %v1892_v38 = vpop.permute.xlu1 %1891  ;;  %v1887_v23 = vpop.permute.xlu0 %1886 }
 0x12d   : > { %v1973_v35 = vmul.f32 %v1892_v38, %v6058_v20  ;;  %v1972_v60 = vmul.f32 %v1887_v23, %v6061_v21  ;;  %2734 = vperm.xlu1 %5443, %v4817_v39   ;;  %2729 = vperm.xlu0 %5442, %v4816_v40   ;;  %v4821_v39 = vld [vmem:[%s7398_s5 + $0x5e8] sm:$0xff]  ;;  %v4820_v40 = vld [vmem:[%s7398_s5 + $0x5e0] sm:$0xff]  ;;  %v2276_v23 = vld [vmem:[#allocation2 + $0xf8] sm:$0xff] }
 0x12e   : > { %5234 = vmatprep.mubr.msk.bf16.mxu1 %vm391_vm0, %v1994_v41 }
 0x12f   : > { %v1995_v63 = vpack.c.bf16 %v1973_v35, %v1972_v60  ;;  %v4823_v60 = vld [vmem:[%s7398_s5 + $0x5f8] sm:$0xff] }
 0x130   : > { %v1902_v20 = vpop.permute.xlu1 %1901  ;;  %v1897_v51 = vpop.permute.xlu0 %1896 }
 0x131   : > { %v1975_v21 = vmul.f32 %v1902_v20, %v6071_v36  ;;  %v1974_v52 = vmul.f32 %v1897_v51, %v6073_v37  ;;  %2744 = vperm.xlu1 %5443, %v4819_v46   ;;  %2739 = vperm.xlu0 %5442, %v4818_v61   ;;  %v2270_v36 = vld [vmem:[#allocation2 + $0xc8] sm:$0xff]  ;;  %v6444_v37 = vpop.f32.mrf.mxu1  ;;  %v4822_v46 = vld [vmem:[%s7398_s5 + $0x5f0] sm:$0xff] }
 0x132   : > { %5235 = vmatmul.mubr.msk.bf16.gmra.mxu1 %vm391_vm0, %v1995_v63  ;;  %5269 = vmatmul.mubr.msk.bf16.gmra.mxu0 %vm391_vm0, %v2289_v0  ;;  %v2291_v30 = vpack.c.bf16 %v2271_v1, %v2270_v36  ;;  %v2279_v36 = vld [vmem:[#allocation2 + $0x110] sm:$0xff] }
 0x133   : > { %v1996_v45 = vpack.c.bf16 %v1975_v21, %v1974_v52  ;;  %5272 = vmatprep.mubr.msk.bf16.mxu0 %vm391_vm0, %v2290_v32  ;;  %v6455_v10 = vpop.f32.mrf.mxu1  ;;  %v2294_v32 = vpack.c.bf16 %v2277_v34, %v2276_v23  ;;  %v6483_v21 = vld [vmem:[#allocation2 + $0x107] sm:$0xff]  ;;  %v6487_v52 = vld [vmem:[#allocation2 + $0x10f] sm:$0xff] }
 0x134   : > { %v1912_v2 = vpop.permute.xlu1 %1911  ;;  %v1907_v47 = vpop.permute.xlu0 %1906 }
 0x135   : > { %v1977_v15 = vmul.f32 %v1912_v2, %v6084_v50  ;;  %v1976_v55 = vmul.f32 %v1907_v47, %v6087_v53  ;;  %3253 = vperm.xlu1 %5443, %v4866_v3   ;;  %3248 = vperm.xlu0 %5442, %v4865_v44   ;;  %v4870_v3 = vld [vmem:[%s7398_s5 + $0x6e8] sm:$0xff] }
 0x136   : > { %5238 = vmatprep.mubr.msk.bf16.mxu1 %vm391_vm0, %v1996_v45  ;;  %v2278_v45 = vld [vmem:[#allocation2 + $0x108] sm:$0xff] }
 0x137   : > { %v1997_v17 = vpack.c.bf16 %v1977_v15, %v1976_v55  ;;  %v4871_v15 = vld [vmem:[%s7398_s5 + $0x6f0] sm:$0xff]  ;;  %v2295_v55 = vpack.c.bf16 %v2279_v36, %v2278_v45  ;;  %v4914_v45 = vld [vmem:[%s7398_s5 + $0x838] sm:$0xff] }
 0x138   : > { %v1922_v50 = vpop.permute.xlu1 %1921  ;;  %v1917_v59 = vpop.permute.xlu0 %1916  ;;  %v4913_v36 = vld [vmem:[%s7398_s5 + $0x830] sm:$0xff] }
 0x139   : > { %v1979_v53 = vmul.f32 %v1922_v50, %v6097_v4  ;;  %v1978_v11 = vmul.f32 %v1917_v59, %v6099_v5  ;;  %3263 = vperm.xlu1 %5443, %v4868_v19   ;;  %3258 = vperm.xlu0 %5442, %v4867_v27   ;;  %v2274_v4 = vld [vmem:[#allocation2 + $0xe8] sm:$0xff]  ;;  %v6468_v5 = vpop.f32.mrf.mxu1 }
 0x13a   : > { %5239 = vmatmul.mubr.msk.bf16.gmra.mxu1 %vm391_vm0, %v1997_v17  ;;  %5273 = vmatmul.mubr.msk.bf16.gmra.mxu0 %vm391_vm0, %v2291_v30  ;;  %v2293_v61 = vpack.c.bf16 %v2275_v6, %v2274_v4  ;;  %v4908_v59 = vld [vmem:[%s7398_s5 + $0x808] sm:$0xff] }
 0x13b   : > { %v1998_v41 = vpack.c.bf16 %v1979_v53, %v1978_v11  ;;  %5276 = vmatprep.mubr.msk.bf16.mxu0 %vm391_vm0, %v2292_v58  ;;  %v6479_v63 = vpop.f32.mrf.mxu1  ;;  %v4907_v53 = vld [vmem:[%s7398_s5 + $0x800] sm:$0xff]  ;;  %v3062_v4 = vld [vmem:[#allocation2 + $0x2f] sm:$0xff] }
 0x13c   : > { %v1932_v54 = vpop.permute.xlu1 %1931  ;;  %v1927_v38 = vpop.permute.xlu0 %1926  ;;  %v3061_v6 = vld [vmem:[#allocation2 + $0x27] sm:$0xff] }
 0x13d   : > { %v1981_v56 = vmul.f32 %v1932_v54, %v6112_v26  ;;  %v1980_v35 = vmul.f32 %v1927_v38, %v6116_v28  ;;  %2754 = vperm.xlu1 %5443, %v4821_v39   ;;  %2749 = vperm.xlu0 %5442, %v4820_v40   ;;  %v4910_v54 = vld [vmem:[%s7398_s5 + $0x818] sm:$0xff]  ;;  %v4909_v38 = vld [vmem:[%s7398_s5 + $0x810] sm:$0xff] }
 0x13e   : > { %5242 = vmatprep.mubr.msk.bf16.mxu1 %vm391_vm0, %v1998_v41 }
 0x13f   : > { %v1999_v0 = vpack.c.bf16 %v1981_v56, %v1980_v35 }
 0x140   : > { %v1942_v26 = vpop.permute.xlu1 %1941  ;;  %v1937_v20 = vpop.permute.xlu0 %1936 }
 0x141   : > { %v1983_v28 = vmul.f32 %v1942_v26, %v6127_v42  ;;  %v1982_v51 = vmul.f32 %v1937_v20, %v6129_v43  ;;  %2764 = vperm.xlu1 %5443, %v4823_v60   ;;  %2759 = vperm.xlu0 %5442, %v4822_v46   ;;  %v4869_v42 = vld [vmem:[%s7398_s5 + $0x6e0] sm:$0xff]  ;;  %v6495_v43 = vpop.f32.mrf.mxu1  ;;  %v6541_v20 = vpop.f32.mrf.mxu0 }
 0x142   : > { %5243 = vmatmul.mubr.msk.bf16.gmra.mxu1 %vm391_vm0, %v1999_v0  ;;  %5277 = vmatmul.mubr.msk.bf16.gmra.mxu0 %vm391_vm0, %v2293_v61  ;;  %v3064_v46 = vld [vmem:[#allocation2 + $0x3f] sm:$0xff]  ;;  %v3063_v61 = vld [vmem:[#allocation2 + $0x37] sm:$0xff]  ;;  %v4912_v0 = vld [vmem:[%s7398_s5 + $0x828] sm:$0xff] }
 0x143   : > { %v2000_v44 = vpack.c.bf16 %v1983_v28, %v1982_v51  ;;  %5280 = vmatprep.mubr.msk.bf16.mxu0 %vm391_vm0, %v2294_v32  ;;  %v6507_v27 = vpop.f32.mrf.mxu1  ;;  %v4911_v32 = vld [vmem:[%s7398_s5 + $0x820] sm:$0xff] }
 0x144   : > { %v1952_v1 = vpop.permute.xlu1 %1951  ;;  %v1947_v2 = vpop.permute.xlu0 %1946 }
 0x145   : > { %v1985_v47 = vmul.f32 %v1952_v1, %v6487_v52  ;;  %v1984_v48 = vmul.f32 %v1947_v2, %v6483_v21  ;;  %3273 = vperm.xlu1 %5443, %v4870_v3   ;;  %3268 = vperm.xlu0 %5442, %v4869_v42   ;;  %v6519_v39 = vpop.f32.mrf.mxu1  ;;  %v6554_v2 = vpop.f32.mrf.mxu0 }
 0x146   : > { %5246 = vmatprep.mubr.msk.bf16.mxu1 %vm391_vm0, %v2000_v44 }
 0x147   : > { %v2001_v19 = vpack.c.bf16 %v1985_v47, %v1984_v48  ;;  %v6530_v34 = vpop.f32.mrf.mxu1 }
 0x148   : > { %v2615_v30 = vpop.permute.xlu1 %2614  ;;  %v2610_v17 = vpop.permute.xlu0 %2609 }
 0x149   : > { %v2768_v58 = vmul.f32 %v2615_v30, %v6147_v24  ;;  %v2767_v50 = vmul.f32 %v2610_v17, %v6149_v25  ;;  %3283 = vperm.xlu1 %5443, %v4872_v14   ;;  %3278 = vperm.xlu0 %5442, %v4871_v15   ;;  %v4198_v15 = vsel %vm833_vm1, %v6340_v57, 0  ;;  %v6562_v30 = vld [vmem:[#allocation2 + $0x51] sm:$0xff]  ;;  %v6565_v17 = vld [vmem:[#allocation2 + $0x49] sm:$0xff]  ;;  %v4915_v57 = vld [vmem:[%s7398_s5 + $0x840] sm:$0xff] }
 0x14a   : > { %5247 = vmatmul.mubr.msk.bf16.gmra.mxu1 %vm391_vm0, %v2001_v19  ;;  %5281 = vmatmul.mubr.msk.bf16.gmra.mxu0 %vm391_vm0, %v2295_v55 }
 0x14b   : > { %v2799_v11 = vpack.c.bf16 %v2768_v58, %v2767_v50  ;;  %v4916_v58 = vld [vmem:[%s7398_s5 + $0x848] sm:$0xff]  ;;  %v6573_v50 = vpop.f32.mrf.mxu0 }
 0x14c   : > { %v2625_v24 = vpop.permute.xlu1 %2624  ;;  %v2620_v40 = vpop.permute.xlu0 %2619 }
 0x14d   : > { %v2770_v25 = vmul.f32 %v2625_v24, %v6160_v18  ;;  %v2769_v41 = vmul.f32 %v2620_v40, %v6168_v49  ;;  %3946 = vperm.xlu1 %5443, %v4908_v59   ;;  %3941 = vperm.xlu0 %5442, %v4907_v53   ;;  %v3679_v49 = vsel %vm833_vm1, %v6322_v13, 0  ;;  %v3066_v40 = vld [vmem:[#allocation2 + $0x4f] sm:$0xff] }
 0x14e   : > { %5286 = vmatprep.mubr.msk.bf16.mxu1 %vm391_vm0, %v2799_v11 }
 0x14f   : > { %v2800_v23 = vpack.c.bf16 %v2770_v25, %v2769_v41  ;;  %v3065_v25 = vld [vmem:[#allocation2 + $0x47] sm:$0xff]  ;;  %v4918_v41 = vld [vmem:[%s7398_s5 + $0x858] sm:$0xff] }
 0x150   : > { %v3134_v18 = vpop.permute.xlu1 %3133  ;;  %v3129_v56 = vpop.permute.xlu0 %3128 }
 0x151   : > { %v3287_v35 = vmul.f32 %v3134_v18, %v3062_v4  ;;  %v3286_v60 = vmul.f32 %v3129_v56, %v3061_v6  ;;  %3956 = vperm.xlu1 %5443, %v4910_v54   ;;  %3951 = vperm.xlu0 %5442, %v4909_v38   ;;  %v4917_v4 = vld [vmem:[%s7398_s5 + $0x850] sm:$0xff]  ;;  %v6586_v6 = vpop.f32.mrf.mxu0 }
 0x152   : > { %5287 = vmatmul.mubr.msk.bf16.vlgmr.msra.gmra.mxu1 %vm391_vm0, %v2800_v23 }
 0x153   : > { %v3318_v26 = vpack.c.bf16 %v3287_v35, %v3286_v60  ;;  %v6543_v13 = vpop.f32.mrf.mxu1  ;;  %5353 = vmatpush3.bf16.msra.mxu1 %v3679_v49  ;;  %v3068_v35 = vld [vmem:[#allocation2 + $0x5f] sm:$0xff]  ;;  %v3067_v60 = vld [vmem:[#allocation2 + $0x57] sm:$0xff] }
 0x154   : > { %v3144_v28 = vpop.permute.xlu1 %3143  ;;  %v3139_v51 = vpop.permute.xlu0 %3138 }
 0x155   : > { %v3289_v3 = vmul.f32 %v3144_v28, %v3064_v46  ;;  %v3288_v42 = vmul.f32 %v3139_v51, %v3063_v61  ;;  %v6545_v44 = vpop.f32.mrf.mxu1  ;;  %3966 = vperm.xlu1 %5443, %v4912_v0   ;;  %3961 = vperm.xlu0 %5442, %v4911_v32   ;;  %v4920_v46 = vld [vmem:[%s7398_s5 + $0x868] sm:$0xff]  ;;  %v4919_v61 = vld [vmem:[%s7398_s5 + $0x860] sm:$0xff]  ;;  %v6597_v0 = vpop.f32.mrf.mxu0 }
 0x156   : > { %5320 = vmatprep.mubr.msk.bf16.mxu0 %vm391_vm0, %v3318_v26 }
 0x157   : > { %v3319_v1 = vpack.c.bf16 %v3289_v3, %v3288_v42  ;;  %v6556_v47 = vpop.f32.mrf.mxu1 }
 0x158   : > { %v2635_v48 = vpop.permute.xlu1 %2634  ;;  %v2630_v14 = vpop.permute.xlu0 %2629 }
 0x159   : > { %v2772_v55 = vmul.f32 %v2635_v48, %v6182_v9  ;;  %v2771_v19 = vmul.f32 %v2630_v14, %v6185_v12  ;;  %3976 = vperm.xlu1 %5443, %v4914_v45   ;;  %3971 = vperm.xlu0 %5442, %v4913_v36   ;;  %v6575_v12 = vpop.f32.mrf.mxu1  ;;  %v6601_v45 = vld [vmem:[#allocation2 + $0x61] sm:$0xff]  ;;  %v6604_v36 = vld [vmem:[#allocation2 + $0x59] sm:$0xff]  ;;  %v4921_v48 = vld [vmem:[%s7398_s5 + $0x870] sm:$0xff]  ;;  %v6612_v14 = vpop.f32.mrf.mxu0 }
 0x15a   : > { %5321 = vmatmul.mubr.msk.bf16.vlgmr.msra.gmra.mxu0 %vm391_vm0, %v3319_v1  ;;  %7423 = vst [vmem:[#allocation3_spill] sm:$0xff] %v6601_v45  ;;  %7424 = vst [vmem:[#allocation4_spill] sm:$0xff] %v6604_v36  ;;  %v4922_v1 = vld [vmem:[%s7398_s5 + $0x878] sm:$0xff] }
 0x15b   : > { %v2801_v9 = vpack.c.bf16 %v2772_v55, %v2771_v19  ;;  %5387 = vmatpush3.bf16.msra.mxu0 %v4198_v15  ;;  %v6588_v54 = vpop.f32.mrf.mxu1 }
 0x15c   : > { %v2645_v59 = vpop.permute.xlu1 %2644  ;;  %v2640_v53 = vpop.permute.xlu0 %2639 }
 0x15d   : > { %v2774_v11 = vmul.f32 %v2645_v59, %v6562_v30  ;;  %v2773_v24 = vmul.f32 %v2640_v53, %v6565_v17  ;;  %3986 = vperm.xlu1 %5443, %v4916_v58   ;;  %3981 = vperm.xlu0 %5442, %v4915_v57   ;;  %v6599_v32 = vpop.f32.mrf.mxu1  ;;  %v6618_v59 = vld [vmem:[#allocation2 + $0x71] sm:$0xff]  ;;  %v6621_v53 = vld [vmem:[#allocation2 + $0x69] sm:$0xff] }
 0x15e   : > { %5290 = vmatprep.mubr.msk.bf16.mxu1 %vm391_vm0, %v2801_v9  ;;  %7425 = vst [vmem:[#allocation5_spill] sm:$0xff] %v6618_v59  ;;  %7426 = vst [vmem:[#allocation6_spill] sm:$0xff] %v6621_v53 }
 0x15f   : > { %v2802_v38 = vpack.c.bf16 %v2774_v11, %v2773_v24  ;;  %v6614_v15 = vpop.f32.mrf.mxu1  ;;  %v4924_v11 = vld [vmem:[%s7398_s5 + $0x888] sm:$0xff]  ;;  %v4923_v24 = vld [vmem:[%s7398_s5 + $0x880] sm:$0xff] }
 0x160   : > { %v3154_v23 = vpop.permute.xlu1 %3153  ;;  %v3149_v18 = vpop.permute.xlu0 %3148 }
 0x161   : > { %v3291_v56 = vmul.f32 %v3154_v23, %v3066_v40  ;;  %v3290_v49 = vmul.f32 %v3149_v18, %v3065_v25  ;;  %3996 = vperm.xlu1 %5443, %v4918_v41   ;;  %3991 = vperm.xlu0 %5442, %v4917_v4   ;;  %v6629_v40 = vpop.f32.mrf.mxu0  ;;  %v6631_v25 = vpop.f32.mrf.mxu1 }
 0x162   : > { %5291 = vmatmul.mubr.msk.bf16.gmra.mxu1 %vm391_vm0, %v2802_v38  ;;  %7427 = vst [vmem:[#allocation7_spill] sm:$0xff] %v6631_v25 }
 0x163   : > { %v3320_v26 = vpack.c.bf16 %v3291_v56, %v3290_v49  ;;  %v3070_v56 = vld [vmem:[#allocation2 + $0x6f] sm:$0xff]  ;;  %v3069_v49 = vld [vmem:[#allocation2 + $0x67] sm:$0xff] }
 0x164   : > { %v3164_v28 = vpop.permute.xlu1 %3163  ;;  %v3159_v51 = vpop.permute.xlu0 %3158 }
 0x165   : > { %v3293_v3 = vmul.f32 %v3164_v28, %v3068_v35  ;;  %v3292_v42 = vmul.f32 %v3159_v51, %v3067_v60  ;;  %4006 = vperm.xlu1 %5443, %v4920_v46   ;;  %4001 = vperm.xlu0 %5442, %v4919_v61   ;;  %v4926_v35 = vld [vmem:[%s7398_s5 + $0x898] sm:$0xff]  ;;  %v4925_v60 = vld [vmem:[%s7398_s5 + $0x890] sm:$0xff]  ;;  %v6642_v46 = vpop.f32.mrf.mxu0  ;;  %v6644_v61 = vpop.f32.mrf.mxu1 }
 0x166   : > { %5324 = vmatprep.mubr.msk.bf16.mxu0 %vm391_vm0, %v3320_v26  ;;  %7428 = vst [vmem:[#allocation8_spill] sm:$0xff] %v6642_v46 }
 0x167   : > { %v3321_v55 = vpack.c.bf16 %v3293_v3, %v3292_v42 }
 0x168   : > { %v2655_v19 = vpop.permute.xlu1 %2654  ;;  %v2650_v58 = vpop.permute.xlu0 %2649 }
 0x169   : > { %v2776_v57 = vmul.f32 %v2655_v19, %v6601_v45  ;;  %v2775_v9 = vmul.f32 %v2650_v58, %v6604_v36  ;;  %4016 = vperm.xlu1 %5443, %v4922_v1   ;;  %4011 = vperm.xlu0 %5442, %v4921_v48   ;;  %v3072_v1 = vld [vmem:[#allocation2 + $0x7f] sm:$0xff]  ;;  %v3071_v48 = vld [vmem:[#allocation2 + $0x77] sm:$0xff]  ;;  %v6653_v58 = vpop.f32.mrf.mxu0 }
 0x16a   : > { %5325 = vmatmul.mubr.msk.bf16.gmra.mxu0 %vm391_vm0, %v3321_v55  ;;  %v4928_v55 = vld [vmem:[%s7398_s5 + $0x8a8] sm:$0xff]  ;;  %v4927_v19 = vld [vmem:[%s7398_s5 + $0x8a0] sm:$0xff] }
 0x16b   : > { %v2803_v41 = vpack.c.bf16 %v2776_v57, %v2775_v9  ;;  %v6655_v57 = vpop.f32.mrf.mxu1 }
 0x16c   : > { %v2665_v4 = vpop.permute.xlu1 %2664  ;;  %v2660_v38 = vpop.permute.xlu0 %2659 }
 0x16d   : > { %v2778_v23 = vmul.f32 %v2665_v4, %v6618_v59  ;;  %v2777_v18 = vmul.f32 %v2660_v38, %v6621_v53  ;;  %4026 = vperm.xlu1 %5443, %v4924_v11   ;;  %4021 = vperm.xlu0 %5442, %v4923_v24   ;;  %v6657_v38 = vld [vmem:[#allocation2 + $0x81] sm:$0xff] }
 0x16e   : > { %5294 = vmatprep.mubr.msk.bf16.mxu1 %vm391_vm0, %v2803_v41  ;;  %7429 = vst [vmem:[#allocation9_spill] sm:$0xff] %v6657_v38 }
 0x16f   : > { %v2804_v26 = vpack.c.bf16 %v2778_v23, %v2777_v18  ;;  %v6660_v23 = vld [vmem:[#allocation2 + $0x79] sm:$0xff] }
 0x170   : > { %v3174_v28 = vpop.permute.xlu1 %3173  ;;  %v3169_v51 = vpop.permute.xlu0 %3168  ;;  %7430 = vst [vmem:[#allocation10_spill] sm:$0xff] %v6660_v23  ;;  %v4930_v18 = vld [vmem:[%s7398_s5 + $0x8b8] sm:$0xff] }
 0x171   : > { %v3295_v3 = vmul.f32 %v3174_v28, %v3070_v56  ;;  %v3294_v42 = vmul.f32 %v3169_v51, %v3069_v49  ;;  %4036 = vperm.xlu1 %5443, %v4926_v35   ;;  %4031 = vperm.xlu0 %5442, %v4925_v60   ;;  %v4929_v56 = vld [vmem:[%s7398_s5 + $0x8b0] sm:$0xff]  ;;  %v6668_v49 = vpop.f32.mrf.mxu0  ;;  %v6670_v35 = vpop.f32.mrf.mxu1 }
 0x172   : > { %5295 = vmatmul.mubr.msk.bf16.gmra.mxu1 %vm391_vm0, %v2804_v26 }
 0x173   : > { %v3322_v9 = vpack.c.bf16 %v3295_v3, %v3294_v42  ;;  %v6674_v42 = vld [vmem:[#allocation2 + $0x91] sm:$0xff] }
 0x174   : > { %v3184_v11 = vpop.permute.xlu1 %3183  ;;  %v3179_v24 = vpop.permute.xlu0 %3178  ;;  %7431 = vst [vmem:[#allocation11_spill] sm:$0xff] %v6674_v42 }
 0x175   : > { %v3297_v41 = vmul.f32 %v3184_v11, %v3072_v1  ;;  %v3296_v4 = vmul.f32 %v3179_v24, %v3071_v48  ;;  %4046 = vperm.xlu1 %5443, %v4928_v55   ;;  %4041 = vperm.xlu0 %5442, %v4927_v19   ;;  %v6677_v1 = vld [vmem:[#allocation2 + $0x89] sm:$0xff]  ;;  %v4931_v55 = vld [vmem:[%s7398_s5 + $0x8c0] sm:$0xff]  ;;  %v6685_v19 = vpop.f32.mrf.mxu0 }
 0x176   : > { %5328 = vmatprep.mubr.msk.bf16.mxu0 %vm391_vm0, %v3322_v9  ;;  %7432 = vst [vmem:[#allocation12_spill] sm:$0xff] %v6677_v1  ;;  %v4932_v48 = vld [vmem:[%s7398_s5 + $0x8c8] sm:$0xff]  ;;  %v6687_v9 = vpop.f32.mrf.mxu1 }
 0x177   : > { %v3323_v60 = vpack.c.bf16 %v3297_v41, %v3296_v4  ;;  %7433 = vst [vmem:[#allocation13_spill] sm:$0xff] %v6687_v9 }
 0x178   : > { %v2675_v26 = vpop.permute.xlu1 %2674  ;;  %v2670_v28 = vpop.permute.xlu0 %2669 }
 0x179   : > { %v2780_v51 = vmul.f32 %v2675_v26, %v6657_v38  ;;  %v2779_v3 = vmul.f32 %v2670_v28, %v6660_v23  ;;  %4056 = vperm.xlu1 %5443, %v4930_v18   ;;  %4051 = vperm.xlu0 %5442, %v4929_v56   ;;  %v3074_v56 = vld [vmem:[#allocation2 + $0x8f] sm:$0xff]  ;;  %v4934_v26 = vld [vmem:[%s7398_s5 + $0x8d8] sm:$0xff] }
 0x17a   : > { %5329 = vmatmul.mubr.msk.bf16.gmra.mxu0 %vm391_vm0, %v3323_v60  ;;  %v3073_v60 = vld [vmem:[#allocation2 + $0x87] sm:$0xff]  ;;  %v4933_v28 = vld [vmem:[%s7398_s5 + $0x8d0] sm:$0xff] }
 0x17b   : > { %v2805_v11 = vpack.c.bf16 %v2780_v51, %v2779_v3  ;;  %v6698_v51 = vpop.f32.mrf.mxu0  ;;  %v6700_v3 = vpop.f32.mrf.mxu1  ;;  %v6733_v38 = vld [vmem:[#allocation2 + $0xa9] sm:$0xff] }
 0x17c   : > { %v2685_v24 = vpop.permute.xlu1 %2684  ;;  %v2680_v41 = vpop.permute.xlu0 %2679  ;;  %7434 = vst [vmem:[#allocation14_spill] sm:$0xff] %v6698_v51  ;;  %v4935_v51 = vld [vmem:[%s7398_s5 + $0x8e0] sm:$0xff]  ;;  %7438 = vst [vmem:[#allocation18_spill] sm:$0xff] %v6733_v38 }
 0x17d   : > { %v2782_v4 = vmul.f32 %v2685_v24, %v6674_v42  ;;  %v2781_v18 = vmul.f32 %v2680_v41, %v6677_v1  ;;  %4066 = vperm.xlu1 %5443, %v4932_v48   ;;  %4061 = vperm.xlu0 %5442, %v4931_v55   ;;  %v3075_v1 = vld [vmem:[#allocation2 + $0x97] sm:$0xff]  ;;  %v4936_v42 = vld [vmem:[%s7398_s5 + $0x8e8] sm:$0xff]  ;;  %v6709_v23 = vpop.f32.mrf.mxu0 }
 0x17e   : > { %5298 = vmatprep.mubr.msk.bf16.mxu1 %vm391_vm0, %v2805_v11  ;;  %v3076_v11 = vld [vmem:[#allocation2 + $0x9f] sm:$0xff] }
 0x17f   : > { %v2806_v24 = vpack.c.bf16 %v2782_v4, %v2781_v18  ;;  %v6711_v4 = vpop.f32.mrf.mxu1 }
 0x180   : > { %v3194_v41 = vpop.permute.xlu1 %3193  ;;  %v3189_v48 = vpop.permute.xlu0 %3188 }
 0x181   : > { %v3299_v55 = vmul.f32 %v3194_v41, %v3074_v56  ;;  %v3298_v9 = vmul.f32 %v3189_v48, %v3073_v60  ;;  %4076 = vperm.xlu1 %5443, %v4934_v26   ;;  %4071 = vperm.xlu0 %5442, %v4933_v28   ;;  %v6716_v41 = vld [vmem:[#allocation2 + $0x99] sm:$0xff] }
 0x182   : > { %5299 = vmatmul.mubr.msk.bf16.gmra.mxu1 %vm391_vm0, %v2806_v24  ;;  %v6713_v24 = vld [vmem:[#allocation2 + $0xa1] sm:$0xff]  ;;  %7436 = vst [vmem:[#allocation16_spill] sm:$0xff] %v6716_v41  ;;  %v4938_v48 = vld [vmem:[%s7398_s5 + $0x8f8] sm:$0xff] }
 0x183   : > { %v3324_v18 = vpack.c.bf16 %v3299_v55, %v3298_v9  ;;  %7435 = vst [vmem:[#allocation15_spill] sm:$0xff] %v6713_v24  ;;  %v4937_v9 = vld [vmem:[%s7398_s5 + $0x8f0] sm:$0xff]  ;;  %v6724_v55 = vpop.f32.mrf.mxu0 }
 0x184   : > { %v3204_v56 = vpop.permute.xlu1 %3203  ;;  %v3199_v60 = vpop.permute.xlu0 %3198 }
 0x185   : > { %v3301_v26 = vmul.f32 %v3204_v56, %v3076_v11  ;;  %v3300_v28 = vmul.f32 %v3199_v60, %v3075_v1  ;;  %4086 = vperm.xlu1 %5443, %v4936_v42   ;;  %4081 = vperm.xlu0 %5442, %v4935_v51   ;;  %v6726_v11 = vpop.f32.mrf.mxu1  ;;  %v6731_v60 = vld [vmem:[#allocation2 + $0xb1] sm:$0xff]  ;;  %v6735_v25 = vpop.f32.mrf.mxu0 }
 0x186   : > { %5332 = vmatprep.mubr.msk.bf16.mxu0 %vm391_vm0, %v3324_v18  ;;  %7437 = vst [vmem:[#allocation17_spill] sm:$0xff] %v6731_v60 }
 0x187   : > { %v3325_v42 = vpack.c.bf16 %v3301_v26, %v3300_v28  ;;  %v6737_v46 = vpop.f32.mrf.mxu1 }
 0x188   : > { %v2695_v1 = vpop.permute.xlu1 %2694  ;;  %v2690_v51 = vpop.permute.xlu0 %2689  ;;  %7439 = vst [vmem:[#allocation19_spill] sm:$0xff] %v6737_v46 }
 0x189   : > { %v2784_v56 = vmul.f32 %v2695_v1, %v6713_v24  ;;  %v2783_v18 = vmul.f32 %v2690_v51, %v6716_v41  ;;  %4096 = vperm.xlu1 %5443, %v4938_v48   ;;  %4091 = vperm.xlu0 %5442, %v4937_v9   ;;  %v3078_v48 = vld [vmem:[#allocation2 + $0xaf] sm:$0xff]  ;;  %v3077_v9 = vld [vmem:[#allocation2 + $0xa7] sm:$0xff]  ;;  %v6744_v51 = vpop.f32.mrf.mxu1 }
 0x18a   : > { %5333 = vmatmul.mubr.msk.bf16.gmra.mxu0 %vm391_vm0, %v3325_v42  ;;  %v6742_v42 = vpop.f32.mrf.mxu0 }
 0x18b   : > { %v2807_v53 = vpack.c.bf16 %v2784_v56, %v2783_v18  ;;  %7440 = vst [vmem:[#allocation20_spill] sm:$0xff] %v6742_v42  ;;  %v1092_v56 = vadd.f32 %v6543_v13, %v6541_v20  ;;  %v1095_v20 = vadd.f32 %v6556_v47, %v6573_v50  ;;  %v1108_v50 = vadd.f32 %v6588_v54, %v6597_v0 }
 0x18c   : > { %v2705_v26 = vpop.permute.xlu1 %2704  ;;  %v2700_v28 = vpop.permute.xlu0 %2699 }
 0x18d   : > { %v2786_v59 = vmul.f32 %v2705_v26, %v6731_v60  ;;  %v2785_v1 = vmul.f32 %v2700_v28, %v6733_v38  ;;  %5302 = vmatprep.mubr.msk.bf16.mxu1 %vm391_vm0, %v2807_v53  ;;  %v3080_v28 = vld [vmem:[#allocation2 + $0xbf] sm:$0xff]  ;;  %v1084_v53 = vadd.f32 %v6545_v44, %v6554_v2  ;;  %v6751_v38 = vpop.f32.mrf.mxu1 }
 0x18e   : > { %v6760_v44 = vld [vmem:[#allocation2 + $0xc1] sm:$0xff] }
 0x18f   : > { %v2808_v41 = vpack.c.bf16 %v2786_v59, %v2785_v1  ;;  %v3079_v59 = vld [vmem:[#allocation2 + $0xb7] sm:$0xff]  ;;  %7441 = vst [vmem:[#allocation21_spill] sm:$0xff] %v6760_v44  ;;  %v6762_v2 = vpop.f32.mrf.mxu1 }
 0x190   : > { %v3214_v24 = vpop.permute.xlu1 %3213  ;;  %v3209_v36 = vpop.permute.xlu0 %3208 }
 0x191   : > { %v3303_v18 = vmul.f32 %v3214_v24, %v3078_v48  ;;  %v3302_v46 = vmul.f32 %v3209_v36, %v3077_v9  ;;  %5303 = vmatmul.mubr.msk.bf16.gmra.mxu1 %vm391_vm0, %v2808_v41  ;;  %v6766_v9 = vld [vmem:[#allocation2 + $0xb9] sm:$0xff] }
 0x192   : > { %v5186_v26 = vpop.f32.mrf.mxu0  ;;  %7442 = vst [vmem:[#allocation22_spill] sm:$0xff] %v6766_v9 }
 0x193   : > { %v3326_v42 = vpack.c.bf16 %v3303_v18, %v3302_v46  ;;  %v6753_v60 = vadd.f32 %v5186_v26, %v1092_v56 }
 0x194   : > { %v1570_v1 = vpop.f32.mrf.mxu0  ;;  %v3224_v45 = vpop.permute.xlu1 %3223 }
 0x195   : > { %v6757_v13 = vadd.f32 %v1570_v1, %v1084_v53  ;;  %v3305_v36 = vmul.f32 %v3224_v45, %v3080_v28  ;;  %v3219_v24 = vpop.permute.xlu0 %3218  ;;  %5336 = vmatprep.mubr.msk.bf16.mxu0 %vm391_vm0, %v3326_v42  ;;  %v6775_v53 = vld [vmem:[#allocation2 + $0xd1] sm:$0xff]  ;;  %v6779_v1 = vpop.f32.mrf.mxu1 }
 0x196   : > { %v3304_v41 = vmul.f32 %v3219_v24, %v3079_v59  ;;  %v5187_v48 = vpop.f32.mrf.mxu0  ;;  %7443 = vst [vmem:[#allocation23_spill] sm:$0xff] %v6775_v53  ;;  %v1100_v59 = vadd.f32 %v6599_v32, %v6612_v14  ;;  %v3082_v14 = vld [vmem:[#allocation2 + $0xcf] sm:$0xff] }
 0x197   : > { %v6764_v46 = vadd.f32 %v5187_v48, %v1095_v20 }
 0x198   : > { %v3327_v56 = vpack.c.bf16 %v3305_v36, %v3304_v41  ;;  %v6768_v18 = vpop.f32.mrf.mxu0  ;;  %v2715_v47 = vpop.permute.xlu1 %2714  ;;  %v6783_v36 = vld [vmem:[#allocation2 + $0xc9] sm:$0xff]  ;;  %v1111_v41 = vadd.f32 %v6614_v15, %v6629_v40  ;;  %v1124_v40 = vadd.f32 %v6644_v61, %v6653_v58  ;;  %v1127_v61 = vadd.f32 %v6670_v35, %v6685_v19 }
 0x199   : > { %v2788_v45 = vmul.f32 %v2715_v47, %v6760_v44  ;;  %v2710_v42 = vpop.permute.xlu0 %2709  ;;  %7444 = vst [vmem:[#allocation24_spill] sm:$0xff] %v6783_v36  ;;  %v1140_v19 = vadd.f32 %v6700_v3, %v6709_v23 }
 0x19a   : > { %v2787_v26 = vmul.f32 %v2710_v42, %v6766_v9  ;;  %v5190_v28 = vpop.f32.mrf.mxu0  ;;  %5337 = vmatmul.mubr.msk.bf16.gmra.mxu0 %vm391_vm0, %v3327_v56 }
 0x19b   : > { %v6781_v20 = vadd.f32 %v5190_v28, %v1108_v50  ;;  %v6792_v50 = vpop.f32.mrf.mxu1 }
 0x19c   : > { %v2809_v54 = vpack.c.bf16 %v2788_v45, %v2787_v26  ;;  %v1586_v0 = vpop.f32.mrf.mxu0  ;;  %v2725_v24 = vpop.permute.xlu1 %2724  ;;  %v3081_v45 = vld [vmem:[#allocation2 + $0xc7] sm:$0xff] }
 0x19d   : > { %v6787_v48 = vadd.f32 %v1586_v0, %v1100_v59  ;;  %v2790_v56 = vmul.f32 %v2725_v24, %v6775_v53  ;;  %v2720_v47 = vpop.permute.xlu0 %2719 }
 0x19e   : > { %v2789_v42 = vmul.f32 %v2720_v47, %v6783_v36  ;;  %v5191_v32 = vpop.f32.mrf.mxu0  ;;  %5306 = vmatprep.mubr.msk.bf16.mxu1 %vm391_vm0, %v2809_v54  ;;  %v3084_v54 = vld [vmem:[#allocation2 + $0xdf] sm:$0xff]  ;;  %v1116_v36 = vadd.f32 %v6655_v57, %v6668_v49 }
 0x19f   : > { %v6794_v28 = vadd.f32 %v5191_v32, %v1111_v41  ;;  %v6803_v41 = vpop.f32.mrf.mxu1  ;;  %v6812_v57 = vld [vmem:[#allocation2 + $0xe1] sm:$0xff] }
 0x1a0   : > { %v2810_v26 = vpack.c.bf16 %v2790_v56, %v2789_v42  ;;  %v6796_v9 = vpop.f32.mrf.mxu0  ;;  %v3234_v15 = vpop.permute.xlu1 %3233  ;;  %v3083_v56 = vld [vmem:[#allocation2 + $0xd7] sm:$0xff]  ;;  %7445 = vst [vmem:[#allocation25_spill] sm:$0xff] %v6812_v57 }
 0x1a1   : > { %v3307_v59 = vmul.f32 %v3234_v15, %v3082_v14  ;;  %v3229_v0 = vpop.permute.xlu0 %3228  ;;  %v6814_v49 = vpop.f32.mrf.mxu1 }
 0x1a2   : > { %v3306_v24 = vmul.f32 %v3229_v0, %v3081_v45  ;;  %v5194_v47 = vpop.f32.mrf.mxu0  ;;  %5307 = vmatmul.mubr.msk.bf16.gmra.mxu1 %vm391_vm0, %v2810_v26 }
 0x1a3   : > { %v6805_v32 = vadd.f32 %v5194_v47, %v1124_v40 }
 0x1a4   : > { %v3328_v42 = vpack.c.bf16 %v3307_v59, %v3306_v24  ;;  %v1602_v53 = vpop.f32.mrf.mxu0  ;;  %v3244_v44 = vpop.permute.xlu1 %3243  ;;  %v6818_v59 = vld [vmem:[#allocation2 + $0xd9] sm:$0xff] }
 0x1a5   : > { %v6809_v58 = vadd.f32 %v1602_v53, %v1116_v36  ;;  %v3309_v14 = vmul.f32 %v3244_v44, %v3084_v54  ;;  %v3239_v45 = vpop.permute.xlu0 %3238  ;;  %7446 = vst [vmem:[#allocation26_spill] sm:$0xff] %v6818_v59  ;;  %v6827_v54 = vld [vmem:[#allocation2 + $0xf1] sm:$0xff] }
 0x1a6   : > { %v3308_v26 = vmul.f32 %v3239_v45, %v3083_v56  ;;  %v5195_v15 = vpop.f32.mrf.mxu0  ;;  %5340 = vmatprep.mubr.msk.bf16.mxu0 %vm391_vm0, %v3328_v42  ;;  %7447 = vst [vmem:[#allocation27_spill] sm:$0xff] %v6827_v54  ;;  %v1132_v56 = vadd.f32 %v6711_v4, %v6724_v55  ;;  %v6831_v42 = vpop.f32.mrf.mxu1  ;;  %v3086_v55 = vld [vmem:[#allocation2 + $0xef] sm:$0xff] }
 0x1a7   : > { %v6816_v40 = vadd.f32 %v5195_v15, %v1127_v61 }
 0x1a8   : > { %v3329_v0 = vpack.c.bf16 %v3309_v14, %v3308_v26  ;;  %v6820_v24 = vpop.f32.mrf.mxu0  ;;  %v2735_v35 = vpop.permute.xlu1 %2734  ;;  %v6835_v14 = vld [vmem:[#allocation2 + $0xe9] sm:$0xff]  ;;  %v1143_v26 = vadd.f32 %v6726_v11, %v6735_v25  ;;  %v1156_v11 = vadd.f32 %v6744_v51, %v6335_v16  ;;  %v1159_v16 = vadd.f32 %v6762_v2, %v6370_v22 }
 0x1a9   : > { %v2792_v44 = vmul.f32 %v2735_v35, %v6812_v57  ;;  %v2730_v53 = vpop.permute.xlu0 %2729  ;;  %7448 = vst [vmem:[#allocation28_spill] sm:$0xff] %v6835_v14 }
 0x1aa   : > { %v2791_v36 = vmul.f32 %v2730_v53, %v6818_v59  ;;  %v5198_v47 = vpop.f32.mrf.mxu0  ;;  %5341 = vmatmul.mubr.msk.bf16.gmra.mxu0 %vm391_vm0, %v3329_v0 }
 0x1ab   : > { %v6833_v61 = vadd.f32 %v5198_v47, %v1140_v19  ;;  %v6844_v19 = vpop.f32.mrf.mxu1 }
 0x1ac   : > { %v2811_v23 = vpack.c.bf16 %v2792_v44, %v2791_v36  ;;  %v1618_v3 = vpop.f32.mrf.mxu0  ;;  %v2745_v45 = vpop.permute.xlu1 %2744  ;;  %v3085_v44 = vld [vmem:[#allocation2 + $0xe7] sm:$0xff] }
 0x1ad   : > { %v6839_v15 = vadd.f32 %v1618_v3, %v1132_v56  ;;  %v2794_v0 = vmul.f32 %v2745_v45, %v6827_v54  ;;  %v2740_v35 = vpop.permute.xlu0 %2739 }
 0x1ae   : > { %v2793_v53 = vmul.f32 %v2740_v35, %v6835_v14  ;;  %v5199_v4 = vpop.f32.mrf.mxu0  ;;  %5310 = vmatprep.mubr.msk.bf16.mxu1 %vm391_vm0, %v2811_v23  ;;  %v3088_v23 = vld [vmem:[#allocation2 + $0xff] sm:$0xff]  ;;  %v1148_v14 = vadd.f32 %v6751_v38, %v6355_v31  ;;  %v1151_v31 = vadd.f32 %v6779_v1, %v6381_v62  ;;  %v6877_v62 = vld [vmem:[#allocation2 + $0x111] sm:$0xff]  ;;  %v1164_v1 = vadd.f32 %v6803_v41, %v6407_v29 }
 0x1af   : > { %v6846_v47 = vadd.f32 %v5199_v4, %v1143_v26  ;;  %v1179_v26 = vpop.f32.mrf.mxu1  ;;  %7450 = vst [vmem:[#allocation30_spill] sm:$0xff] %v6877_v62 }
 0x1b0   : > { %v2812_v36 = vpack.c.bf16 %v2794_v0, %v2793_v53  ;;  %v6848_v59 = vpop.f32.mrf.mxu0  ;;  %v3254_v25 = vpop.permute.xlu1 %3253  ;;  %v3087_v0 = vld [vmem:[#allocation2 + $0xf7] sm:$0xff] }
 0x1b1   : > { %v3311_v56 = vmul.f32 %v3254_v25, %v3086_v55  ;;  %v3249_v3 = vpop.permute.xlu0 %3248  ;;  %v5177_v38 = vpop.f32.mrf.mxu1 }
 0x1b2   : > { %v3310_v45 = vmul.f32 %v3249_v3, %v3085_v44  ;;  %v5202_v35 = vpop.f32.mrf.mxu0  ;;  %5311 = vmatmul.mubr.msk.bf16.gmra.mxu1 %vm391_vm0, %v2812_v36  ;;  %v6862_v3 = vld [vmem:[#allocation2 + $0x101] sm:$0xff] }
 0x1b3   : > { %v6855_v4 = vadd.f32 %v5202_v35, %v1156_v11 }
 0x1b4   : > { %v3330_v53 = vpack.c.bf16 %v3311_v56, %v3310_v45  ;;  %v1634_v54 = vpop.f32.mrf.mxu0  ;;  %v3264_v57 = vpop.permute.xlu1 %3263  ;;  %v6868_v56 = vld [vmem:[#allocation2 + $0xf9] sm:$0xff] }
 0x1b5   : > { %v6859_v51 = vadd.f32 %v1634_v54, %v1148_v14  ;;  %v3313_v55 = vmul.f32 %v3264_v57, %v3088_v23  ;;  %v3259_v44 = vpop.permute.xlu0 %3258  ;;  %7449 = vst [vmem:[#allocation29_spill] sm:$0xff] %v6868_v56  ;;  %v1172_v57 = vadd.f32 %v6792_v50, %v6396_v8 }
 0x1b6   : > { %v3312_v25 = vmul.f32 %v3259_v44, %v3087_v0  ;;  %v5203_v36 = vpop.f32.mrf.mxu0  ;;  %5344 = vmatprep.mubr.msk.bf16.mxu0 %vm391_vm0, %v3330_v53  ;;  %v1182_v53 = vpop.f32.mrf.mxu1 }
 0x1b7   : > { %v6866_v11 = vadd.f32 %v5203_v36, %v1159_v16  ;;  %v3581_v36 = vld [vmem:[#allocation2 + $0x30] sm:$0xff] }
 0x1b8   : > { %v3331_v45 = vpack.c.bf16 %v3313_v55, %v3312_v25  ;;  %v1637_v22 = vpop.f32.mrf.mxu0  ;;  %v2755_v2 = vpop.permute.xlu1 %2754  ;;  %v6883_v55 = vld [vmem:[#allocation2 + $0x109] sm:$0xff] }
 0x1b9   : > { %v6872_v54 = vadd.f32 %v1637_v22, %v1151_v31  ;;  %v2796_v14 = vmul.f32 %v2755_v2, %v6862_v3  ;;  %v2750_v35 = vpop.permute.xlu0 %2749  ;;  %7451 = vst [vmem:[#allocation31_spill] sm:$0xff] %v6883_v55  ;;  %v3580_v25 = vld [vmem:[#allocation2 + $0x28] sm:$0xff]  ;;  %v1175_v31 = vadd.f32 %v6814_v49, %v6420_v7  ;;  %v1188_v49 = vadd.f32 %v6844_v19, %v6444_v37  ;;  %v3582_v37 = vld [vmem:[#allocation2 + $0x38] sm:$0xff]  ;;  %v3583_v19 = vld [vmem:[#allocation2 + $0x40] sm:$0xff] }
 0x1ba   : > { %v2795_v23 = vmul.f32 %v2750_v35, %v6868_v56  ;;  %v5206_v0 = vpop.f32.mrf.mxu0  ;;  %5345 = vmatmul.mubr.msk.bf16.gmra.mxu0 %vm391_vm0, %v3331_v45 }
 0x1bb   : > { %v6881_v16 = vadd.f32 %v5206_v0, %v1172_v57  ;;  %v1167_v57 = vadd.f32 %v6831_v42, %v6431_v33  ;;  %v3092_v33 = vld [vmem:[#allocation2 + $0x11f] sm:$0xff]  ;;  %v1180_v42 = vadd.f32 %v1179_v26, %v6455_v10 }
 0x1bc   : > { %v2813_v8 = vpack.c.bf16 %v2796_v14, %v2795_v23  ;;  %v1650_v50 = vpop.f32.mrf.mxu0  ;;  %v2765_v44 = vpop.permute.xlu1 %2764  ;;  %v3612_v23 = vpack.c.bf16 %v3581_v36, %v3580_v25 }
 0x1bd   : > { %v6887_v22 = vadd.f32 %v1650_v50, %v1164_v1  ;;  %v2798_v45 = vmul.f32 %v2765_v44, %v6877_v62  ;;  %v2760_v2 = vpop.permute.xlu0 %2759  ;;  %v5180_v14 = vpop.f32.mrf.mxu1 }
 0x1be   : > { %v2797_v29 = vmul.f32 %v2760_v2, %v6883_v55  ;;  %v5207_v41 = vpop.f32.mrf.mxu0  ;;  %5314 = vmatprep.mubr.msk.bf16.mxu1 %vm391_vm0, %v2813_v8 }
 0x1bf   : > { %v6894_v35 = vadd.f32 %v5207_v41, %v1175_v31  ;;  %v1195_v25 = vpop.f32.mrf.mxu1  ;;  %v3091_v31 = vld [vmem:[#allocation2 + $0x117] sm:$0xff] }
 0x1c0   : > { %v2814_v0 = vpack.c.bf16 %v2798_v45, %v2797_v29  ;;  %v1653_v56 = vpop.f32.mrf.mxu0  ;;  %v3274_v7 = vpop.permute.xlu1 %3273  ;;  %v3584_v29 = vld [vmem:[#allocation2 + $0x48] sm:$0xff]  ;;  %v3585_v41 = vld [vmem:[#allocation2 + $0x50] sm:$0xff] }
 0x1c1   : > { %v6898_v1 = vadd.f32 %v1653_v56, %v1167_v57  ;;  %v3315_v50 = vmul.f32 %v3274_v7, %v6487_v52  ;;  %v3269_v44 = vpop.permute.xlu0 %3268 }
 0x1c2   : > { %v3314_v8 = vmul.f32 %v3269_v44, %v6483_v21  ;;  %v5210_v2 = vpop.f32.mrf.mxu0  ;;  %5315 = vmatmul.mubr.msk.bf16.gmra.mxu1 %vm391_vm0, %v2814_v0  ;;  %v1191_v21 = vadd.f32 %v5177_v38, %v6468_v5  ;;  %v3613_v44 = vpack.c.bf16 %v3583_v19, %v3582_v37  ;;  %v1204_v38 = vadd.f32 %v5180_v14, %v6495_v43  ;;  %v3586_v43 = vld [vmem:[#allocation2 + $0x58] sm:$0xff] }
 0x1c3   : > { %v6904_v36 = vadd.f32 %v5210_v2, %v1188_v49  ;;  %5354 = vmatprep.mubr.msk.bf16.mxu1 %vm391_vm0, %v3612_v23  ;;  %v3875_v49 = vld [vmem:[#allocation2 + $0x31] sm:$0xff]  ;;  %v1183_v23 = vadd.f32 %v1182_v53, %v6479_v63  ;;  %v5181_v2 = vpop.f32.mrf.mxu1  ;;  %v3877_v63 = vld [vmem:[#allocation2 + $0x41] sm:$0xff]  ;;  %v1196_v53 = vadd.f32 %v1195_v25, %v6507_v27 }
 0x1c4   : > { %v3332_v56 = vpack.c.bf16 %v3315_v50, %v3314_v8  ;;  %v1666_v45 = vpop.f32.mrf.mxu0  ;;  %v3284_v52 = vpop.permute.xlu1 %3283  ;;  %v3874_v8 = vld [vmem:[#allocation2 + $0x29] sm:$0xff] }
 0x1c5   : > { %7452 = vst [vmem:[#allocation32_spill] sm:$0xff] %v6904_v36  ;;  %v6908_v57 = vadd.f32 %v1666_v45, %v1180_v42  ;;  %v3317_v0 = vmul.f32 %v3284_v52, %v3092_v33  ;;  %v3279_v7 = vpop.permute.xlu0 %3278  ;;  %v3614_v36 = vpack.c.bf16 %v3585_v41, %v3584_v29  ;;  %v1198_v37 = vpop.f32.mrf.mxu1  ;;  %v3876_v52 = vld [vmem:[#allocation2 + $0x39] sm:$0xff] }
 0x1c6   : > { %v3316_v10 = vmul.f32 %v3279_v7, %v3091_v31  ;;  %v5211_v26 = vpop.f32.mrf.mxu0  ;;  %5348 = vmatprep.mubr.msk.bf16.mxu0 %vm391_vm0, %v3332_v56 }
 0x1c7   : > { %v6912_v50 = vadd.f32 %v5211_v26, %v1191_v21  ;;  %v3588_v21 = vld [vmem:[#allocation2 + $0x68] sm:$0xff] }
 0x1c8   : > { %v3333_v55 = vpack.c.bf16 %v3317_v0, %v3316_v10  ;;  %v1669_v62 = vpop.f32.mrf.mxu0  ;;  %v3947_v5 = vpop.permute.xlu1 %3946  ;;  %v3589_v0 = vld [vmem:[#allocation2 + $0x70] sm:$0xff] }
 0x1c9   : > { %v6915_v33 = vadd.f32 %v1669_v62, %v1183_v23  ;;  %v4100_v42 = vmul.f32 %v3947_v5, %v3875_v49  ;;  %v3942_v31 = vpop.permute.xlu0 %3941  ;;  %v3587_v62 = vld [vmem:[#allocation2 + $0x60] sm:$0xff]  ;;  %v3616_v23 = vpack.c.bf16 %v3589_v0, %v3588_v21 }
 0x1ca   : > { %v4099_v45 = vmul.f32 %v3942_v31, %v3874_v8  ;;  %v5214_v56 = vpop.f32.mrf.mxu0  ;;  %5349 = vmatmul.mubr.msk.bf16.gmra.mxu0 %vm391_vm0, %v3333_v55  ;;  %5355 = vmatmul.mubr.msk.bf16.vlgmr.msra.gmra.mxu1 %vm391_vm0, %v3613_v44  ;;  %v1207_v55 = vadd.f32 %v5181_v2, %v6519_v39  ;;  %v3615_v49 = vpack.c.bf16 %v3587_v62, %v3586_v43  ;;  %v3592_v62 = vld [vmem:[#allocation2 + $0x88] sm:$0xff] }
 0x1cb   : > { %v6920_v19 = vadd.f32 %v5214_v56, %v1204_v38  ;;  %5358 = vmatprep.mubr.msk.bf16.mxu1 %vm391_vm0, %v3614_v36  ;;  %v1199_v36 = vadd.f32 %v1198_v37, %v6530_v34 }
 0x1cc   : > { %v4131_v14 = vpack.c.bf16 %v4100_v42, %v4099_v45  ;;  %v1682_v29 = vpop.f32.mrf.mxu0  ;;  %v3957_v41 = vpop.permute.xlu1 %3956 }
 0x1cd   : > { %v6924_v7 = vadd.f32 %v1682_v29, %v1196_v53  ;;  %v4102_v10 = vmul.f32 %v3957_v41, %v3877_v63  ;;  %v3952_v26 = vpop.permute.xlu0 %3951  ;;  %v3590_v63 = vld [vmem:[#allocation2 + $0x78] sm:$0xff]  ;;  %v3591_v53 = vld [vmem:[#allocation2 + $0x80] sm:$0xff]  ;;  %v7453_v41 = vld [vmem:[#allocation3_spill] sm:$0xff] }
 0x1ce   : > { %v4101_v27 = vmul.f32 %v3952_v26, %v3876_v52  ;;  %v5215_v25 = vpop.f32.mrf.mxu0  ;;  %5388 = vmatprep.mubr.msk.bf16.mxu0 %vm391_vm0, %v4131_v14 }
 0x1cf   : > { %v6928_v44 = vadd.f32 %v5215_v25, %v1207_v55  ;;  %v7454_v55 = vld [vmem:[#allocation4_spill] sm:$0xff] }
 0x1d0   : > { %v4132_v8 = vpack.c.bf16 %v4102_v10, %v4101_v27  ;;  %v1685_v5 = vpop.f32.mrf.mxu0  ;;  %v3967_v38 = vpop.permute.xlu1 %3966  ;;  %v3617_v27 = vpack.c.bf16 %v3591_v53, %v3590_v63 }
 0x1d1   : > { %v6930_v42 = vadd.f32 %v1685_v5, %v1199_v36  ;;  %v4104_v39 = vmul.f32 %v3967_v38, %v6562_v30  ;;  %v3962_v2 = vpop.permute.xlu0 %3961  ;;  %v3593_v30 = vld [vmem:[#allocation2 + $0x90] sm:$0xff] }
 0x1d2   : > { %v4103_v31 = vmul.f32 %v3962_v2, %v6565_v17  ;;  %v5220_v45 = vpop.f32.mrf.mxu1  ;;  %5359 = vmatmul.mubr.msk.bf16.gmra.mxu1 %vm391_vm0, %v3615_v49  ;;  %5389 = vmatmul.mubr.msk.bf16.vlgmr.msra.gmra.mxu0 %vm391_vm0, %v4132_v8  ;;  %v5254_v56 = vpop.f32.mrf.mxu0  ;;  %v1087_v17 = vadd.f32 %v6575_v12, %v6586_v6  ;;  %v3618_v6 = vpack.c.bf16 %v3593_v30, %v3592_v62 }
 0x1d3   : > { %v2218_v34 = vadd.f32 %v5220_v45, %v6753_v60  ;;  %5362 = vmatprep.mubr.msk.bf16.mxu1 %vm391_vm0, %v3616_v23 }
 0x1d4   : > { %v4133_v37 = vpack.c.bf16 %v4104_v39, %v4103_v31  ;;  %v2089_v52 = vpop.f32.mrf.mxu1  ;;  %v3977_v43 = vpop.permute.xlu1 %3976  ;;  %v1698_v25 = vadd.f32 %v6768_v18, %v1087_v17  ;;  %v7455_v39 = vld [vmem:[#allocation5_spill] sm:$0xff]  ;;  %v3596_v17 = vld [vmem:[#allocation2 + $0xa8] sm:$0xff] }
 0x1d5   : > { %v2216_v14 = vadd.f32 %v2089_v52, %v6757_v13  ;;  %v6941_v29 = vadd.f32 %v5254_v56, %v2218_v34  ;;  %v4106_v21 = vmul.f32 %v3977_v43, %v7453_v41  ;;  %v3972_v0 = vpop.permute.xlu0 %3971  ;;  %v2383_v60 = vpop.f32.mrf.mxu0  ;;  %v7456_v56 = vld [vmem:[#allocation6_spill] sm:$0xff]  ;;  %v3595_v52 = vld [vmem:[#allocation2 + $0xa0] sm:$0xff]  ;;  %v7457_v41 = vld [vmem:[#allocation8_spill] sm:$0xff] }
 0x1d6   : > { %v4105_v10 = vmul.f32 %v3972_v0, %v7454_v55  ;;  %v5221_v26 = vpop.f32.mrf.mxu1  ;;  %5392 = vmatprep.mubr.msk.bf16.mxu0 %vm391_vm0, %v4133_v37  ;;  %v3594_v37 = vld [vmem:[#allocation2 + $0x98] sm:$0xff] }
 0x1d7   : > { %v2219_v49 = vadd.f32 %v5221_v26, %v6764_v46  ;;  %v6948_v36 = vadd.f32 %v2383_v60, %v2216_v14  ;;  %v5255_v12 = vpop.f32.mrf.mxu0  ;;  %v3597_v14 = vld [vmem:[#allocation2 + $0xb0] sm:$0xff] }
 0x1d8   : > { %v4134_v13 = vpack.c.bf16 %v4106_v21, %v4105_v10  ;;  %v2092_v23 = vpop.f32.mrf.mxu1  ;;  %v3987_v8 = vpop.permute.xlu1 %3986  ;;  %v7458_v21 = vld [vmem:[#allocation7_spill] sm:$0xff] }
 0x1d9   : > { %v2217_v5 = vadd.f32 %v2092_v23, %v1698_v25  ;;  %v6950_v38 = vadd.f32 %v5255_v12, %v2219_v49  ;;  %v4108_v2 = vmul.f32 %v3987_v8, %v7455_v39  ;;  %v3982_v31 = vpop.permute.xlu0 %3981  ;;  %v2386_v45 = vpop.f32.mrf.mxu0  ;;  %v1103_v0 = vadd.f32 %v7458_v21, %v7457_v41  ;;  %v7460_v25 = vld [vmem:[#allocation10_spill] sm:$0xff] }
 0x1da   : > { %v4107_v34 = vmul.f32 %v3982_v31, %v7456_v56  ;;  %v5224_v63 = vpop.f32.mrf.mxu1  ;;  %5363 = vmatmul.mubr.msk.bf16.gmra.mxu1 %vm391_vm0, %v3617_v27  ;;  %5393 = vmatmul.mubr.msk.bf16.gmra.mxu0 %vm391_vm0, %v4134_v13 }
 0x1db   : > { %v2222_v46 = vadd.f32 %v5224_v63, %v6781_v20  ;;  %v6957_v18 = vadd.f32 %v2386_v45, %v2217_v5  ;;  %v5258_v53 = vpop.f32.mrf.mxu0  ;;  %5366 = vmatprep.mubr.msk.bf16.mxu1 %vm391_vm0, %v3618_v6  ;;  %v7459_v20 = vld [vmem:[#allocation9_spill] sm:$0xff]  ;;  %v3619_v6 = vpack.c.bf16 %v3595_v52, %v3594_v37  ;;  %v1702_v13 = vadd.f32 %v6796_v9, %v1103_v0  ;;  %v3600_v0 = vld [vmem:[#allocation2 + $0xc8] sm:$0xff] }
 0x1dc   : > { %v4135_v43 = vpack.c.bf16 %v4108_v2, %v4107_v34  ;;  %v2105_v62 = vpop.f32.mrf.mxu1  ;;  %v3997_v30 = vpop.permute.xlu1 %3996  ;;  %v7461_v34 = vld [vmem:[#allocation11_spill] sm:$0xff] }
 0x1dd   : > { %v2220_v60 = vadd.f32 %v2105_v62, %v6787_v48  ;;  %v6963_v55 = vadd.f32 %v5258_v53, %v2222_v46  ;;  %v4110_v10 = vmul.f32 %v3997_v30, %v7459_v20  ;;  %v3992_v26 = vpop.permute.xlu0 %3991  ;;  %v2399_v27 = vpop.f32.mrf.mxu0  ;;  %v3620_v48 = vpack.c.bf16 %v3597_v14, %v3596_v17  ;;  %v3598_v30 = vld [vmem:[#allocation2 + $0xb8] sm:$0xff]  ;;  %v3599_v17 = vld [vmem:[#allocation2 + $0xc0] sm:$0xff]  ;;  %v7463_v20 = vld [vmem:[#allocation14_spill] sm:$0xff] }
 0x1de   : > { %v4109_v49 = vmul.f32 %v3992_v26, %v7460_v25  ;;  %v5225_v12 = vpop.f32.mrf.mxu1  ;;  %5396 = vmatprep.mubr.msk.bf16.mxu0 %vm391_vm0, %v4135_v43  ;;  %v7462_v43 = vld [vmem:[#allocation12_spill] sm:$0xff] }
 0x1df   : > { %v2223_v23 = vadd.f32 %v5225_v12, %v6794_v28  ;;  %v6970_v8 = vadd.f32 %v2399_v27, %v2220_v60  ;;  %v5259_v5 = vpop.f32.mrf.mxu0  ;;  %v3601_v60 = vld [vmem:[#allocation2 + $0xd0] sm:$0xff] }
 0x1e0   : > { %v4136_v39 = vpack.c.bf16 %v4110_v10, %v4109_v49  ;;  %v2108_v2 = vpop.f32.mrf.mxu1  ;;  %v4007_v31 = vpop.permute.xlu1 %4006  ;;  %v7464_v10 = vld [vmem:[#allocation13_spill] sm:$0xff] }
 0x1e1   : > { %v2221_v45 = vadd.f32 %v2108_v2, %v1702_v13  ;;  %v6972_v56 = vadd.f32 %v5259_v5, %v2223_v23  ;;  %v4112_v63 = vmul.f32 %v4007_v31, %v7461_v34  ;;  %v4002_v46 = vpop.permute.xlu0 %4001  ;;  %v2402_v53 = vpop.f32.mrf.mxu0  ;;  %v1119_v26 = vadd.f32 %v7464_v10, %v7463_v20  ;;  %v7466_v13 = vld [vmem:[#allocation16_spill] sm:$0xff] }
 0x1e2   : > { %v4111_v37 = vmul.f32 %v4002_v46, %v7462_v43  ;;  %v5228_v52 = vpop.f32.mrf.mxu1  ;;  %5367 = vmatmul.mubr.msk.bf16.gmra.mxu1 %vm391_vm0, %v3619_v6  ;;  %5397 = vmatmul.mubr.msk.bf16.gmra.mxu0 %vm391_vm0, %v4136_v39 }
 0x1e3   : > { %v2226_v9 = vadd.f32 %v5228_v52, %v6805_v32  ;;  %v6979_v28 = vadd.f32 %v2402_v53, %v2221_v45  ;;  %v5262_v62 = vpop.f32.mrf.mxu0  ;;  %5370 = vmatprep.mubr.msk.bf16.mxu1 %vm391_vm0, %v3620_v48  ;;  %v7465_v32 = vld [vmem:[#allocation15_spill] sm:$0xff]  ;;  %v3621_v48 = vpack.c.bf16 %v3599_v17, %v3598_v30  ;;  %v1706_v39 = vadd.f32 %v6820_v24, %v1119_v26  ;;  %v3604_v26 = vld [vmem:[#allocation2 + $0xe8] sm:$0xff] }
 0x1e4   : > { %v4137_v14 = vpack.c.bf16 %v4112_v63, %v4111_v37  ;;  %v2121_v41 = vpop.f32.mrf.mxu1  ;;  %v4017_v21 = vpop.permute.xlu1 %4016  ;;  %v7467_v37 = vld [vmem:[#allocation17_spill] sm:$0xff] }
 0x1e5   : > { %v2224_v27 = vadd.f32 %v2121_v41, %v6809_v58  ;;  %v6985_v25 = vadd.f32 %v5262_v62, %v2226_v9  ;;  %v4114_v49 = vmul.f32 %v4017_v21, %v7465_v32  ;;  %v4012_v12 = vpop.permute.xlu0 %4011  ;;  %v2415_v6 = vpop.f32.mrf.mxu0  ;;  %v3622_v58 = vpack.c.bf16 %v3601_v60, %v3600_v0  ;;  %v3602_v21 = vld [vmem:[#allocation2 + $0xd8] sm:$0xff]  ;;  %v3603_v0 = vld [vmem:[#allocation2 + $0xe0] sm:$0xff] }
 0x1e6   : > { %v4113_v23 = vmul.f32 %v4012_v12, %v7466_v13  ;;  %v5229_v5 = vpop.f32.mrf.mxu1  ;;  %5400 = vmatprep.mubr.msk.bf16.mxu0 %vm391_vm0, %v4137_v14  ;;  %v7468_v14 = vld [vmem:[#allocation18_spill] sm:$0xff]  ;;  %v7469_v32 = vld [vmem:[#allocation20_spill] sm:$0xff] }
 0x1e7   : > { %v2227_v2 = vadd.f32 %v5229_v5, %v6816_v40  ;;  %v6992_v31 = vadd.f32 %v2415_v6, %v2224_v27  ;;  %v5263_v45 = vpop.f32.mrf.mxu0  ;;  %v3605_v27 = vld [vmem:[#allocation2 + $0xf0] sm:$0xff] }
 0x1e8   : > { %v4138_v34 = vpack.c.bf16 %v4114_v49, %v4113_v23  ;;  %v2124_v63 = vpop.f32.mrf.mxu1  ;;  %v4027_v46 = vpop.permute.xlu1 %4026  ;;  %v7470_v49 = vld [vmem:[#allocation19_spill] sm:$0xff] }
 0x1e9   : > { %v2225_v53 = vadd.f32 %v2124_v63, %v1706_v39  ;;  %v6994_v43 = vadd.f32 %v5263_v45, %v2227_v2  ;;  %v4116_v52 = vmul.f32 %v4027_v46, %v7467_v37  ;;  %v4022_v9 = vpop.permute.xlu0 %4021  ;;  %v2418_v62 = vpop.f32.mrf.mxu0  ;;  %v1135_v12 = vadd.f32 %v7470_v49, %v7469_v32  ;;  %v7472_v39 = vld [vmem:[#allocation22_spill] sm:$0xff] }
 0x1ea   : > { %v4115_v30 = vmul.f32 %v4022_v9, %v7468_v14  ;;  %v5232_v17 = vpop.f32.mrf.mxu1  ;;  %5371 = vmatmul.mubr.msk.bf16.gmra.mxu1 %vm391_vm0, %v3621_v48  ;;  %5401 = vmatmul.mubr.msk.bf16.gmra.mxu0 %vm391_vm0, %v4138_v34 }
 0x1eb   : > { %v2230_v40 = vadd.f32 %v5232_v17, %v6833_v61  ;;  %v7001_v24 = vadd.f32 %v2418_v62, %v2225_v53  ;;  %v5266_v41 = vpop.f32.mrf.mxu0  ;;  %5374 = vmatprep.mubr.msk.bf16.mxu1 %vm391_vm0, %v3622_v58  ;;  %v7471_v61 = vld [vmem:[#allocation21_spill] sm:$0xff]  ;;  %v3623_v58 = vpack.c.bf16 %v3603_v0, %v3602_v21  ;;  %v1710_v34 = vadd.f32 %v6848_v59, %v1135_v12  ;;  %v3608_v12 = vld [vmem:[#allocation2 + $0x108] sm:$0xff] }
 0x1ec   : > { %v4139_v60 = vpack.c.bf16 %v4116_v52, %v4115_v30  ;;  %v2137_v20 = vpop.f32.mrf.mxu1  ;;  %v4037_v10 = vpop.permute.xlu1 %4036  ;;  %v7473_v30 = vld [vmem:[#allocation23_spill] sm:$0xff] }
 0x1ed   : > { %v2228_v6 = vadd.f32 %v2137_v20, %v6839_v15  ;;  %v7007_v13 = vadd.f32 %v5266_v41, %v2230_v40  ;;  %v4118_v23 = vmul.f32 %v4037_v10, %v7471_v61  ;;  %v4032_v5 = vpop.permute.xlu0 %4031  ;;  %v2431_v48 = vpop.f32.mrf.mxu0  ;;  %v3624_v15 = vpack.c.bf16 %v3605_v27, %v3604_v26  ;;  %v3606_v10 = vld [vmem:[#allocation2 + $0xf8] sm:$0xff]  ;;  %v3607_v26 = vld [vmem:[#allocation2 + $0x100] sm:$0xff] }
 0x1ee   : > { %v4117_v2 = vmul.f32 %v4032_v5, %v7472_v39  ;;  %v5233_v45 = vpop.f32.mrf.mxu1  ;;  %5404 = vmatprep.mubr.msk.bf16.mxu0 %vm391_vm0, %v4139_v60  ;;  %v7474_v60 = vld [vmem:[#allocation24_spill] sm:$0xff]  ;;  %v7475_v5 = vld [vmem:[#allocation25_spill] sm:$0xff] }
 0x1ef   : > { %v2231_v63 = vadd.f32 %v5233_v45, %v6846_v47  ;;  %v7014_v46 = vadd.f32 %v2431_v48, %v2228_v6  ;;  %v5267_v53 = vpop.f32.mrf.mxu0  ;;  %v3609_v6 = vld [vmem:[#allocation2 + $0x110] sm:$0xff] }
 0x1f0   : > { %v4140_v37 = vpack.c.bf16 %v4118_v23, %v4117_v2  ;;  %v2140_v52 = vpop.f32.mrf.mxu1  ;;  %v4047_v9 = vpop.permute.xlu1 %4046  ;;  %v7476_v2 = vld [vmem:[#allocation26_spill] sm:$0xff] }
 0x1f1   : > { %v2229_v62 = vadd.f32 %v2140_v52, %v1710_v34  ;;  %v7016_v14 = vadd.f32 %v5267_v53, %v2231_v63  ;;  %v4120_v17 = vmul.f32 %v4047_v9, %v7473_v30  ;;  %v4042_v40 = vpop.permute.xlu0 %4041  ;;  %v2434_v41 = vpop.f32.mrf.mxu0  ;;  %v3625_v34 = vpack.c.bf16 %v3607_v26, %v3606_v10  ;;  %v3611_v26 = vld [vmem:[#allocation2 + $0x120] sm:$0xff] }
 0x1f2   : > { %v4119_v21 = vmul.f32 %v4042_v40, %v7474_v60  ;;  %v5236_v0 = vpop.f32.mrf.mxu1  ;;  %5375 = vmatmul.mubr.msk.bf16.gmra.mxu1 %vm391_vm0, %v3623_v58  ;;  %5405 = vmatmul.mubr.msk.bf16.gmra.mxu0 %vm391_vm0, %v4140_v37  ;;  %v3626_v37 = vpack.c.bf16 %v3609_v6, %v3608_v12 }
 0x1f3   : > { %v2234_v59 = vadd.f32 %v5236_v0, %v6855_v4  ;;  %v7023_v47 = vadd.f32 %v2434_v41, %v2229_v62  ;;  %v5270_v20 = vpop.f32.mrf.mxu0  ;;  %5378 = vmatprep.mubr.msk.bf16.mxu1 %vm391_vm0, %v3624_v15 }
 0x1f4   : > { %v4141_v27 = vpack.c.bf16 %v4120_v17, %v4119_v21  ;;  %v2153_v32 = vpop.f32.mrf.mxu1  ;;  %v4057_v49 = vpop.permute.xlu1 %4056  ;;  %v7479_v17 = vld [vmem:[#allocation27_spill] sm:$0xff]  ;;  %v7480_v21 = vld [vmem:[#allocation28_spill] sm:$0xff] }
 0x1f5   : > { %v2232_v61 = vadd.f32 %v2153_v32, %v6859_v51  ;;  %v7027_v23 = vadd.f32 %v5270_v20, %v2234_v59  ;;  %v4122_v48 = vmul.f32 %v4057_v49, %v7475_v5  ;;  %v4052_v39 = vpop.permute.xlu0 %4051  ;;  %v2447_v4 = vpop.f32.mrf.mxu0 }
 0x1f6   : > { %v4121_v45 = vmul.f32 %v4052_v39, %v7476_v2  ;;  %v5237_v58 = vpop.f32.mrf.mxu1  ;;  %5408 = vmatprep.mubr.msk.bf16.mxu0 %vm391_vm0, %v4141_v27  ;;  %v7483_v39 = vld [vmem:[#allocation29_spill] sm:$0xff] }
 0x1f7   : > { %v2235_v63 = vadd.f32 %v5237_v58, %v6866_v11  ;;  %v7033_v53 = vadd.f32 %v2447_v4, %v2232_v61  ;;  %v5271_v15 = vpop.f32.mrf.mxu0 }
 0x1f8   : > { %v4142_v52 = vpack.c.bf16 %v4122_v48, %v4121_v45  ;;  %v2156_v51 = vpop.f32.mrf.mxu1  ;;  %v4067_v9 = vpop.permute.xlu1 %4066 }
 0x1f9   : > { %7477 = vst [vmem:[#allocation3_spill] sm:$0xff] %v7033_v53  ;;  %v2233_v62 = vadd.f32 %v2156_v51, %v6872_v54  ;;  %v7036_v30 = vadd.f32 %v5271_v15, %v2235_v63  ;;  %v4124_v40 = vmul.f32 %v4067_v9, %v7479_v17  ;;  %v4062_v41 = vpop.permute.xlu0 %4061  ;;  %v2450_v60 = vpop.f32.mrf.mxu0  ;;  %v3610_v54 = vld [vmem:[#allocation2 + $0x118] sm:$0xff]  ;;  %v7487_v17 = vld [vmem:[#allocation31_spill] sm:$0xff] }
 0x1fa   : > { %v4123_v0 = vmul.f32 %v4062_v41, %v7480_v21  ;;  %v5240_v59 = vpop.f32.mrf.mxu1  ;;  %5379 = vmatmul.mubr.msk.bf16.gmra.mxu1 %vm391_vm0, %v3625_v34  ;;  %5409 = vmatmul.mubr.msk.bf16.gmra.mxu0 %vm391_vm0, %v4142_v52  ;;  %v3627_v2 = vpack.c.bf16 %v3611_v26, %v3610_v54 }
 0x1fb   : > { %7478 = vst [vmem:[#allocation4_spill] sm:$0xff] %v7036_v30  ;;  %v2238_v11 = vadd.f32 %v5240_v59, %v6881_v16  ;;  %v7043_v20 = vadd.f32 %v2450_v60, %v2233_v62  ;;  %v5274_v10 = vpop.f32.mrf.mxu0  ;;  %5382 = vmatprep.mubr.msk.bf16.mxu1 %vm391_vm0, %v3626_v37  ;;  %v7488_v60 = vld [vmem:[#allocation32_spill] sm:$0xff] }
 0x1fc   : > { %v4143_v27 = vpack.c.bf16 %v4124_v40, %v4123_v0  ;;  %v2169_v32 = vpop.f32.mrf.mxu1  ;;  %v4077_v49 = vpop.permute.xlu1 %4076 }
 0x1fd   : > { %7481 = vst [vmem:[#allocation5_spill] sm:$0xff] %v7043_v20  ;;  %v2236_v12 = vadd.f32 %v2169_v32, %v6887_v22  ;;  %v7047_v6 = vadd.f32 %v5274_v10, %v2238_v11  ;;  %v4126_v61 = vmul.f32 %v4077_v49, %v6862_v3  ;;  %v4072_v5 = vpop.permute.xlu0 %4071  ;;  %v2463_v48 = vpop.f32.mrf.mxu0  ;;  %v7486_v3 = vld [vmem:[#allocation30_spill] sm:$0xff] }
 0x1fe   : > { %v4125_v16 = vmul.f32 %v4072_v5, %v7483_v39  ;;  %v5241_v4 = vpop.f32.mrf.mxu1  ;;  %5412 = vmatprep.mubr.msk.bf16.mxu0 %vm391_vm0, %v4143_v27 }
 0x1ff   : > { %7482 = vst [vmem:[#allocation6_spill] sm:$0xff] %v7047_v6  ;;  %v2239_v45 = vadd.f32 %v5241_v4, %v6894_v35  ;;  %v7053_v58 = vadd.f32 %v2463_v48, %v2236_v12  ;;  %v5275_v34 = vpop.f32.mrf.mxu0  ;;  %v3905_v35 = vld [vmem:[#allocation2 + $0x121] sm:$0xff] }
 0x200   : > { %v4144_v63 = vpack.c.bf16 %v4126_v61, %v4125_v16  ;;  %v2172_v15 = vpop.f32.mrf.mxu1  ;;  %v4087_v22 = vpop.permute.xlu1 %4086 }
 0x201   : > { %7484 = vst [vmem:[#allocation8_spill] sm:$0xff] %v7053_v58  ;;  %v2237_v37 = vadd.f32 %v2172_v15, %v6898_v1  ;;  %v7056_v52 = vadd.f32 %v5275_v34, %v2239_v45  ;;  %v4128_v51 = vmul.f32 %v4087_v22, %v7486_v3  ;;  %v4082_v9 = vpop.permute.xlu0 %4081  ;;  %v2466_v62 = vpop.f32.mrf.mxu0  ;;  %v3904_v1 = vld [vmem:[#allocation2 + $0x119] sm:$0xff] }
 0x202   : > { %v4127_v40 = vmul.f32 %v4082_v9, %v7487_v17  ;;  %v5244_v41 = vpop.f32.mrf.mxu1  ;;  %5383 = vmatmul.mubr.msk.bf16.gmra.mxu1 %vm391_vm0, %v3627_v2  ;;  %5413 = vmatmul.mubr.msk.bf16.gmra.mxu0 %vm391_vm0, %v4144_v63 }
 0x203   : > { %7485 = vst [vmem:[#allocation7_spill] sm:$0xff] %v7056_v52  ;;  %v2242_v21 = vadd.f32 %v5244_v41, %v7488_v60  ;;  %v7063_v0 = vadd.f32 %v2466_v62, %v2237_v37  ;;  %v5278_v59 = vpop.f32.mrf.mxu0 }
 0x204   : > { %v4145_v11 = vpack.c.bf16 %v4128_v51, %v4127_v40  ;;  %v2185_v10 = vpop.f32.mrf.mxu1  ;;  %v4097_v54 = vpop.permute.xlu1 %4096 }
 0x205   : > { %7489 = vst [vmem:[#allocation9_spill] sm:$0xff] %v7063_v0  ;;  %v2240_v26 = vadd.f32 %v2185_v10, %v6908_v57  ;;  %v7066_v27 = vadd.f32 %v5278_v59, %v2242_v21  ;;  %v4130_v32 = vmul.f32 %v4097_v54, %v3905_v35  ;;  %v4092_v49 = vpop.permute.xlu0 %4091  ;;  %v2479_v12 = vpop.f32.mrf.mxu0 }
 0x206   : > { %v4129_v61 = vmul.f32 %v4092_v49, %v3904_v1  ;;  %v5245_v5 = vpop.f32.mrf.mxu1  ;;  %5416 = vmatprep.mubr.msk.bf16.mxu0 %vm391_vm0, %v4145_v11 }
 0x207   : > { %7490 = vst [vmem:[#allocation10_spill] sm:$0xff] %v7066_v27  ;;  %v2243_v48 = vadd.f32 %v5245_v5, %v6912_v50  ;;  %v7070_v39 = vadd.f32 %v2479_v12, %v2240_v26  ;;  %v5279_v16 = vpop.f32.mrf.mxu0 }
 0x208   : > { %v4146_v4 = vpack.c.bf16 %v4130_v32, %v4129_v61  ;;  %v2188_v2 = vpop.f32.mrf.mxu1 }
 0x209   : > { %7491 = vst [vmem:[#allocation11_spill] sm:$0xff] %v7070_v39  ;;  %v2241_v45 = vadd.f32 %v2188_v2, %v6915_v33  ;;  %v7073_v34 = vadd.f32 %v5279_v16, %v2243_v48  ;;  %v2482_v57 = vpop.f32.mrf.mxu0 }
 0x20a   : > { %v5248_v63 = vpop.f32.mrf.mxu1  ;;  %5417 = vmatmul.mubr.msk.bf16.gmra.mxu0 %vm391_vm0, %v4146_v4 }
 0x20b   : > { %7492 = vst [vmem:[#allocation12_spill] sm:$0xff] %v7073_v34  ;;  %v2246_v15 = vadd.f32 %v5248_v63, %v6920_v19  ;;  %v7077_v22 = vadd.f32 %v2482_v57, %v2241_v45  ;;  %v5282_v37 = vpop.f32.mrf.mxu0 }
 0x20c   : > { %v2201_v3 = vpop.f32.mrf.mxu1 }
 0x20d   : > { %7493 = vst [vmem:[#allocation14_spill] sm:$0xff] %v7077_v22  ;;  %v2244_v50 = vadd.f32 %v2201_v3, %v6924_v7  ;;  %v7080_v51 = vadd.f32 %v5282_v37, %v2246_v15  ;;  %v2495_v9 = vpop.f32.mrf.mxu0 }
 0x20e   : > { %v5249_v62 = vpop.f32.mrf.mxu1 }
 0x20f   : > { %7494 = vst [vmem:[#allocation13_spill] sm:$0xff] %v7080_v51  ;;  %v2247_v33 = vadd.f32 %v5249_v62, %v6928_v44  ;;  %v7083_v17 = vadd.f32 %v2495_v9, %v2244_v50  ;;  %v5283_v40 = vpop.f32.mrf.mxu0 }
 0x210   : > { %v2204_v41 = vpop.f32.mrf.mxu1 }
 0x211   : > { %7495 = vst [vmem:[#allocation15_spill] sm:$0xff] %v7083_v17  ;;  %v2245_v35 = vadd.f32 %v2204_v41, %v6930_v42  ;;  %v7086_v60 = vadd.f32 %v5283_v40, %v2247_v33  ;;  %v2498_v19 = vpop.f32.mrf.mxu0 }
 0x212   : > { %v7090_v59 = vpop.f32.mrf.mxu1 }
 0x213   : > { %7496 = vst [vmem:[#allocation16_spill] sm:$0xff] %v7086_v60  ;;  %v7088_v21 = vadd.f32 %v2498_v19, %v2245_v35 }
 0x214   : > { %v7092_v7 = vpop.f32.mrf.mxu1 }
 0x215   : > { %7497 = vst [vmem:[#allocation17_spill] sm:$0xff] %v7088_v21 }
 0x216   : > { %v7094_v1 = vpop.f32.mrf.mxu1 }
 0x218   : > { %v7098_v44 = vpop.f32.mrf.mxu1 }
 0x21a   : > { %v7096_v11 = vpop.f32.mrf.mxu0 }
 0x21c   : > { %v7100_v10 = vpop.f32.mrf.mxu0 }
 0x21e   : > { %v7104_v42 = vpop.f32.mrf.mxu0 }
 0x220   : > { %v7108_v32 = vpop.f32.mrf.mxu0 }
 0x222   : > { %v7102_v54 = vpop.f32.mrf.mxu1 }
 0x224   : > { %v7106_v26 = vpop.f32.mrf.mxu1 }
 0x226   : > { %v7110_v49 = vpop.f32.mrf.mxu1 }
 0x228   : > { %v7114_v61 = vpop.f32.mrf.mxu1 }
 0x22a   : > { %v7112_v12 = vpop.f32.mrf.mxu0 }
 0x22c   : > { %v7116_v5 = vpop.f32.mrf.mxu0 }
 0x22e   : > { %v7120_v16 = vpop.f32.mrf.mxu0 }
 0x230   : > { %v7124_v2 = vpop.f32.mrf.mxu0 }
 0x232   : > { %v7118_v48 = vpop.f32.mrf.mxu1 }
 0x234   : > { %v7122_v4 = vpop.f32.mrf.mxu1 }
 0x236   : > { %v7126_v45 = vpop.f32.mrf.mxu1 }
 0x238   : > { %v7130_v63 = vpop.f32.mrf.mxu1 }
 0x23a   : > { %v7128_v57 = vpop.f32.mrf.mxu0 }
 0x23c   : > { %v7132_v15 = vpop.f32.mrf.mxu0 }
 0x23e   : > { %v7136_v3 = vpop.f32.mrf.mxu0 }
 0x240   : > { %v7140_v9 = vpop.f32.mrf.mxu0 }
 0x242   : > { %v7134_v37 = vpop.f32.mrf.mxu1 }
 0x244   : > { %v7138_v50 = vpop.f32.mrf.mxu1 }
 0x246   : > { %v7142_v62 = vpop.f32.mrf.mxu1 }
 0x248   : > { %v7146_v40 = vpop.f32.mrf.mxu1 }
 0x24a   : > { %v7144_v33 = vpop.f32.mrf.mxu0 }
 0x24c   : > { %v7148_v41 = vpop.f32.mrf.mxu0 }
 0x24e   : > { %v7152_v19 = vpop.f32.mrf.mxu0 }
 0x250   : > { %v7156_v60 = vpop.f32.mrf.mxu0 }
 0x251   : > { %v7150_v35 = vpop.f32.mrf.mxu1 }
 0x253   : > { %v7154_v21 = vpop.f32.mrf.mxu1 }
 0x254   : > { %7498 = vst [vmem:[#allocation18_spill] sm:$0xff] %v7154_v21 }
 0x255   : > { %v7158_v17 = vpop.f32.mrf.mxu1 }
 0x256   : > { %7499 = vst [vmem:[#allocation20_spill] sm:$0xff] %v7158_v17 }
 0x257   : > { %v7162_v22 = vpop.f32.mrf.mxu1 }
 0x258   : > { %7501 = vst [vmem:[#allocation21_spill] sm:$0xff] %v7162_v22 }
 0x25a   : > { %v7160_v51 = vpop.f32.mrf.mxu0 }
 0x25b   : > { %7500 = vst [vmem:[#allocation19_spill] sm:$0xff] %v7160_v51 }
 0x25c   : > { %v7164_v34 = vpop.f32.mrf.mxu0 }
 0x25d   : > { %7502 = vst [vmem:[#allocation22_spill] sm:$0xff] %v7164_v34 }
 0x25e   : > { %v7168_v27 = vpop.f32.mrf.mxu0 }
 0x25f   : > { %7504 = vst [vmem:[#allocation24_spill] sm:$0xff] %v7168_v27 }
 0x260   : > { %v7172_v52 = vpop.f32.mrf.mxu0 }
 0x261   : > { %7506 = vst [vmem:[#allocation26_spill] sm:$0xff] %v7172_v52 }
 0x262   : > { %v7166_v39 = vpop.f32.mrf.mxu1 }
 0x263   : > { %7503 = vst [vmem:[#allocation23_spill] sm:$0xff] %v7166_v39 }
 0x264   : > { %v7170_v0 = vpop.f32.mrf.mxu1 }
 0x265   : > { %7505 = vst [vmem:[#allocation25_spill] sm:$0xff] %v7170_v0 }
 0x266   : > { %v7174_v58 = vpop.f32.mrf.mxu1 }
 0x267   : > { %7507 = vst [vmem:[#allocation27_spill] sm:$0xff] %v7174_v58 }
 0x268   : > { %v7178_v20 = vpop.f32.mrf.mxu1 }
 0x269   : > { %7509 = vst [vmem:[#allocation29_spill] sm:$0xff] %v7178_v20 }
 0x26a   : > { %v7176_v6 = vpop.f32.mrf.mxu0 }
 0x26b   : > { %7508 = vst [vmem:[#allocation28_spill] sm:$0xff] %v7176_v6 }
 0x26c   : > { %v7180_v17 = vpop.f32.mrf.mxu0 }
 0x26d   : > { %7510 = vst [vmem:[#allocation30_spill] sm:$0xff] %v7180_v17 }
 0x26e   : > { %v7184_v22 = vpop.f32.mrf.mxu0 }
 0x26f   : > { %7512 = vst [vmem:[#allocation32_spill] sm:$0xff] %v7184_v22 }
 0x270   : > { %v7188_v39 = vpop.f32.mrf.mxu0 }
 0x271   : > { %7514 = vst [vmem:[#allocation34_spill] sm:$0xff] %v7188_v39 }
 0x272   : > { %v7182_v51 = vpop.f32.mrf.mxu1 }
 0x273   : > { %7511 = vst [vmem:[#allocation31_spill] sm:$0xff] %v7182_v51 }
 0x274   : > { %v7186_v34 = vpop.f32.mrf.mxu1 }
 0x275   : > { %7513 = vst [vmem:[#allocation33_spill] sm:$0xff] %v7186_v34 }
 0x276   : > { %v7190_v27 = vpop.f32.mrf.mxu1 }
 0x277   : > { %7515 = vst [vmem:[#allocation35_spill] sm:$0xff] %v7190_v27 }
 0x278   : > { %v7194_v52 = vpop.f32.mrf.mxu1 }
 0x279   : > { %7517 = vst [vmem:[#allocation37_spill] sm:$0xff] %v7194_v52 }
 0x27a   : > { %v7192_v0 = vpop.f32.mrf.mxu0 }
 0x27b   : > { %7516 = vst [vmem:[#allocation36_spill] sm:$0xff] %v7192_v0 }
 0x27c   : > { %v7196_v58 = vpop.f32.mrf.mxu0 }
 0x27d   : > { %7518 = vst [vmem:[#allocation38_spill] sm:$0xff] %v7196_v58  ;;  %v3031_v58 = vadd.f32 %v7090_v59, %v6941_v29  ;;  %v7229_v29 = vld [vmem:[%s7397_s4] ss:$0 sm:$0xff] }
 0x27e   : > { %v7200_v20 = vpop.f32.mrf.mxu0 }
 0x27f   : > { %7520 = vst [vmem:[#allocation40_spill] sm:$0xff] %v7200_v20 }
 0x280   : > { %v7206_v22 = vpop.f32.mrf.mxu0 }
 0x281   : > { %7523 = vst [vmem:[#allocation43_spill] sm:$0xff] %v7206_v22 }
 0x282   : > { %v7198_v6 = vpop.f32.mrf.mxu1 }
 0x283   : > { %7519 = vst [vmem:[#allocation39_spill] sm:$0xff] %v7198_v6 }
 0x284   : > { %v7202_v17 = vpop.f32.mrf.mxu1 }
 0x285   : > { %7521 = vst [vmem:[#allocation41_spill] sm:$0xff] %v7202_v17  ;;  %v3029_v17 = vadd.f32 %v7092_v7, %v6948_v36 }
 0x286   : > { %v7204_v51 = vpop.f32.mrf.mxu1 }
 0x287   : > { %7522 = vst [vmem:[#allocation42_spill] sm:$0xff] %v7204_v51  ;;  %v3550_v51 = vadd.f32 %v7096_v11, %v3031_v58  ;;  %v3030_v58 = vadd.f32 %v7098_v44, %v6957_v18 }
 0x288   : > { %v7208_v34 = vpop.f32.mrf.mxu1 }
 0x289   : > { %7524 = vst [vmem:[#allocation44_spill] sm:$0xff] %v7208_v34  ;;  %v3549_v11 = vadd.f32 %v7108_v32, %v3030_v58 }
 0x28a   : > { %v7210_v39 = vpop.f32.mrf.mxu0  ;;  %v5356_v27 = vpop.f32.mrf.mxu1 }
 0x28b   : > { %7525 = vst [vmem:[#allocation45_spill] sm:$0xff] %v7210_v39  ;;  %v3548_v39 = vadd.f32 %v7100_v10, %v3029_v17  ;;  %v3844_v30 = vadd.f32 %v5356_v27, %v3550_v51 }
 0x28c   : > { %v7212_v0 = vpop.f32.mrf.mxu0  ;;  %v3715_v52 = vpop.f32.mrf.mxu1 }
 0x28d   : > { %7526 = vst [vmem:[#allocation46_spill] sm:$0xff] %v7212_v0  ;;  %v3032_v0 = vadd.f32 %v7094_v1, %v6950_v38  ;;  %v3842_v59 = vadd.f32 %v3715_v52, %v3548_v39  ;;  %v3035_v38 = vadd.f32 %v7102_v54, %v6963_v55  ;;  %v3033_v52 = vadd.f32 %v7106_v26, %v6970_v8 }
 0x28e   : > { %v7216_v6 = vpop.f32.mrf.mxu0  ;;  %v5357_v20 = vpop.f32.mrf.mxu1  ;;  %v3034_v8 = vadd.f32 %v7114_v61, %v6979_v28 }
 0x28f   : > { %v3551_v7 = vadd.f32 %v7104_v42, %v3032_v0  ;;  %v3554_v0 = vadd.f32 %v7112_v12, %v3035_v38 }
 0x290   : > { %v7221_v22 = vpop.f32.mrf.mxu0  ;;  %v3718_v34 = vpop.f32.mrf.mxu1 }
 0x292   : > { %v5360_v21 = vpop.f32.mrf.mxu1  ;;  %v5390_v53 = vpop.f32.mrf.mxu0 }
 0x293   : > { %v4363_v36 = vadd.f32 %v5390_v53, %v3844_v30  ;;  %v3036_v53 = vadd.f32 %v7110_v49, %v6972_v56  ;;  %v3845_v30 = vadd.f32 %v5357_v20, %v3551_v7  ;;  %v3552_v56 = vadd.f32 %v7116_v5, %v3033_v52 }
 0x294   : > { %v3731_v17 = vpop.f32.mrf.mxu1  ;;  %v4234_v27 = vpop.f32.mrf.mxu0  ;;  %v3843_v20 = vadd.f32 %v3718_v34, %v3549_v11  ;;  %v3848_v26 = vadd.f32 %v5360_v21, %v3554_v0  ;;  %v3039_v34 = vadd.f32 %v7118_v48, %v6985_v25  ;;  %v3038_v25 = vadd.f32 %v7130_v63, %v7001_v24 }
 0x295   : > { %v4402_v51 = vadd.f32 %v7229_v29, %v4363_v36  ;;  %v4361_v1 = vadd.f32 %v4234_v27, %v3842_v59  ;;  %v3555_v12 = vadd.f32 %v7120_v16, %v3036_v53  ;;  %v3553_v59 = vadd.f32 %v7124_v2, %v3034_v8 }
 0x296   : > { %v5361_v18 = vpop.f32.mrf.mxu1  ;;  %v5391_v39 = vpop.f32.mrf.mxu0  ;;  %v3846_v5 = vadd.f32 %v3731_v17, %v3552_v56  ;;  %v3037_v27 = vadd.f32 %v7122_v4, %v6992_v31 }
 0x297   : > { %vm4434_vm2 = vcmp.ge.f32.partialorder %v4402_v51, 0.0  ;;  %v4466_v55 = vmul.f32 0.2, %v4402_v51  ;;  %v4400_v44 = vadd.f32 %v7229_v29, %v4361_v1  ;;  %v4364_v10 = vadd.f32 %v5391_v39, %v3845_v30 }
 0x298   : > { %v3734_v54 = vpop.f32.mrf.mxu1  ;;  %v4237_v42 = vpop.f32.mrf.mxu0  ;;  %v3040_v1 = vadd.f32 %v7126_v45, %v6994_v43  ;;  %v3849_v11 = vadd.f32 %v5361_v18, %v3555_v12  ;;  %v3558_v30 = vadd.f32 %v7128_v57, %v3039_v34  ;;  %v3556_v24 = vadd.f32 %v7132_v15, %v3037_v27 }
 0x299   : > { %v4498_v32 = vsel %vm4434_vm2, %v4402_v51, %v4466_v55  ;;  %vm4432_vm3 = vcmp.ge.f32.partialorder %v4400_v44, 0.0  ;;  %v4464_v49 = vmul.f32 0.2, %v4400_v44  ;;  %v4403_v36 = vadd.f32 %v7229_v29, %v4364_v10 }
 0x29a   : > { %4530 = vst [vmem:[%s7248_s26 + $0x10] sm:$0xff] %v4498_v32  ;;  %v4362_v58 = vadd.f32 %v4237_v42, %v3843_v20  ;;  %v5364_v28 = vpop.f32.mrf.mxu1  ;;  %v5394_v61 = vpop.f32.mrf.mxu0  ;;  %v3847_v45 = vadd.f32 %v3734_v54, %v3553_v59  ;;  %v3559_v57 = vadd.f32 %v7136_v3, %v3040_v1  ;;  %v3557_v20 = vadd.f32 %v7140_v9, %v3038_v25 }
 0x29b   : > { %v4496_v7 = vsel %vm4432_vm3, %v4400_v44, %v4464_v49  ;;  %v4367_v21 = vadd.f32 %v5394_v61, %v3848_v26  ;;  %vm4435_vm4 = vcmp.ge.f32.partialorder %v4403_v36, 0.0  ;;  %v4467_v16 = vmul.f32 0.2, %v4403_v36 }
 0x29c   : > { %4528 = vst [vmem:[%s7248_s26] sm:$0xff] %v4496_v7  ;;  %v4401_v2 = vadd.f32 %v7229_v29, %v4362_v58  ;;  %v3747_v38 = vpop.f32.mrf.mxu1  ;;  %v4250_v51 = vpop.f32.mrf.mxu0  ;;  %v3852_v44 = vadd.f32 %v5364_v28, %v3558_v30  ;;  %v3043_v26 = vadd.f32 %v7134_v37, %v7007_v13  ;;  %v3041_v59 = vadd.f32 %v7138_v50, %v7014_v46 }
 0x29d   : > { %v4406_v48 = vadd.f32 %v7229_v29, %v4367_v21  ;;  %v4365_v17 = vadd.f32 %v4250_v51, %v3846_v5  ;;  %v4499_v52 = vsel %vm4435_vm4, %v4403_v36, %v4467_v16  ;;  %v3850_v32 = vadd.f32 %v3747_v38, %v3556_v24 }
 0x29e   : > { %vm4433_vm5 = vcmp.ge.f32.partialorder %v4401_v2, 0.0  ;;  %v4465_v31 = vmul.f32 0.2, %v4401_v2  ;;  %v5365_v4 = vpop.f32.mrf.mxu1  ;;  %v5395_v53 = vpop.f32.mrf.mxu0  ;;  %4531 = vst [vmem:[%s7248_s26 + $0x18] sm:$0xff] %v4499_v52  ;;  %v3044_v28 = vadd.f32 %v7142_v62, %v7016_v14  ;;  %v3042_v13 = vadd.f32 %v7146_v40, %v7023_v47 }
 0x29f   : > { %vm4438_vm6 = vcmp.ge.f32.partialorder %v4406_v48, 0.0  ;;  %v4470_v39 = vmul.f32 0.2, %v4406_v48  ;;  %v4404_v43 = vadd.f32 %v7229_v29, %v4365_v17  ;;  %v4368_v0 = vadd.f32 %v5395_v53, %v3849_v11 }
 0x2a0   : > { %v4497_v63 = vsel %vm4433_vm5, %v4401_v2, %v4465_v31  ;;  %v3750_v18 = vpop.f32.mrf.mxu1  ;;  %v4253_v55 = vpop.f32.mrf.mxu0  ;;  %v3853_v34 = vadd.f32 %v5365_v4, %v3559_v57  ;;  %v3562_v21 = vadd.f32 %v7144_v33, %v3043_v26  ;;  %v3560_v47 = vadd.f32 %v7148_v41, %v3041_v59 }
 0x2a1   : > { %4529 = vst [vmem:[%s7248_s26 + $0x8] sm:$0xff] %v4497_v63  ;;  %v4502_v8 = vsel %vm4438_vm6, %v4406_v48, %v4470_v39  ;;  %vm4436_vm7 = vcmp.ge.f32.partialorder %v4404_v43, 0.0  ;;  %v4468_v56 = vmul.f32 0.2, %v4404_v43  ;;  %v4407_v10 = vadd.f32 %v7229_v29, %v4368_v0  ;;  %v7527_v39 = vld [vmem:[#allocation3_spill] sm:$0xff]  ;;  %v7529_v0 = vld [vmem:[#allocation4_spill] sm:$0xff] }
 0x2a2   : > { %4534 = vst [vmem:[%s7248_s26 + $0x30] sm:$0xff] %v4502_v8  ;;  %v4366_v42 = vadd.f32 %v4253_v55, %v3847_v45  ;;  %v5368_v15 = vpop.f32.mrf.mxu1  ;;  %v5398_v54 = vpop.f32.mrf.mxu0  ;;  %v3851_v62 = vadd.f32 %v3750_v18, %v3557_v20  ;;  %v3563_v33 = vadd.f32 %v7152_v19, %v3044_v28  ;;  %v3561_v48 = vadd.f32 %v7156_v60, %v3042_v13  ;;  %v7530_v18 = vld [vmem:[#allocation20_spill] sm:$0xff]  ;;  %v7532_v8 = vld [vmem:[#allocation21_spill] sm:$0xff] }
 0x2a3   : > { %v4500_v49 = vsel %vm4436_vm7, %v4404_v43, %v4468_v56  ;;  %v4371_v12 = vadd.f32 %v5398_v54, %v3852_v44  ;;  %vm4439_vm8 = vcmp.ge.f32.partialorder %v4407_v10, 0.0  ;;  %v4471_v3 = vmul.f32 0.2, %v4407_v10  ;;  %v7528_v43 = vld [vmem:[#allocation18_spill] sm:$0xff]  ;;  %v7531_v44 = vld [vmem:[#allocation5_spill] sm:$0xff]  ;;  %v7533_v54 = vld [vmem:[#allocation19_spill] sm:$0xff] }
 0x2a4   : > { %4532 = vst [vmem:[%s7248_s26 + $0x20] sm:$0xff] %v4500_v49  ;;  %v4405_v9 = vadd.f32 %v7229_v29, %v4366_v42  ;;  %v3763_v36 = vpop.f32.mrf.mxu1  ;;  %v4266_v58 = vpop.f32.mrf.mxu0  ;;  %v3856_v51 = vadd.f32 %v5368_v15, %v3562_v21  ;;  %v3047_v31 = vadd.f32 %v7150_v35, %v7027_v23  ;;  %v3045_v24 = vadd.f32 %v7528_v43, %v7527_v39 }
 0x2a5   : > { %v4410_v37 = vadd.f32 %v7229_v29, %v4371_v12  ;;  %v4369_v61 = vadd.f32 %v4266_v58, %v3850_v32  ;;  %v4503_v5 = vsel %vm4439_vm8, %v4407_v10, %v4471_v3  ;;  %v3854_v4 = vadd.f32 %v3763_v36, %v3560_v47  ;;  %v7534_v12 = vld [vmem:[#allocation22_spill] sm:$0xff] }
 0x2a6   : > { %vm4437_vm9 = vcmp.ge.f32.partialorder %v4405_v9, 0.0  ;;  %v4469_v46 = vmul.f32 0.2, %v4405_v9  ;;  %v5369_v50 = vpop.f32.mrf.mxu1  ;;  %v5399_v7 = vpop.f32.mrf.mxu0  ;;  %4535 = vst [vmem:[%s7248_s26 + $0x38] sm:$0xff] %v4503_v5  ;;  %v3048_v55 = vadd.f32 %v7530_v18, %v7529_v0  ;;  %v3046_v23 = vadd.f32 %v7532_v8, %v7531_v44  ;;  %v7537_v47 = vld [vmem:[#allocation6_spill] sm:$0xff]  ;;  %v7545_v0 = vld [vmem:[#allocation28_spill] sm:$0xff] }
 0x2a7   : > { %vm4442_vm10 = vcmp.ge.f32.partialorder %v4410_v37, 0.0  ;;  %v4474_v27 = vmul.f32 0.2, %v4410_v37  ;;  %v4408_v14 = vadd.f32 %v7229_v29, %v4369_v61  ;;  %v4372_v16 = vadd.f32 %v5399_v7, %v3853_v34  ;;  %v7535_v34 = vld [vmem:[#allocation24_spill] sm:$0xff]  ;;  %v7546_v8 = vld [vmem:[#allocation30_spill] sm:$0xff] }
 0x2a8   : > { %v4501_v40 = vsel %vm4437_vm9, %v4405_v9, %v4469_v46  ;;  %v3766_v2 = vpop.f32.mrf.mxu1  ;;  %v4269_v38 = vpop.f32.mrf.mxu0  ;;  %v3857_v57 = vadd.f32 %v5369_v50, %v3563_v33  ;;  %v3566_v26 = vadd.f32 %v7533_v54, %v3047_v31  ;;  %v3564_v59 = vadd.f32 %v7534_v12, %v3045_v24  ;;  %v7536_v46 = vld [vmem:[#allocation26_spill] sm:$0xff] }
 0x2a9   : > { %4533 = vst [vmem:[%s7248_s26 + $0x28] sm:$0xff] %v4501_v40  ;;  %v4506_v1 = vsel %vm4442_vm10, %v4410_v37, %v4474_v27  ;;  %vm4440_vm11 = vcmp.ge.f32.partialorder %v4408_v14, 0.0  ;;  %v4472_v25 = vmul.f32 0.2, %v4408_v14  ;;  %v4411_v17 = vadd.f32 %v7229_v29, %v4372_v16 }
 0x2aa   : > { %4538 = vst [vmem:[%s7248_s26 + $0x50] sm:$0xff] %v4506_v1  ;;  %v4370_v11 = vadd.f32 %v4269_v38, %v3851_v62  ;;  %v5372_v41 = vpop.f32.mrf.mxu1  ;;  %v5402_v52 = vpop.f32.mrf.mxu0  ;;  %v3855_v3 = vadd.f32 %v3766_v2, %v3561_v48  ;;  %v3567_v5 = vadd.f32 %v7535_v34, %v3048_v55  ;;  %v3565_v50 = vadd.f32 %v7536_v46, %v3046_v23  ;;  %v7538_v62 = vld [vmem:[#allocation23_spill] sm:$0xff]  ;;  %v7540_v1 = vld [vmem:[#allocation25_spill] sm:$0xff] }
 0x2ab   : > { %v4504_v53 = vsel %vm4440_vm11, %v4408_v14, %v4472_v25  ;;  %v4375_v30 = vadd.f32 %v5402_v52, %v3856_v51  ;;  %vm4443_vm12 = vcmp.ge.f32.partialorder %v4411_v17, 0.0  ;;  %v4475_v19 = vmul.f32 0.2, %v4411_v17  ;;  %v7539_v51 = vld [vmem:[#allocation8_spill] sm:$0xff]  ;;  %v7542_v52 = vld [vmem:[#allocation27_spill] sm:$0xff]  ;;  %v7552_v46 = vld [vmem:[#allocation33_spill] sm:$0xff] }
 0x2ac   : > { %4536 = vst [vmem:[%s7248_s26 + $0x40] sm:$0xff] %v4504_v53  ;;  %v4409_v60 = vadd.f32 %v7229_v29, %v4370_v11  ;;  %v3779_v45 = vpop.f32.mrf.mxu1  ;;  %v4282_v63 = vpop.f32.mrf.mxu0  ;;  %v3860_v13 = vadd.f32 %v5372_v41, %v3566_v26  ;;  %v3051_v40 = vadd.f32 %v7538_v62, %v7537_v47  ;;  %v3049_v25 = vadd.f32 %v7540_v1, %v7539_v51  ;;  %v7541_v41 = vld [vmem:[#allocation7_spill] sm:$0xff]  ;;  %v7544_v53 = vld [vmem:[#allocation29_spill] sm:$0xff]  ;;  %v7547_v26 = vld [vmem:[#allocation32_spill] sm:$0xff] }
 0x2ad   : > { %v4414_v35 = vadd.f32 %v7229_v29, %v4375_v30  ;;  %v4373_v56 = vadd.f32 %v4282_v63, %v3854_v4  ;;  %v4507_v20 = vsel %vm4443_vm12, %v4411_v17, %v4475_v19  ;;  %v3858_v16 = vadd.f32 %v3779_v45, %v3564_v59  ;;  %v7543_v4 = vld [vmem:[#allocation9_spill] sm:$0xff]  ;;  %v7553_v47 = vld [vmem:[#allocation12_spill] sm:$0xff]  ;;  %v7554_v62 = vld [vmem:[#allocation35_spill] sm:$0xff] }
 0x2ae   : > { %vm4441_vm13 = vcmp.ge.f32.partialorder %v4409_v60, 0.0  ;;  %v4473_v10 = vmul.f32 0.2, %v4409_v60  ;;  %v5373_v42 = vpop.f32.mrf.mxu1  ;;  %v5403_v15 = vpop.f32.mrf.mxu0  ;;  %4539 = vst [vmem:[%s7248_s26 + $0x58] sm:$0xff] %v4507_v20  ;;  %v3052_v31 = vadd.f32 %v7542_v52, %v7541_v41  ;;  %v3050_v30 = vadd.f32 %v7544_v53, %v7543_v4  ;;  %v7557_v41 = vld [vmem:[#allocation36_spill] sm:$0xff]  ;;  %v7558_v53 = vld [vmem:[#allocation38_spill] sm:$0xff] }
 0x2af   : > { %vm4446_vm14 = vcmp.ge.f32.partialorder %v4414_v35, 0.0  ;;  %v4478_v32 = vmul.f32 0.2, %v4414_v35  ;;  %v4412_v49 = vadd.f32 %v7229_v29, %v4373_v56  ;;  %v4376_v36 = vadd.f32 %v5403_v15, %v3857_v57 }
 0x2b0   : > { %v4505_v9 = vsel %vm4441_vm13, %v4409_v60, %v4473_v10  ;;  %v3782_v58 = vpop.f32.mrf.mxu1  ;;  %v4285_v28 = vpop.f32.mrf.mxu0  ;;  %v3861_v24 = vadd.f32 %v5373_v42, %v3567_v5  ;;  %v3570_v18 = vadd.f32 %v7545_v0, %v3051_v40  ;;  %v3568_v23 = vadd.f32 %v7546_v8, %v3049_v25  ;;  %v7551_v5 = vld [vmem:[#allocation11_spill] sm:$0xff] }
 0x2b1   : > { %4537 = vst [vmem:[%s7248_s26 + $0x48] sm:$0xff] %v4505_v9  ;;  %v4510_v37 = vsel %vm4446_vm14, %v4414_v35, %v4478_v32  ;;  %vm4444_vm15 = vcmp.ge.f32.partialorder %v4412_v49, 0.0  ;;  %v4476_v61 = vmul.f32 0.2, %v4412_v49  ;;  %v4415_v7 = vadd.f32 %v7229_v29, %v4376_v36 }
 0x2b2   : > { %4542 = vst [vmem:[%s7248_s26 + $0x70] sm:$0xff] %v4510_v37  ;;  %v4374_v21 = vadd.f32 %v4285_v28, %v3855_v3  ;;  %v5376_v27 = vpop.f32.mrf.mxu1  ;;  %v5406_v14 = vpop.f32.mrf.mxu0  ;;  %v3859_v35 = vadd.f32 %v3782_v58, %v3565_v50  ;;  %v3571_v32 = vadd.f32 %v7547_v26, %v3052_v31  ;;  %v7549_v58 = vld [vmem:[#allocation10_spill] sm:$0xff]  ;;  %v7550_v28 = vld [vmem:[#allocation31_spill] sm:$0xff]  ;;  %v3053_v50 = vadd.f32 %v7552_v46, %v7551_v5 }
 0x2b3   : > { %v4508_v2 = vsel %vm4444_vm15, %v4412_v49, %v4476_v61  ;;  %v4379_v38 = vadd.f32 %v5406_v14, %v3860_v13  ;;  %vm4447_vm0 = vcmp.ge.f32.partialorder %v4415_v7, 0.0  ;;  %v4479_v33 = vmul.f32 0.2, %v4415_v7  ;;  %v7548_v49 = vld [vmem:[#allocation34_spill] sm:$0xff] }
 0x2b4   : > { %4540 = vst [vmem:[%s7248_s26 + $0x60] sm:$0xff] %v4508_v2  ;;  %v4413_v48 = vadd.f32 %v7229_v29, %v4374_v21  ;;  %v3795_v17 = vpop.f32.mrf.mxu1  ;;  %v4298_v11 = vpop.f32.mrf.mxu0  ;;  %v3864_v42 = vadd.f32 %v5376_v27, %v3570_v18  ;;  %v3569_v12 = vadd.f32 %v7548_v49, %v3050_v30  ;;  %v3055_v13 = vadd.f32 %v7550_v28, %v7549_v58  ;;  %v7556_v2 = vld [vmem:[#allocation37_spill] sm:$0xff]  ;;  %v7559_v18 = vld [vmem:[#allocation40_spill] sm:$0xff]  ;;  %v7566_v58 = vld [vmem:[#allocation42_spill] sm:$0xff] }
 0x2b5   : > { %v4418_v39 = vadd.f32 %v7229_v29, %v4379_v38  ;;  %v4377_v43 = vadd.f32 %v4298_v11, %v3858_v16  ;;  %v4511_v19 = vsel %vm4447_vm0, %v4415_v7, %v4479_v33  ;;  %v3862_v37 = vadd.f32 %v3795_v17, %v3568_v23  ;;  %v7555_v16 = vld [vmem:[#allocation14_spill] sm:$0xff] }
 0x2b6   : > { %vm4445_vm1 = vcmp.ge.f32.partialorder %v4413_v48, 0.0  ;;  %v4477_v60 = vmul.f32 0.2, %v4413_v48  ;;  %v5377_v45 = vpop.f32.mrf.mxu1  ;;  %v5407_v63 = vpop.f32.mrf.mxu0  ;;  %4543 = vst [vmem:[%s7248_s26 + $0x78] sm:$0xff] %v4511_v19  ;;  %v3056_v40 = vadd.f32 %v7554_v62, %v7553_v47  ;;  %v3054_v38 = vadd.f32 %v7556_v2, %v7555_v16  ;;  %v7568_v47 = vld [vmem:[#allocation46_spill] sm:$0xff] }
 0x2b7   : > { %vm4450_vm2 = vcmp.ge.f32.partialorder %v4418_v39, 0.0  ;;  %v4482_v55 = vmul.f32 0.2, %v4418_v39  ;;  %v4416_v44 = vadd.f32 %v7229_v29, %v4377_v43  ;;  %v4380_v57 = vadd.f32 %v5407_v63, %v3861_v24 }
 0x2b8   : > { %v4509_v56 = vsel %vm4445_vm1, %v4413_v48, %v4477_v60  ;;  %v3798_v20 = vpop.f32.mrf.mxu1  ;;  %v4301_v10 = vpop.f32.mrf.mxu0  ;;  %v3865_v25 = vadd.f32 %v5377_v45, %v3571_v32  ;;  %v3574_v52 = vadd.f32 %v7557_v41, %v3055_v13  ;;  %v3572_v30 = vadd.f32 %v7558_v53, %v3053_v50  ;;  %v7569_v53 = vld [vmem:[#allocation17_spill] sm:$0xff] }
 0x2b9   : > { %4541 = vst [vmem:[%s7248_s26 + $0x68] sm:$0xff] %v4509_v56  ;;  %v4514_v15 = vsel %vm4450_vm2, %v4418_v39, %v4482_v55  ;;  %vm4448_vm3 = vcmp.ge.f32.partialorder %v4416_v44, 0.0  ;;  %v4480_v54 = vmul.f32 0.2, %v4416_v44  ;;  %v4419_v59 = vadd.f32 %v7229_v29, %v4380_v57  ;;  %v7560_v56 = vld [vmem:[#allocation43_spill] sm:$0xff] }
 0x2ba   : > { %4546 = vst [vmem:[%s7248_s26 + $0x90] sm:$0xff] %v4514_v15  ;;  %v4378_v3 = vadd.f32 %v4301_v10, %v3859_v35  ;;  %v5380_v9 = vpop.f32.mrf.mxu1  ;;  %v5410_v36 = vpop.f32.mrf.mxu0  ;;  %v3863_v39 = vadd.f32 %v3798_v20, %v3569_v12  ;;  %v3575_v55 = vadd.f32 %v7559_v18, %v3056_v40  ;;  %v3573_v57 = vadd.f32 %v7560_v56, %v3054_v38  ;;  %v7561_v15 = vld [vmem:[#allocation13_spill] sm:$0xff] }
 0x2bb   : > { %v4512_v61 = vsel %vm4448_vm3, %v4416_v44, %v4480_v54  ;;  %v4383_v34 = vadd.f32 %v5410_v36, %v3864_v42  ;;  %vm4451_vm4 = vcmp.ge.f32.partialorder %v4419_v59, 0.0  ;;  %v4483_v7 = vmul.f32 0.2, %v4419_v59  ;;  %v7562_v54 = vld [vmem:[#allocation39_spill] sm:$0xff]  ;;  %v7565_v36 = vld [vmem:[#allocation16_spill] sm:$0xff] }
 0x2bc   : > { %4544 = vst [vmem:[%s7248_s26 + $0x80] sm:$0xff] %v4512_v61  ;;  %v4417_v21 = vadd.f32 %v7229_v29, %v4378_v3  ;;  %v3811_v27 = vpop.f32.mrf.mxu1  ;;  %v4314_v14 = vpop.f32.mrf.mxu0  ;;  %v3868_v45 = vadd.f32 %v5380_v9, %v3574_v52  ;;  %v3059_v26 = vadd.f32 %v7562_v54, %v7561_v15  ;;  %v7564_v3 = vld [vmem:[#allocation41_spill] sm:$0xff]  ;;  %v3060_v28 = vadd.f32 %v7566_v58, %v7565_v36 }
 0x2bd   : > { %v4422_v51 = vadd.f32 %v7229_v29, %v4383_v34  ;;  %v4381_v1 = vadd.f32 %v4314_v14, %v3862_v37  ;;  %v4515_v33 = vsel %vm4451_vm4, %v4419_v59, %v4483_v7  ;;  %v3866_v20 = vadd.f32 %v3811_v27, %v3572_v30  ;;  %v7563_v59 = vld [vmem:[#allocation15_spill] sm:$0xff]  ;;  %v7567_v7 = vld [vmem:[#allocation45_spill] sm:$0xff]  ;;  %v7570_v30 = vld [vmem:[#allocation44_spill] sm:$0xff] }
 0x2be   : > { %vm4449_vm5 = vcmp.ge.f32.partialorder %v4417_v21, 0.0  ;;  %v4481_v48 = vmul.f32 0.2, %v4417_v21  ;;  %v5381_v17 = vpop.f32.mrf.mxu1  ;;  %v5411_v11 = vpop.f32.mrf.mxu0  ;;  %4547 = vst [vmem:[%s7248_s26 + $0x98] sm:$0xff] %v4515_v33  ;;  %v3057_v9 = vadd.f32 %v7564_v3, %v7563_v59  ;;  %v3579_v41 = vadd.f32 %v7216_v6, %v3060_v28 }
 0x2bf   : > { %vm4454_vm6 = vcmp.ge.f32.partialorder %v4422_v51, 0.0  ;;  %v4486_v31 = vmul.f32 0.2, %v4422_v51  ;;  %v4420_v4 = vadd.f32 %v7229_v29, %v4381_v1  ;;  %v4384_v24 = vadd.f32 %v5411_v11, %v3865_v25 }
 0x2c0   : > { %v4513_v43 = vsel %vm4449_vm5, %v4417_v21, %v4481_v48  ;;  %v3814_v19 = vpop.f32.mrf.mxu1  ;;  %v4317_v60 = vpop.f32.mrf.mxu0  ;;  %v3869_v34 = vadd.f32 %v5381_v17, %v3575_v55  ;;  %v3578_v21 = vadd.f32 %v7567_v7, %v3059_v26  ;;  %v3576_v62 = vadd.f32 %v7568_v47, %v3057_v9 }
 0x2c1   : > { %4545 = vst [vmem:[%s7248_s26 + $0x88] sm:$0xff] %v4513_v43  ;;  %v4518_v63 = vsel %vm4454_vm6, %v4422_v51, %v4486_v31  ;;  %vm4452_vm7 = vcmp.ge.f32.partialorder %v4420_v4, 0.0  ;;  %v4484_v0 = vmul.f32 0.2, %v4420_v4  ;;  %v4423_v44 = vadd.f32 %v7229_v29, %v4384_v24 }
 0x2c2   : > { %4550 = vst [vmem:[%s7248_s26 + $0xb0] sm:$0xff] %v4518_v63  ;;  %v4382_v8 = vadd.f32 %v4317_v60, %v3863_v39  ;;  %v5384_v23 = vpop.f32.mrf.mxu1  ;;  %v5414_v35 = vpop.f32.mrf.mxu0  ;;  %v3867_v40 = vadd.f32 %v3814_v19, %v3573_v57  ;;  %v3058_v39 = vadd.f32 %v7570_v30, %v7569_v53 }
 0x2c3   : > { %v4516_v10 = vsel %vm4452_vm7, %v4420_v4, %v4484_v0  ;;  %v4387_v42 = vadd.f32 %v5414_v35, %v3868_v45  ;;  %vm4455_vm8 = vcmp.ge.f32.partialorder %v4423_v44, 0.0  ;;  %v4487_v32 = vmul.f32 0.2, %v4423_v44 }
 0x2c4   : > { %4548 = vst [vmem:[%s7248_s26 + $0xa0] sm:$0xff] %v4516_v10  ;;  %v4421_v49 = vadd.f32 %v7229_v29, %v4382_v8  ;;  %v4330_v12 = vpop.f32.mrf.mxu0  ;;  %v3827_v37 = vpop.f32.mrf.mxu1  ;;  %v3872_v51 = vadd.f32 %v5384_v23, %v3578_v21  ;;  %v3577_v6 = vadd.f32 %v7221_v22, %v3058_v39 }
 0x2c5   : > { %v4426_v13 = vadd.f32 %v7229_v29, %v4387_v42  ;;  %v4385_v61 = vadd.f32 %v4330_v12, %v3866_v20  ;;  %v4519_v5 = vsel %vm4455_vm8, %v4423_v44, %v4487_v32  ;;  %v3870_v52 = vadd.f32 %v3827_v37, %v3576_v62 }
 0x2c6   : > { %vm4453_vm9 = vcmp.ge.f32.partialorder %v4421_v49, 0.0  ;;  %v4485_v46 = vmul.f32 0.2, %v4421_v49  ;;  %v5415_v50 = vpop.f32.mrf.mxu0  ;;  %4551 = vst [vmem:[%s7248_s26 + $0xb8] sm:$0xff] %v4519_v5  ;;  %v5385_v33 = vpop.f32.mrf.mxu1 }
 0x2c7   : > { %vm4458_vm10 = vcmp.ge.f32.partialorder %v4426_v13, 0.0  ;;  %v4490_v27 = vmul.f32 0.2, %v4426_v13  ;;  %v4424_v14 = vadd.f32 %v7229_v29, %v4385_v61  ;;  %v4388_v2 = vadd.f32 %v5415_v50, %v3869_v34 }
 0x2c8   : > { %v4517_v16 = vsel %vm4453_vm9, %v4421_v49, %v4485_v46  ;;  %v4333_v38 = vpop.f32.mrf.mxu0  ;;  %v3873_v60 = vadd.f32 %v5385_v33, %v3579_v41  ;;  %v3830_v45 = vpop.f32.mrf.mxu1 }
 0x2c9   : > { %4549 = vst [vmem:[%s7248_s26 + $0xa8] sm:$0xff] %v4517_v16  ;;  %v4522_v1 = vsel %vm4458_vm10, %v4426_v13, %v4490_v27  ;;  %vm4456_vm11 = vcmp.ge.f32.partialorder %v4424_v14, 0.0  ;;  %v4488_v25 = vmul.f32 0.2, %v4424_v14  ;;  %v4427_v48 = vadd.f32 %v7229_v29, %v4388_v2 }
 0x2ca   : > { %4554 = vst [vmem:[%s7248_s26 + $0xd0] sm:$0xff] %v4522_v1  ;;  %v4386_v17 = vadd.f32 %v4333_v38, %v3867_v40  ;;  %v5418_v11 = vpop.f32.mrf.mxu0  ;;  %v3871_v56 = vadd.f32 %v3830_v45, %v3577_v6 }
 0x2cb   : > { %v4520_v31 = vsel %vm4456_vm11, %v4424_v14, %v4488_v25  ;;  %v4391_v4 = vadd.f32 %v5418_v11, %v3872_v51  ;;  %vm4459_vm12 = vcmp.ge.f32.partialorder %v4427_v48, 0.0  ;;  %v4491_v43 = vmul.f32 0.2, %v4427_v48 }
 0x2cc   : > { %4552 = vst [vmem:[%s7248_s26 + $0xc0] sm:$0xff] %v4520_v31  ;;  %v4425_v24 = vadd.f32 %v7229_v29, %v4386_v17  ;;  %v4346_v19 = vpop.f32.mrf.mxu0 }
 0x2cd   : > { %v4430_v63 = vadd.f32 %v7229_v29, %v4391_v4  ;;  %v4389_v0 = vadd.f32 %v4346_v19, %v3870_v52  ;;  %v4523_v18 = vsel %vm4459_vm12, %v4427_v48, %v4491_v43 }
 0x2ce   : > { %vm4457_vm13 = vcmp.ge.f32.partialorder %v4425_v24, 0.0  ;;  %v4489_v55 = vmul.f32 0.2, %v4425_v24  ;;  %v5419_v44 = vpop.f32.mrf.mxu0  ;;  %4555 = vst [vmem:[%s7248_s26 + $0xd8] sm:$0xff] %v4523_v18 }
 0x2cf   : > { %vm4462_vm14 = vcmp.ge.f32.partialorder %v4430_v63, 0.0  ;;  %v4494_v8 = vmul.f32 0.2, %v4430_v63  ;;  %v4428_v23 = vadd.f32 %v7229_v29, %v4389_v0  ;;  %v4392_v35 = vadd.f32 %v5419_v44, %v3873_v60 }
 0x2d0   : > { %v4521_v57 = vsel %vm4457_vm13, %v4425_v24, %v4489_v55  ;;  %v4349_v20 = vpop.f32.mrf.mxu0 }
 0x2d1   : > { %4553 = vst [vmem:[%s7248_s26 + $0xc8] sm:$0xff] %v4521_v57  ;;  %v4526_v10 = vsel %vm4462_vm14, %v4430_v63, %v4494_v8  ;;  %vm4460_vm15 = vcmp.ge.f32.partialorder %v4428_v23, 0.0  ;;  %v4492_v22 = vmul.f32 0.2, %v4428_v23  ;;  %v4431_v42 = vadd.f32 %v7229_v29, %v4392_v35 }
 0x2d2   : > { %4558 = vst [vmem:[%s7248_s26 + $0xf0] sm:$0xff] %v4526_v10  ;;  %v4390_v15 = vadd.f32 %v4349_v20, %v3871_v56 }
 0x2d3   : > { %v4524_v54 = vsel %vm4460_vm15, %v4428_v23, %v4492_v22  ;;  %vm4463_vm0 = vcmp.ge.f32.partialorder %v4431_v42, 0.0  ;;  %v4495_v26 = vmul.f32 0.2, %v4431_v42 }
 0x2d4   : > { %4556 = vst [vmem:[%s7248_s26 + $0xe0] sm:$0xff] %v4524_v54  ;;  %v4429_v32 = vadd.f32 %v7229_v29, %v4390_v15 }
 0x2d5   : > { %v4527_v49 = vsel %vm4463_vm0, %v4431_v42, %v4495_v26 }
 0x2d6   : > { %4559 = vst [vmem:[%s7248_s26 + $0xf8] sm:$0xff] %v4527_v49  ;;  %vm4461_vm1 = vcmp.ge.f32.partialorder %v4429_v32, 0.0  ;;  %v4493_v12 = vmul.f32 0.2, %v4429_v32 }
 0x2d8   : > { %v4525_v59 = vsel %vm4461_vm1, %v4429_v32, %v4493_v12 }
 0x2d9   : > { %4557 = vst [vmem:[%s7248_s26 + $0xe8] sm:$0xff] %v4525_v59 }
 0x2da PF: > { %s16_s21 = sadd.s32 1, %s5450_s21  }
 0x2db   : > { %p13_p4 = scmp.ge.s32.totalorder %s16_s21, 4  }
 0x2dd   :  { %15 = sbr.rel (!%p13_p4) target bundleno = 1 (0x1), region = 93 }

// kernel: _lambda_.9
= control target key start
LH: loop header
LB: loop body
LE: loop exit
PB: predicated region body
PF: predicated region fallthrough
CT: control target
= control target key end

     0   :  { %s3886_s24 = smov 0   ;;  %s5080_s0 = inlined_call_operand.vmem [shape: f32[2,64,512], index: 0, kind: input, shape index: {}]   ;;  %s5081_s1 = inlined_call_operand.vmem [shape: f32[2,1,512], index: 1, kind: input, shape index: {}]   ;;  %s5082_s2 = inlined_call_operand.vmem [shape: f32[2,1,512], index: 2, kind: input, shape index: {}]   ;;  %s5083_s3 = inlined_call_operand.vmem [shape: bf16[4,512,128], index: 3, kind: input, shape index: {}]   ;;  %s5084_s4 = inlined_call_operand.vmem [shape: f32[1,128], index: 4, kind: input, shape index: {}]   ;;  %s5085_s5 = inlined_call_operand.vmem [shape: f32[4,64,1], index: 5, kind: input, shape index: {}]   ;;  %s5086_s6 = inlined_call_operand.vmem [shape: f32[2,64,128], index: 6, kind: input, shape index: {}]   ;;  %s5087_s7 = inlined_call_operand.vmem [shape: f32[2,64,128], index: 7, kind: output, shape index: {}]  }
   0x1 LB: > { %s3002_s25 = sadd.s32 4294967295, %s3842_s24   ;;  %p3006_p0 = scmp.ge.s32.totalorder %s3842_s24, 1  ;;  %s3842_s24 = sphi %s3886_s24, %s17_s24  }
   0x2   : > { %p265_p1 = scmp.lt.s32.totalorder %s3842_s24, 3 }
   0x4   : > { %p266_p2 = pnand %p3006_p0, %p265_p1 }
   0x6   : > { %269 = sbr.rel (%p266_p2) target bundleno = 495 (0x1ef), region = 48 }
   0xb   : > { %v584_v0 = vld [vmem:[%s5085_s5 + $0x10] sm:$0xff]  ;;  %v582_v1 = vld [vmem:[%s5085_s5] sm:$0xff]  ;;  %v3844_v2 = vmov 0   ;;  %v3845_v3 = vmov 0.0   ;;  %v585_v4 = vld [vmem:[%s5085_s5 + $0x18] sm:$0xff]  ;;  %p3997_p3 = scmp.lt.s32.totalorder %s3002_s25, 1  ;;  %v368_v34 = vlaneseq }
   0xc   : > { %3680 = vset.pattern.permute.xlu1 %v3844_v2  ;;  %3679 = vset.pattern.permute.xlu0 %v3844_v2  ;;  %479 = vst [vmem:[#allocation2 + $0x38] sm:$0xff] %v3845_v3  ;;  %474 = vst [vmem:[#allocation2 + $0xb0] sm:$0xff] %v3845_v3  ;;  %v583_v5 = vld [vmem:[%s5085_s5 + $0x8] sm:$0xff]  ;;  %v586_v7 = vld [vmem:[%s5085_s5 + $0x20] sm:$0xff]  ;;  %vm622_vm0 = vcmask 1046528  }
   0xd   : > { %475 = vst [vmem:[#allocation2 + $0xd0] sm:$0xff] %v3845_v3  ;;  %476 = vst [vmem:[#allocation2 + $0x10] sm:$0xff] %v3845_v3  ;;  %600 = vperm.xlu1 %3680, %v584_v0   ;;  %592 = vperm.xlu0 %3679, %v582_v1   ;;  %v587_v6 = vld [vmem:[%s5085_s5 + $0x28] sm:$0xff]  ;;  %v3681_v8 = vld [vmem:[%s5083_s3 + $0x178] sm:$0xff]   ;;  %s5142_s25 = smov (!%p3997_p3, %s3002_s25), 1  ;;  %v369_v41 = vshrl.u32 %v368_v34, 7 }
   0xe   : > { %477 = vst [vmem:[#allocation2 + $0x48] sm:$0xff] %v3845_v3  ;;  %478 = vst [vmem:[#allocation2 + $0x120] sm:$0xff] %v3845_v3  ;;  %v3682_v9 = vld [vmem:[%s5083_s3 + $0x1f8] sm:$0xff]   ;;  %3349 = vmatprep.subr.bf16.mxu0 %v3681_v8  ;;  %v588_v12 = vld [vmem:[%s5085_s5 + $0x30] sm:$0xff]  ;;  %s3346_s21 = sshll.u32 %s5142_s25, 8  ;;  %s3009_s26 = sshll.u32 %s5142_s25, 2 }
   0xf   : > { %480 = vst [vmem:[#allocation2 + $0xf8] sm:$0xff] %v3845_v3  ;;  %481 = vst [vmem:[#allocation2 + $0x100] sm:$0xff] %v3845_v3  ;;  %v3683_v10 = vld [vmem:[%s5083_s3 + $0x138] sm:$0xff]   ;;  %3389 = vmatprep.subr.bf16.mxu1 %v3682_v9  ;;  %v3685_v14 = vld [vmem:[%s5083_s3 + $0x170] sm:$0xff]   ;;  %v374_v46 = vsub.s32 1, %v369_v41  ;;  %v382_v48 = vsub.s32 3, %v369_v41  ;;  %s4054_s14 = scalar_lea.vmem %s5080_s0, %s3346_s21  ;;  %s318_s17 = scalar_lea.vmem %s5081_s1, %s3009_s26 }
  0x10   : > { %v589_v11 = vld [vmem:[%s5085_s5 + $0x38] sm:$0xff]  ;;  %3350 = vmatpush3.bf16.msra.mxu0 %v3683_v10  ;;  %v3686_v15 = vld [vmem:[%s5083_s3 + $0x1f0] sm:$0xff]   ;;  %v3144_v17 = vld [vmem:[%s5085_s5 + $0x88] sm:$0xff]  ;;  %v370_v50 = vsub.s32 0, %v369_v41  ;;  %v378_v52 = vsub.s32 2, %v369_v41  ;;  %s322_s23 = scalar_lea.vmem %s5082_s2, %s3009_s26 }
  0x11   : > { %604 = vperm.xlu1 %3680, %v585_v4   ;;  %596 = vperm.xlu0 %3679, %v583_v5   ;;  %v3684_v13 = vld [vmem:[%s5083_s3 + $0x1b8] sm:$0xff]   ;;  %v3687_v16 = vld [vmem:[%s5083_s3 + $0x130] sm:$0xff]   ;;  %v3143_v18 = vld [vmem:[%s5085_s5 + $0x80] sm:$0xff]  ;;  %vm1174_vm1 = vsmask.f32 4352 }
  0x12   : > { %3390 = vmatpush3.bf16.msra.mxu1 %v3684_v13  ;;  %3351 = vmatprep.subr.bf16.mxu0 %v3685_v14  ;;  %v3688_v19 = vld [vmem:[%s5083_s3 + $0x1b0] sm:$0xff]   ;;  %v3689_v20 = vld [vmem:[%s5083_s3 + $0x168] sm:$0xff]   ;;  %v3146_v23 = vld [vmem:[%s5085_s5 + $0x98] sm:$0xff] }
  0x13   : > { %3391 = vmatprep.subr.bf16.mxu1 %v3686_v15  ;;  %v3690_v21 = vld [vmem:[%s5083_s3 + $0x1e8] sm:$0xff]   ;;  %v3145_v24 = vld [vmem:[%s5085_s5 + $0x90] sm:$0xff]  ;;  %v3693_v26 = vld [vmem:[%s5083_s3 + $0x160] sm:$0xff]  }
  0x14   : > { %3352 = vmatpush3.bf16.msra.mxu0 %v3687_v16  ;;  %v3691_v22 = vld [vmem:[%s5083_s3 + $0x128] sm:$0xff]   ;;  %v3694_v27 = vld [vmem:[%s5083_s3 + $0x1e0] sm:$0xff]   ;;  %v3697_v32 = vld [vmem:[%s5083_s3 + $0x158] sm:$0xff]  }
  0x15   : > { %612 = vperm.xlu1 %3680, %v587_v6   ;;  %608 = vperm.xlu0 %3679, %v586_v7   ;;  %v3692_v25 = vld [vmem:[%s5083_s3 + $0x1a8] sm:$0xff]   ;;  %v3695_v28 = vld [vmem:[%s5083_s3 + $0x120] sm:$0xff]   ;;  %v3698_v33 = vld [vmem:[%s5083_s3 + $0x1d8] sm:$0xff]  }
  0x16   : > { %3392 = vmatpush3.bf16.msra.mxu1 %v3688_v19  ;;  %3353 = vmatprep.subr.bf16.mxu0 %v3689_v20  ;;  %v3148_v29 = vld [vmem:[%s5085_s5 + $0xa8] sm:$0xff]  ;;  %v3147_v30 = vld [vmem:[%s5085_s5 + $0xa0] sm:$0xff]  ;;  %v3699_v35 = vld [vmem:[%s5083_s3 + $0x118] sm:$0xff]  }
  0x17   : > { %3393 = vmatprep.subr.bf16.mxu1 %v3690_v21  ;;  %v3696_v31 = vld [vmem:[%s5083_s3 + $0x1a0] sm:$0xff]   ;;  %v3150_v36 = vld [vmem:[%s5085_s5 + $0xb8] sm:$0xff]  ;;  %v3149_v37 = vld [vmem:[%s5085_s5 + $0xb0] sm:$0xff] }
  0x18   : > { %3354 = vmatpush3.bf16.msra.mxu0 %v3691_v22  ;;  %v3700_v38 = vld [vmem:[%s5083_s3 + $0x198] sm:$0xff]   ;;  %v3701_v39 = vld [vmem:[%s5083_s3 + $0x150] sm:$0xff]   ;;  %v3705_v44 = vld [vmem:[%s5083_s3 + $0x148] sm:$0xff]  }
  0x19   : > { %620 = vperm.xlu1 %3680, %v589_v11   ;;  %616 = vperm.xlu0 %3679, %v588_v12   ;;  %v3702_v40 = vld [vmem:[%s5083_s3 + $0x1d0] sm:$0xff]   ;;  %v3706_v45 = vld [vmem:[%s5083_s3 + $0x1c8] sm:$0xff]   ;;  %v3709_v51 = vld [vmem:[%s5083_s3 + $0x140] sm:$0xff]  }
  0x1a   : > { %3394 = vmatpush3.bf16.msra.mxu1 %v3692_v25  ;;  %3355 = vmatprep.subr.bf16.mxu0 %v3693_v26  ;;  %v3703_v42 = vld [vmem:[%s5083_s3 + $0x110] sm:$0xff]   ;;  %v3707_v47 = vld [vmem:[%s5083_s3 + $0x108] sm:$0xff]   ;;  %v3710_v53 = vld [vmem:[%s5083_s3 + $0x1c0] sm:$0xff]  }
  0x1b   : > { %3395 = vmatprep.subr.bf16.mxu1 %v3694_v27  ;;  %v3704_v43 = vld [vmem:[%s5083_s3 + $0x190] sm:$0xff]   ;;  %v3708_v49 = vld [vmem:[%s5083_s3 + $0x188] sm:$0xff]   ;;  %v3711_v54 = vld [vmem:[%s5083_s3 + $0x100] sm:$0xff]  }
  0x1c   : > { %3356 = vmatpush3.bf16.msra.mxu0 %v3695_v28  ;;  %v3712_v55 = vld [vmem:[%s5083_s3 + $0x180] sm:$0xff]   ;;  %v335_v56 = vld [vmem:[%s4054_s14 + $0x8] sm:$0xff]  ;;  %v337_v60 = vld [vmem:[%s4054_s14 + $0x18] sm:$0xff] }
  0x1d   : > { %1740 = vperm.xlu1 %3680, %v3144_v17   ;;  %1736 = vperm.xlu0 %3679, %v3143_v18   ;;  %v366_v57 = vld [vmem:[%s318_s17] sm:$0xf]  ;;  %v336_v5 = vld [vmem:[%s4054_s14 + $0x10] sm:$0xff]  ;;  %v3713_v10 = vld [vmem:[%s5083_s3 + $0x78] sm:$0xff]   ;;  %s3347_s17 = sshll.u32 %s5142_s25, 6 }
  0x1e   : > { %3396 = vmatpush3.bf16.msra.mxu1 %v3696_v31  ;;  %3357 = vmatprep.subr.bf16.mxu0 %v3697_v32  ;;  %v4072_v58 = vrot.slane %v366_v57, %v374_v46  ;;  %v420_v59 = vld [vmem:[%s322_s23] sm:$0xf]  ;;  %v4075_v61 = vrot.slane %v366_v57, %v382_v48  ;;  %v4078_v63 = vrot.slane %v366_v57, %v370_v50  ;;  %v3714_v12 = vld [vmem:[%s5083_s3 + $0xf8] sm:$0xff]   ;;  %v339_v19 = vld [vmem:[%s4054_s14 + $0x28] sm:$0xff]  ;;  %s5025_s23 = scalar_lea.vmem %s5086_s6, %s3347_s17  ;;  %s5036_s28 = scalar_lea.vmem %s5087_s7, %s3347_s17 }
  0x1f   : > { %3397 = vmatprep.subr.bf16.mxu1 %v3698_v33  ;;  %v334_v62 = vld [vmem:[%s4054_s14] sm:$0xff]  ;;  %v4080_v0 = vrot.slane %v366_v57, %v378_v52  ;;  %v4082_v1 = vrot.slane %v420_v59, %v374_v46  ;;  %v4084_v2 = vrot.slane %v420_v59, %v382_v48  ;;  %v4086_v4 = vrot.slane %v420_v59, %v370_v50  ;;  %v3715_v16 = vld [vmem:[%s5083_s3 + $0x38] sm:$0xff]   ;;  %v343_v20 = vld [vmem:[%s4054_s14 + $0x48] sm:$0xff] }
  0x20   : > { %3358 = vmatpush3.bf16.msra.mxu0 %v3699_v35  ;;  %5101 = vst [vmem:[#allocation3_spill] sm:$0xff] %v4072_v58  ;;  %5102 = vst [vmem:[#allocation4_spill] sm:$0xff] %v4075_v61  ;;  %v389_v6 = vsub.f32 %v335_v56, %v4072_v58  ;;  %v391_v7 = vsub.f32 %v337_v60, %v4075_v61  ;;  %v388_v8 = vsub.f32 %v334_v62, %v4078_v63  ;;  %v3716_v18 = vld [vmem:[%s5083_s3 + $0xb8] sm:$0xff]   ;;  %v338_v27 = vld [vmem:[%s4054_s14 + $0x20] sm:$0xff] }
  0x21   : > { %1748 = vperm.xlu1 %3680, %v3146_v23   ;;  %1744 = vperm.xlu0 %3679, %v3145_v24   ;;  %5103 = vst [vmem:[#allocation5_spill] sm:$0xff] %v4078_v63  ;;  %5104 = vst [vmem:[#allocation6_spill] sm:$0xff] %v4080_v0  ;;  %v390_v9 = vsub.f32 %v336_v5, %v4080_v0  ;;  %v4096_v11 = vrot.slane %v420_v59, %v378_v52  ;;  %v341_v25 = vld [vmem:[%s4054_s14 + $0x38] sm:$0xff]  ;;  %v342_v32 = vld [vmem:[%s4054_s14 + $0x40] sm:$0xff] }
  0x22   : > { %3398 = vmatpush3.bf16.msra.mxu1 %v3700_v38  ;;  %3359 = vmatprep.subr.bf16.mxu0 %v3701_v39  ;;  %5105 = vst [vmem:[#allocation7_spill] sm:$0xff] %v4082_v1  ;;  %5106 = vst [vmem:[#allocation8_spill] sm:$0xff] %v4084_v2  ;;  %v4102_v13 = vmul.f32 %v4082_v1, %v389_v6  ;;  %v4105_v14 = vmul.f32 %v4084_v2, %v391_v7  ;;  %v345_v26 = vld [vmem:[%s4054_s14 + $0x58] sm:$0xff]  ;;  %v340_v33 = vld [vmem:[%s4054_s14 + $0x30] sm:$0xff] }
  0x23   : > { %3399 = vmatprep.subr.bf16.mxu1 %v3702_v40  ;;  %5107 = vst [vmem:[#allocation9_spill] sm:$0xff] %v4086_v4  ;;  %5108 = vst [vmem:[#allocation10_spill] sm:$0xff] %v4096_v11  ;;  %v4108_v15 = vmul.f32 %v4086_v4, %v388_v8  ;;  %v4114_v17 = vmul.f32 %v4096_v11, %v390_v9  ;;  %v393_v24 = vsub.f32 %v339_v19, %v4072_v58  ;;  %v344_v34 = vld [vmem:[%s4054_s14 + $0x50] sm:$0xff]  ;;  %v3724_v57 = vld [vmem:[%s5083_s3 + $0xa8] sm:$0xff]  }
  0x24   : > { %3360 = vmatpush3.bf16.msra.mxu0 %v3703_v42  ;;  %515 = vst [vmem:[#allocation2 + $0x108] sm:$0xff] %v4102_v13  ;;  %v772_v21 = vpack.c.bf16 %v4102_v13, %v3845_v3  ;;  %517 = vst [vmem:[#allocation2 + $0xf0] sm:$0xff] %v4105_v14  ;;  %v774_v22 = vpack.c.bf16 %v4105_v14, %v3845_v3  ;;  %v399_v31 = vsub.f32 %v345_v26, %v4075_v61  ;;  %v3718_v41 = vld [vmem:[%s5083_s3 + $0xf0] sm:$0xff]   ;;  %v347_v59 = vld [vmem:[%s4054_s14 + $0x68] sm:$0xff] }
  0x25   : > { %1756 = vperm.xlu1 %3680, %v3148_v29   ;;  %1752 = vperm.xlu0 %3679, %v3147_v30   ;;  %514 = vst [vmem:[#allocation2 + $0x80] sm:$0xff] %v4108_v15  ;;  %v771_v23 = vpack.c.bf16 %v4108_v15, %v3845_v3  ;;  %516 = vst [vmem:[#allocation2 + $0x138] sm:$0xff] %v4114_v17  ;;  %v773_v28 = vpack.c.bf16 %v4114_v17, %v3845_v3  ;;  %v3717_v3 = vld [vmem:[%s5083_s3 + $0x70] sm:$0xff]   ;;  %v351_v60 = vld [vmem:[%s4054_s14 + $0x88] sm:$0xff] }
  0x26   : > { %3400 = vmatpush3.bf16.msra.mxu1 %v3704_v43  ;;  %3361 = vmatprep.subr.bf16.mxu0 %v3705_v44  ;;  %v397_v29 = vsub.f32 %v343_v20, %v4072_v58  ;;  %v395_v30 = vsub.f32 %v341_v25, %v4075_v61  ;;  %v4144_v35 = vmul.f32 %v4082_v1, %v393_v24  ;;  %v349_v62 = vld [vmem:[%s4054_s14 + $0x78] sm:$0xff]  ;;  %v346_v9 = vld [vmem:[%s4054_s14 + $0x60] sm:$0xff]  ;;  %v348_v19 = vld [vmem:[%s4054_s14 + $0x70] sm:$0xff] }
  0x27   : > { %3401 = vmatprep.subr.bf16.mxu1 %v3706_v45  ;;  %1076 = vmatprep.mubr.bf16.mxu0 %v772_v21  ;;  %v4158_v40 = vmul.f32 %v4084_v2, %v399_v31  ;;  %v394_v44 = vsub.f32 %v340_v33, %v4080_v0  ;;  %v3719_v45 = vld [vmem:[%s5083_s3 + $0x30] sm:$0xff]   ;;  %v398_v48 = vsub.f32 %v344_v34, %v4080_v0  ;;  %v353_v7 = vld [vmem:[%s4054_s14 + $0x98] sm:$0xff]  ;;  %v3725_v25 = vld [vmem:[%s5083_s3 + $0x60] sm:$0xff]  }
  0x28   : > { %3362 = vmatpush3.bf16.msra.mxu0 %v3707_v47  ;;  %1141 = vmatprep.mubr.bf16.mxu1 %v774_v22  ;;  %v4152_v38 = vmul.f32 %v4082_v1, %v397_v29  ;;  %v4155_v39 = vmul.f32 %v4084_v2, %v395_v30  ;;  %519 = vst [vmem:[#allocation2 + $0xc8] sm:$0xff] %v4144_v35  ;;  %v352_v20 = vld [vmem:[%s4054_s14 + $0x90] sm:$0xff]  ;;  %v3726_v30 = vld [vmem:[%s5083_s3 + $0xe0] sm:$0xff]  }
  0x29   : > { %1764 = vperm.xlu1 %3680, %v3150_v36   ;;  %1760 = vperm.xlu0 %3679, %v3149_v37   ;;  %v392_v36 = vsub.f32 %v338_v27, %v4078_v63  ;;  %v396_v37 = vsub.f32 %v342_v32, %v4078_v63  ;;  %525 = vst [vmem:[#allocation2 + $0x98] sm:$0xff] %v4158_v40  ;;  %v3727_v33 = vld [vmem:[%s5083_s3 + $0x20] sm:$0xff]  }
  0x2a   : > { %3402 = vmatpush3.bf16.msra.mxu1 %v3708_v49  ;;  %3363 = vmatprep.subr.bf16.mxu0 %v3709_v51  ;;  %523 = vst [vmem:[#allocation2 + $0x110] sm:$0xff] %v4152_v38  ;;  %v776_v46 = vpack.c.bf16 %v4152_v38, %v4144_v35  ;;  %521 = vst [vmem:[#allocation2 + $0x20] sm:$0xff] %v4155_v39  ;;  %v778_v47 = vpack.c.bf16 %v4158_v40, %v4155_v39  ;;  %v3720_v49 = vld [vmem:[%s5083_s3 + $0xb0] sm:$0xff]   ;;  %v3721_v51 = vld [vmem:[%s5083_s3 + $0x68] sm:$0xff]  }
  0x2b   : > { %3403 = vmatprep.subr.bf16.mxu1 %v3710_v53  ;;  %v4165_v42 = vmul.f32 %v4086_v4, %v392_v36  ;;  %v4168_v43 = vmul.f32 %v4086_v4, %v396_v37  ;;  %v4188_v50 = vmul.f32 %v4096_v11, %v394_v44  ;;  %v4196_v53 = vmul.f32 %v4096_v11, %v398_v48  ;;  %v355_v48 = vld [vmem:[%s4054_s14 + $0xa8] sm:$0xff] }
  0x2c   : > { %3364 = vmatpush3.bf16.msra.mxu0 %v3711_v54  ;;  %v3722_v54 = vld [vmem:[%s5083_s3 + $0xe8] sm:$0xff]   ;;  %v401_v5 = vsub.f32 %v347_v59, %v4072_v58  ;;  %v405_v6 = vsub.f32 %v351_v60, %v4072_v58  ;;  %v403_v8 = vsub.f32 %v349_v62, %v4075_v61  ;;  %v402_v24 = vsub.f32 %v348_v19, %v4080_v0  ;;  %v358_v60 = vld [vmem:[%s4054_s14 + $0xc0] sm:$0xff] }
  0x2d   : > { %3429 = vmatprep.subr.bf16.mxu0 %v3713_v10  ;;  %518 = vst [vmem:[#allocation2 + $0x18] sm:$0xff] %v4165_v42  ;;  %522 = vst [vmem:[#allocation2 + $0x128] sm:$0xff] %v4168_v43  ;;  %v775_v52 = vpack.c.bf16 %v4168_v43, %v4165_v42  ;;  %v777_v56 = vpack.c.bf16 %v4196_v53, %v4188_v50  ;;  %v350_v10 = vld [vmem:[%s4054_s14 + $0x80] sm:$0xff]  ;;  %v406_v29 = vsub.f32 %v352_v20, %v4080_v0 }
  0x2e   : > { %3404 = vmatpush3.bf16.msra.mxu1 %v3712_v55  ;;  %520 = vst [vmem:[#allocation2 + $0x70] sm:$0xff] %v4188_v50  ;;  %v3723_v55 = vld [vmem:[%s5083_s3 + $0x28] sm:$0xff]   ;;  %524 = vst [vmem:[#allocation2 + $0x8] sm:$0xff] %v4196_v53  ;;  %v4226_v21 = vmul.f32 %v4082_v1, %v401_v5  ;;  %v4229_v22 = vmul.f32 %v4082_v1, %v405_v6  ;;  %v4257_v32 = vmul.f32 %v4096_v11, %v402_v24  ;;  %v356_v5 = vld [vmem:[%s4054_s14 + $0xb0] sm:$0xff] }
  0x2f   : > { %3469 = vmatprep.subr.bf16.mxu1 %v3714_v12  ;;  %1077 = vmatmul.mubr.bf16.vlgmr.msra.gmra.mxu0 %v771_v23  ;;  %v407_v12 = vsub.f32 %v353_v7, %v4075_v61  ;;  %v4232_v23 = vmul.f32 %v4084_v2, %v403_v8  ;;  %v4270_v37 = vmul.f32 %v4096_v11, %v406_v29  ;;  %v360_v6 = vld [vmem:[%s4054_s14 + $0xd0] sm:$0xff] }
  0x30   : > { %3430 = vmatpush3.bf16.msra.mxu0 %v3715_v16  ;;  %1084 = vmatprep.mubr.bf16.mxu0 %v776_v46  ;;  %v400_v16 = vsub.f32 %v346_v9, %v4078_v63  ;;  %527 = vst [vmem:[#allocation2 + $0x90] sm:$0xff] %v4226_v21  ;;  %531 = vst [vmem:[#allocation2 + $0x118] sm:$0xff] %v4229_v22  ;;  %v780_v31 = vpack.c.bf16 %v4229_v22, %v4226_v21  ;;  %v3731_v46 = vld [vmem:[%s5083_s3 + $0x18] sm:$0xff]   ;;  %v3734_v24 = vld [vmem:[%s5083_s3 + $0xd0] sm:$0xff]  }
  0x31   : > { %1142 = vmatmul.mubr.bf16.vlgmr.msra.gmra.mxu1 %v773_v28  ;;  %3431 = vmatprep.subr.bf16.mxu0 %v3717_v3  ;;  %v4239_v26 = vmul.f32 %v4084_v2, %v407_v12  ;;  %529 = vst [vmem:[#allocation2 + $0x88] sm:$0xff] %v4232_v23  ;;  %v3728_v3 = vld [vmem:[%s5083_s3 + $0xa0] sm:$0xff]   ;;  %528 = vst [vmem:[#allocation2 + $0xe0] sm:$0xff] %v4257_v32  ;;  %v781_v44 = vpack.c.bf16 %v4270_v37, %v4257_v32  ;;  %v3733_v12 = vld [vmem:[%s5083_s3 + $0x50] sm:$0xff]  }
  0x32   : > { %3470 = vmatpush3.bf16.msra.mxu1 %v3716_v18  ;;  %1149 = vmatprep.mubr.bf16.mxu1 %v778_v47  ;;  %v404_v18 = vsub.f32 %v350_v10, %v4078_v63  ;;  %v4242_v27 = vmul.f32 %v4086_v4, %v400_v16  ;;  %532 = vst [vmem:[#allocation2 + $0xd8] sm:$0xff] %v4270_v37  ;;  %v3732_v47 = vld [vmem:[%s5083_s3 + $0x98] sm:$0xff]  }
  0x33   : > { %3471 = vmatprep.subr.bf16.mxu1 %v3718_v41  ;;  %533 = vst [vmem:[#allocation2 + $0xa0] sm:$0xff] %v4239_v26  ;;  %v782_v34 = vpack.c.bf16 %v4239_v26, %v4232_v23  ;;  %v3729_v41 = vld [vmem:[%s5083_s3 + $0x58] sm:$0xff]   ;;  %v412_v9 = vsub.f32 %v358_v60, %v4078_v63  ;;  %v410_v10 = vsub.f32 %v356_v5, %v4080_v0  ;;  %v548_v60 = vld [vmem:[#allocation2 + $0x10] sm:$0x80] }
  0x34   : > { %3432 = vmatpush3.bf16.msra.mxu0 %v3719_v45  ;;  %v4245_v28 = vmul.f32 %v4086_v4, %v404_v18  ;;  %526 = vst [vmem:[#allocation2 + $0xa8] sm:$0xff] %v4242_v27  ;;  %v3730_v45 = vld [vmem:[%s5083_s3 + $0xd8] sm:$0xff]   ;;  %v414_v20 = vsub.f32 %v360_v6, %v4080_v0  ;;  %v547_v5 = vld [vmem:[#allocation2 + $0xd0] sm:$0x80] }
  0x35   : > { %3433 = vmatprep.subr.bf16.mxu0 %v3721_v51  ;;  %v409_v51 = vsub.f32 %v355_v48, %v4072_v58  ;;  %v4333_v29 = vmul.f32 %v4086_v4, %v412_v9  ;;  %v3741_v48 = vld [vmem:[%s5083_s3 + $0x40] sm:$0xff]  }
  0x36   : > { %3472 = vmatpush3.bf16.msra.mxu1 %v3720_v49  ;;  %530 = vst [vmem:[#allocation2 + $0xc0] sm:$0xff] %v4245_v28  ;;  %v779_v36 = vpack.c.bf16 %v4245_v28, %v4242_v27  ;;  %v359_v49 = vld [vmem:[%s4054_s14 + $0xc8] sm:$0xff] }
  0x37   : > { %3473 = vmatprep.subr.bf16.mxu1 %v3722_v54  ;;  %1085 = vmatmul.mubr.bf16.gmra.mxu0 %v775_v52  ;;  %v413_v52 = vsub.f32 %v359_v49, %v4072_v58  ;;  %v357_v54 = vld [vmem:[%s4054_s14 + $0xb8] sm:$0xff]  ;;  %v4305_v7 = vmul.f32 %v4082_v1, %v409_v51  ;;  %538 = vst [vmem:[#allocation2 + $0x58] sm:$0xff] %v4333_v29  ;;  %v3742_v49 = vld [vmem:[%s5083_s3 + $0xc0] sm:$0xff]  }
  0x38   : > { %3434 = vmatpush3.bf16.msra.mxu0 %v3723_v55  ;;  %1092 = vmatprep.mubr.bf16.mxu0 %v780_v31  ;;  %v361_v55 = vld [vmem:[%s4054_s14 + $0xd8] sm:$0xff]  ;;  %v3735_v31 = vld [vmem:[%s5083_s3 + $0x10] sm:$0xff]   ;;  %v3743_v51 = vld [vmem:[%s5083_s3] sm:$0xff]  }
  0x39   : > { %1150 = vmatmul.mubr.bf16.gmra.mxu1 %v777_v56  ;;  %3435 = vmatprep.subr.bf16.mxu0 %v3725_v25  ;;  %v354_v56 = vld [vmem:[%s4054_s14 + $0xa0] sm:$0xff]  ;;  %v415_v59 = vsub.f32 %v361_v55, %v4075_v61  ;;  %v4308_v8 = vmul.f32 %v4082_v1, %v413_v52  ;;  %535 = vst [vmem:[#allocation2 + $0x130] sm:$0xff] %v4305_v7  ;;  %v3746_v55 = vld [vmem:[%s5083_s3 + $0x2f8] sm:$0xff]  }
  0x3a   : > { %3474 = vmatpush3.bf16.msra.mxu1 %v3724_v57  ;;  %1157 = vmatprep.mubr.bf16.mxu1 %v782_v34  ;;  %v411_v57 = vsub.f32 %v357_v54, %v4075_v61  ;;  %v408_v62 = vsub.f32 %v354_v56, %v4078_v63  ;;  %v4347_v34 = vmul.f32 %v4096_v11, %v414_v20  ;;  %v3744_v52 = vld [vmem:[%s5083_s3 + $0x80] sm:$0xff]   ;;  %v3745_v54 = vld [vmem:[%s5083_s3 + $0x278] sm:$0xff]  }
  0x3b   : > { %3475 = vmatprep.subr.bf16.mxu1 %v3726_v30  ;;  %v4319_v18 = vmul.f32 %v4084_v2, %v415_v59  ;;  %539 = vst [vmem:[#allocation2 + $0x78] sm:$0xff] %v4308_v8  ;;  %v784_v25 = vpack.c.bf16 %v4308_v8, %v4305_v7  ;;  %v4336_v30 = vmul.f32 %v4096_v11, %v410_v10  ;;  %v546_v59 = vld [vmem:[#allocation2 + $0xb0] sm:$0x80]  ;;  %v549_v10 = vld [vmem:[#allocation2 + $0x48] sm:$0x80] }
  0x3c   : > { %3436 = vmatpush3.bf16.msra.mxu0 %v3727_v33  ;;  %v4316_v16 = vmul.f32 %v4084_v2, %v411_v57  ;;  %v4322_v19 = vmul.f32 %v4086_v4, %v408_v62  ;;  %540 = vst [vmem:[#allocation2 + $0x30] sm:$0xff] %v4347_v34 }
  0x3d   : > { %3437 = vmatprep.subr.bf16.mxu0 %v3729_v41  ;;  %541 = vst [vmem:[#allocation2 + $0x40] sm:$0xff] %v4319_v18  ;;  %536 = vst [vmem:[#allocation2 + $0x50] sm:$0xff] %v4336_v30  ;;  %v3737_v41 = vld [vmem:[%s5083_s3 + $0x48] sm:$0xff]  }
  0x3e   : > { %3476 = vmatpush3.bf16.msra.mxu1 %v3728_v3  ;;  %537 = vst [vmem:[#allocation2 + $0xe8] sm:$0xff] %v4316_v16  ;;  %v786_v33 = vpack.c.bf16 %v4319_v18, %v4316_v16  ;;  %534 = vst [vmem:[#allocation2 + $0x68] sm:$0xff] %v4322_v19  ;;  %v783_v3 = vpack.c.bf16 %v4333_v29, %v4322_v19 }
  0x3f   : > { %1093 = vmatmul.mubr.bf16.gmra.mxu0 %v779_v36  ;;  %3477 = vmatprep.subr.bf16.mxu1 %v3730_v45  ;;  %v3736_v36 = vld [vmem:[%s5083_s3 + $0x90] sm:$0xff]   ;;  %v3738_v45 = vld [vmem:[%s5083_s3 + $0xc8] sm:$0xff]  }
  0x40   : > { %3438 = vmatpush3.bf16.msra.mxu0 %v3731_v46  ;;  %1100 = vmatprep.mubr.bf16.mxu0 %v784_v25  ;;  %v3739_v46 = vld [vmem:[%s5083_s3 + $0x8] sm:$0xff]  }
  0x41   : > { %1158 = vmatmul.mubr.bf16.gmra.mxu1 %v781_v44  ;;  %3439 = vmatprep.subr.bf16.mxu0 %v3733_v12  ;;  %v785_v44 = vpack.c.bf16 %v4347_v34, %v4336_v30 }
  0x42   : > { %3478 = vmatpush3.bf16.msra.mxu1 %v3732_v47  ;;  %1165 = vmatprep.mubr.bf16.mxu1 %v786_v33  ;;  %v3740_v47 = vld [vmem:[%s5083_s3 + $0x88] sm:$0xff]  }
  0x43   : > { %3479 = vmatprep.subr.bf16.mxu1 %v3734_v24 }
  0x44   : > { %3440 = vmatpush3.bf16.msra.mxu0 %v3735_v31 }
  0x45   : > { %3441 = vmatprep.subr.bf16.mxu0 %v3737_v41 }
  0x46   : > { %3480 = vmatpush3.bf16.msra.mxu1 %v3736_v36 }
  0x47   : > { %1101 = vmatmul.mubr.bf16.gmra.mxu0 %v783_v3  ;;  %3481 = vmatprep.subr.bf16.mxu1 %v3738_v45 }
  0x48   : > { %3442 = vmatpush3.bf16.msra.mxu0 %v3739_v46 }
  0x49   : > { %1166 = vmatmul.mubr.bf16.gmra.mxu1 %v785_v44  ;;  %3443 = vmatprep.subr.bf16.mxu0 %v3741_v48 }
  0x4a   : > { %3482 = vmatpush3.bf16.msra.mxu1 %v3740_v47 }
  0x4b   : > { %3483 = vmatprep.subr.bf16.mxu1 %v3742_v49 }
  0x4c   : > { %3444 = vmatpush3.bf16.msra.mxu0 %v3743_v51  ;;  %v3809_v51 = vld [vmem:[#allocation2 + $0x38] sm:$0xff] }
  0x4d   : > { %3509 = vmatprep.subr.bf16.mxu0 %v3745_v54 }
  0x4e   : > { %3484 = vmatpush3.bf16.msra.mxu1 %v3744_v52 }
  0x4f   : > { %3549 = vmatprep.subr.bf16.mxu1 %v3746_v55 }
  0x88   : > { %v601_v56 = vpop.permute.xlu1 %600  ;;  %v593_v57 = vpop.permute.xlu0 %592 }
  0x89   : > { %v623_v62 = vrot.slane %v593_v57, 1  ;;  %v626_v12 = vrot.slane %v601_v56, 1 }
  0x8b   : > { %v647_v25 = vmul.f32 %v623_v62, %v546_v59  ;;  %v649_v31 = vmul.f32 %v623_v62, %v548_v60  ;;  %v648_v41 = vmul.f32 %v623_v62, %v547_v5  ;;  %v650_v49 = vmul.f32 %v623_v62, %v549_v10 }
  0x8c   : > { %v605_v6 = vpop.permute.xlu1 %604  ;;  %v597_v9 = vpop.permute.xlu0 %596 }
  0x8d   : > { %v628_v20 = vrot.slane %v605_v6, 1  ;;  %v624_v24 = vrot.slane %v597_v9, 1 }
  0x8f   : > { %v629_v33 = vsel %vm622_vm0, %v626_v12, %v628_v20  ;;  %v625_v36 = vsel %vm622_vm0, %v623_v62, %v624_v24  ;;  %v627_v3 = vsel %vm622_vm0, %v624_v24, %v626_v12 }
  0x90   : > { %v659_v44 = vmul.f32 %v629_v33, %v4165_v42  ;;  %v660_v45 = vmul.f32 %v629_v33, %v4144_v35  ;;  %v661_v46 = vmul.f32 %v629_v33, %v4188_v50  ;;  %v613_v47 = vpop.permute.xlu1 %612  ;;  %v609_v48 = vpop.permute.xlu0 %608  ;;  %v651_v52 = vmul.f32 %v3809_v51, %v625_v36 }
  0x91   : > { %v655_v54 = vmul.f32 %v627_v3, %v4108_v15  ;;  %v656_v55 = vmul.f32 %v627_v3, %v4102_v13  ;;  %v657_v56 = vmul.f32 %v627_v3, %v4114_v17  ;;  %v662_v57 = vmul.f32 %v629_v33, %v4155_v39 }
  0x92   : > { %v658_v59 = vmul.f32 %v627_v3, %v4105_v14  ;;  %v632_v60 = vrot.slane %v613_v47, 1  ;;  %v630_v5 = vrot.slane %v609_v48, 1  ;;  %v4400_v6 = vpack.c.bf16 %v651_v52, %v647_v25  ;;  %v1689_v48 = vld [vmem:[#allocation2 + $0x120] sm:$0x80] }
  0x93   : > { %v4402_v9 = vpack.c.bf16 %v651_v52, %v649_v31  ;;  %v4404_v12 = vpack.c.bf16 %v659_v44, %v655_v54  ;;  %v4406_v62 = vpack.c.bf16 %v661_v46, %v657_v56  ;;  %v684_v51 = vpack.c.bf16 %v651_v52, %v648_v41 }
  0x94   : > { %v631_v10 = vsel %vm622_vm0, %v628_v20, %v630_v5  ;;  %v633_v13 = vsel %vm622_vm0, %v630_v5, %v632_v60  ;;  %v621_v24 = vpop.permute.xlu1 %620  ;;  %v617_v36 = vpop.permute.xlu0 %616  ;;  %v688_v33 = vpack.c.bf16 %v660_v45, %v656_v55  ;;  %v686_v2 = vpack.c.bf16 %v651_v52, %v650_v49 }
  0x95   : > { %v4411_v14 = vmul.f32 %v631_v10, %v4168_v43  ;;  %v4414_v25 = vmul.f32 %v631_v10, %v4152_v38  ;;  %v4417_v31 = vmul.f32 %v631_v10, %v4196_v53  ;;  %v4420_v3 = vmul.f32 %v631_v10, %v4158_v40  ;;  %v1691_v10 = vld [vmem:[#allocation2 + $0xf8] sm:$0x80] }
  0x96   : > { %v4423_v20 = vmul.f32 %v633_v13, %v4242_v27  ;;  %v4426_v44 = vmul.f32 %v633_v13, %v4226_v21  ;;  %v4429_v41 = vmul.f32 %v633_v13, %v4257_v32  ;;  %v4432_v45 = vmul.f32 %v633_v13, %v4232_v23 }
  0x97   : > { %v4434_v46 = vrot.slane %v621_v24, 1  ;;  %v634_v47 = vrot.slane %v617_v36, 1  ;;  %v1193_v54 = vshrl.u32 %v684_v51, 16  ;;  %v1196_v55 = vshll.u32 %v684_v51, 16 }
  0x98   : > { %v1741_v56 = vpop.permute.xlu1 %1740  ;;  %v1737_v5 = vpop.permute.xlu0 %1736  ;;  %v1201_v11 = vshrl.u32 %v688_v33, 16  ;;  %v1204_v4 = vshll.u32 %v688_v33, 16  ;;  %v690_v0 = vpack.c.bf16 %v662_v57, %v658_v59 }
  0x99   : > { %5109 = vst [vmem:[#allocation11_spill] sm:$0xff] %v4434_v46  ;;  %v635_v63 = vsel %vm622_vm0, %v632_v60, %v634_v47  ;;  %v637_v13 = vsel %vm622_vm0, %v634_v47, %v4434_v46  ;;  %v1767_v61 = vrot.slane %v1741_v56, 1  ;;  %v4439_v1 = vrot.slane %v1737_v5, 1 }
  0x9a   : > { %v4442_v24 = vmul.f32 %v635_v63, %v4245_v28  ;;  %v4445_v36 = vmul.f32 %v635_v63, %v4229_v22  ;;  %v4448_v51 = vmul.f32 %v635_v63, %v4270_v37  ;;  %v4451_v49 = vmul.f32 %v635_v63, %v4239_v26 }
  0x9b   : > { %5110 = vst [vmem:[#allocation12_spill] sm:$0xff] %v4439_v1  ;;  %v4454_v52 = vmul.f32 %v637_v13, %v4322_v19  ;;  %v4457_v57 = vmul.f32 %v637_v13, %v4305_v7  ;;  %v4460_v59 = vmul.f32 %v637_v13, %v4336_v30  ;;  %v4463_v60 = vmul.f32 %v637_v13, %v4316_v16 }
  0x9c   : > { %5111 = vst [vmem:[#allocation13_spill] sm:$0xff] %v4442_v24  ;;  %5112 = vst [vmem:[#allocation14_spill] sm:$0xff] %v4445_v36  ;;  %v4467_v33 = vsel %vm622_vm0, %v4439_v1, %v1767_v61  ;;  %v4470_v47 = vmul.f32 %v4439_v1, %v1689_v48  ;;  %v4473_v63 = vmul.f32 %v4439_v1, %v1691_v10  ;;  %v1195_v56 = vrot.slane %v1193_v54, 3  ;;  %v4475_v5 = vpop.permute.xlu1 %1748  ;;  %v1745_v58 = vpop.permute.xlu0 %1744 }
  0x9d   : > { %5113 = vst [vmem:[#allocation15_spill] sm:$0xff] %v4448_v51  ;;  %5114 = vst [vmem:[#allocation16_spill] sm:$0xff] %v4451_v49  ;;  %v1198_v46 = vrot.slane %v1196_v55, 4  ;;  %v1203_v51 = vrot.slane %v1201_v11, 3  ;;  %v1230_v13 = vshll.u32 %v686_v2, 16  ;;  %v1235_v24 = vshrl.u32 %v690_v0, 16 }
  0x9e   : > { %5115 = vst [vmem:[#allocation17_spill] sm:$0xff] %v4454_v52  ;;  %5116 = vst [vmem:[#allocation18_spill] sm:$0xff] %v4457_v57  ;;  %v1227_v52 = vshrl.u32 %v686_v2, 16  ;;  %v1771_v49 = vrot.slane %v4475_v5, 1  ;;  %v4482_v1 = vmul.f32 %v4467_v33, %v4108_v15  ;;  %v4492_v11 = vmul.f32 %v4467_v33, %v4114_v17 }
  0x9f   : > { %5117 = vst [vmem:[#allocation19_spill] sm:$0xff] %v4460_v59  ;;  %5118 = vst [vmem:[#allocation20_spill] sm:$0xff] %v4463_v60  ;;  %v1206_v59 = vrot.slane %v1204_v4, 4  ;;  %v1238_v60 = vshll.u32 %v690_v0, 16  ;;  %v1199_v57 = vor.u32 %v1198_v46, %v1195_v56  ;;  %v1232_v10 = vrot.slane %v1230_v13, 4 }
  0xa0   : > { %5119 = vst [vmem:[#allocation21_spill] sm:$0xff] %v4470_v47  ;;  %5120 = vst [vmem:[#allocation22_spill] sm:$0xff] %v4473_v63  ;;  %v1229_v48 = vrot.slane %v1227_v52, 3  ;;  %v1769_v47 = vrot.slane %v1745_v58, 1  ;;  %v1237_v63 = vrot.slane %v1235_v24, 3 }
  0xa1   : > { %v4478_v36 = vor.u32 %v1206_v59, %v1203_v51  ;;  %v1240_v54 = vrot.slane %v1238_v60, 4  ;;  %v4515_v59 = vpop.permute.xlu1 %1756  ;;  %v1187_v60 = vshll.u32 %v4404_v12, 16 }
  0xa2   : > { %v1770_v2 = vsel %vm622_vm0, %v1767_v61, %v1769_v47  ;;  %v1772_v0 = vsel %vm622_vm0, %v1769_v47, %v1771_v49  ;;  %v1233_v58 = vor.u32 %v1232_v10, %v1229_v48  ;;  %v1218_v10 = vshrl.u32 %v4406_v62, 16 }
  0xa3   : > { %v1208_v4 = vsel %vm1174_vm1, %v1199_v57, %v4478_v36  ;;  %v4494_v46 = vor.u32 %v1240_v54, %v1237_v63  ;;  %v1798_v15 = vmul.f32 %v1770_v2, %v4165_v42  ;;  %v4498_v55 = vmul.f32 %v1770_v2, %v4144_v35 }
  0xa4   : > { %1591 = vmatprep.mubr.bf16.mxu0 %v1208_v4  ;;  %v1800_v24 = vmul.f32 %v1770_v2, %v4188_v50  ;;  %v4502_v61 = vmul.f32 %v1770_v2, %v4155_v39  ;;  %v1802_v51 = vmul.f32 %v1772_v0, %v4168_v43  ;;  %v4506_v52 = vmul.f32 %v1772_v0, %v4152_v38  ;;  %v1753_v50 = vpop.permute.xlu0 %1752 }
  0xa5   : > { %v1242_v17 = vsel %vm1174_vm1, %v1233_v58, %v4494_v46  ;;  %v1804_v57 = vmul.f32 %v1772_v0, %v4196_v53  ;;  %v4512_v42 = vmul.f32 %v1772_v0, %v4158_v40  ;;  %v1176_v35 = vshrl.u32 %v4400_v6, 16 }
  0xa6   : > { %1656 = vmatprep.mubr.bf16.mxu1 %v1242_v17  ;;  %v4517_v39 = vpack.c.bf16 %v1802_v51, %v1798_v15  ;;  %v1179_v43 = vshll.u32 %v4400_v6, 16  ;;  %v1184_v38 = vshrl.u32 %v4404_v12, 16  ;;  %v1210_v40 = vshrl.u32 %v4402_v9, 16 }
  0xa7   : > { %v4522_v47 = vpack.c.bf16 %v1804_v57, %v1800_v24  ;;  %v1178_v53 = vrot.slane %v1176_v35, 3  ;;  %v1213_v63 = vshll.u32 %v4402_v9, 16  ;;  %v1189_v48 = vrot.slane %v1187_v60, 4  ;;  %v3747_v9 = vld [vmem:[%s5083_s3 + $0x238] sm:$0xff]  }
  0xa8   : > { %v1181_v56 = vrot.slane %v1179_v43, 4  ;;  %v1186_v13 = vrot.slane %v1184_v38, 3  ;;  %v1212_v54 = vrot.slane %v1210_v40, 3  ;;  %v1221_v6 = vshll.u32 %v4406_v62, 16  ;;  %v3749_v62 = vld [vmem:[%s5083_s3 + $0x270] sm:$0xff]  }
  0xa9   : > { %v1215_v4 = vrot.slane %v1213_v63, 4  ;;  %v692_v2 = vpack.c.bf16 %v4426_v44, %v4414_v25  ;;  %v1220_v58 = vrot.slane %v1218_v10, 3  ;;  %v694_v15 = vpack.c.bf16 %v4432_v45, %v4420_v3  ;;  %v1765_v25 = vpop.permute.xlu1 %1764  ;;  %v1761_v44 = vpop.permute.xlu0 %1760  ;;  %v3748_v3 = vld [vmem:[%s5083_s3 + $0x2b8] sm:$0xff]  }
  0xaa   : > { %v1182_v12 = vor.u32 %v1181_v56, %v1178_v53  ;;  %v4530_v0 = vor.u32 %v1189_v48, %v1186_v13  ;;  %v1223_v51 = vrot.slane %v1221_v6, 4  ;;  %v1775_v60 = vrot.slane %v4515_v59, 1  ;;  %v3750_v48 = vld [vmem:[%s5083_s3 + $0x2f0] sm:$0xff]  }
  0xab   : > { %v1216_v24 = vor.u32 %v1215_v4, %v1212_v54  ;;  %v1253_v17 = vshrl.u32 %v692_v2, 16  ;;  %v1256_v57 = vshll.u32 %v692_v2, 16  ;;  %v1271_v43 = vshrl.u32 %v694_v15, 16  ;;  %v3751_v2 = vld [vmem:[%s5083_s3 + $0x230] sm:$0xff]  }
  0xac   : > { %v1191_v35 = vsel %vm1174_vm1, %v1182_v12, %v4530_v0  ;;  %v1274_v38 = vshll.u32 %v694_v15, 16  ;;  %v4543_v53 = vor.u32 %v1223_v51, %v1220_v58  ;;  %v1773_v63 = vrot.slane %v1753_v50, 1 }
  0xad   : > { %1592 = vmatmul.mubr.bf16.vlgmr.msra.gmra.mxu0 %v1191_v35  ;;  %v1255_v45 = vrot.slane %v1253_v17, 3  ;;  %v1258_v40 = vrot.slane %v1256_v57, 4  ;;  %v1273_v56 = vrot.slane %v1271_v43, 3  ;;  %v4551_v10 = vrot.slane %v1765_v25, 1  ;;  %v3757_v43 = vld [vmem:[%s5083_s3 + $0x260] sm:$0xff]  }
  0xae   : > { %3510 = vmatpush3.bf16.msra.mxu0 %v3747_v9  ;;  %v1276_v13 = vrot.slane %v1274_v38, 4  ;;  %v1777_v59 = vrot.slane %v1761_v44, 1  ;;  %v1225_v54 = vsel %vm1174_vm1, %v1216_v24, %v4543_v53  ;;  %v1774_v50 = vsel %vm622_vm0, %v1771_v49, %v1773_v63  ;;  %v3753_v49 = vld [vmem:[%s5083_s3 + $0x268] sm:$0xff]  }
  0xaf   : > { %v4555_v4 = vor.u32 %v1258_v40, %v1255_v45  ;;  %3511 = vmatprep.subr.bf16.mxu0 %v3749_v62  ;;  %v1776_v6 = vsel %vm622_vm0, %v1773_v63, %v1775_v60  ;;  %1657 = vmatmul.mubr.bf16.vlgmr.msra.gmra.mxu1 %v1225_v54  ;;  %v4567_v58 = vmul.f32 %v1774_v50, %v4242_v27  ;;  %v1923_v57 = vshll.u32 %v4517_v39, 16  ;;  %v5122_v45 = vld [vmem:[#allocation18_spill] sm:$0xff] }
  0xb0   : > { %v4564_v12 = vor.u32 %v1276_v13, %v1273_v56  ;;  %v4570_v9 = vmul.f32 %v1774_v50, %v4226_v21  ;;  %v4573_v15 = vmul.f32 %v1774_v50, %v4257_v32  ;;  %3550 = vmatpush3.bf16.msra.mxu1 %v3748_v3  ;;  %v4582_v24 = vmul.f32 %v1774_v50, %v4232_v23  ;;  %v3752_v32 = vld [vmem:[%s5083_s3 + $0x2b0] sm:$0xff]   ;;  %v5121_v3 = vld [vmem:[#allocation14_spill] sm:$0xff] }
  0xb1   : > { %v1260_v5 = vsel %vm1174_vm1, %v4478_v36, %v4555_v4  ;;  %v4585_v27 = vmul.f32 %v1776_v6, %v4245_v28  ;;  %v4588_v21 = vmul.f32 %v1776_v6, %v4229_v22  ;;  %3551 = vmatprep.subr.bf16.mxu1 %v3750_v48  ;;  %v4597_v36 = vmul.f32 %v1776_v6, %v4270_v37  ;;  %v3754_v22 = vld [vmem:[%s5083_s3 + $0x2e8] sm:$0xff]  }
  0xb2   : > { %1599 = vmatprep.mubr.bf16.mxu0 %v1260_v5  ;;  %v1278_v51 = vsel %vm1174_vm1, %v4494_v46, %v4564_v12  ;;  %v4600_v23 = vmul.f32 %v1776_v6, %v4239_v26  ;;  %v1920_v28 = vshrl.u32 %v4517_v39, 16  ;;  %3512 = vmatpush3.bf16.msra.mxu0 %v3751_v2  ;;  %v1778_v17 = vsel %vm622_vm0, %v1775_v60, %v1777_v59  ;;  %v3755_v26 = vld [vmem:[%s5083_s3 + $0x228] sm:$0xff]   ;;  %v3760_v5 = vld [vmem:[%s5083_s3 + $0x2a0] sm:$0xff]  }
  0xb3   : > { %1664 = vmatprep.mubr.bf16.mxu1 %v1278_v51  ;;  %v1780_v46 = vsel %vm622_vm0, %v1777_v59, %v4551_v10  ;;  %v691_v37 = vpack.c.bf16 %v4423_v20, %v4411_v14  ;;  %3513 = vmatprep.subr.bf16.mxu0 %v3753_v49  ;;  %v1814_v62 = vmul.f32 %v1778_v17, %v4322_v19  ;;  %v3761_v59 = vld [vmem:[%s5083_s3 + $0x258] sm:$0xff]   ;;  %v5123_v6 = vld [vmem:[#allocation16_spill] sm:$0xff]  ;;  %v5126_v51 = vld [vmem:[#allocation17_spill] sm:$0xff] }
  0xb4   : > { %v1815_v25 = vmul.f32 %v1778_v17, %v4305_v7  ;;  %v1816_v44 = vmul.f32 %v1778_v17, %v4336_v30  ;;  %v1817_v35 = vmul.f32 %v1778_v17, %v4316_v16  ;;  %3552 = vmatpush3.bf16.msra.mxu1 %v3752_v32  ;;  %v1818_v14 = vmul.f32 %v1780_v46, %v4333_v29  ;;  %v3756_v7 = vld [vmem:[%s5083_s3 + $0x2a8] sm:$0xff]   ;;  %v5125_v32 = vld [vmem:[#allocation13_spill] sm:$0xff] }
  0xb5   : > { %v1819_v20 = vmul.f32 %v1780_v46, %v4308_v8  ;;  %v1820_v38 = vmul.f32 %v1780_v46, %v4347_v34  ;;  %v1821_v60 = vmul.f32 %v1780_v46, %v4319_v18  ;;  %3553 = vmatprep.subr.bf16.mxu1 %v3754_v22  ;;  %v1244_v19 = vshrl.u32 %v691_v37, 16  ;;  %v3758_v8 = vld [vmem:[%s5083_s3 + $0x2e0] sm:$0xff]   ;;  %v5124_v2 = vld [vmem:[#allocation20_spill] sm:$0xff] }
  0xb6   : > { %v1247_v16 = vshll.u32 %v691_v37, 16  ;;  %v693_v30 = vpack.c.bf16 %v4429_v41, %v4417_v31  ;;  %v696_v40 = vpack.c.bf16 %v5122_v45, %v5121_v3  ;;  %v4636_v29 = vpack.c.bf16 %v1818_v14, %v1814_v62  ;;  %3514 = vmatpush3.bf16.msra.mxu0 %v3755_v26  ;;  %v3759_v31 = vld [vmem:[%s5083_s3 + $0x220] sm:$0xff]   ;;  %v3762_v26 = vld [vmem:[%s5083_s3 + $0x2d8] sm:$0xff]   ;;  %v3765_v45 = vld [vmem:[%s5083_s3 + $0x250] sm:$0xff]  }
  0xb7   : > { %v4638_v18 = vpack.c.bf16 %v1819_v20, %v1815_v25  ;;  %v4640_v34 = vpack.c.bf16 %v1820_v38, %v1816_v44  ;;  %v4642_v63 = vpack.c.bf16 %v1821_v60, %v1817_v35  ;;  %v1246_v41 = vrot.slane %v1244_v19, 3  ;;  %3515 = vmatprep.subr.bf16.mxu0 %v3757_v43  ;;  %v5127_v62 = vld [vmem:[#allocation15_spill] sm:$0xff]  ;;  %v3763_v35 = vld [vmem:[%s5083_s3 + $0x218] sm:$0xff]  }
  0xb8   : > { %v1249_v56 = vrot.slane %v1247_v16, 4  ;;  %v1262_v13 = vshrl.u32 %v693_v30, 16  ;;  %v1265_v48 = vshll.u32 %v693_v30, 16  ;;  %3554 = vmatpush3.bf16.msra.mxu1 %v3756_v7  ;;  %v1289_v54 = vshrl.u32 %v696_v40, 16  ;;  %v5128_v25 = vld [vmem:[#allocation19_spill] sm:$0xff] }
  0xb9   : > { %v1292_v50 = vshll.u32 %v696_v40, 16  ;;  %v698_v49 = vpack.c.bf16 %v5124_v2, %v5123_v6  ;;  %v695_v22 = vpack.c.bf16 %v5126_v51, %v5125_v32  ;;  %3555 = vmatprep.subr.bf16.mxu1 %v3758_v8  ;;  %v697_v44 = vpack.c.bf16 %v5128_v25, %v5127_v62  ;;  %v579_v43 = vld [vmem:[#allocation2 + $0x78] sm:$0x7f]  ;;  %v581_v7 = vld [vmem:[#allocation2 + $0x40] sm:$0x7f]  ;;  %v3766_v6 = vld [vmem:[%s5083_s3 + $0x2d0] sm:$0xff]  }
  0xba   : > { %v1250_v17 = vor.u32 %v1249_v56, %v1246_v41  ;;  %v1264_v46 = vrot.slane %v1262_v13, 3  ;;  %v1267_v37 = vrot.slane %v1265_v48, 4  ;;  %v1291_v14 = vrot.slane %v1289_v54, 3  ;;  %3516 = vmatpush3.bf16.msra.mxu0 %v3759_v31  ;;  %v578_v40 = vld [vmem:[#allocation2 + $0x58] sm:$0x7f]  ;;  %v5129_v51 = vld [vmem:[#allocation11_spill] sm:$0xff] }
  0xbb   : > { %v1294_v20 = vrot.slane %v1292_v50, 4  ;;  %v1307_v38 = vshrl.u32 %v698_v49, 16  ;;  %v1310_v60 = vshll.u32 %v698_v49, 16  ;;  %3517 = vmatprep.subr.bf16.mxu0 %v3761_v59  ;;  %v1280_v30 = vshrl.u32 %v695_v22, 16  ;;  %v580_v13 = vld [vmem:[#allocation2 + $0x30] sm:$0x7f] }
  0xbc   : > { %v1251_v19 = vsel %vm1174_vm1, %v4530_v0, %v1250_v17  ;;  %v1268_v16 = vor.u32 %v1267_v37, %v1264_v46  ;;  %v1283_v3 = vshll.u32 %v695_v22, 16  ;;  %3556 = vmatpush3.bf16.msra.mxu1 %v3760_v5  ;;  %v1298_v31 = vshrl.u32 %v697_v44, 16  ;;  %v3764_v0 = vld [vmem:[%s5083_s3 + $0x298] sm:$0xff]   ;;  %v3767_v22 = vld [vmem:[%s5083_s3 + $0x210] sm:$0xff]  }
  0xbd   : > { %1600 = vmatmul.mubr.bf16.gmra.mxu0 %v1251_v19  ;;  %v4670_v8 = vor.u32 %v1294_v20, %v1291_v14  ;;  %v1309_v41 = vrot.slane %v1307_v38, 3  ;;  %v1312_v56 = vrot.slane %v1310_v60, 4  ;;  %3557 = vmatprep.subr.bf16.mxu1 %v3762_v26  ;;  %v1282_v59 = vrot.slane %v1280_v30, 3  ;;  %v1690_v2 = vld [vmem:[#allocation2 + $0x38] sm:$0x80]  ;;  %v4703_v14 = vld [vmem:[#allocation2 + $0x108] sm:$0xff] }
  0xbe   : > { %v1269_v48 = vsel %vm1174_vm1, %v4543_v53, %v1268_v16  ;;  %v1285_v54 = vrot.slane %v1283_v3, 4  ;;  %v1301_v50 = vshll.u32 %v697_v44, 16  ;;  %v1300_v32 = vrot.slane %v1298_v31, 3  ;;  %3518 = vmatpush3.bf16.msra.mxu0 %v3763_v35  ;;  %v3768_v35 = vld [vmem:[%s5083_s3 + $0x290] sm:$0xff]   ;;  %v5130_v20 = vld [vmem:[#allocation12_spill] sm:$0xff] }
  0xbf   : > { %1665 = vmatmul.mubr.bf16.gmra.mxu1 %v1269_v48  ;;  %v1296_v49 = vsel %vm1174_vm1, %v4555_v4, %v4670_v8  ;;  %v4683_v5 = vor.u32 %v1312_v56, %v1309_v41  ;;  %v680_v53 = vmul.f32 %v5129_v51, %v579_v43  ;;  %v682_v26 = vmul.f32 %v5129_v51, %v581_v7  ;;  %v3769_v4 = vld [vmem:[%s5083_s3 + $0x248] sm:$0xff]  }
  0xc0   : > { %1607 = vmatprep.mubr.bf16.mxu0 %v1296_v49  ;;  %v4689_v46 = vor.u32 %v1285_v54, %v1282_v59  ;;  %v1303_v37 = vrot.slane %v1301_v50, 4  ;;  %3519 = vmatprep.subr.bf16.mxu0 %v3765_v45  ;;  %v679_v62 = vmul.f32 %v5129_v51, %v578_v40  ;;  %v681_v43 = vmul.f32 %v5129_v51, %v580_v13  ;;  %v3774_v51 = vld [vmem:[%s5083_s3 + $0x2c0] sm:$0xff]  }
  0xc1   : > { %v1314_v25 = vsel %vm1174_vm1, %v4564_v12, %v4683_v5  ;;  %3558 = vmatpush3.bf16.msra.mxu1 %v3764_v0  ;;  %v700_v44 = vpack.c.bf16 %v680_v53, %v680_v53  ;;  %v1791_v38 = vmul.f32 %v5130_v20, %v1690_v2  ;;  %v702_v19 = vpack.c.bf16 %v682_v26, %v682_v26  ;;  %v3770_v12 = vld [vmem:[%s5083_s3 + $0x2c8] sm:$0xff]  }
  0xc2   : > { %1672 = vmatprep.mubr.bf16.mxu1 %v1314_v25  ;;  %v1287_v60 = vsel %vm1174_vm1, %v1250_v17, %v4689_v46  ;;  %v4708_v7 = vor.u32 %v1303_v37, %v1300_v32  ;;  %3559 = vmatprep.subr.bf16.mxu1 %v3766_v6  ;;  %v4715_v30 = vrot.slane %v1920_v28, 3  ;;  %v699_v40 = vpack.c.bf16 %v679_v62, %v679_v62  ;;  %v3771_v17 = vld [vmem:[%s5083_s3 + $0x208] sm:$0xff]   ;;  %v3773_v28 = vld [vmem:[%s5083_s3 + $0x240] sm:$0xff]  }
  0xc3   : > { %v1325_v3 = vshrl.u32 %v700_v44, 16  ;;  %v1328_v45 = vshll.u32 %v700_v44, 16  ;;  %3520 = vmatpush3.bf16.msra.mxu0 %v3767_v22  ;;  %v701_v41 = vpack.c.bf16 %v681_v43, %v681_v43  ;;  %v1343_v31 = vshrl.u32 %v702_v19, 16  ;;  %v1692_v43 = vld [vmem:[#allocation2 + $0x100] sm:$0x80] }
  0xc4   : > { %v1305_v56 = vsel %vm1174_vm1, %v1268_v16, %v4708_v7  ;;  %v1346_v0 = vshll.u32 %v702_v19, 16  ;;  %3521 = vmatprep.subr.bf16.mxu0 %v3769_v4  ;;  %v1795_v13 = vmul.f32 %v4467_v33, %v4703_v14  ;;  %v1316_v54 = vshrl.u32 %v699_v40, 16  ;;  %v3772_v16 = vld [vmem:[%s5083_s3 + $0x288] sm:$0xff]   ;;  %v3775_v4 = vld [vmem:[%s5083_s3 + $0x200] sm:$0xff]  }
  0xc5   : > { %1608 = vmatmul.mubr.bf16.gmra.mxu0 %v1287_v60  ;;  %v1327_v48 = vrot.slane %v1325_v3, 3  ;;  %v1330_v59 = vrot.slane %v1328_v45, 4  ;;  %3560 = vmatpush3.bf16.msra.mxu1 %v3768_v35  ;;  %v1319_v50 = vshll.u32 %v699_v40, 16  ;;  %v1345_v6 = vrot.slane %v1343_v31, 3  ;;  %v3777_v60 = vld [vmem:[%s5083_s3 + $0x378] sm:$0xff]   ;;  %v4743_v45 = vld [vmem:[#allocation2 + $0xf0] sm:$0xff] }
  0xc6   : > { %v1348_v2 = vrot.slane %v1346_v0, 4  ;;  %3561 = vmatprep.subr.bf16.mxu1 %v3770_v12  ;;  %v1334_v49 = vshrl.u32 %v701_v41, 16  ;;  %v1337_v32 = vshll.u32 %v701_v41, 16  ;;  %v1318_v22 = vrot.slane %v1316_v54, 3  ;;  %v3776_v40 = vld [vmem:[%s5083_s3 + $0x280] sm:$0xff]  }
  0xc7   : > { %1673 = vmatmul.mubr.bf16.gmra.mxu1 %v1305_v56  ;;  %v1331_v53 = vor.u32 %v1330_v59, %v1327_v48  ;;  %v1321_v37 = vrot.slane %v1319_v50, 4  ;;  %3522 = vmatpush3.bf16.msra.mxu0 %v3771_v17  ;;  %v1827_v26 = vpack.c.bf16 %v1795_v13, %v1791_v38  ;;  %v1831_v35 = vpack.c.bf16 %v4506_v52, %v4498_v55 }
  0xc8   : > { %v1349_v62 = vor.u32 %v1348_v2, %v1345_v6  ;;  %v1336_v25 = vrot.slane %v1334_v49, 3  ;;  %v1339_v44 = vrot.slane %v1337_v32, 4  ;;  %3523 = vmatprep.subr.bf16.mxu0 %v3773_v28  ;;  %v1793_v13 = vmul.f32 %v5130_v20, %v1692_v43  ;;  %v5132_v2 = vld [vmem:[#allocation22_spill] sm:$0xff] }
  0xc9   : > { %v1332_v19 = vsel %vm1174_vm1, %v4670_v8, %v1331_v53  ;;  %v1322_v38 = vor.u32 %v1321_v37, %v1318_v22  ;;  %3562 = vmatpush3.bf16.msra.mxu1 %v3772_v16  ;;  %v1929_v12 = vshrl.u32 %v1827_v26, 16  ;;  %v1932_v3 = vshll.u32 %v1827_v26, 16  ;;  %v3778_v8 = vld [vmem:[%s5083_s3 + $0x3f8] sm:$0xff]  }
  0xca   : > { %1615 = vmatprep.mubr.bf16.mxu0 %v1332_v19  ;;  %v1350_v55 = vsel %vm1174_vm1, %v4683_v5, %v1349_v62  ;;  %v1340_v52 = vor.u32 %v1339_v44, %v1336_v25  ;;  %v1937_v41 = vshrl.u32 %v1831_v35, 16  ;;  %v1940_v17 = vshll.u32 %v1831_v35, 16  ;;  %3563 = vmatprep.subr.bf16.mxu1 %v3774_v51 }
  0xcb   : > { %1680 = vmatprep.mubr.bf16.mxu1 %v1350_v55  ;;  %v1323_v56 = vsel %vm1174_vm1, %v4689_v46, %v1322_v38  ;;  %v1931_v31 = vrot.slane %v1929_v12, 3  ;;  %v1934_v0 = vrot.slane %v1932_v3, 4  ;;  %3524 = vmatpush3.bf16.msra.mxu0 %v3775_v4  ;;  %v1797_v59 = vmul.f32 %v4467_v33, %v4743_v45  ;;  %v5131_v46 = vld [vmem:[#allocation21_spill] sm:$0xff]  ;;  %v3779_v38 = vld [vmem:[%s5083_s3 + $0x338] sm:$0xff]  }
  0xcc   : > { %v1341_v5 = vsel %vm1174_vm1, %v4708_v7, %v1340_v52  ;;  %v1939_v28 = vrot.slane %v1937_v41, 3  ;;  %v1942_v48 = vrot.slane %v1940_v17, 4  ;;  %3589 = vmatprep.subr.bf16.mxu0 %v3777_v60  ;;  %v1833_v50 = vpack.c.bf16 %v4512_v42, %v4502_v61  ;;  %v3781_v55 = vld [vmem:[%s5083_s3 + $0x370] sm:$0xff]  }
  0xcd   : > { %1616 = vmatmul.mubr.bf16.gmra.mxu0 %v1323_v56  ;;  %v1935_v54 = vor.u32 %v1934_v0, %v1931_v31  ;;  %3564 = vmatpush3.bf16.msra.mxu1 %v3776_v40  ;;  %v1826_v16 = vpack.c.bf16 %v4482_v1, %v5131_v46  ;;  %v1925_v20 = vrot.slane %v1923_v57, 4  ;;  %v1829_v7 = vpack.c.bf16 %v1797_v59, %v1793_v13  ;;  %v3780_v0 = vld [vmem:[%s5083_s3 + $0x3b8] sm:$0xff]  }
  0xce   : > { %v4766_v6 = vor.u32 %v1942_v48, %v1939_v28  ;;  %3629 = vmatprep.subr.bf16.mxu1 %v3778_v8  ;;  %v1828_v33 = vpack.c.bf16 %v4492_v11, %v5132_v2  ;;  %v1954_v49 = vshrl.u32 %v4522_v47, 16  ;;  %v1971_v32 = vshrl.u32 %v1833_v50, 16  ;;  %v3782_v28 = vld [vmem:[%s5083_s3 + $0x3f0] sm:$0xff]   ;;  %v3785_v48 = vld [vmem:[%s5083_s3 + $0x368] sm:$0xff]  }
  0xcf   : > { %1681 = vmatmul.mubr.bf16.gmra.mxu1 %v1341_v5  ;;  %v1974_v51 = vshll.u32 %v1833_v50, 16  ;;  %v1912_v61 = vshrl.u32 %v1826_v16, 16  ;;  %v1915_v42 = vshll.u32 %v1826_v16, 16  ;;  %v1963_v53 = vshrl.u32 %v1829_v7, 16 }
  0xd0   : > { %v1944_v1 = vsel %vm1174_vm1, %v1935_v54, %v4766_v6  ;;  %v1966_v39 = vshll.u32 %v1829_v7, 16  ;;  %v4774_v57 = vor.u32 %v1925_v20, %v4715_v30  ;;  %v1973_v22 = vrot.slane %v1971_v32, 3 }
  0xd1   : > { %2327 = vmatprep.mubr.bf16.mxu0 %v1944_v1  ;;  %v1976_v37 = vrot.slane %v1974_v51, 4  ;;  %v1914_v26 = vrot.slane %v1912_v61, 3  ;;  %v1917_v11 = vrot.slane %v1915_v42, 4  ;;  %v1965_v4 = vrot.slane %v1963_v53, 3  ;;  %v3784_v51 = vld [vmem:[%s5083_s3 + $0x3b0] sm:$0xff]   ;;  %v3786_v1 = vld [vmem:[%s5083_s3 + $0x3e8] sm:$0xff]  }
  0xd2   : > { %v1968_v62 = vrot.slane %v1966_v39, 4  ;;  %v1946_v25 = vshrl.u32 %v1828_v33, 16  ;;  %v1949_v44 = vshll.u32 %v1828_v33, 16  ;;  %v1956_v60 = vrot.slane %v1954_v49, 3 }
  0xd3   : > { %v1977_v35 = vor.u32 %v1976_v37, %v1973_v22  ;;  %v1918_v43 = vor.u32 %v1917_v11, %v1914_v26  ;;  %v1957_v19 = vshll.u32 %v4522_v47, 16  ;;  %v1835_v40 = vpack.c.bf16 %v4588_v21, %v4570_v9 }
  0xd4   : > { %v1969_v30 = vor.u32 %v1968_v62, %v1965_v4  ;;  %v1948_v12 = vrot.slane %v1946_v25, 3  ;;  %v1951_v3 = vrot.slane %v1949_v44, 4  ;;  %v1837_v47 = vpack.c.bf16 %v4600_v23, %v4582_v24  ;;  %v3783_v24 = vld [vmem:[%s5083_s3 + $0x330] sm:$0xff]   ;;  %v3789_v4 = vld [vmem:[%s5083_s3 + $0x360] sm:$0xff]   ;;  %v363_v62 = vld [vmem:[%s4054_s14 + $0xe8] sm:$0xff] }
  0xd5   : > { %v1927_v52 = vsel %vm1174_vm1, %v1918_v43, %v4774_v57  ;;  %v1959_v41 = vrot.slane %v1957_v19, 4  ;;  %v1834_v17 = vpack.c.bf16 %v4585_v27, %v4567_v58  ;;  %v1989_v31 = vshrl.u32 %v1835_v40, 16 }
  0xd6   : > { %v1978_v8 = vsel %vm1174_vm1, %v1969_v30, %v1977_v35  ;;  %2328 = vmatmul.mubr.bf16.vlgmr.msra.gmra.mxu0 %v1927_v52  ;;  %v1952_v56 = vor.u32 %v1951_v3, %v1948_v12  ;;  %v1992_v9 = vshll.u32 %v1835_v40, 16  ;;  %v2007_v13 = vshrl.u32 %v1837_v47, 16  ;;  %v365_v12 = vld [vmem:[%s4054_s14 + $0xf8] sm:$0xff] }
  0xd7   : > { %2392 = vmatprep.mubr.bf16.mxu1 %v1978_v8  ;;  %v1960_v21 = vor.u32 %v1959_v41, %v1956_v60  ;;  %3590 = vmatpush3.bf16.msra.mxu0 %v3779_v38  ;;  %v2010_v5 = vshll.u32 %v1837_v47, 16  ;;  %v1980_v58 = vshrl.u32 %v1834_v17, 16  ;;  %v1991_v27 = vrot.slane %v1989_v31, 3  ;;  %v3790_v38 = vld [vmem:[%s5083_s3 + $0x3e0] sm:$0xff]   ;;  %v364_v8 = vld [vmem:[%s4054_s14 + $0xf0] sm:$0xff] }
  0xd8   : > { %v1994_v23 = vrot.slane %v1992_v9, 4  ;;  %3591 = vmatprep.subr.bf16.mxu0 %v3781_v55  ;;  %v1983_v59 = vshll.u32 %v1834_v17, 16  ;;  %v1836_v54 = vpack.c.bf16 %v4597_v36, %v4573_v15  ;;  %v2009_v46 = vrot.slane %v2007_v13, 3  ;;  %v3791_v55 = vld [vmem:[%s5083_s3 + $0x320] sm:$0xff]  }
  0xd9   : > { %v1961_v50 = vsel %vm1174_vm1, %v1952_v56, %v1960_v21  ;;  %v2012_v16 = vrot.slane %v2010_v5, 4  ;;  %v1982_v20 = vrot.slane %v1980_v58, 3  ;;  %v2025_v61 = vshrl.u32 %v4638_v18, 16  ;;  %v5133_v41 = vld [vmem:[#allocation3_spill] sm:$0xff]  ;;  %v5135_v5 = vld [vmem:[#allocation4_spill] sm:$0xff] }
  0xda   : > { %2393 = vmatmul.mubr.bf16.vlgmr.msra.gmra.mxu1 %v1961_v50  ;;  %v1995_v7 = vor.u32 %v1994_v23, %v1991_v27  ;;  %v1985_v2 = vrot.slane %v1983_v59, 4  ;;  %v1998_v33 = vshrl.u32 %v1836_v54, 16  ;;  %v2001_v49 = vshll.u32 %v1836_v54, 16  ;;  %v362_v17 = vld [vmem:[%s4054_s14 + $0xe0] sm:$0xff]  ;;  %v5136_v23 = vld [vmem:[#allocation5_spill] sm:$0xff]  ;;  %v3794_v50 = vld [vmem:[%s5083_s3 + $0x3d8] sm:$0xff]  }
  0xdb   : > { %3630 = vmatpush3.bf16.msra.mxu1 %v3780_v0  ;;  %v2013_v32 = vor.u32 %v2012_v16, %v2009_v46  ;;  %3592 = vmatpush3.bf16.msra.mxu0 %v3783_v24  ;;  %v2028_v15 = vshll.u32 %v4638_v18, 16  ;;  %v2043_v36 = vshrl.u32 %v4642_v63, 16  ;;  %v3787_v18 = vld [vmem:[%s5083_s3 + $0x328] sm:$0xff]   ;;  %v2027_v26 = vrot.slane %v2025_v61, 3  ;;  %v5134_v0 = vld [vmem:[#allocation7_spill] sm:$0xff]  ;;  %v3795_v46 = vld [vmem:[%s5083_s3 + $0x318] sm:$0xff]  }
  0xdc   : > { %v1996_v42 = vsel %vm1174_vm1, %v4766_v6, %v1995_v7  ;;  %3631 = vmatprep.subr.bf16.mxu1 %v3782_v28  ;;  %3593 = vmatprep.subr.bf16.mxu0 %v3785_v48  ;;  %v4818_v53 = vor.u32 %v1985_v2, %v1982_v20  ;;  %v2000_v39 = vrot.slane %v1998_v33, 3  ;;  %v2003_v22 = vrot.slane %v2001_v49, 4  ;;  %v3792_v58 = vld [vmem:[%s5083_s3 + $0x3a0] sm:$0xff]   ;;  %v5137_v48 = vld [vmem:[#allocation6_spill] sm:$0xff]  ;;  %v5138_v16 = vld [vmem:[#allocation8_spill] sm:$0xff] }
  0xdd   : > { %2335 = vmatprep.mubr.bf16.mxu0 %v1996_v42  ;;  %v2014_v37 = vsel %vm1174_vm1, %v1977_v35, %v2013_v32  ;;  %v2030_v11 = vrot.slane %v2028_v15, 4  ;;  %v2045_v6 = vrot.slane %v2043_v36, 3  ;;  %v2046_v43 = vshll.u32 %v4642_v63, 16  ;;  %v3788_v35 = vld [vmem:[%s5083_s3 + $0x3a8] sm:$0xff]   ;;  %v3797_v2 = vld [vmem:[%s5083_s3 + $0x350] sm:$0xff]   ;;  %v3796_v15 = vld [vmem:[%s5083_s3 + $0x398] sm:$0xff]  }
  0xde   : > { %2400 = vmatprep.mubr.bf16.mxu1 %v2014_v37  ;;  %v1987_v25 = vsel %vm1174_vm1, %v4774_v57, %v4818_v53  ;;  %v2004_v44 = vor.u32 %v2003_v22, %v2000_v39  ;;  %v2016_v60 = vshrl.u32 %v4636_v29, 16  ;;  %v2019_v57 = vshll.u32 %v4636_v29, 16  ;;  %v5139_v33 = vld [vmem:[#allocation9_spill] sm:$0xff]  ;;  %v3802_v37 = vld [vmem:[%s5083_s3 + $0x3c8] sm:$0xff]  }
  0xdf   : > { %3632 = vmatpush3.bf16.msra.mxu1 %v3784_v51  ;;  %2336 = vmatmul.mubr.bf16.gmra.mxu0 %v1987_v25  ;;  %v4836_v19 = vor.u32 %v2030_v11, %v2027_v26  ;;  %v2034_v63 = vshrl.u32 %v4640_v34, 16  ;;  %v2037_v30 = vshll.u32 %v4640_v34, 16  ;;  %v2048_v40 = vrot.slane %v2046_v43, 4  ;;  %v3793_v34 = vld [vmem:[%s5083_s3 + $0x358] sm:$0xff]   ;;  %v3798_v36 = vld [vmem:[%s5083_s3 + $0x3d0] sm:$0xff]   ;;  %v3803_v26 = vld [vmem:[%s5083_s3 + $0x308] sm:$0xff]  }
  0xe0   : > { %3633 = vmatprep.subr.bf16.mxu1 %v3786_v1  ;;  %v2005_v3 = vsel %vm1174_vm1, %v1960_v21, %v2004_v44  ;;  %3594 = vmatpush3.bf16.msra.mxu0 %v3787_v18  ;;  %v2018_v52 = vrot.slane %v2016_v60, 3  ;;  %v417_v47 = vsub.f32 %v363_v62, %v5133_v41  ;;  %v2021_v56 = vrot.slane %v2019_v57, 4  ;;  %v5140_v51 = vld [vmem:[#allocation10_spill] sm:$0xff]  ;;  %v3799_v42 = vld [vmem:[%s5083_s3 + $0x310] sm:$0xff]   ;;  %v3804_v60 = vld [vmem:[%s5083_s3 + $0x388] sm:$0xff]  }
  0xe1   : > { %v2032_v29 = vsel %vm1174_vm1, %v1995_v7, %v4836_v19  ;;  %3595 = vmatprep.subr.bf16.mxu0 %v3789_v4  ;;  %v2036_v31 = vrot.slane %v2034_v63, 3  ;;  %v2039_v9 = vrot.slane %v2037_v30, 4  ;;  %v4857_v21 = vor.u32 %v2048_v40, %v2045_v6  ;;  %v3800_v22 = vld [vmem:[%s5083_s3 + $0x390] sm:$0xff]   ;;  %v3805_v6 = vld [vmem:[%s5083_s3 + $0x340] sm:$0xff]  }
  0xe2   : > { %2401 = vmatmul.mubr.bf16.gmra.mxu1 %v2005_v3  ;;  %2343 = vmatprep.mubr.bf16.mxu0 %v2032_v29  ;;  %v4860_v13 = vmul.f32 %v5134_v0, %v417_v47  ;;  %v419_v24 = vsub.f32 %v365_v12, %v5135_v5  ;;  %v4866_v27 = vor.u32 %v2021_v56, %v2018_v52  ;;  %v3806_v30 = vld [vmem:[%s5083_s3 + $0x3c0] sm:$0xff]  }
  0xe3   : > { %3634 = vmatpush3.bf16.msra.mxu1 %v3788_v35  ;;  %v416_v28 = vsub.f32 %v362_v17, %v5136_v23  ;;  %v418_v59 = vsub.f32 %v364_v8, %v5137_v48  ;;  %v2050_v54 = vsel %vm1174_vm1, %v2013_v32, %v4857_v21  ;;  %v4882_v7 = vor.u32 %v2039_v9, %v2036_v31  ;;  %v3807_v12 = vld [vmem:[%s5083_s3 + $0x300] sm:$0xff]  }
  0xe4   : > { %3635 = vmatprep.subr.bf16.mxu1 %v3790_v38  ;;  %3596 = vmatpush3.bf16.msra.mxu0 %v3791_v55  ;;  %543 = vst [vmem:[#allocation2] sm:$0xff] %v4860_v13  ;;  %v4880_v20 = vmul.f32 %v5138_v16, %v419_v24  ;;  %v2023_v32 = vsel %vm1174_vm1, %v4818_v53, %v4866_v27  ;;  %v3801_v53 = vld [vmem:[%s5083_s3 + $0x348] sm:$0xff]  }
  0xe5   : > { %2408 = vmatprep.mubr.bf16.mxu1 %v2050_v54  ;;  %3597 = vmatprep.subr.bf16.mxu0 %v3793_v34  ;;  %v4888_v49 = vmul.f32 %v5139_v33, %v416_v28  ;;  %v4895_v61 = vmul.f32 %v5140_v51, %v418_v59  ;;  %v2041_v1 = vsel %vm1174_vm1, %v2004_v44, %v4882_v7  ;;  %v3810_v59 = vld [vmem:[#allocation2 + $0xc8] sm:$0xff] }
  0xe6   : > { %545 = vst [vmem:[#allocation2 + $0x60] sm:$0xff] %v4880_v20  ;;  %v2438_v54 = vpack.c.bf16 %v3810_v59, %v4703_v14 }
  0xe7   : > { %3636 = vmatpush3.bf16.msra.mxu1 %v3792_v58  ;;  %2344 = vmatmul.mubr.bf16.gmra.mxu0 %v2023_v32  ;;  %542 = vst [vmem:[#allocation2 + $0x28] sm:$0xff] %v4888_v49  ;;  %544 = vst [vmem:[#allocation2 + $0xb8] sm:$0xff] %v4895_v61 }
  0xe8   : > { %3637 = vmatprep.subr.bf16.mxu1 %v3794_v50  ;;  %3598 = vmatpush3.bf16.msra.mxu0 %v3795_v46 }
  0xe9   : > { %3599 = vmatprep.subr.bf16.mxu0 %v3797_v2  ;;  %v3811_v2 = vld [vmem:[#allocation2 + $0x20] sm:$0xff] }
  0xea   : > { %2409 = vmatmul.mubr.bf16.gmra.mxu1 %v2041_v1 }
  0xeb   : > { %3638 = vmatpush3.bf16.msra.mxu1 %v3796_v15  ;;  %v1722_v39 = vld [vmem:[#allocation2] sm:$0x7f] }
  0xec   : > { %v1823_v18 = vmul.f32 %v4551_v10, %v1722_v39  ;;  %3639 = vmatprep.subr.bf16.mxu1 %v3798_v36  ;;  %3600 = vmatpush3.bf16.msra.mxu0 %v3799_v42  ;;  %v3813_v36 = vld [vmem:[#allocation2 + $0x18] sm:$0xff]  ;;  %v3815_v39 = vld [vmem:[#allocation2 + $0x90] sm:$0xff] }
  0xed   : > { %v1724_v11 = vld [vmem:[#allocation2 + $0x60] sm:$0x7f]  ;;  %3601 = vmatprep.subr.bf16.mxu0 %v3801_v53  ;;  %v3814_v53 = vld [vmem:[#allocation2 + $0x110] sm:$0xff] }
  0xee   : > { %v1843_v4 = vpack.c.bf16 %v1823_v18, %v1823_v18  ;;  %v1825_v62 = vmul.f32 %v4551_v10, %v1724_v11  ;;  %v1721_v25 = vld [vmem:[#allocation2 + $0x28] sm:$0x7f]  ;;  %v1723_v43 = vld [vmem:[#allocation2 + $0xb8] sm:$0x7f] }
  0xef   : > { %3640 = vmatpush3.bf16.msra.mxu1 %v3800_v22  ;;  %v1822_v44 = vmul.f32 %v4551_v10, %v1721_v25  ;;  %v1824_v63 = vmul.f32 %v4551_v10, %v1723_v43  ;;  %v3808_v10 = vld [vmem:[%s5083_s3 + $0x380] sm:$0xff]   ;;  %v3365_v32 = vpop.f32.mrf.mxu0  ;;  %v2442_v22 = vpack.c.bf16 %v3815_v39, %v3814_v53 }
  0xf0   : > { %v2061_v35 = vshrl.u32 %v1843_v4, 16  ;;  %v2064_v38 = vshll.u32 %v1843_v4, 16  ;;  %v1845_v57 = vpack.c.bf16 %v1825_v62, %v1825_v62  ;;  %3641 = vmatprep.subr.bf16.mxu1 %v3802_v37  ;;  %3602 = vmatpush3.bf16.msra.mxu0 %v3803_v26  ;;  %v3816_v37 = vld [vmem:[#allocation2 + $0x138] sm:$0xff]  ;;  %v3817_v26 = vld [vmem:[#allocation2 + $0x70] sm:$0xff]  ;;  %v3819_v4 = vld [vmem:[#allocation2 + $0x88] sm:$0xff] }
  0xf1   : > { %v1842_v3 = vpack.c.bf16 %v1822_v44, %v1822_v44  ;;  %3603 = vmatprep.subr.bf16.mxu0 %v3805_v6  ;;  %v1844_v8 = vpack.c.bf16 %v1824_v63, %v1824_v63  ;;  %v3405_v51 = vpop.f32.mrf.mxu1  ;;  %v3366_v14 = vpop.f32.mrf.mxu0  ;;  %v3818_v6 = vld [vmem:[#allocation2 + $0x98] sm:$0xff] }
  0xf2   : > { %v2063_v40 = vrot.slane %v2061_v35, 3  ;;  %v2066_v55 = vrot.slane %v2064_v38, 4  ;;  %v2079_v52 = vshrl.u32 %v1845_v57, 16  ;;  %v2082_v41 = vshll.u32 %v1845_v57, 16 }
  0xf3   : > { %v2052_v47 = vshrl.u32 %v1842_v3, 16  ;;  %v2055_v17 = vshll.u32 %v1842_v3, 16  ;;  %3642 = vmatpush3.bf16.msra.mxu1 %v3804_v60  ;;  %v2070_v0 = vshrl.u32 %v1844_v8, 16  ;;  %v2073_v5 = vshll.u32 %v1844_v8, 16  ;;  %v3406_v15 = vpop.f32.mrf.mxu1  ;;  %v3821_v3 = vld [vmem:[#allocation2 + $0xa8] sm:$0xff] }
  0xf4   : > { %v2067_v29 = vor.u32 %v2066_v55, %v2063_v40  ;;  %v2081_v34 = vrot.slane %v2079_v52, 3  ;;  %v2084_v56 = vrot.slane %v2082_v41, 4  ;;  %3643 = vmatprep.subr.bf16.mxu1 %v3806_v30  ;;  %3604 = vmatpush3.bf16.msra.mxu0 %v3807_v12  ;;  %v3367_v1 = vadd.f32 %v3366_v14, %v3365_v32  ;;  %v3820_v12 = vld [vmem:[#allocation2 + $0x128] sm:$0xff]  ;;  %v3822_v41 = vld [vmem:[#allocation2 + $0x118] sm:$0xff] }
  0xf5   : > { %v2054_v31 = vrot.slane %v2052_v47, 3  ;;  %v2057_v9 = vrot.slane %v2055_v17, 4  ;;  %v2072_v28 = vrot.slane %v2070_v0, 3  ;;  %v2075_v48 = vrot.slane %v2073_v5, 4  ;;  %v3408_v18 = vpop.f32.mrf.mxu1  ;;  %v3823_v47 = vld [vmem:[#allocation2 + $0x130] sm:$0xff]  ;;  %v3827_v0 = vld [vmem:[#allocation2 + $0xe8] sm:$0xff] }
  0xf6   : > { %v2068_v24 = vsel %vm1174_vm1, %v4836_v19, %v2067_v29  ;;  %v2085_v58 = vor.u32 %v2084_v56, %v2081_v34  ;;  %v2440_v19 = vpack.c.bf16 %v3811_v2, %v4743_v45  ;;  %v3368_v45 = vpop.f32.mrf.mxu0  ;;  %v2444_v62 = vpack.c.bf16 %v3819_v4, %v3818_v6  ;;  %v3824_v29 = vld [vmem:[#allocation2 + $0x8] sm:$0xff]  ;;  %v3825_v34 = vld [vmem:[#allocation2 + $0xe0] sm:$0xff]  ;;  %v3830_v32 = vld [vmem:[#allocation2 + $0x78] sm:$0xff] }
  0xf7   : > { %2351 = vmatprep.mubr.bf16.mxu0 %v2068_v24  ;;  %v2058_v23 = vor.u32 %v2057_v9, %v2054_v31  ;;  %3644 = vmatpush3.bf16.msra.mxu1 %v3808_v10  ;;  %v2076_v16 = vor.u32 %v2075_v48, %v2072_v28  ;;  %v3409_v44 = vpop.f32.mrf.mxu1  ;;  %v2441_v40 = vpack.c.bf16 %v3821_v3, %v3820_v12  ;;  %v3826_v9 = vld [vmem:[#allocation2 + $0xa0] sm:$0xff] }
  0xf8   : > { %v2086_v50 = vsel %vm1174_vm1, %v4857_v21, %v2085_v58  ;;  %v3812_v21 = vld [vmem:[#allocation2 + $0x80] sm:$0xff]  ;;  %v3369_v25 = vpop.f32.mrf.mxu0  ;;  %v3410_v60 = vadd.f32 %v3409_v44, %v3408_v18  ;;  %v2446_v17 = vpack.c.bf16 %v3823_v47, %v3822_v41  ;;  %v2443_v56 = vpack.c.bf16 %v3825_v34, %v3824_v29 }
  0xf9   : > { %2416 = vmatprep.mubr.bf16.mxu1 %v2086_v50  ;;  %v2059_v46 = vsel %vm1174_vm1, %v4866_v27, %v2058_v23  ;;  %v2077_v33 = vsel %vm1174_vm1, %v4882_v7, %v2076_v16  ;;  %v2437_v42 = vpack.c.bf16 %v3813_v36, %v3812_v21  ;;  %v3407_v27 = vadd.f32 %v3406_v15, %v3405_v51  ;;  %v3411_v38 = vpop.f32.mrf.mxu1  ;;  %v3829_v16 = vld [vmem:[#allocation2 + $0x68] sm:$0xff]  ;;  %v3831_v21 = vld [vmem:[#allocation2 + $0xd8] sm:$0xff]  ;;  %v3832_v36 = vld [vmem:[#allocation2 + $0x50] sm:$0xff] }
  0xfa   : > { %2352 = vmatmul.mubr.bf16.gmra.mxu0 %v2059_v46  ;;  %2417 = vmatmul.mubr.bf16.gmra.mxu1 %v2077_v33  ;;  %v2439_v7 = vpack.c.bf16 %v3817_v26, %v3816_v37  ;;  %v3370_v43 = vadd.f32 %v3369_v25, %v3368_v45  ;;  %v3371_v35 = vpop.f32.mrf.mxu0  ;;  %v2448_v5 = vpack.c.bf16 %v3827_v0, %v3826_v9  ;;  %v3828_v46 = vld [vmem:[#allocation2 + $0xc0] sm:$0xff]  ;;  %v3834_v26 = vld [vmem:[#allocation2 + $0x58] sm:$0xff] }
  0xfb   : > { %2742 = vmatprep.mubr.bf16.mxu0 %v2438_v54  ;;  %2807 = vmatprep.mubr.bf16.mxu1 %v2440_v19  ;;  %v4951_v11 = vadd.f32 %v3407_v27, %v3367_v1  ;;  %v3412_v30 = vpop.f32.mrf.mxu1  ;;  %v2445_v2 = vpack.c.bf16 %v3829_v16, %v3828_v46  ;;  %v2450_v51 = vpack.c.bf16 %v4860_v13, %v3830_v32  ;;  %v3833_v27 = vld [vmem:[#allocation2 + $0x40] sm:$0xff] }
  0xfc   : > { %v4953_v57 = vadd.f32 %v3410_v60, %v3370_v43  ;;  %v3372_v63 = vpop.f32.mrf.mxu0  ;;  %v3413_v52 = vadd.f32 %v3412_v30, %v3411_v38  ;;  %v2452_v53 = vpack.c.bf16 %v4880_v20, %v3833_v27 }
  0xfd   : > { %v3373_v55 = vadd.f32 %v3372_v63, %v3371_v35  ;;  %v3414_v10 = vpop.f32.mrf.mxu1 }
  0xfe   : > { %v3374_v8 = vpop.f32.mrf.mxu0 }
  0xff   : > { %v4955_v31 = vadd.f32 %v3413_v52, %v3373_v55  ;;  %v3415_v58 = vpop.f32.mrf.mxu1 }
 0x100   : > { %v3375_v24 = vpop.f32.mrf.mxu0  ;;  %v3416_v28 = vadd.f32 %v3415_v58, %v3414_v10 }
 0x101   : > { %v3376_v23 = vadd.f32 %v3375_v24, %v3374_v8  ;;  %v3417_v54 = vpop.f32.mrf.mxu1 }
 0x102   : > { %2743 = vmatmul.mubr.bf16.vlgmr.msra.gmra.mxu0 %v2437_v42  ;;  %2808 = vmatmul.mubr.bf16.vlgmr.msra.gmra.mxu1 %v2439_v7  ;;  %v3377_v48 = vpop.f32.mrf.mxu0  ;;  %v2447_v42 = vpack.c.bf16 %v3832_v36, %v3831_v21  ;;  %v2449_v7 = vpack.c.bf16 %v4888_v49, %v3834_v26 }
 0x103   : > { %2750 = vmatprep.mubr.bf16.mxu0 %v2442_v22  ;;  %2815 = vmatprep.mubr.bf16.mxu1 %v2444_v62  ;;  %v4957_v59 = vadd.f32 %v3416_v28, %v3376_v23  ;;  %v3418_v33 = vpop.f32.mrf.mxu1  ;;  %v3835_v62 = vld [vmem:[#allocation2 + $0x30] sm:$0xff] }
 0x104   : > { %v3378_v50 = vpop.f32.mrf.mxu0  ;;  %v3419_v14 = vadd.f32 %v3418_v33, %v3417_v54  ;;  %v2451_v20 = vpack.c.bf16 %v4895_v61, %v3835_v62 }
 0x105   : > { %v3379_v19 = vadd.f32 %v3378_v50, %v3377_v48  ;;  %v3420_v1 = vpop.f32.mrf.mxu1 }
 0x106   : > { %v3380_v15 = vpop.f32.mrf.mxu0 }
 0x107   : > { %v4961_v39 = vadd.f32 %v3419_v14, %v3379_v19  ;;  %v3421_v18 = vpop.f32.mrf.mxu1 }
 0x108   : > { %v3381_v22 = vpop.f32.mrf.mxu0  ;;  %v3422_v37 = vadd.f32 %v3421_v18, %v3420_v1 }
 0x109   : > { %v3382_v45 = vadd.f32 %v3381_v22, %v3380_v15  ;;  %v3423_v4 = vpop.f32.mrf.mxu1 }
 0x10a   : > { %2751 = vmatmul.mubr.bf16.gmra.mxu0 %v2441_v40  ;;  %2816 = vmatmul.mubr.bf16.gmra.mxu1 %v2443_v56  ;;  %v3383_v6 = vpop.f32.mrf.mxu0 }
 0x10b   : > { %2758 = vmatprep.mubr.bf16.mxu0 %v2446_v17  ;;  %2823 = vmatprep.mubr.bf16.mxu1 %v2448_v5  ;;  %v4963_v13 = vadd.f32 %v3422_v37, %v3382_v45  ;;  %v3424_v43 = vpop.f32.mrf.mxu1 }
 0x10c   : > { %v3384_v25 = vpop.f32.mrf.mxu0  ;;  %v3425_v60 = vadd.f32 %v3424_v43, %v3423_v4 }
 0x10d   : > { %v3385_v44 = vadd.f32 %v3384_v25, %v3383_v6  ;;  %v3426_v38 = vpop.f32.mrf.mxu1 }
 0x10e   : > { %v3386_v35 = vpop.f32.mrf.mxu0 }
 0x10f   : > { %v1168_v63 = vadd.f32 %v3425_v60, %v3385_v44  ;;  %v3427_v3 = vpop.f32.mrf.mxu1 }
 0x110   : > { %v3387_v30 = vpop.f32.mrf.mxu0  ;;  %v3428_v40 = vadd.f32 %v3427_v3, %v3426_v38 }
 0x111   : > { %v3388_v12 = vadd.f32 %v3387_v30, %v3386_v35 }
 0x112   : > { %2759 = vmatmul.mubr.bf16.gmra.mxu0 %v2445_v2  ;;  %2824 = vmatmul.mubr.bf16.gmra.mxu1 %v2447_v42 }
 0x113   : > { %2766 = vmatprep.mubr.bf16.mxu0 %v2450_v51  ;;  %2831 = vmatprep.mubr.bf16.mxu1 %v2452_v53  ;;  %v1171_v55 = vadd.f32 %v3428_v40, %v3388_v12 }
 0x11a   : > { %2767 = vmatmul.mubr.bf16.gmra.mxu0 %v2449_v7  ;;  %2832 = vmatmul.mubr.bf16.gmra.mxu1 %v2451_v20 }
 0x16d   : > { %v3445_v49 = vpop.f32.mrf.mxu0 }
 0x16f   : > { %v3446_v52 = vpop.f32.mrf.mxu0  ;;  %v3485_v41 = vpop.f32.mrf.mxu1 }
 0x170   : > { %v3447_v47 = vadd.f32 %v3446_v52, %v3445_v49 }
 0x171   : > { %v3448_v17 = vpop.f32.mrf.mxu0  ;;  %v3486_v8 = vpop.f32.mrf.mxu1 }
 0x172   : > { %v1594_v61 = vadd.f32 %v3447_v47, %v4951_v11  ;;  %v3487_v10 = vadd.f32 %v3486_v8, %v3485_v41 }
 0x173   : > { %v3449_v29 = vpop.f32.mrf.mxu0  ;;  %v3488_v34 = vpop.f32.mrf.mxu1 }
 0x174   : > { %v3450_v56 = vadd.f32 %v3449_v29, %v3448_v17  ;;  %v4968_v9 = vadd.f32 %v3487_v10, %v1594_v61 }
 0x175   : > { %v3489_v5 = vpop.f32.mrf.mxu1 }
 0x176   : > { %v1597_v0 = vadd.f32 %v3450_v56, %v4953_v57  ;;  %v3490_v24 = vadd.f32 %v3489_v5, %v3488_v34 }
 0x178   : > { %v4971_v58 = vadd.f32 %v3490_v24, %v1597_v0 }
 0x17d   : > { %v3451_v23 = vpop.f32.mrf.mxu0 }
 0x17f   : > { %v3491_v28 = vpop.f32.mrf.mxu1  ;;  %v3452_v48 = vpop.f32.mrf.mxu0 }
 0x180   : > { %v3453_v54 = vadd.f32 %v3452_v48, %v3451_v23 }
 0x181   : > { %v3492_v50 = vpop.f32.mrf.mxu1  ;;  %v3454_v46 = vpop.f32.mrf.mxu0 }
 0x182   : > { %v1602_v11 = vadd.f32 %v3453_v54, %v4955_v31  ;;  %v3493_v16 = vadd.f32 %v3492_v50, %v3491_v28 }
 0x183   : > { %v3494_v2 = vpop.f32.mrf.mxu1  ;;  %v3455_v19 = vpop.f32.mrf.mxu0 }
 0x184   : > { %v4974_v33 = vadd.f32 %v3493_v16, %v1602_v11  ;;  %v3456_v32 = vadd.f32 %v3455_v19, %v3454_v46 }
 0x185   : > { %v3495_v51 = vpop.f32.mrf.mxu1  ;;  %v3457_v57 = vpop.f32.mrf.mxu0 }
 0x186   : > { %v1605_v14 = vadd.f32 %v3456_v32, %v4957_v59  ;;  %v3496_v15 = vadd.f32 %v3495_v51, %v3494_v2 }
 0x187   : > { %v3497_v21 = vpop.f32.mrf.mxu1  ;;  %v3458_v36 = vpop.f32.mrf.mxu0 }
 0x188   : > { %v4977_v42 = vadd.f32 %v3496_v15, %v1605_v14  ;;  %v3459_v1 = vadd.f32 %v3458_v36, %v3457_v57 }
 0x189   : > { %v3498_v27 = vpop.f32.mrf.mxu1  ;;  %v3460_v53 = vpop.f32.mrf.mxu0 }
 0x18a   : > { %v1610_v31 = vadd.f32 %v3459_v1, %v4961_v39  ;;  %v3499_v22 = vadd.f32 %v3498_v27, %v3497_v21 }
 0x18b   : > { %v3500_v45 = vpop.f32.mrf.mxu1  ;;  %v3461_v18 = vpop.f32.mrf.mxu0 }
 0x18c   : > { %v4980_v37 = vadd.f32 %v3499_v22, %v1610_v31  ;;  %v3462_v26 = vadd.f32 %v3461_v18, %v3460_v53 }
 0x18d   : > { %v3501_v7 = vpop.f32.mrf.mxu1  ;;  %v3463_v6 = vpop.f32.mrf.mxu0 }
 0x18e   : > { %v1613_v59 = vadd.f32 %v3462_v26, %v4963_v13  ;;  %v3502_v4 = vadd.f32 %v3501_v7, %v3500_v45 }
 0x18f   : > { %v3503_v62 = vpop.f32.mrf.mxu1  ;;  %v3464_v20 = vpop.f32.mrf.mxu0 }
 0x190   : > { %v4983_v25 = vadd.f32 %v3502_v4, %v1613_v59  ;;  %v3465_v44 = vadd.f32 %v3464_v20, %v3463_v6 }
 0x191   : > { %v3504_v43 = vpop.f32.mrf.mxu1  ;;  %v3466_v60 = vpop.f32.mrf.mxu0 }
 0x192   : > { %v1618_v35 = vadd.f32 %v3465_v44, %v1168_v63  ;;  %v3505_v39 = vadd.f32 %v3504_v43, %v3503_v62 }
 0x193   : > { %v3506_v38 = vpop.f32.mrf.mxu1  ;;  %v3467_v30 = vpop.f32.mrf.mxu0 }
 0x194   : > { %v4985_v12 = vadd.f32 %v3505_v39, %v1618_v35  ;;  %v3468_v3 = vadd.f32 %v3467_v30, %v3466_v60 }
 0x195   : > { %v3507_v40 = vpop.f32.mrf.mxu1 }
 0x196   : > { %v1621_v49 = vadd.f32 %v3468_v3, %v1171_v55  ;;  %v3508_v52 = vadd.f32 %v3507_v40, %v3506_v38  ;;  %v3525_v41 = vpop.f32.mrf.mxu0  ;;  %v5018_v3 = vld [vmem:[%s5084_s4] ss:$0 sm:$0xff] }
 0x198   : > { %v4987_v13 = vadd.f32 %v3508_v52, %v1621_v49  ;;  %v3526_v47 = vpop.f32.mrf.mxu0 }
 0x199   : > { %v3527_v1 = vadd.f32 %v3526_v47, %v3525_v41 }
 0x19a   : > { %v3565_v17 = vpop.f32.mrf.mxu1  ;;  %v3528_v61 = vpop.f32.mrf.mxu0 }
 0x19c   : > { %v3566_v8 = vpop.f32.mrf.mxu1  ;;  %v3529_v10 = vpop.f32.mrf.mxu0 }
 0x19d   : > { %v3567_v27 = vadd.f32 %v3566_v8, %v3565_v17  ;;  %v3530_v26 = vadd.f32 %v3529_v10, %v3528_v61 }
 0x19e   : > { %v3568_v29 = vpop.f32.mrf.mxu1 }
 0x19f   : > { %v3531_v34 = vpop.f32.mrf.mxu0  ;;  %v2395_v18 = vadd.f32 %v3567_v27, %v3527_v1 }
 0x1a0   : > { %v3569_v63 = vpop.f32.mrf.mxu1 }
 0x1a1   : > { %v3532_v56 = vpop.f32.mrf.mxu0  ;;  %v3570_v7 = vadd.f32 %v3569_v63, %v3568_v29  ;;  %v2425_v35 = vadd.f32 %v2395_v18, %v4968_v9 }
 0x1a2   : > { %v3571_v0 = vpop.f32.mrf.mxu1  ;;  %v3533_v20 = vadd.f32 %v3532_v56, %v3531_v34 }
 0x1a3   : > { %v3534_v5 = vpop.f32.mrf.mxu0  ;;  %v2398_v39 = vadd.f32 %v3570_v7, %v3530_v26 }
 0x1a4   : > { %v3572_v24 = vpop.f32.mrf.mxu1 }
 0x1a5   : > { %v3535_v28 = vpop.f32.mrf.mxu0  ;;  %v3573_v44 = vadd.f32 %v3572_v24, %v3571_v0  ;;  %v2426_v10 = vadd.f32 %v2398_v39, %v4971_v58  ;;  %v2887_v24 = vld [vmem:[%s5025_s23] sm:$0xff] }
 0x1a6   : > { %v3574_v23 = vpop.f32.mrf.mxu1  ;;  %v3536_v17 = vadd.f32 %v3535_v28, %v3534_v5 }
 0x1a7   : > { %v3537_v55 = vpop.f32.mrf.mxu0  ;;  %v2403_v47 = vadd.f32 %v3573_v44, %v3533_v20 }
 0x1a8   : > { %v3575_v48 = vpop.f32.mrf.mxu1 }
 0x1a9   : > { %v3538_v50 = vpop.f32.mrf.mxu0  ;;  %v3576_v61 = vadd.f32 %v3575_v48, %v3574_v23  ;;  %v2427_v48 = vadd.f32 %v2403_v47, %v4974_v33 }
 0x1aa   : > { %v3577_v54 = vpop.f32.mrf.mxu1  ;;  %v3539_v27 = vadd.f32 %v3538_v50, %v3537_v55 }
 0x1ab   : > { %v4989_v11 = vpop.f32.mrf.mxu0  ;;  %v2406_v1 = vadd.f32 %v3576_v61, %v3536_v17 }
 0x1ac   : > { %v3578_v46 = vpop.f32.mrf.mxu1 }
 0x1ad   : > { %v4993_v2 = vpop.f32.mrf.mxu0 }
 0x1ae   : > { %v4991_v16 = vpop.f32.mrf.mxu1  ;;  %v3542_v20 = vadd.f32 %v4993_v2, %v4989_v11 }
 0x1b0   : > { %v4995_v19 = vpop.f32.mrf.mxu1 }
 0x1b1   : > { %v3582_v44 = vadd.f32 %v4995_v19, %v4991_v16 }
 0x1b3   : > { %v2414_v16 = vadd.f32 %v3582_v44, %v3542_v20 }
 0x1ba   : > { %v4997_v32 = vpop.f32.mrf.mxu0  ;;  %v4999_v51 = vpop.f32.mrf.mxu1 }
 0x1bc   : > { %v5001_v57 = vpop.f32.mrf.mxu0  ;;  %v5003_v14 = vpop.f32.mrf.mxu1 }
 0x1bd   : > { %v3545_v19 = vadd.f32 %v5001_v57, %v4997_v32  ;;  %v3585_v17 = vadd.f32 %v5003_v14, %v4999_v51  ;;  %v2430_v57 = vadd.f32 %v2414_v16, %v4983_v25 }
 0x1be   : > { %v5005_v15 = vpop.f32.mrf.mxu0  ;;  %v5007_v21 = vpop.f32.mrf.mxu1 }
 0x1bf   : > { %v2419_v51 = vadd.f32 %v3585_v17, %v3545_v19 }
 0x1c0   : > { %v5009_v36 = vpop.f32.mrf.mxu0  ;;  %v5011_v53 = vpop.f32.mrf.mxu1 }
 0x1c1   : > { %v3548_v14 = vadd.f32 %v5009_v36, %v5005_v15 }
 0x1c2   : > { %v3605_v31 = vpop.f32.mrf.mxu0  ;;  %v3645_v22 = vpop.f32.mrf.mxu1 }
 0x1c4   : > { %v3606_v45 = vpop.f32.mrf.mxu0  ;;  %v3646_v59 = vpop.f32.mrf.mxu1 }
 0x1c5   : > { %v3607_v6 = vadd.f32 %v3606_v45, %v3605_v31  ;;  %v3647_v62 = vadd.f32 %v3646_v59, %v3645_v22  ;;  %v3579_v31 = vadd.f32 %v3578_v46, %v3577_v54  ;;  %v2888_v54 = vld [vmem:[%s5025_s23 + $0x8] sm:$0xff] }
 0x1c6   : > { %v3608_v4 = vpop.f32.mrf.mxu0  ;;  %v3648_v43 = vpop.f32.mrf.mxu1 }
 0x1c7   : > { %v2810_v38 = vadd.f32 %v3647_v62, %v3607_v6  ;;  %v2411_v62 = vadd.f32 %v3579_v31, %v3539_v27 }
 0x1c8   : > { %v3609_v60 = vpop.f32.mrf.mxu0  ;;  %v3649_v40 = vpop.f32.mrf.mxu1 }
 0x1c9   : > { %v3610_v30 = vadd.f32 %v3609_v60, %v3608_v4  ;;  %v2840_v52 = vadd.f32 %v2810_v38, %v2425_v35  ;;  %v3650_v41 = vadd.f32 %v3649_v40, %v3648_v43  ;;  %v2428_v4 = vadd.f32 %v2406_v1, %v4977_v42 }
 0x1ca   : > { %v3611_v49 = vpop.f32.mrf.mxu0  ;;  %v3651_v9 = vpop.f32.mrf.mxu1  ;;  %v2429_v2 = vadd.f32 %v2411_v62, %v4980_v37  ;;  %v2892_v62 = vld [vmem:[%s5025_s23 + $0x28] sm:$0xff] }
 0x1cb   : > { %v2855_v29 = vadd.f32 %v5018_v3, %v2840_v52  ;;  %v2813_v34 = vadd.f32 %v3650_v41, %v3610_v30  ;;  %v2889_v41 = vld [vmem:[%s5025_s23 + $0x10] sm:$0xff] }
 0x1cc   : > { %v3612_v8 = vpop.f32.mrf.mxu0  ;;  %v3652_v56 = vpop.f32.mrf.mxu1 }
 0x1cd   : > { %v3613_v63 = vadd.f32 %v3612_v8, %v3611_v49  ;;  %vm2863_vm2 = vcmp.ge.f32.partialorder %v2855_v29, 0.0  ;;  %v2871_v5 = vmul.f32 0.2, %v2855_v29  ;;  %v2841_v23 = vadd.f32 %v2813_v34, %v2426_v10 }
 0x1ce   : > { %v3614_v0 = vpop.f32.mrf.mxu0  ;;  %v3653_v28 = vadd.f32 %v3652_v56, %v3651_v9  ;;  %v3654_v22 = vpop.f32.mrf.mxu1 }
 0x1cf   : > { %v2879_v45 = vsel %vm2863_vm2, %v2855_v29, %v2871_v5  ;;  %v2856_v18 = vadd.f32 %v5018_v3, %v2841_v23  ;;  %v2890_v5 = vld [vmem:[%s5025_s23 + $0x18] sm:$0xff]  ;;  %v3588_v23 = vadd.f32 %v5011_v53, %v5007_v21  ;;  %v2431_v21 = vadd.f32 %v2419_v51, %v4985_v12 }
 0x1d0   : > { %v3615_v58 = vpop.f32.mrf.mxu0  ;;  %v2818_v26 = vadd.f32 %v3653_v28, %v3613_v63  ;;  %v2895_v6 = vadd.f32 %v2887_v24, %v2879_v45  ;;  %v3655_v33 = vpop.f32.mrf.mxu1 }
 0x1d1   : > { %v3616_v7 = vadd.f32 %v3615_v58, %v3614_v0  ;;  %vm2864_vm3 = vcmp.ge.f32.partialorder %v2856_v18, 0.0  ;;  %v2872_v55 = vmul.f32 0.2, %v2856_v18  ;;  %v3656_v46 = vadd.f32 %v3655_v33, %v3654_v22 }
 0x1d2   : > { %v3617_v59 = vpop.f32.mrf.mxu0  ;;  %v2842_v50 = vadd.f32 %v2818_v26, %v2427_v48  ;;  %2903 = vst [vmem:[%s5036_s28] sm:$0xff] %v2895_v6  ;;  %v3657_v43 = vpop.f32.mrf.mxu1  ;;  %v2891_v26 = vld [vmem:[%s5025_s23 + $0x20] sm:$0xff]  ;;  %v2422_v53 = vadd.f32 %v3588_v23, %v3548_v14 }
 0x1d3   : > { %v2880_v35 = vsel %vm2864_vm3, %v2856_v18, %v2872_v55  ;;  %v2821_v38 = vadd.f32 %v3656_v46, %v3616_v7 }
 0x1d4   : > { %v3618_v60 = vpop.f32.mrf.mxu0  ;;  %v2857_v39 = vadd.f32 %v5018_v3, %v2842_v50  ;;  %v2896_v40 = vadd.f32 %v2888_v54, %v2880_v35  ;;  %v3658_v49 = vpop.f32.mrf.mxu1  ;;  %v2432_v12 = vadd.f32 %v2422_v53, %v4987_v13 }
 0x1d5   : > { %v3619_v30 = vadd.f32 %v3618_v60, %v3617_v59  ;;  %v2843_v47 = vadd.f32 %v2821_v38, %v2428_v4  ;;  %v3659_v11 = vadd.f32 %v3658_v49, %v3657_v43 }
 0x1d6   : > { %v3620_v42 = vpop.f32.mrf.mxu0  ;;  %vm2865_vm4 = vcmp.ge.f32.partialorder %v2857_v39, 0.0  ;;  %v2873_v52 = vmul.f32 0.2, %v2857_v39  ;;  %2904 = vst [vmem:[%s5036_s28 + $0x8] sm:$0xff] %v2896_v40  ;;  %v3660_v61 = vpop.f32.mrf.mxu1 }
 0x1d7   : > { %v2858_v10 = vadd.f32 %v5018_v3, %v2843_v47  ;;  %v2826_v29 = vadd.f32 %v3659_v11, %v3619_v30  ;;  %v2893_v30 = vld [vmem:[%s5025_s23 + $0x30] sm:$0xff]  ;;  %v2894_v47 = vld [vmem:[%s5025_s23 + $0x38] sm:$0xff] }
 0x1d8   : > { %v3621_v9 = vpop.f32.mrf.mxu0  ;;  %v2881_v8 = vsel %vm2865_vm4, %v2857_v39, %v2873_v52  ;;  %v3661_v56 = vpop.f32.mrf.mxu1 }
 0x1d9   : > { %v3622_v34 = vadd.f32 %v3621_v9, %v3620_v42  ;;  %v2897_v63 = vadd.f32 %v2889_v41, %v2881_v8  ;;  %vm2866_vm5 = vcmp.ge.f32.partialorder %v2858_v10, 0.0  ;;  %v2874_v0 = vmul.f32 0.2, %v2858_v10 }
 0x1da   : > { %v3623_v37 = vpop.f32.mrf.mxu0  ;;  %v2844_v24 = vadd.f32 %v2826_v29, %v2429_v2  ;;  %v3662_v32 = vadd.f32 %v3661_v56, %v3660_v61  ;;  %v3663_v28 = vpop.f32.mrf.mxu1 }
 0x1db   : > { %2905 = vst [vmem:[%s5036_s28 + $0x10] sm:$0xff] %v2897_v63  ;;  %v2882_v1 = vsel %vm2866_vm5, %v2858_v10, %v2874_v0 }
 0x1dc   : > { %v3624_v48 = vpop.f32.mrf.mxu0  ;;  %v2859_v27 = vadd.f32 %v5018_v3, %v2844_v24  ;;  %v2829_v31 = vadd.f32 %v3662_v32, %v3622_v34  ;;  %v2898_v58 = vadd.f32 %v2890_v5, %v2882_v1  ;;  %v3664_v45 = vpop.f32.mrf.mxu1 }
 0x1dd   : > { %v3625_v22 = vadd.f32 %v3624_v48, %v3623_v37  ;;  %v3665_v36 = vadd.f32 %v3664_v45, %v3663_v28 }
 0x1de   : > { %v3626_v25 = vpop.f32.mrf.mxu0  ;;  %vm2867_vm6 = vcmp.ge.f32.partialorder %v2859_v27, 0.0  ;;  %v2875_v18 = vmul.f32 0.2, %v2859_v27  ;;  %v2845_v15 = vadd.f32 %v2829_v31, %v2430_v57  ;;  %2906 = vst [vmem:[%s5036_s28 + $0x18] sm:$0xff] %v2898_v58  ;;  %v3666_v7 = vpop.f32.mrf.mxu1 }
 0x1df   : > { %v2834_v55 = vadd.f32 %v3665_v36, %v3625_v22 }
 0x1e0   : > { %v3627_v6 = vpop.f32.mrf.mxu0  ;;  %v2883_v33 = vsel %vm2867_vm6, %v2859_v27, %v2875_v18  ;;  %v2860_v59 = vadd.f32 %v5018_v3, %v2845_v15  ;;  %v3667_v46 = vpop.f32.mrf.mxu1 }
 0x1e1   : > { %v3628_v54 = vadd.f32 %v3627_v6, %v3626_v25  ;;  %v2899_v50 = vadd.f32 %v2891_v26, %v2883_v33  ;;  %v2846_v20 = vadd.f32 %v2834_v55, %v2431_v21  ;;  %v3668_v44 = vadd.f32 %v3667_v46, %v3666_v7 }
 0x1e2   : > { %vm2868_vm7 = vcmp.ge.f32.partialorder %v2860_v59, 0.0  ;;  %v2876_v4 = vmul.f32 0.2, %v2860_v59 }
 0x1e3   : > { %2907 = vst [vmem:[%s5036_s28 + $0x20] sm:$0xff] %v2899_v50  ;;  %v2861_v60 = vadd.f32 %v5018_v3, %v2846_v20  ;;  %v2837_v35 = vadd.f32 %v3668_v44, %v3628_v54 }
 0x1e4   : > { %v2884_v43 = vsel %vm2868_vm7, %v2860_v59, %v2876_v4 }
 0x1e5   : > { %v2900_v39 = vadd.f32 %v2892_v62, %v2884_v43  ;;  %vm2869_vm8 = vcmp.ge.f32.partialorder %v2861_v60, 0.0  ;;  %v2877_v38 = vmul.f32 0.2, %v2861_v60  ;;  %v2847_v40 = vadd.f32 %v2837_v35, %v2432_v12 }
 0x1e7   : > { %2908 = vst [vmem:[%s5036_s28 + $0x28] sm:$0xff] %v2900_v39  ;;  %v2885_v49 = vsel %vm2869_vm8, %v2861_v60, %v2877_v38  ;;  %v2862_v42 = vadd.f32 %v5018_v3, %v2847_v40 }
 0x1e8   : > { %v2901_v52 = vadd.f32 %v2893_v30, %v2885_v49 }
 0x1e9   : > { %vm2870_vm9 = vcmp.ge.f32.partialorder %v2862_v42, 0.0  ;;  %v2878_v41 = vmul.f32 0.2, %v2862_v42 }
 0x1ea   : > { %2909 = vst [vmem:[%s5036_s28 + $0x30] sm:$0xff] %v2901_v52 }
 0x1eb   : > { %v2886_v13 = vsel %vm2870_vm9, %v2862_v42, %v2878_v41 }
 0x1ec   : > { %v2902_v11 = vadd.f32 %v2894_v47, %v2886_v13 }
 0x1ee   : > { %2910 = vst [vmem:[%s5036_s28 + $0x38] sm:$0xff] %v2902_v11 }
 0x1ef PF: > { %s17_s24 = sadd.s32 1, %s3842_s24  }
 0x1f0   : > { %p14_p4 = scmp.ge.s32.totalorder %s17_s24, 4  }
 0x1f2   :  { %16 = sbr.rel (!%p14_p4) target bundleno = 1 (0x1), region = 91 }

</bundles_post_ra>
